<compile_context>
chip_gen: v5e
topology: v5e:2x2
jax: 0.10.0
libtpu: 0.0.40
codegen_flags: <defaults>
</compile_context>

<pallas_src>
from functools import partial

import jax
import jax.numpy as jnp
from jax.experimental import pallas as pl
from jax.experimental.pallas import tpu as pltpu


# ----------------------------- fused Pallas kernel ---------------------------

def _lenet_kernel(blk,
                  x_ref, t1_ref, b1r_ref, t2r_ref, b2r_ref,
                  p1c_ref, p1r_ref, p2c_ref, p2r_ref,
                  w1h_ref, b1p_ref, w2p_ref, b2p_ref, w3p_ref, b3p_ref,
                  out_ref):
    f32 = jnp.float32

    def mm(a, b):
        return jnp.dot(a, b, preferred_element_type=f32)

    def pool2x2(z, pc_ref, pr_ref):
        """2x2 / stride-2 max-pool of a channel-stacked [rows, OC*cols] slab
        via PRECOMPUTED even/odd 0/1 selection matmuls (no strided slices)."""
        cm = jnp.maximum(mm(z, pc_ref[0]), mm(z, pc_ref[1]))   # lane pairs
        return jnp.maximum(mm(pr_ref[0], cm), mm(pr_ref[1], cm))  # row pairs

    # ---- conv stage: per image of the block (unrolled); everything stays in
    #      registers, no VMEM scratch --------------------------------------
    a_rows = []                                   # per-image [4, 48] fc1 LHS
    for img in range(blk):
        # conv1 (1->6, k=5, valid) + relu: 5 row-band matmuls -> [24, 6*24]
        # (two independent accumulators shorten the MXU pop->add chain)
        za = (mm(x_ref[0, img, 0:24, :], t1_ref[0])
              + mm(x_ref[0, img, 2:26, :], t1_ref[2])
              + mm(x_ref[0, img, 4:28, :], t1_ref[4]))
        zb = (mm(x_ref[0, img, 1:25, :], t1_ref[1])
              + mm(x_ref[0, img, 3:27, :], t1_ref[3]))
        z1 = jnp.maximum(za + zb + b1r_ref[...], 0.0)

        # maxpool 2x2/2 -> [12, 6*12]; kept as a register value
        s1 = pool2x2(z1, p1c_ref, p1r_ref)

        # conv2 (6->12, k=5, valid) + relu: input channels are folded into the
        # contraction axis, so only 5 band matmuls -> [8, 12*8]
        ca = (mm(s1[0:8, :], t2r_ref[0])
              + mm(s1[2:10, :], t2r_ref[2])
              + mm(s1[4:12, :], t2r_ref[4]))
        cb = (mm(s1[1:9, :], t2r_ref[1])
              + mm(s1[3:11, :], t2r_ref[3]))
        z2 = jnp.maximum(ca + cb + b2r_ref[...], 0.0)

        # maxpool 2x2/2 -> a[h, oc*4 + w]  (== fc1 operand layout, no flatten)
        a_rows.append(pool2x2(z2, p2c_ref, p2r_ref))            # [4, 48]

    # ---- FC stage, vectorized across the image block (M = blk) -------------
    def stack_h(h):   # [blk, 48] LHS: spatial row h of every image in block
        return jnp.concatenate([a[h:h + 1, :] for a in a_rows], axis=0)

    ha = mm(stack_h(0), w1h_ref[0]) + mm(stack_h(2), w1h_ref[2])
    hb = mm(stack_h(1), w1h_ref[1]) + mm(stack_h(3), w1h_ref[3])
    h1 = jnp.maximum(ha + hb + b1p_ref[...], 0.0)                # [blk, 128]
    h2 = jnp.maximum(mm(h1, w2p_ref[...]) + b2p_ref[...], 0.0)   # [blk, 128]
    out_ref[0] = mm(h2, w3p_ref[...]) + b3p_ref[...]             # [blk, 128]


# -------------------- one-time weight re-layout (host/XLA) -------------------

def _conv_band_weights(w, in_w, out_w):
    """w: [OC, IC, KH, KW] -> T: [IC, KH, in_w, OC*out_w] banded matrices s.t.
    sum_{ic,kh} x_band[ic,kh] @ T[ic,kh] is the valid conv for ALL OC at once,
    where x_band[ic,kh] = input[ic, kh:kh+out_h, :in_w]."""
    OC, IC, KH, KW = w.shape
    c = jnp.arange(in_w)[:, None]
    j = jnp.arange(out_w)[None, :]
    diff = c - j
    valid = ((diff >= 0) & (diff < KW)).astype(w.dtype)
    didx = jnp.clip(diff, 0, KW - 1)
    t = w[:, :, :, didx] * valid[None, None, None]          # [OC,IC,KH,in_w,out_w]
    t = jnp.transpose(t, (1, 2, 3, 0, 4))                   # [IC,KH,in_w,OC,out_w]
    return t.reshape(IC, KH, in_w, OC * out_w)


def _pool_sel(n_rows, n_cols):
    """Precompute even/odd selection matrices for a 2x2/stride-2 max pool of a
    channel-stacked [n_rows, n_cols] slab (hoisted out of the kernel)."""
    rc = jnp.arange(n_cols)[:, None]
    cc = jnp.arange(n_cols // 2)[None, :]
    col = jnp.stack([(rc == 2 * cc).astype(jnp.float32),
                     (rc == 2 * cc + 1).astype(jnp.float32)])   # (2, C, C//2)
    rr = jnp.arange(n_rows // 2)[:, None]
    cr = jnp.arange(n_rows)[None, :]
    row = jnp.stack([(cr == 2 * rr).astype(jnp.float32),
                     (cr == 2 * rr + 1).astype(jnp.float32)])   # (2, R//2, R)
    return col, row


def pack_params(params):
    """Pre-layout all weights & constants ONCE (nothing rebuilt per call)."""
    # conv1 banded weights, OC stacked in lanes
    t1 = _conv_band_weights(params["conv1_w"], 28, 24)[0]        # (5, 28, 144)
    b1r = jnp.repeat(params["conv1_b"], 24)[None, :]             # (1, 144)

    # conv2 banded weights with the 6 input channels folded into the
    # contraction axis -> conv2 becomes 5 matmuls instead of 30
    t2 = _conv_band_weights(params["conv2_w"], 12, 8)            # (6, 5, 12, 96)
    t2r = jnp.transpose(t2, (1, 0, 2, 3)).reshape(5, 72, 96)     # (5, 72, 96)
    b2r = jnp.repeat(params["conv2_b"], 8)[None, :]              # (1, 96)

    # pooling selection matrices (precomputed, not rebuilt on the VPU)
    p1c, p1r = _pool_sel(24, 144)     # (2,144,72), (2,12,24)
    p2c, p2r = _pool_sel(8, 96)       # (2,96,48),  (2,4,8)

    # fc1 weight [120, 192] with k = oc*16 + h*4 + w  ->  per-h blocks
    # w1h[h][oc*4 + w, n] = fc1_w[n, oc*16 + h*4 + w], padded to 128 lanes.
    w1h = params["fc1_w"].reshape(120, 12, 4, 4).transpose(2, 1, 3, 0)
    w1h = jnp.pad(w1h.reshape(4, 48, 120), ((0, 0), (0, 0), (0, 8)))   # (4,48,128)
    b1p = jnp.pad(params["fc1_b"], (0, 8))[None, :]                    # (1, 128)
    w2p = jnp.pad(params["fc2_w"].T, ((0, 8), (0, 68)))                # (128, 128)
    b2p = jnp.pad(params["fc2_b"], (0, 68))[None, :]                   # (1, 128)
    w3p = jnp.pad(params["out_w"].T, ((0, 68), (0, 118)))              # (128, 128)
    b3p = jnp.pad(params["out_b"], (0, 118))[None, :]                  # (1, 128)
    return {"t1": t1, "b1r": b1r, "t2r": t2r, "b2r": b2r,
            "p1c": p1c, "p1r": p1r, "p2c": p2c, "p2r": p2r,
            "w1h": w1h, "b1p": b1p, "w2p": w2p, "b2p": b2p,
            "w3p": w3p, "b3p": b3p}


# ------------------------------ the network ----------------------------------

def network_forward(packed, x, img_blk=8):
    """x: [B, 1, 28, 28] float32 -> [B, 10] float32 (single fused kernel,
    `img_blk` images per grid step)."""
    B = x.shape[0]
    # Block several images per grid step (amortizes per-step overhead / DMA and
    # raises FC matmul M) while keeping grid length >= 2 so both v7x
    # TensorCores get work.
    blk = max(1, min(img_blk, B // 2)) if B >= 2 else 1
    grid_len = -(-B // blk)
    Bp = grid_len * blk

    x2 = x.reshape(B, 28, 28)
    if Bp != B:
        x2 = jnp.pad(x2, ((0, Bp - B), (0, 0), (0, 0)))
    x3 = x2.reshape(grid_len, blk, 28, 28)

    ops = (packed["t1"], packed["b1r"], packed["t2r"], packed["b2r"],
           packed["p1c"], packed["p1r"], packed["p2c"], packed["p2r"],
           packed["w1h"], packed["b1p"], packed["w2p"], packed["b2p"],
           packed["w3p"], packed["b3p"])

    def _const_spec(a):
        nd = a.ndim
        return pl.BlockSpec(a.shape, lambda g, _n=nd: (0,) * _n)

    in_specs = [pl.BlockSpec((1, blk, 28, 28), lambda g: (g, 0, 0, 0))]
    in_specs += [_const_spec(a) for a in ops]

    # matmul FLOPs per image (conv bands, pooling selections, fc layers)
    flops_img = (5 * 2 * 24 * 28 * 144
                 + 2 * 2 * 24 * 144 * 72 + 2 * 2 * 12 * 24 * 72
                 + 5 * 2 * 8 * 72 * 96
                 + 2 * 2 * 8 * 96 * 48 + 2 * 2 * 4 * 8 * 48
                 + 4 * 2 * 48 * 128 + 2 * 2 * 128 * 128)
    bytes_accessed = 4 * (x3.size + sum(a.size for a in ops) + Bp * 128)

    out = pl.pallas_call(
        partial(_lenet_kernel, blk),
        out_shape=jax.ShapeDtypeStruct((grid_len, blk, 128), jnp.float32),
        grid_spec=pltpu.PrefetchScalarGridSpec(
            num_scalar_prefetch=0,
            grid=(grid_len,),
            in_specs=in_specs,
            out_specs=pl.BlockSpec((1, blk, 128), lambda g: (g, 0, 0))),
        compiler_params=pltpu.CompilerParams(
            dimension_semantics=("parallel",)),
        cost_estimate=pl.CostEstimate(flops=int(Bp * flops_img),
                                      transcendentals=0,
                                      bytes_accessed=int(bytes_accessed)),
    )(x3, *ops)
    return out.reshape(Bp, 128)[:B, :10]


def init_params(key):
    """Deterministic fan-in uniform init (same spirit as PyTorch defaults)."""
    def uni(k, shape, fan_in):
        bound = 1.0 / (fan_in ** 0.5)
        return jax.random.uniform(k, shape, jnp.float32, -bound, bound)
    ks = jax.random.split(key, 10)
    return {
        "conv1_w": uni(ks[0], (6, 1, 5, 5), 1 * 5 * 5),
        "conv1_b": uni(ks[1], (6,), 1 * 5 * 5),
        "conv2_w": uni(ks[2], (12, 6, 5, 5), 6 * 5 * 5),
        "conv2_b": uni(ks[3], (12,), 6 * 5 * 5),
        "fc1_w":   uni(ks[4], (120, 192), 192),
        "fc1_b":   uni(ks[5], (120,), 192),
        "fc2_w":   uni(ks[6], (60, 120), 120),
        "fc2_b":   uni(ks[7], (60,), 120),
        "out_w":   uni(ks[8], (10, 60), 60),
        "out_b":   uni(ks[9], (10,), 60),
    }


# pure-JAX reference (HIGHEST precision) for the correctness self-check
def _reference_forward(params, x):
    hp = jax.lax.Precision.HIGHEST

    def conv(x, w, b):
        y = jax.lax.conv_general_dilated(
            x, w, (1, 1), "VALID",
            dimension_numbers=("NCHW", "OIHW", "NCHW"), precision=hp)
        return jax.nn.relu(y + b[None, :, None, None])

    def pool(x):
        return jax.lax.reduce_window(x, -jnp.inf, jax.lax.max,
                                     (1, 1, 2, 2), (1, 1, 2, 2), "VALID")

    t = pool(conv(x, params["conv1_w"], params["conv1_b"]))
    t = pool(conv(t, params["conv2_w"], params["conv2_b"]))
    t = t.reshape(-1, 192)
    t = jax.nn.relu(jnp.dot(t, params["fc1_w"].T, precision=hp) + params["fc1_b"])
    t = jax.nn.relu(jnp.dot(t, params["fc2_w"].T, precision=hp) + params["fc2_b"])
    return jnp.dot(t, params["out_w"].T, precision=hp) + params["out_b"]


if __name__ == "__main__":
    key = jax.random.PRNGKey(0)
    pkey, xkey = jax.random.split(key)
    params = init_params(pkey)
    packed = pack_params(params)       # one-time weight re-layout, not per step

    # input spatial size fixed to 28x28 by the 12*4*4 flatten in the module;
    # batch 16 -> 2 grid steps of 8 images each (both v7x TensorCores busy).
    B = 16
    x = jax.random.normal(xkey, (B, 1, 28, 28), dtype=jnp.float32)

    fwd = jax.jit(network_forward)
    out = jax.block_until_ready(fwd(packed, x))
    assert out.shape == (B, 10) and out.dtype == jnp.float32

    ref = _reference_forward(params, x)
    assert jnp.allclose(out, ref, rtol=5e-3, atol=5e-3), "mismatch vs reference"

    print("KERNEL_OK")
</pallas_src>

<mosaic_0001>
module attributes {stable_mosaic.version = 11 : i64} {
  func.func @_lenet_kernel(%arg0: i32, %arg1: memref<1x8x28x28xf32, #tpu.memory_space<vmem>>, %arg2: memref<5x28x144xf32, #tpu.memory_space<vmem>>, %arg3: memref<1x144xf32, #tpu.memory_space<vmem>>, %arg4: memref<5x72x96xf32, #tpu.memory_space<vmem>>, %arg5: memref<1x96xf32, #tpu.memory_space<vmem>>, %arg6: memref<2x144x72xf32, #tpu.memory_space<vmem>>, %arg7: memref<2x12x24xf32, #tpu.memory_space<vmem>>, %arg8: memref<2x96x48xf32, #tpu.memory_space<vmem>>, %arg9: memref<2x4x8xf32, #tpu.memory_space<vmem>>, %arg10: memref<4x48x128xf32, #tpu.memory_space<vmem>>, %arg11: memref<1x128xf32, #tpu.memory_space<vmem>>, %arg12: memref<128x128xf32, #tpu.memory_space<vmem>>, %arg13: memref<1x128xf32, #tpu.memory_space<vmem>>, %arg14: memref<128x128xf32, #tpu.memory_space<vmem>>, %arg15: memref<1x128xf32, #tpu.memory_space<vmem>>, %arg16: memref<1x8x128xf32, #tpu.memory_space<vmem>>) attributes {dimension_semantics = [#tpu.dimension_semantics<parallel>], iteration_bounds = array<i64: 2>, scalar_prefetch = 0 : i64, scratch_operands = 0 : i64, tpu.core_type = #tpu.core_type<tc>, window_params = [{transform_indices = @transform_0, window_bounds = array<i64: 1, 8, 28, 28>}, {pipeline_mode = #tpu.pipeline_mode<synchronous>, transform_indices = @transform_1, window_bounds = array<i64: 5, 28, 144>}, {pipeline_mode = #tpu.pipeline_mode<synchronous>, transform_indices = @transform_2, window_bounds = array<i64: 1, 144>}, {pipeline_mode = #tpu.pipeline_mode<synchronous>, transform_indices = @transform_3, window_bounds = array<i64: 5, 72, 96>}, {pipeline_mode = #tpu.pipeline_mode<synchronous>, transform_indices = @transform_4, window_bounds = array<i64: 1, 96>}, {pipeline_mode = #tpu.pipeline_mode<synchronous>, transform_indices = @transform_5, window_bounds = array<i64: 2, 144, 72>}, {pipeline_mode = #tpu.pipeline_mode<synchronous>, transform_indices = @transform_6, window_bounds = array<i64: 2, 12, 24>}, {pipeline_mode = #tpu.pipeline_mode<synchronous>, transform_indices = @transform_7, window_bounds = array<i64: 2, 96, 48>}, {pipeline_mode = #tpu.pipeline_mode<synchronous>, transform_indices = @transform_8, window_bounds = array<i64: 2, 4, 8>}, {pipeline_mode = #tpu.pipeline_mode<synchronous>, transform_indices = @transform_9, window_bounds = array<i64: 4, 48, 128>}, {pipeline_mode = #tpu.pipeline_mode<synchronous>, transform_indices = @transform_10, window_bounds = array<i64: 1, 128>}, {pipeline_mode = #tpu.pipeline_mode<synchronous>, transform_indices = @transform_11, window_bounds = array<i64: 128, 128>}, {pipeline_mode = #tpu.pipeline_mode<synchronous>, transform_indices = @transform_12, window_bounds = array<i64: 1, 128>}, {pipeline_mode = #tpu.pipeline_mode<synchronous>, transform_indices = @transform_13, window_bounds = array<i64: 128, 128>}, {pipeline_mode = #tpu.pipeline_mode<synchronous>, transform_indices = @transform_14, window_bounds = array<i64: 1, 128>}, {transform_indices = @transform_15, window_bounds = array<i64: 1, 8, 128>}]} {
    %c0 = arith.constant 0 : index
    %c0_0 = arith.constant 0 : index
    %c0_1 = arith.constant 0 : index
    %c0_2 = arith.constant 0 : index
    %0 = vector.load %arg1[%c0, %c0_0, %c0_1, %c0_2] : memref<1x8x28x28xf32, #tpu.memory_space<vmem>>, vector<1x1x24x28xf32>
    %1 = vector.shape_cast %0 : vector<1x1x24x28xf32> to vector<24x28xf32>
    %c0_3 = arith.constant 0 : index
    %c0_4 = arith.constant 0 : index
    %c0_5 = arith.constant 0 : index
    %2 = vector.load %arg2[%c0_3, %c0_4, %c0_5] : memref<5x28x144xf32, #tpu.memory_space<vmem>>, vector<1x28x144xf32>
    %3 = vector.shape_cast %2 : vector<1x28x144xf32> to vector<28x144xf32>
    %cst = arith.constant dense<0.000000e+00> : vector<24x144xf32>
    %4 = tpu.matmul %1, %3, %cst {dimension_numbers = #tpu.dot_dimension_numbers<[1], [0], [0], [1], [0, 0, 1, 1], [], []>} : vector<24x28xf32>, vector<28x144xf32>, vector<24x144xf32> -> vector<24x144xf32>
    %c0_6 = arith.constant 0 : index
    %c0_7 = arith.constant 0 : index
    %c2 = arith.constant 2 : index
    %c0_8 = arith.constant 0 : index
    %5 = vector.load %arg1[%c0_6, %c0_7, %c2, %c0_8] : memref<1x8x28x28xf32, #tpu.memory_space<vmem>>, vector<1x1x24x28xf32>
    %6 = vector.shape_cast %5 : vector<1x1x24x28xf32> to vector<24x28xf32>
    %c2_9 = arith.constant 2 : index
    %c0_10 = arith.constant 0 : index
    %c0_11 = arith.constant 0 : index
    %7 = vector.load %arg2[%c2_9, %c0_10, %c0_11] : memref<5x28x144xf32, #tpu.memory_space<vmem>>, vector<1x28x144xf32>
    %8 = vector.shape_cast %7 : vector<1x28x144xf32> to vector<28x144xf32>
    %cst_12 = arith.constant dense<0.000000e+00> : vector<24x144xf32>
    %9 = tpu.matmul %6, %8, %cst_12 {dimension_numbers = #tpu.dot_dimension_numbers<[1], [0], [0], [1], [0, 0, 1, 1], [], []>} : vector<24x28xf32>, vector<28x144xf32>, vector<24x144xf32> -> vector<24x144xf32>
    %10 = arith.addf %4, %9 : vector<24x144xf32>
    %c0_13 = arith.constant 0 : index
    %c0_14 = arith.constant 0 : index
    %c4 = arith.constant 4 : index
    %c0_15 = arith.constant 0 : index
    %11 = vector.load %arg1[%c0_13, %c0_14, %c4, %c0_15] : memref<1x8x28x28xf32, #tpu.memory_space<vmem>>, vector<1x1x24x28xf32>
    %12 = vector.shape_cast %11 : vector<1x1x24x28xf32> to vector<24x28xf32>
    %c4_16 = arith.constant 4 : index
    %c0_17 = arith.constant 0 : index
    %c0_18 = arith.constant 0 : index
    %13 = vector.load %arg2[%c4_16, %c0_17, %c0_18] : memref<5x28x144xf32, #tpu.memory_space<vmem>>, vector<1x28x144xf32>
    %14 = vector.shape_cast %13 : vector<1x28x144xf32> to vector<28x144xf32>
    %cst_19 = arith.constant dense<0.000000e+00> : vector<24x144xf32>
    %15 = tpu.matmul %12, %14, %cst_19 {dimension_numbers = #tpu.dot_dimension_numbers<[1], [0], [0], [1], [0, 0, 1, 1], [], []>} : vector<24x28xf32>, vector<28x144xf32>, vector<24x144xf32> -> vector<24x144xf32>
    %16 = arith.addf %10, %15 : vector<24x144xf32>
    %c0_20 = arith.constant 0 : index
    %c0_21 = arith.constant 0 : index
    %c1 = arith.constant 1 : index
    %c0_22 = arith.constant 0 : index
    %17 = vector.load %arg1[%c0_20, %c0_21, %c1, %c0_22] : memref<1x8x28x28xf32, #tpu.memory_space<vmem>>, vector<1x1x24x28xf32>
    %18 = vector.shape_cast %17 : vector<1x1x24x28xf32> to vector<24x28xf32>
    %c1_23 = arith.constant 1 : index
    %c0_24 = arith.constant 0 : index
    %c0_25 = arith.constant 0 : index
    %19 = vector.load %arg2[%c1_23, %c0_24, %c0_25] : memref<5x28x144xf32, #tpu.memory_space<vmem>>, vector<1x28x144xf32>
    %20 = vector.shape_cast %19 : vector<1x28x144xf32> to vector<28x144xf32>
    %cst_26 = arith.constant dense<0.000000e+00> : vector<24x144xf32>
    %21 = tpu.matmul %18, %20, %cst_26 {dimension_numbers = #tpu.dot_dimension_numbers<[1], [0], [0], [1], [0, 0, 1, 1], [], []>} : vector<24x28xf32>, vector<28x144xf32>, vector<24x144xf32> -> vector<24x144xf32>
    %c0_27 = arith.constant 0 : index
    %c0_28 = arith.constant 0 : index
    %c3 = arith.constant 3 : index
    %c0_29 = arith.constant 0 : index
    %22 = vector.load %arg1[%c0_27, %c0_28, %c3, %c0_29] : memref<1x8x28x28xf32, #tpu.memory_space<vmem>>, vector<1x1x24x28xf32>
    %23 = vector.shape_cast %22 : vector<1x1x24x28xf32> to vector<24x28xf32>
    %c3_30 = arith.constant 3 : index
    %c0_31 = arith.constant 0 : index
    %c0_32 = arith.constant 0 : index
    %24 = vector.load %arg2[%c3_30, %c0_31, %c0_32] : memref<5x28x144xf32, #tpu.memory_space<vmem>>, vector<1x28x144xf32>
    %25 = vector.shape_cast %24 : vector<1x28x144xf32> to vector<28x144xf32>
    %cst_33 = arith.constant dense<0.000000e+00> : vector<24x144xf32>
    %26 = tpu.matmul %23, %25, %cst_33 {dimension_numbers = #tpu.dot_dimension_numbers<[1], [0], [0], [1], [0, 0, 1, 1], [], []>} : vector<24x28xf32>, vector<28x144xf32>, vector<24x144xf32> -> vector<24x144xf32>
    %27 = arith.addf %21, %26 : vector<24x144xf32>
    %28 = arith.addf %16, %27 : vector<24x144xf32>
    %c0_34 = arith.constant 0 : index
    %c0_35 = arith.constant 0 : index
    %29 = vector.load %arg3[%c0_34, %c0_35] : memref<1x144xf32, #tpu.memory_space<vmem>>, vector<1x144xf32>
    %30 = vector.broadcast %29 : vector<1x144xf32> to vector<24x144xf32>
    %31 = arith.addf %28, %30 : vector<24x144xf32>
    %cst_36 = arith.constant 0.000000e+00 : f32
    %32 = vector.broadcast %cst_36 : f32 to vector<24x144xf32>
    %33 = arith.maximumf %31, %32 : vector<24x144xf32>
    %c0_37 = arith.constant 0 : index
    %c0_38 = arith.constant 0 : index
    %c0_39 = arith.constant 0 : index
    %34 = vector.load %arg6[%c0_37, %c0_38, %c0_39] : memref<2x144x72xf32, #tpu.memory_space<vmem>>, vector<1x144x72xf32>
    %35 = vector.shape_cast %34 : vector<1x144x72xf32> to vector<144x72xf32>
    %cst_40 = arith.constant dense<0.000000e+00> : vector<24x72xf32>
    %36 = tpu.matmul %33, %35, %cst_40 {dimension_numbers = #tpu.dot_dimension_numbers<[1], [0], [0], [1], [0, 0, 1, 1], [], []>} : vector<24x144xf32>, vector<144x72xf32>, vector<24x72xf32> -> vector<24x72xf32>
    %c1_41 = arith.constant 1 : index
    %c0_42 = arith.constant 0 : index
    %c0_43 = arith.constant 0 : index
    %37 = vector.load %arg6[%c1_41, %c0_42, %c0_43] : memref<2x144x72xf32, #tpu.memory_space<vmem>>, vector<1x144x72xf32>
    %38 = vector.shape_cast %37 : vector<1x144x72xf32> to vector<144x72xf32>
    %cst_44 = arith.constant dense<0.000000e+00> : vector<24x72xf32>
    %39 = tpu.matmul %33, %38, %cst_44 {dimension_numbers = #tpu.dot_dimension_numbers<[1], [0], [0], [1], [0, 0, 1, 1], [], []>} : vector<24x144xf32>, vector<144x72xf32>, vector<24x72xf32> -> vector<24x72xf32>
    %40 = arith.maximumf %36, %39 : vector<24x72xf32>
    %c0_45 = arith.constant 0 : index
    %c0_46 = arith.constant 0 : index
    %c0_47 = arith.constant 0 : index
    %41 = vector.load %arg7[%c0_45, %c0_46, %c0_47] : memref<2x12x24xf32, #tpu.memory_space<vmem>>, vector<1x12x24xf32>
    %42 = vector.shape_cast %41 : vector<1x12x24xf32> to vector<12x24xf32>
    %cst_48 = arith.constant dense<0.000000e+00> : vector<12x72xf32>
    %43 = tpu.matmul %42, %40, %cst_48 {dimension_numbers = #tpu.dot_dimension_numbers<[1], [0], [0], [1], [0, 0, 1, 1], [], []>} : vector<12x24xf32>, vector<24x72xf32>, vector<12x72xf32> -> vector<12x72xf32>
    %c1_49 = arith.constant 1 : index
    %c0_50 = arith.constant 0 : index
    %c0_51 = arith.constant 0 : index
    %44 = vector.load %arg7[%c1_49, %c0_50, %c0_51] : memref<2x12x24xf32, #tpu.memory_space<vmem>>, vector<1x12x24xf32>
    %45 = vector.shape_cast %44 : vector<1x12x24xf32> to vector<12x24xf32>
    %cst_52 = arith.constant dense<0.000000e+00> : vector<12x72xf32>
    %46 = tpu.matmul %45, %40, %cst_52 {dimension_numbers = #tpu.dot_dimension_numbers<[1], [0], [0], [1], [0, 0, 1, 1], [], []>} : vector<12x24xf32>, vector<24x72xf32>, vector<12x72xf32> -> vector<12x72xf32>
    %47 = arith.maximumf %43, %46 : vector<12x72xf32>
    %48 = vector.extract_strided_slice %47 {offsets = [0, 0], sizes = [8, 72], strides = [1, 1]} : vector<12x72xf32> to vector<8x72xf32>
    %c0_53 = arith.constant 0 : index
    %c0_54 = arith.constant 0 : index
    %c0_55 = arith.constant 0 : index
    %49 = vector.load %arg4[%c0_53, %c0_54, %c0_55] : memref<5x72x96xf32, #tpu.memory_space<vmem>>, vector<1x72x96xf32>
    %50 = vector.shape_cast %49 : vector<1x72x96xf32> to vector<72x96xf32>
    %cst_56 = arith.constant dense<0.000000e+00> : vector<8x96xf32>
    %51 = tpu.matmul %48, %50, %cst_56 {dimension_numbers = #tpu.dot_dimension_numbers<[1], [0], [0], [1], [0, 0, 1, 1], [], []>} : vector<8x72xf32>, vector<72x96xf32>, vector<8x96xf32> -> vector<8x96xf32>
    %52 = vector.extract_strided_slice %47 {offsets = [2, 0], sizes = [8, 72], strides = [1, 1]} : vector<12x72xf32> to vector<8x72xf32>
    %c2_57 = arith.constant 2 : index
    %c0_58 = arith.constant 0 : index
    %c0_59 = arith.constant 0 : index
    %53 = vector.load %arg4[%c2_57, %c0_58, %c0_59] : memref<5x72x96xf32, #tpu.memory_space<vmem>>, vector<1x72x96xf32>
    %54 = vector.shape_cast %53 : vector<1x72x96xf32> to vector<72x96xf32>
    %cst_60 = arith.constant dense<0.000000e+00> : vector<8x96xf32>
    %55 = tpu.matmul %52, %54, %cst_60 {dimension_numbers = #tpu.dot_dimension_numbers<[1], [0], [0], [1], [0, 0, 1, 1], [], []>} : vector<8x72xf32>, vector<72x96xf32>, vector<8x96xf32> -> vector<8x96xf32>
    %56 = arith.addf %51, %55 : vector<8x96xf32>
    %57 = vector.extract_strided_slice %47 {offsets = [4, 0], sizes = [8, 72], strides = [1, 1]} : vector<12x72xf32> to vector<8x72xf32>
    %c4_61 = arith.constant 4 : index
    %c0_62 = arith.constant 0 : index
    %c0_63 = arith.constant 0 : index
    %58 = vector.load %arg4[%c4_61, %c0_62, %c0_63] : memref<5x72x96xf32, #tpu.memory_space<vmem>>, vector<1x72x96xf32>
    %59 = vector.shape_cast %58 : vector<1x72x96xf32> to vector<72x96xf32>
    %cst_64 = arith.constant dense<0.000000e+00> : vector<8x96xf32>
    %60 = tpu.matmul %57, %59, %cst_64 {dimension_numbers = #tpu.dot_dimension_numbers<[1], [0], [0], [1], [0, 0, 1, 1], [], []>} : vector<8x72xf32>, vector<72x96xf32>, vector<8x96xf32> -> vector<8x96xf32>
    %61 = arith.addf %56, %60 : vector<8x96xf32>
    %62 = vector.extract_strided_slice %47 {offsets = [1, 0], sizes = [8, 72], strides = [1, 1]} : vector<12x72xf32> to vector<8x72xf32>
    %c1_65 = arith.constant 1 : index
    %c0_66 = arith.constant 0 : index
    %c0_67 = arith.constant 0 : index
    %63 = vector.load %arg4[%c1_65, %c0_66, %c0_67] : memref<5x72x96xf32, #tpu.memory_space<vmem>>, vector<1x72x96xf32>
    %64 = vector.shape_cast %63 : vector<1x72x96xf32> to vector<72x96xf32>
    %cst_68 = arith.constant dense<0.000000e+00> : vector<8x96xf32>
    %65 = tpu.matmul %62, %64, %cst_68 {dimension_numbers = #tpu.dot_dimension_numbers<[1], [0], [0], [1], [0, 0, 1, 1], [], []>} : vector<8x72xf32>, vector<72x96xf32>, vector<8x96xf32> -> vector<8x96xf32>
    %66 = vector.extract_strided_slice %47 {offsets = [3, 0], sizes = [8, 72], strides = [1, 1]} : vector<12x72xf32> to vector<8x72xf32>
    %c3_69 = arith.constant 3 : index
    %c0_70 = arith.constant 0 : index
    %c0_71 = arith.constant 0 : index
    %67 = vector.load %arg4[%c3_69, %c0_70, %c0_71] : memref<5x72x96xf32, #tpu.memory_space<vmem>>, vector<1x72x96xf32>
    %68 = vector.shape_cast %67 : vector<1x72x96xf32> to vector<72x96xf32>
    %cst_72 = arith.constant dense<0.000000e+00> : vector<8x96xf32>
    %69 = tpu.matmul %66, %68, %cst_72 {dimension_numbers = #tpu.dot_dimension_numbers<[1], [0], [0], [1], [0, 0, 1, 1], [], []>} : vector<8x72xf32>, vector<72x96xf32>, vector<8x96xf32> -> vector<8x96xf32>
    %70 = arith.addf %65, %69 : vector<8x96xf32>
    %71 = arith.addf %61, %70 : vector<8x96xf32>
    %c0_73 = arith.constant 0 : index
    %c0_74 = arith.constant 0 : index
    %72 = vector.load %arg5[%c0_73, %c0_74] : memref<1x96xf32, #tpu.memory_space<vmem>>, vector<1x96xf32>
    %73 = vector.broadcast %72 : vector<1x96xf32> to vector<8x96xf32>
    %74 = arith.addf %71, %73 : vector<8x96xf32>
    %cst_75 = arith.constant 0.000000e+00 : f32
    %75 = vector.broadcast %cst_75 : f32 to vector<8x96xf32>
    %76 = arith.maximumf %74, %75 : vector<8x96xf32>
    %c0_76 = arith.constant 0 : index
    %c0_77 = arith.constant 0 : index
    %c0_78 = arith.constant 0 : index
    %77 = vector.load %arg8[%c0_76, %c0_77, %c0_78] : memref<2x96x48xf32, #tpu.memory_space<vmem>>, vector<1x96x48xf32>
    %78 = vector.shape_cast %77 : vector<1x96x48xf32> to vector<96x48xf32>
    %cst_79 = arith.constant dense<0.000000e+00> : vector<8x48xf32>
    %79 = tpu.matmul %76, %78, %cst_79 {dimension_numbers = #tpu.dot_dimension_numbers<[1], [0], [0], [1], [0, 0, 1, 1], [], []>} : vector<8x96xf32>, vector<96x48xf32>, vector<8x48xf32> -> vector<8x48xf32>
    %c1_80 = arith.constant 1 : index
    %c0_81 = arith.constant 0 : index
    %c0_82 = arith.constant 0 : index
    %80 = vector.load %arg8[%c1_80, %c0_81, %c0_82] : memref<2x96x48xf32, #tpu.memory_space<vmem>>, vector<1x96x48xf32>
    %81 = vector.shape_cast %80 : vector<1x96x48xf32> to vector<96x48xf32>
    %cst_83 = arith.constant dense<0.000000e+00> : vector<8x48xf32>
    %82 = tpu.matmul %76, %81, %cst_83 {dimension_numbers = #tpu.dot_dimension_numbers<[1], [0], [0], [1], [0, 0, 1, 1], [], []>} : vector<8x96xf32>, vector<96x48xf32>, vector<8x48xf32> -> vector<8x48xf32>
    %83 = arith.maximumf %79, %82 : vector<8x48xf32>
    %c0_84 = arith.constant 0 : index
    %c0_85 = arith.constant 0 : index
    %c0_86 = arith.constant 0 : index
    %84 = vector.load %arg9[%c0_84, %c0_85, %c0_86] : memref<2x4x8xf32, #tpu.memory_space<vmem>>, vector<1x4x8xf32>
    %85 = vector.shape_cast %84 : vector<1x4x8xf32> to vector<4x8xf32>
    %cst_87 = arith.constant dense<0.000000e+00> : vector<4x48xf32>
    %86 = tpu.matmul %85, %83, %cst_87 {dimension_numbers = #tpu.dot_dimension_numbers<[1], [0], [0], [1], [0, 0, 1, 1], [], []>} : vector<4x8xf32>, vector<8x48xf32>, vector<4x48xf32> -> vector<4x48xf32>
    %c1_88 = arith.constant 1 : index
    %c0_89 = arith.constant 0 : index
    %c0_90 = arith.constant 0 : index
    %87 = vector.load %arg9[%c1_88, %c0_89, %c0_90] : memref<2x4x8xf32, #tpu.memory_space<vmem>>, vector<1x4x8xf32>
    %88 = vector.shape_cast %87 : vector<1x4x8xf32> to vector<4x8xf32>
    %cst_91 = arith.constant dense<0.000000e+00> : vector<4x48xf32>
    %89 = tpu.matmul %88, %83, %cst_91 {dimension_numbers = #tpu.dot_dimension_numbers<[1], [0], [0], [1], [0, 0, 1, 1], [], []>} : vector<4x8xf32>, vector<8x48xf32>, vector<4x48xf32> -> vector<4x48xf32>
    %90 = arith.maximumf %86, %89 : vector<4x48xf32>
    %c0_92 = arith.constant 0 : index
    %c1_93 = arith.constant 1 : index
    %c0_94 = arith.constant 0 : index
    %c0_95 = arith.constant 0 : index
    %91 = vector.load %arg1[%c0_92, %c1_93, %c0_94, %c0_95] : memref<1x8x28x28xf32, #tpu.memory_space<vmem>>, vector<1x1x24x28xf32>
    %92 = vector.shape_cast %91 : vector<1x1x24x28xf32> to vector<24x28xf32>
    %c0_96 = arith.constant 0 : index
    %c0_97 = arith.constant 0 : index
    %c0_98 = arith.constant 0 : index
    %93 = vector.load %arg2[%c0_96, %c0_97, %c0_98] : memref<5x28x144xf32, #tpu.memory_space<vmem>>, vector<1x28x144xf32>
    %94 = vector.shape_cast %93 : vector<1x28x144xf32> to vector<28x144xf32>
    %cst_99 = arith.constant dense<0.000000e+00> : vector<24x144xf32>
    %95 = tpu.matmul %92, %94, %cst_99 {dimension_numbers = #tpu.dot_dimension_numbers<[1], [0], [0], [1], [0, 0, 1, 1], [], []>} : vector<24x28xf32>, vector<28x144xf32>, vector<24x144xf32> -> vector<24x144xf32>
    %c0_100 = arith.constant 0 : index
    %c1_101 = arith.constant 1 : index
    %c2_102 = arith.constant 2 : index
    %c0_103 = arith.constant 0 : index
    %96 = vector.load %arg1[%c0_100, %c1_101, %c2_102, %c0_103] : memref<1x8x28x28xf32, #tpu.memory_space<vmem>>, vector<1x1x24x28xf32>
    %97 = vector.shape_cast %96 : vector<1x1x24x28xf32> to vector<24x28xf32>
    %c2_104 = arith.constant 2 : index
    %c0_105 = arith.constant 0 : index
    %c0_106 = arith.constant 0 : index
    %98 = vector.load %arg2[%c2_104, %c0_105, %c0_106] : memref<5x28x144xf32, #tpu.memory_space<vmem>>, vector<1x28x144xf32>
    %99 = vector.shape_cast %98 : vector<1x28x144xf32> to vector<28x144xf32>
    %cst_107 = arith.constant dense<0.000000e+00> : vector<24x144xf32>
    %100 = tpu.matmul %97, %99, %cst_107 {dimension_numbers = #tpu.dot_dimension_numbers<[1], [0], [0], [1], [0, 0, 1, 1], [], []>} : vector<24x28xf32>, vector<28x144xf32>, vector<24x144xf32> -> vector<24x144xf32>
    %101 = arith.addf %95, %100 : vector<24x144xf32>
    %c0_108 = arith.constant 0 : index
    %c1_109 = arith.constant 1 : index
    %c4_110 = arith.constant 4 : index
    %c0_111 = arith.constant 0 : index
    %102 = vector.load %arg1[%c0_108, %c1_109, %c4_110, %c0_111] : memref<1x8x28x28xf32, #tpu.memory_space<vmem>>, vector<1x1x24x28xf32>
    %103 = vector.shape_cast %102 : vector<1x1x24x28xf32> to vector<24x28xf32>
    %c4_112 = arith.constant 4 : index
    %c0_113 = arith.constant 0 : index
    %c0_114 = arith.constant 0 : index
    %104 = vector.load %arg2[%c4_112, %c0_113, %c0_114] : memref<5x28x144xf32, #tpu.memory_space<vmem>>, vector<1x28x144xf32>
    %105 = vector.shape_cast %104 : vector<1x28x144xf32> to vector<28x144xf32>
    %cst_115 = arith.constant dense<0.000000e+00> : vector<24x144xf32>
    %106 = tpu.matmul %103, %105, %cst_115 {dimension_numbers = #tpu.dot_dimension_numbers<[1], [0], [0], [1], [0, 0, 1, 1], [], []>} : vector<24x28xf32>, vector<28x144xf32>, vector<24x144xf32> -> vector<24x144xf32>
    %107 = arith.addf %101, %106 : vector<24x144xf32>
    %c0_116 = arith.constant 0 : index
    %c1_117 = arith.constant 1 : index
    %c1_118 = arith.constant 1 : index
    %c0_119 = arith.constant 0 : index
    %108 = vector.load %arg1[%c0_116, %c1_117, %c1_118, %c0_119] : memref<1x8x28x28xf32, #tpu.memory_space<vmem>>, vector<1x1x24x28xf32>
    %109 = vector.shape_cast %108 : vector<1x1x24x28xf32> to vector<24x28xf32>
    %c1_120 = arith.constant 1 : index
    %c0_121 = arith.constant 0 : index
    %c0_122 = arith.constant 0 : index
    %110 = vector.load %arg2[%c1_120, %c0_121, %c0_122] : memref<5x28x144xf32, #tpu.memory_space<vmem>>, vector<1x28x144xf32>
    %111 = vector.shape_cast %110 : vector<1x28x144xf32> to vector<28x144xf32>
    %cst_123 = arith.constant dense<0.000000e+00> : vector<24x144xf32>
    %112 = tpu.matmul %109, %111, %cst_123 {dimension_numbers = #tpu.dot_dimension_numbers<[1], [0], [0], [1], [0, 0, 1, 1], [], []>} : vector<24x28xf32>, vector<28x144xf32>, vector<24x144xf32> -> vector<24x144xf32>
    %c0_124 = arith.constant 0 : index
    %c1_125 = arith.constant 1 : index
    %c3_126 = arith.constant 3 : index
    %c0_127 = arith.constant 0 : index
    %113 = vector.load %arg1[%c0_124, %c1_125, %c3_126, %c0_127] : memref<1x8x28x28xf32, #tpu.memory_space<vmem>>, vector<1x1x24x28xf32>
    %114 = vector.shape_cast %113 : vector<1x1x24x28xf32> to vector<24x28xf32>
    %c3_128 = arith.constant 3 : index
    %c0_129 = arith.constant 0 : index
    %c0_130 = arith.constant 0 : index
    %115 = vector.load %arg2[%c3_128, %c0_129, %c0_130] : memref<5x28x144xf32, #tpu.memory_space<vmem>>, vector<1x28x144xf32>
    %116 = vector.shape_cast %115 : vector<1x28x144xf32> to vector<28x144xf32>
    %cst_131 = arith.constant dense<0.000000e+00> : vector<24x144xf32>
    %117 = tpu.matmul %114, %116, %cst_131 {dimension_numbers = #tpu.dot_dimension_numbers<[1], [0], [0], [1], [0, 0, 1, 1], [], []>} : vector<24x28xf32>, vector<28x144xf32>, vector<24x144xf32> -> vector<24x144xf32>
    %118 = arith.addf %112, %117 : vector<24x144xf32>
    %119 = arith.addf %107, %118 : vector<24x144xf32>
    %c0_132 = arith.constant 0 : index
    %c0_133 = arith.constant 0 : index
    %120 = vector.load %arg3[%c0_132, %c0_133] : memref<1x144xf32, #tpu.memory_space<vmem>>, vector<1x144xf32>
    %121 = vector.broadcast %120 : vector<1x144xf32> to vector<24x144xf32>
    %122 = arith.addf %119, %121 : vector<24x144xf32>
    %cst_134 = arith.constant 0.000000e+00 : f32
    %123 = vector.broadcast %cst_134 : f32 to vector<24x144xf32>
    %124 = arith.maximumf %122, %123 : vector<24x144xf32>
    %c0_135 = arith.constant 0 : index
    %c0_136 = arith.constant 0 : index
    %c0_137 = arith.constant 0 : index
    %125 = vector.load %arg6[%c0_135, %c0_136, %c0_137] : memref<2x144x72xf32, #tpu.memory_space<vmem>>, vector<1x144x72xf32>
    %126 = vector.shape_cast %125 : vector<1x144x72xf32> to vector<144x72xf32>
    %cst_138 = arith.constant dense<0.000000e+00> : vector<24x72xf32>
    %127 = tpu.matmul %124, %126, %cst_138 {dimension_numbers = #tpu.dot_dimension_numbers<[1], [0], [0], [1], [0, 0, 1, 1], [], []>} : vector<24x144xf32>, vector<144x72xf32>, vector<24x72xf32> -> vector<24x72xf32>
    %c1_139 = arith.constant 1 : index
    %c0_140 = arith.constant 0 : index
    %c0_141 = arith.constant 0 : index
    %128 = vector.load %arg6[%c1_139, %c0_140, %c0_141] : memref<2x144x72xf32, #tpu.memory_space<vmem>>, vector<1x144x72xf32>
    %129 = vector.shape_cast %128 : vector<1x144x72xf32> to vector<144x72xf32>
    %cst_142 = arith.constant dense<0.000000e+00> : vector<24x72xf32>
    %130 = tpu.matmul %124, %129, %cst_142 {dimension_numbers = #tpu.dot_dimension_numbers<[1], [0], [0], [1], [0, 0, 1, 1], [], []>} : vector<24x144xf32>, vector<144x72xf32>, vector<24x72xf32> -> vector<24x72xf32>
    %131 = arith.maximumf %127, %130 : vector<24x72xf32>
    %c0_143 = arith.constant 0 : index
    %c0_144 = arith.constant 0 : index
    %c0_145 = arith.constant 0 : index
    %132 = vector.load %arg7[%c0_143, %c0_144, %c0_145] : memref<2x12x24xf32, #tpu.memory_space<vmem>>, vector<1x12x24xf32>
    %133 = vector.shape_cast %132 : vector<1x12x24xf32> to vector<12x24xf32>
    %cst_146 = arith.constant dense<0.000000e+00> : vector<12x72xf32>
    %134 = tpu.matmul %133, %131, %cst_146 {dimension_numbers = #tpu.dot_dimension_numbers<[1], [0], [0], [1], [0, 0, 1, 1], [], []>} : vector<12x24xf32>, vector<24x72xf32>, vector<12x72xf32> -> vector<12x72xf32>
    %c1_147 = arith.constant 1 : index
    %c0_148 = arith.constant 0 : index
    %c0_149 = arith.constant 0 : index
    %135 = vector.load %arg7[%c1_147, %c0_148, %c0_149] : memref<2x12x24xf32, #tpu.memory_space<vmem>>, vector<1x12x24xf32>
    %136 = vector.shape_cast %135 : vector<1x12x24xf32> to vector<12x24xf32>
    %cst_150 = arith.constant dense<0.000000e+00> : vector<12x72xf32>
    %137 = tpu.matmul %136, %131, %cst_150 {dimension_numbers = #tpu.dot_dimension_numbers<[1], [0], [0], [1], [0, 0, 1, 1], [], []>} : vector<12x24xf32>, vector<24x72xf32>, vector<12x72xf32> -> vector<12x72xf32>
    %138 = arith.maximumf %134, %137 : vector<12x72xf32>
    %139 = vector.extract_strided_slice %138 {offsets = [0, 0], sizes = [8, 72], strides = [1, 1]} : vector<12x72xf32> to vector<8x72xf32>
    %c0_151 = arith.constant 0 : index
    %c0_152 = arith.constant 0 : index
    %c0_153 = arith.constant 0 : index
    %140 = vector.load %arg4[%c0_151, %c0_152, %c0_153] : memref<5x72x96xf32, #tpu.memory_space<vmem>>, vector<1x72x96xf32>
    %141 = vector.shape_cast %140 : vector<1x72x96xf32> to vector<72x96xf32>
    %cst_154 = arith.constant dense<0.000000e+00> : vector<8x96xf32>
    %142 = tpu.matmul %139, %141, %cst_154 {dimension_numbers = #tpu.dot_dimension_numbers<[1], [0], [0], [1], [0, 0, 1, 1], [], []>} : vector<8x72xf32>, vector<72x96xf32>, vector<8x96xf32> -> vector<8x96xf32>
    %143 = vector.extract_strided_slice %138 {offsets = [2, 0], sizes = [8, 72], strides = [1, 1]} : vector<12x72xf32> to vector<8x72xf32>
    %c2_155 = arith.constant 2 : index
    %c0_156 = arith.constant 0 : index
    %c0_157 = arith.constant 0 : index
    %144 = vector.load %arg4[%c2_155, %c0_156, %c0_157] : memref<5x72x96xf32, #tpu.memory_space<vmem>>, vector<1x72x96xf32>
    %145 = vector.shape_cast %144 : vector<1x72x96xf32> to vector<72x96xf32>
    %cst_158 = arith.constant dense<0.000000e+00> : vector<8x96xf32>
    %146 = tpu.matmul %143, %145, %cst_158 {dimension_numbers = #tpu.dot_dimension_numbers<[1], [0], [0], [1], [0, 0, 1, 1], [], []>} : vector<8x72xf32>, vector<72x96xf32>, vector<8x96xf32> -> vector<8x96xf32>
    %147 = arith.addf %142, %146 : vector<8x96xf32>
    %148 = vector.extract_strided_slice %138 {offsets = [4, 0], sizes = [8, 72], strides = [1, 1]} : vector<12x72xf32> to vector<8x72xf32>
    %c4_159 = arith.constant 4 : index
    %c0_160 = arith.constant 0 : index
    %c0_161 = arith.constant 0 : index
    %149 = vector.load %arg4[%c4_159, %c0_160, %c0_161] : memref<5x72x96xf32, #tpu.memory_space<vmem>>, vector<1x72x96xf32>
    %150 = vector.shape_cast %149 : vector<1x72x96xf32> to vector<72x96xf32>
    %cst_162 = arith.constant dense<0.000000e+00> : vector<8x96xf32>
    %151 = tpu.matmul %148, %150, %cst_162 {dimension_numbers = #tpu.dot_dimension_numbers<[1], [0], [0], [1], [0, 0, 1, 1], [], []>} : vector<8x72xf32>, vector<72x96xf32>, vector<8x96xf32> -> vector<8x96xf32>
    %152 = arith.addf %147, %151 : vector<8x96xf32>
    %153 = vector.extract_strided_slice %138 {offsets = [1, 0], sizes = [8, 72], strides = [1, 1]} : vector<12x72xf32> to vector<8x72xf32>
    %c1_163 = arith.constant 1 : index
    %c0_164 = arith.constant 0 : index
    %c0_165 = arith.constant 0 : index
    %154 = vector.load %arg4[%c1_163, %c0_164, %c0_165] : memref<5x72x96xf32, #tpu.memory_space<vmem>>, vector<1x72x96xf32>
    %155 = vector.shape_cast %154 : vector<1x72x96xf32> to vector<72x96xf32>
    %cst_166 = arith.constant dense<0.000000e+00> : vector<8x96xf32>
    %156 = tpu.matmul %153, %155, %cst_166 {dimension_numbers = #tpu.dot_dimension_numbers<[1], [0], [0], [1], [0, 0, 1, 1], [], []>} : vector<8x72xf32>, vector<72x96xf32>, vector<8x96xf32> -> vector<8x96xf32>
    %157 = vector.extract_strided_slice %138 {offsets = [3, 0], sizes = [8, 72], strides = [1, 1]} : vector<12x72xf32> to vector<8x72xf32>
    %c3_167 = arith.constant 3 : index
    %c0_168 = arith.constant 0 : index
    %c0_169 = arith.constant 0 : index
    %158 = vector.load %arg4[%c3_167, %c0_168, %c0_169] : memref<5x72x96xf32, #tpu.memory_space<vmem>>, vector<1x72x96xf32>
    %159 = vector.shape_cast %158 : vector<1x72x96xf32> to vector<72x96xf32>
    %cst_170 = arith.constant dense<0.000000e+00> : vector<8x96xf32>
    %160 = tpu.matmul %157, %159, %cst_170 {dimension_numbers = #tpu.dot_dimension_numbers<[1], [0], [0], [1], [0, 0, 1, 1], [], []>} : vector<8x72xf32>, vector<72x96xf32>, vector<8x96xf32> -> vector<8x96xf32>
    %161 = arith.addf %156, %160 : vector<8x96xf32>
    %162 = arith.addf %152, %161 : vector<8x96xf32>
    %c0_171 = arith.constant 0 : index
    %c0_172 = arith.constant 0 : index
    %163 = vector.load %arg5[%c0_171, %c0_172] : memref<1x96xf32, #tpu.memory_space<vmem>>, vector<1x96xf32>
    %164 = vector.broadcast %163 : vector<1x96xf32> to vector<8x96xf32>
    %165 = arith.addf %162, %164 : vector<8x96xf32>
    %cst_173 = arith.constant 0.000000e+00 : f32
    %166 = vector.broadcast %cst_173 : f32 to vector<8x96xf32>
    %167 = arith.maximumf %165, %166 : vector<8x96xf32>
    %c0_174 = arith.constant 0 : index
    %c0_175 = arith.constant 0 : index
    %c0_176 = arith.constant 0 : index
    %168 = vector.load %arg8[%c0_174, %c0_175, %c0_176] : memref<2x96x48xf32, #tpu.memory_space<vmem>>, vector<1x96x48xf32>
    %169 = vector.shape_cast %168 : vector<1x96x48xf32> to vector<96x48xf32>
    %cst_177 = arith.constant dense<0.000000e+00> : vector<8x48xf32>
    %170 = tpu.matmul %167, %169, %cst_177 {dimension_numbers = #tpu.dot_dimension_numbers<[1], [0], [0], [1], [0, 0, 1, 1], [], []>} : vector<8x96xf32>, vector<96x48xf32>, vector<8x48xf32> -> vector<8x48xf32>
    %c1_178 = arith.constant 1 : index
    %c0_179 = arith.constant 0 : index
    %c0_180 = arith.constant 0 : index
    %171 = vector.load %arg8[%c1_178, %c0_179, %c0_180] : memref<2x96x48xf32, #tpu.memory_space<vmem>>, vector<1x96x48xf32>
    %172 = vector.shape_cast %171 : vector<1x96x48xf32> to vector<96x48xf32>
    %cst_181 = arith.constant dense<0.000000e+00> : vector<8x48xf32>
    %173 = tpu.matmul %167, %172, %cst_181 {dimension_numbers = #tpu.dot_dimension_numbers<[1], [0], [0], [1], [0, 0, 1, 1], [], []>} : vector<8x96xf32>, vector<96x48xf32>, vector<8x48xf32> -> vector<8x48xf32>
    %174 = arith.maximumf %170, %173 : vector<8x48xf32>
    %c0_182 = arith.constant 0 : index
    %c0_183 = arith.constant 0 : index
    %c0_184 = arith.constant 0 : index
    %175 = vector.load %arg9[%c0_182, %c0_183, %c0_184] : memref<2x4x8xf32, #tpu.memory_space<vmem>>, vector<1x4x8xf32>
    %176 = vector.shape_cast %175 : vector<1x4x8xf32> to vector<4x8xf32>
    %cst_185 = arith.constant dense<0.000000e+00> : vector<4x48xf32>
    %177 = tpu.matmul %176, %174, %cst_185 {dimension_numbers = #tpu.dot_dimension_numbers<[1], [0], [0], [1], [0, 0, 1, 1], [], []>} : vector<4x8xf32>, vector<8x48xf32>, vector<4x48xf32> -> vector<4x48xf32>
    %c1_186 = arith.constant 1 : index
    %c0_187 = arith.constant 0 : index
    %c0_188 = arith.constant 0 : index
    %178 = vector.load %arg9[%c1_186, %c0_187, %c0_188] : memref<2x4x8xf32, #tpu.memory_space<vmem>>, vector<1x4x8xf32>
    %179 = vector.shape_cast %178 : vector<1x4x8xf32> to vector<4x8xf32>
    %cst_189 = arith.constant dense<0.000000e+00> : vector<4x48xf32>
    %180 = tpu.matmul %179, %174, %cst_189 {dimension_numbers = #tpu.dot_dimension_numbers<[1], [0], [0], [1], [0, 0, 1, 1], [], []>} : vector<4x8xf32>, vector<8x48xf32>, vector<4x48xf32> -> vector<4x48xf32>
    %181 = arith.maximumf %177, %180 : vector<4x48xf32>
    %c0_190 = arith.constant 0 : index
    %c2_191 = arith.constant 2 : index
    %c0_192 = arith.constant 0 : index
    %c0_193 = arith.constant 0 : index
    %182 = vector.load %arg1[%c0_190, %c2_191, %c0_192, %c0_193] : memref<1x8x28x28xf32, #tpu.memory_space<vmem>>, vector<1x1x24x28xf32>
    %183 = vector.shape_cast %182 : vector<1x1x24x28xf32> to vector<24x28xf32>
    %c0_194 = arith.constant 0 : index
    %c0_195 = arith.constant 0 : index
    %c0_196 = arith.constant 0 : index
    %184 = vector.load %arg2[%c0_194, %c0_195, %c0_196] : memref<5x28x144xf32, #tpu.memory_space<vmem>>, vector<1x28x144xf32>
    %185 = vector.shape_cast %184 : vector<1x28x144xf32> to vector<28x144xf32>
    %cst_197 = arith.constant dense<0.000000e+00> : vector<24x144xf32>
    %186 = tpu.matmul %183, %185, %cst_197 {dimension_numbers = #tpu.dot_dimension_numbers<[1], [0], [0], [1], [0, 0, 1, 1], [], []>} : vector<24x28xf32>, vector<28x144xf32>, vector<24x144xf32> -> vector<24x144xf32>
    %c0_198 = arith.constant 0 : index
    %c2_199 = arith.constant 2 : index
    %c2_200 = arith.constant 2 : index
    %c0_201 = arith.constant 0 : index
    %187 = vector.load %arg1[%c0_198, %c2_199, %c2_200, %c0_201] : memref<1x8x28x28xf32, #tpu.memory_space<vmem>>, vector<1x1x24x28xf32>
    %188 = vector.shape_cast %187 : vector<1x1x24x28xf32> to vector<24x28xf32>
    %c2_202 = arith.constant 2 : index
    %c0_203 = arith.constant 0 : index
    %c0_204 = arith.constant 0 : index
    %189 = vector.load %arg2[%c2_202, %c0_203, %c0_204] : memref<5x28x144xf32, #tpu.memory_space<vmem>>, vector<1x28x144xf32>
    %190 = vector.shape_cast %189 : vector<1x28x144xf32> to vector<28x144xf32>
    %cst_205 = arith.constant dense<0.000000e+00> : vector<24x144xf32>
    %191 = tpu.matmul %188, %190, %cst_205 {dimension_numbers = #tpu.dot_dimension_numbers<[1], [0], [0], [1], [0, 0, 1, 1], [], []>} : vector<24x28xf32>, vector<28x144xf32>, vector<24x144xf32> -> vector<24x144xf32>
    %192 = arith.addf %186, %191 : vector<24x144xf32>
    %c0_206 = arith.constant 0 : index
    %c2_207 = arith.constant 2 : index
    %c4_208 = arith.constant 4 : index
    %c0_209 = arith.constant 0 : index
    %193 = vector.load %arg1[%c0_206, %c2_207, %c4_208, %c0_209] : memref<1x8x28x28xf32, #tpu.memory_space<vmem>>, vector<1x1x24x28xf32>
    %194 = vector.shape_cast %193 : vector<1x1x24x28xf32> to vector<24x28xf32>
    %c4_210 = arith.constant 4 : index
    %c0_211 = arith.constant 0 : index
    %c0_212 = arith.constant 0 : index
    %195 = vector.load %arg2[%c4_210, %c0_211, %c0_212] : memref<5x28x144xf32, #tpu.memory_space<vmem>>, vector<1x28x144xf32>
    %196 = vector.shape_cast %195 : vector<1x28x144xf32> to vector<28x144xf32>
    %cst_213 = arith.constant dense<0.000000e+00> : vector<24x144xf32>
    %197 = tpu.matmul %194, %196, %cst_213 {dimension_numbers = #tpu.dot_dimension_numbers<[1], [0], [0], [1], [0, 0, 1, 1], [], []>} : vector<24x28xf32>, vector<28x144xf32>, vector<24x144xf32> -> vector<24x144xf32>
    %198 = arith.addf %192, %197 : vector<24x144xf32>
    %c0_214 = arith.constant 0 : index
    %c2_215 = arith.constant 2 : index
    %c1_216 = arith.constant 1 : index
    %c0_217 = arith.constant 0 : index
    %199 = vector.load %arg1[%c0_214, %c2_215, %c1_216, %c0_217] : memref<1x8x28x28xf32, #tpu.memory_space<vmem>>, vector<1x1x24x28xf32>
    %200 = vector.shape_cast %199 : vector<1x1x24x28xf32> to vector<24x28xf32>
    %c1_218 = arith.constant 1 : index
    %c0_219 = arith.constant 0 : index
    %c0_220 = arith.constant 0 : index
    %201 = vector.load %arg2[%c1_218, %c0_219, %c0_220] : memref<5x28x144xf32, #tpu.memory_space<vmem>>, vector<1x28x144xf32>
    %202 = vector.shape_cast %201 : vector<1x28x144xf32> to vector<28x144xf32>
    %cst_221 = arith.constant dense<0.000000e+00> : vector<24x144xf32>
    %203 = tpu.matmul %200, %202, %cst_221 {dimension_numbers = #tpu.dot_dimension_numbers<[1], [0], [0], [1], [0, 0, 1, 1], [], []>} : vector<24x28xf32>, vector<28x144xf32>, vector<24x144xf32> -> vector<24x144xf32>
    %c0_222 = arith.constant 0 : index
    %c2_223 = arith.constant 2 : index
    %c3_224 = arith.constant 3 : index
    %c0_225 = arith.constant 0 : index
    %204 = vector.load %arg1[%c0_222, %c2_223, %c3_224, %c0_225] : memref<1x8x28x28xf32, #tpu.memory_space<vmem>>, vector<1x1x24x28xf32>
    %205 = vector.shape_cast %204 : vector<1x1x24x28xf32> to vector<24x28xf32>
    %c3_226 = arith.constant 3 : index
    %c0_227 = arith.constant 0 : index
    %c0_228 = arith.constant 0 : index
    %206 = vector.load %arg2[%c3_226, %c0_227, %c0_228] : memref<5x28x144xf32, #tpu.memory_space<vmem>>, vector<1x28x144xf32>
    %207 = vector.shape_cast %206 : vector<1x28x144xf32> to vector<28x144xf32>
    %cst_229 = arith.constant dense<0.000000e+00> : vector<24x144xf32>
    %208 = tpu.matmul %205, %207, %cst_229 {dimension_numbers = #tpu.dot_dimension_numbers<[1], [0], [0], [1], [0, 0, 1, 1], [], []>} : vector<24x28xf32>, vector<28x144xf32>, vector<24x144xf32> -> vector<24x144xf32>
    %209 = arith.addf %203, %208 : vector<24x144xf32>
    %210 = arith.addf %198, %209 : vector<24x144xf32>
    %c0_230 = arith.constant 0 : index
    %c0_231 = arith.constant 0 : index
    %211 = vector.load %arg3[%c0_230, %c0_231] : memref<1x144xf32, #tpu.memory_space<vmem>>, vector<1x144xf32>
    %212 = vector.broadcast %211 : vector<1x144xf32> to vector<24x144xf32>
    %213 = arith.addf %210, %212 : vector<24x144xf32>
    %cst_232 = arith.constant 0.000000e+00 : f32
    %214 = vector.broadcast %cst_232 : f32 to vector<24x144xf32>
    %215 = arith.maximumf %213, %214 : vector<24x144xf32>
    %c0_233 = arith.constant 0 : index
    %c0_234 = arith.constant 0 : index
    %c0_235 = arith.constant 0 : index
    %216 = vector.load %arg6[%c0_233, %c0_234, %c0_235] : memref<2x144x72xf32, #tpu.memory_space<vmem>>, vector<1x144x72xf32>
    %217 = vector.shape_cast %216 : vector<1x144x72xf32> to vector<144x72xf32>
    %cst_236 = arith.constant dense<0.000000e+00> : vector<24x72xf32>
    %218 = tpu.matmul %215, %217, %cst_236 {dimension_numbers = #tpu.dot_dimension_numbers<[1], [0], [0], [1], [0, 0, 1, 1], [], []>} : vector<24x144xf32>, vector<144x72xf32>, vector<24x72xf32> -> vector<24x72xf32>
    %c1_237 = arith.constant 1 : index
    %c0_238 = arith.constant 0 : index
    %c0_239 = arith.constant 0 : index
    %219 = vector.load %arg6[%c1_237, %c0_238, %c0_239] : memref<2x144x72xf32, #tpu.memory_space<vmem>>, vector<1x144x72xf32>
    %220 = vector.shape_cast %219 : vector<1x144x72xf32> to vector<144x72xf32>
    %cst_240 = arith.constant dense<0.000000e+00> : vector<24x72xf32>
    %221 = tpu.matmul %215, %220, %cst_240 {dimension_numbers = #tpu.dot_dimension_numbers<[1], [0], [0], [1], [0, 0, 1, 1], [], []>} : vector<24x144xf32>, vector<144x72xf32>, vector<24x72xf32> -> vector<24x72xf32>
    %222 = arith.maximumf %218, %221 : vector<24x72xf32>
    %c0_241 = arith.constant 0 : index
    %c0_242 = arith.constant 0 : index
    %c0_243 = arith.constant 0 : index
    %223 = vector.load %arg7[%c0_241, %c0_242, %c0_243] : memref<2x12x24xf32, #tpu.memory_space<vmem>>, vector<1x12x24xf32>
    %224 = vector.shape_cast %223 : vector<1x12x24xf32> to vector<12x24xf32>
    %cst_244 = arith.constant dense<0.000000e+00> : vector<12x72xf32>
    %225 = tpu.matmul %224, %222, %cst_244 {dimension_numbers = #tpu.dot_dimension_numbers<[1], [0], [0], [1], [0, 0, 1, 1], [], []>} : vector<12x24xf32>, vector<24x72xf32>, vector<12x72xf32> -> vector<12x72xf32>
    %c1_245 = arith.constant 1 : index
    %c0_246 = arith.constant 0 : index
    %c0_247 = arith.constant 0 : index
    %226 = vector.load %arg7[%c1_245, %c0_246, %c0_247] : memref<2x12x24xf32, #tpu.memory_space<vmem>>, vector<1x12x24xf32>
    %227 = vector.shape_cast %226 : vector<1x12x24xf32> to vector<12x24xf32>
    %cst_248 = arith.constant dense<0.000000e+00> : vector<12x72xf32>
    %228 = tpu.matmul %227, %222, %cst_248 {dimension_numbers = #tpu.dot_dimension_numbers<[1], [0], [0], [1], [0, 0, 1, 1], [], []>} : vector<12x24xf32>, vector<24x72xf32>, vector<12x72xf32> -> vector<12x72xf32>
    %229 = arith.maximumf %225, %228 : vector<12x72xf32>
    %230 = vector.extract_strided_slice %229 {offsets = [0, 0], sizes = [8, 72], strides = [1, 1]} : vector<12x72xf32> to vector<8x72xf32>
    %c0_249 = arith.constant 0 : index
    %c0_250 = arith.constant 0 : index
    %c0_251 = arith.constant 0 : index
    %231 = vector.load %arg4[%c0_249, %c0_250, %c0_251] : memref<5x72x96xf32, #tpu.memory_space<vmem>>, vector<1x72x96xf32>
    %232 = vector.shape_cast %231 : vector<1x72x96xf32> to vector<72x96xf32>
    %cst_252 = arith.constant dense<0.000000e+00> : vector<8x96xf32>
    %233 = tpu.matmul %230, %232, %cst_252 {dimension_numbers = #tpu.dot_dimension_numbers<[1], [0], [0], [1], [0, 0, 1, 1], [], []>} : vector<8x72xf32>, vector<72x96xf32>, vector<8x96xf32> -> vector<8x96xf32>
    %234 = vector.extract_strided_slice %229 {offsets = [2, 0], sizes = [8, 72], strides = [1, 1]} : vector<12x72xf32> to vector<8x72xf32>
    %c2_253 = arith.constant 2 : index
    %c0_254 = arith.constant 0 : index
    %c0_255 = arith.constant 0 : index
    %235 = vector.load %arg4[%c2_253, %c0_254, %c0_255] : memref<5x72x96xf32, #tpu.memory_space<vmem>>, vector<1x72x96xf32>
    %236 = vector.shape_cast %235 : vector<1x72x96xf32> to vector<72x96xf32>
    %cst_256 = arith.constant dense<0.000000e+00> : vector<8x96xf32>
    %237 = tpu.matmul %234, %236, %cst_256 {dimension_numbers = #tpu.dot_dimension_numbers<[1], [0], [0], [1], [0, 0, 1, 1], [], []>} : vector<8x72xf32>, vector<72x96xf32>, vector<8x96xf32> -> vector<8x96xf32>
    %238 = arith.addf %233, %237 : vector<8x96xf32>
    %239 = vector.extract_strided_slice %229 {offsets = [4, 0], sizes = [8, 72], strides = [1, 1]} : vector<12x72xf32> to vector<8x72xf32>
    %c4_257 = arith.constant 4 : index
    %c0_258 = arith.constant 0 : index
    %c0_259 = arith.constant 0 : index
    %240 = vector.load %arg4[%c4_257, %c0_258, %c0_259] : memref<5x72x96xf32, #tpu.memory_space<vmem>>, vector<1x72x96xf32>
    %241 = vector.shape_cast %240 : vector<1x72x96xf32> to vector<72x96xf32>
    %cst_260 = arith.constant dense<0.000000e+00> : vector<8x96xf32>
    %242 = tpu.matmul %239, %241, %cst_260 {dimension_numbers = #tpu.dot_dimension_numbers<[1], [0], [0], [1], [0, 0, 1, 1], [], []>} : vector<8x72xf32>, vector<72x96xf32>, vector<8x96xf32> -> vector<8x96xf32>
    %243 = arith.addf %238, %242 : vector<8x96xf32>
    %244 = vector.extract_strided_slice %229 {offsets = [1, 0], sizes = [8, 72], strides = [1, 1]} : vector<12x72xf32> to vector<8x72xf32>
    %c1_261 = arith.constant 1 : index
    %c0_262 = arith.constant 0 : index
    %c0_263 = arith.constant 0 : index
    %245 = vector.load %arg4[%c1_261, %c0_262, %c0_263] : memref<5x72x96xf32, #tpu.memory_space<vmem>>, vector<1x72x96xf32>
    %246 = vector.shape_cast %245 : vector<1x72x96xf32> to vector<72x96xf32>
    %cst_264 = arith.constant dense<0.000000e+00> : vector<8x96xf32>
    %247 = tpu.matmul %244, %246, %cst_264 {dimension_numbers = #tpu.dot_dimension_numbers<[1], [0], [0], [1], [0, 0, 1, 1], [], []>} : vector<8x72xf32>, vector<72x96xf32>, vector<8x96xf32> -> vector<8x96xf32>
    %248 = vector.extract_strided_slice %229 {offsets = [3, 0], sizes = [8, 72], strides = [1, 1]} : vector<12x72xf32> to vector<8x72xf32>
    %c3_265 = arith.constant 3 : index
    %c0_266 = arith.constant 0 : index
    %c0_267 = arith.constant 0 : index
    %249 = vector.load %arg4[%c3_265, %c0_266, %c0_267] : memref<5x72x96xf32, #tpu.memory_space<vmem>>, vector<1x72x96xf32>
    %250 = vector.shape_cast %249 : vector<1x72x96xf32> to vector<72x96xf32>
    %cst_268 = arith.constant dense<0.000000e+00> : vector<8x96xf32>
    %251 = tpu.matmul %248, %250, %cst_268 {dimension_numbers = #tpu.dot_dimension_numbers<[1], [0], [0], [1], [0, 0, 1, 1], [], []>} : vector<8x72xf32>, vector<72x96xf32>, vector<8x96xf32> -> vector<8x96xf32>
    %252 = arith.addf %247, %251 : vector<8x96xf32>
    %253 = arith.addf %243, %252 : vector<8x96xf32>
    %c0_269 = arith.constant 0 : index
    %c0_270 = arith.constant 0 : index
    %254 = vector.load %arg5[%c0_269, %c0_270] : memref<1x96xf32, #tpu.memory_space<vmem>>, vector<1x96xf32>
    %255 = vector.broadcast %254 : vector<1x96xf32> to vector<8x96xf32>
    %256 = arith.addf %253, %255 : vector<8x96xf32>
    %cst_271 = arith.constant 0.000000e+00 : f32
    %257 = vector.broadcast %cst_271 : f32 to vector<8x96xf32>
    %258 = arith.maximumf %256, %257 : vector<8x96xf32>
    %c0_272 = arith.constant 0 : index
    %c0_273 = arith.constant 0 : index
    %c0_274 = arith.constant 0 : index
    %259 = vector.load %arg8[%c0_272, %c0_273, %c0_274] : memref<2x96x48xf32, #tpu.memory_space<vmem>>, vector<1x96x48xf32>
    %260 = vector.shape_cast %259 : vector<1x96x48xf32> to vector<96x48xf32>
    %cst_275 = arith.constant dense<0.000000e+00> : vector<8x48xf32>
    %261 = tpu.matmul %258, %260, %cst_275 {dimension_numbers = #tpu.dot_dimension_numbers<[1], [0], [0], [1], [0, 0, 1, 1], [], []>} : vector<8x96xf32>, vector<96x48xf32>, vector<8x48xf32> -> vector<8x48xf32>
    %c1_276 = arith.constant 1 : index
    %c0_277 = arith.constant 0 : index
    %c0_278 = arith.constant 0 : index
    %262 = vector.load %arg8[%c1_276, %c0_277, %c0_278] : memref<2x96x48xf32, #tpu.memory_space<vmem>>, vector<1x96x48xf32>
    %263 = vector.shape_cast %262 : vector<1x96x48xf32> to vector<96x48xf32>
    %cst_279 = arith.constant dense<0.000000e+00> : vector<8x48xf32>
    %264 = tpu.matmul %258, %263, %cst_279 {dimension_numbers = #tpu.dot_dimension_numbers<[1], [0], [0], [1], [0, 0, 1, 1], [], []>} : vector<8x96xf32>, vector<96x48xf32>, vector<8x48xf32> -> vector<8x48xf32>
    %265 = arith.maximumf %261, %264 : vector<8x48xf32>
    %c0_280 = arith.constant 0 : index
    %c0_281 = arith.constant 0 : index
    %c0_282 = arith.constant 0 : index
    %266 = vector.load %arg9[%c0_280, %c0_281, %c0_282] : memref<2x4x8xf32, #tpu.memory_space<vmem>>, vector<1x4x8xf32>
    %267 = vector.shape_cast %266 : vector<1x4x8xf32> to vector<4x8xf32>
    %cst_283 = arith.constant dense<0.000000e+00> : vector<4x48xf32>
    %268 = tpu.matmul %267, %265, %cst_283 {dimension_numbers = #tpu.dot_dimension_numbers<[1], [0], [0], [1], [0, 0, 1, 1], [], []>} : vector<4x8xf32>, vector<8x48xf32>, vector<4x48xf32> -> vector<4x48xf32>
    %c1_284 = arith.constant 1 : index
    %c0_285 = arith.constant 0 : index
    %c0_286 = arith.constant 0 : index
    %269 = vector.load %arg9[%c1_284, %c0_285, %c0_286] : memref<2x4x8xf32, #tpu.memory_space<vmem>>, vector<1x4x8xf32>
    %270 = vector.shape_cast %269 : vector<1x4x8xf32> to vector<4x8xf32>
    %cst_287 = arith.constant dense<0.000000e+00> : vector<4x48xf32>
    %271 = tpu.matmul %270, %265, %cst_287 {dimension_numbers = #tpu.dot_dimension_numbers<[1], [0], [0], [1], [0, 0, 1, 1], [], []>} : vector<4x8xf32>, vector<8x48xf32>, vector<4x48xf32> -> vector<4x48xf32>
    %272 = arith.maximumf %268, %271 : vector<4x48xf32>
    %c0_288 = arith.constant 0 : index
    %c3_289 = arith.constant 3 : index
    %c0_290 = arith.constant 0 : index
    %c0_291 = arith.constant 0 : index
    %273 = vector.load %arg1[%c0_288, %c3_289, %c0_290, %c0_291] : memref<1x8x28x28xf32, #tpu.memory_space<vmem>>, vector<1x1x24x28xf32>
    %274 = vector.shape_cast %273 : vector<1x1x24x28xf32> to vector<24x28xf32>
    %c0_292 = arith.constant 0 : index
    %c0_293 = arith.constant 0 : index
    %c0_294 = arith.constant 0 : index
    %275 = vector.load %arg2[%c0_292, %c0_293, %c0_294] : memref<5x28x144xf32, #tpu.memory_space<vmem>>, vector<1x28x144xf32>
    %276 = vector.shape_cast %275 : vector<1x28x144xf32> to vector<28x144xf32>
    %cst_295 = arith.constant dense<0.000000e+00> : vector<24x144xf32>
    %277 = tpu.matmul %274, %276, %cst_295 {dimension_numbers = #tpu.dot_dimension_numbers<[1], [0], [0], [1], [0, 0, 1, 1], [], []>} : vector<24x28xf32>, vector<28x144xf32>, vector<24x144xf32> -> vector<24x144xf32>
    %c0_296 = arith.constant 0 : index
    %c3_297 = arith.constant 3 : index
    %c2_298 = arith.constant 2 : index
    %c0_299 = arith.constant 0 : index
    %278 = vector.load %arg1[%c0_296, %c3_297, %c2_298, %c0_299] : memref<1x8x28x28xf32, #tpu.memory_space<vmem>>, vector<1x1x24x28xf32>
    %279 = vector.shape_cast %278 : vector<1x1x24x28xf32> to vector<24x28xf32>
    %c2_300 = arith.constant 2 : index
    %c0_301 = arith.constant 0 : index
    %c0_302 = arith.constant 0 : index
    %280 = vector.load %arg2[%c2_300, %c0_301, %c0_302] : memref<5x28x144xf32, #tpu.memory_space<vmem>>, vector<1x28x144xf32>
    %281 = vector.shape_cast %280 : vector<1x28x144xf32> to vector<28x144xf32>
    %cst_303 = arith.constant dense<0.000000e+00> : vector<24x144xf32>
    %282 = tpu.matmul %279, %281, %cst_303 {dimension_numbers = #tpu.dot_dimension_numbers<[1], [0], [0], [1], [0, 0, 1, 1], [], []>} : vector<24x28xf32>, vector<28x144xf32>, vector<24x144xf32> -> vector<24x144xf32>
    %283 = arith.addf %277, %282 : vector<24x144xf32>
    %c0_304 = arith.constant 0 : index
    %c3_305 = arith.constant 3 : index
    %c4_306 = arith.constant 4 : index
    %c0_307 = arith.constant 0 : index
    %284 = vector.load %arg1[%c0_304, %c3_305, %c4_306, %c0_307] : memref<1x8x28x28xf32, #tpu.memory_space<vmem>>, vector<1x1x24x28xf32>
    %285 = vector.shape_cast %284 : vector<1x1x24x28xf32> to vector<24x28xf32>
    %c4_308 = arith.constant 4 : index
    %c0_309 = arith.constant 0 : index
    %c0_310 = arith.constant 0 : index
    %286 = vector.load %arg2[%c4_308, %c0_309, %c0_310] : memref<5x28x144xf32, #tpu.memory_space<vmem>>, vector<1x28x144xf32>
    %287 = vector.shape_cast %286 : vector<1x28x144xf32> to vector<28x144xf32>
    %cst_311 = arith.constant dense<0.000000e+00> : vector<24x144xf32>
    %288 = tpu.matmul %285, %287, %cst_311 {dimension_numbers = #tpu.dot_dimension_numbers<[1], [0], [0], [1], [0, 0, 1, 1], [], []>} : vector<24x28xf32>, vector<28x144xf32>, vector<24x144xf32> -> vector<24x144xf32>
    %289 = arith.addf %283, %288 : vector<24x144xf32>
    %c0_312 = arith.constant 0 : index
    %c3_313 = arith.constant 3 : index
    %c1_314 = arith.constant 1 : index
    %c0_315 = arith.constant 0 : index
    %290 = vector.load %arg1[%c0_312, %c3_313, %c1_314, %c0_315] : memref<1x8x28x28xf32, #tpu.memory_space<vmem>>, vector<1x1x24x28xf32>
    %291 = vector.shape_cast %290 : vector<1x1x24x28xf32> to vector<24x28xf32>
    %c1_316 = arith.constant 1 : index
    %c0_317 = arith.constant 0 : index
    %c0_318 = arith.constant 0 : index
    %292 = vector.load %arg2[%c1_316, %c0_317, %c0_318] : memref<5x28x144xf32, #tpu.memory_space<vmem>>, vector<1x28x144xf32>
    %293 = vector.shape_cast %292 : vector<1x28x144xf32> to vector<28x144xf32>
    %cst_319 = arith.constant dense<0.000000e+00> : vector<24x144xf32>
    %294 = tpu.matmul %291, %293, %cst_319 {dimension_numbers = #tpu.dot_dimension_numbers<[1], [0], [0], [1], [0, 0, 1, 1], [], []>} : vector<24x28xf32>, vector<28x144xf32>, vector<24x144xf32> -> vector<24x144xf32>
    %c0_320 = arith.constant 0 : index
    %c3_321 = arith.constant 3 : index
    %c3_322 = arith.constant 3 : index
    %c0_323 = arith.constant 0 : index
    %295 = vector.load %arg1[%c0_320, %c3_321, %c3_322, %c0_323] : memref<1x8x28x28xf32, #tpu.memory_space<vmem>>, vector<1x1x24x28xf32>
    %296 = vector.shape_cast %295 : vector<1x1x24x28xf32> to vector<24x28xf32>
    %c3_324 = arith.constant 3 : index
    %c0_325 = arith.constant 0 : index
    %c0_326 = arith.constant 0 : index
    %297 = vector.load %arg2[%c3_324, %c0_325, %c0_326] : memref<5x28x144xf32, #tpu.memory_space<vmem>>, vector<1x28x144xf32>
    %298 = vector.shape_cast %297 : vector<1x28x144xf32> to vector<28x144xf32>
    %cst_327 = arith.constant dense<0.000000e+00> : vector<24x144xf32>
    %299 = tpu.matmul %296, %298, %cst_327 {dimension_numbers = #tpu.dot_dimension_numbers<[1], [0], [0], [1], [0, 0, 1, 1], [], []>} : vector<24x28xf32>, vector<28x144xf32>, vector<24x144xf32> -> vector<24x144xf32>
    %300 = arith.addf %294, %299 : vector<24x144xf32>
    %301 = arith.addf %289, %300 : vector<24x144xf32>
    %c0_328 = arith.constant 0 : index
    %c0_329 = arith.constant 0 : index
    %302 = vector.load %arg3[%c0_328, %c0_329] : memref<1x144xf32, #tpu.memory_space<vmem>>, vector<1x144xf32>
    %303 = vector.broadcast %302 : vector<1x144xf32> to vector<24x144xf32>
    %304 = arith.addf %301, %303 : vector<24x144xf32>
    %cst_330 = arith.constant 0.000000e+00 : f32
    %305 = vector.broadcast %cst_330 : f32 to vector<24x144xf32>
    %306 = arith.maximumf %304, %305 : vector<24x144xf32>
    %c0_331 = arith.constant 0 : index
    %c0_332 = arith.constant 0 : index
    %c0_333 = arith.constant 0 : index
    %307 = vector.load %arg6[%c0_331, %c0_332, %c0_333] : memref<2x144x72xf32, #tpu.memory_space<vmem>>, vector<1x144x72xf32>
    %308 = vector.shape_cast %307 : vector<1x144x72xf32> to vector<144x72xf32>
    %cst_334 = arith.constant dense<0.000000e+00> : vector<24x72xf32>
    %309 = tpu.matmul %306, %308, %cst_334 {dimension_numbers = #tpu.dot_dimension_numbers<[1], [0], [0], [1], [0, 0, 1, 1], [], []>} : vector<24x144xf32>, vector<144x72xf32>, vector<24x72xf32> -> vector<24x72xf32>
    %c1_335 = arith.constant 1 : index
    %c0_336 = arith.constant 0 : index
    %c0_337 = arith.constant 0 : index
    %310 = vector.load %arg6[%c1_335, %c0_336, %c0_337] : memref<2x144x72xf32, #tpu.memory_space<vmem>>, vector<1x144x72xf32>
    %311 = vector.shape_cast %310 : vector<1x144x72xf32> to vector<144x72xf32>
    %cst_338 = arith.constant dense<0.000000e+00> : vector<24x72xf32>
    %312 = tpu.matmul %306, %311, %cst_338 {dimension_numbers = #tpu.dot_dimension_numbers<[1], [0], [0], [1], [0, 0, 1, 1], [], []>} : vector<24x144xf32>, vector<144x72xf32>, vector<24x72xf32> -> vector<24x72xf32>
    %313 = arith.maximumf %309, %312 : vector<24x72xf32>
    %c0_339 = arith.constant 0 : index
    %c0_340 = arith.constant 0 : index
    %c0_341 = arith.constant 0 : index
    %314 = vector.load %arg7[%c0_339, %c0_340, %c0_341] : memref<2x12x24xf32, #tpu.memory_space<vmem>>, vector<1x12x24xf32>
    %315 = vector.shape_cast %314 : vector<1x12x24xf32> to vector<12x24xf32>
    %cst_342 = arith.constant dense<0.000000e+00> : vector<12x72xf32>
    %316 = tpu.matmul %315, %313, %cst_342 {dimension_numbers = #tpu.dot_dimension_numbers<[1], [0], [0], [1], [0, 0, 1, 1], [], []>} : vector<12x24xf32>, vector<24x72xf32>, vector<12x72xf32> -> vector<12x72xf32>
    %c1_343 = arith.constant 1 : index
    %c0_344 = arith.constant 0 : index
    %c0_345 = arith.constant 0 : index
    %317 = vector.load %arg7[%c1_343, %c0_344, %c0_345] : memref<2x12x24xf32, #tpu.memory_space<vmem>>, vector<1x12x24xf32>
    %318 = vector.shape_cast %317 : vector<1x12x24xf32> to vector<12x24xf32>
    %cst_346 = arith.constant dense<0.000000e+00> : vector<12x72xf32>
    %319 = tpu.matmul %318, %313, %cst_346 {dimension_numbers = #tpu.dot_dimension_numbers<[1], [0], [0], [1], [0, 0, 1, 1], [], []>} : vector<12x24xf32>, vector<24x72xf32>, vector<12x72xf32> -> vector<12x72xf32>
    %320 = arith.maximumf %316, %319 : vector<12x72xf32>
    %321 = vector.extract_strided_slice %320 {offsets = [0, 0], sizes = [8, 72], strides = [1, 1]} : vector<12x72xf32> to vector<8x72xf32>
    %c0_347 = arith.constant 0 : index
    %c0_348 = arith.constant 0 : index
    %c0_349 = arith.constant 0 : index
    %322 = vector.load %arg4[%c0_347, %c0_348, %c0_349] : memref<5x72x96xf32, #tpu.memory_space<vmem>>, vector<1x72x96xf32>
    %323 = vector.shape_cast %322 : vector<1x72x96xf32> to vector<72x96xf32>
    %cst_350 = arith.constant dense<0.000000e+00> : vector<8x96xf32>
    %324 = tpu.matmul %321, %323, %cst_350 {dimension_numbers = #tpu.dot_dimension_numbers<[1], [0], [0], [1], [0, 0, 1, 1], [], []>} : vector<8x72xf32>, vector<72x96xf32>, vector<8x96xf32> -> vector<8x96xf32>
    %325 = vector.extract_strided_slice %320 {offsets = [2, 0], sizes = [8, 72], strides = [1, 1]} : vector<12x72xf32> to vector<8x72xf32>
    %c2_351 = arith.constant 2 : index
    %c0_352 = arith.constant 0 : index
    %c0_353 = arith.constant 0 : index
    %326 = vector.load %arg4[%c2_351, %c0_352, %c0_353] : memref<5x72x96xf32, #tpu.memory_space<vmem>>, vector<1x72x96xf32>
    %327 = vector.shape_cast %326 : vector<1x72x96xf32> to vector<72x96xf32>
    %cst_354 = arith.constant dense<0.000000e+00> : vector<8x96xf32>
    %328 = tpu.matmul %325, %327, %cst_354 {dimension_numbers = #tpu.dot_dimension_numbers<[1], [0], [0], [1], [0, 0, 1, 1], [], []>} : vector<8x72xf32>, vector<72x96xf32>, vector<8x96xf32> -> vector<8x96xf32>
    %329 = arith.addf %324, %328 : vector<8x96xf32>
    %330 = vector.extract_strided_slice %320 {offsets = [4, 0], sizes = [8, 72], strides = [1, 1]} : vector<12x72xf32> to vector<8x72xf32>
    %c4_355 = arith.constant 4 : index
    %c0_356 = arith.constant 0 : index
    %c0_357 = arith.constant 0 : index
    %331 = vector.load %arg4[%c4_355, %c0_356, %c0_357] : memref<5x72x96xf32, #tpu.memory_space<vmem>>, vector<1x72x96xf32>
    %332 = vector.shape_cast %331 : vector<1x72x96xf32> to vector<72x96xf32>
    %cst_358 = arith.constant dense<0.000000e+00> : vector<8x96xf32>
    %333 = tpu.matmul %330, %332, %cst_358 {dimension_numbers = #tpu.dot_dimension_numbers<[1], [0], [0], [1], [0, 0, 1, 1], [], []>} : vector<8x72xf32>, vector<72x96xf32>, vector<8x96xf32> -> vector<8x96xf32>
    %334 = arith.addf %329, %333 : vector<8x96xf32>
    %335 = vector.extract_strided_slice %320 {offsets = [1, 0], sizes = [8, 72], strides = [1, 1]} : vector<12x72xf32> to vector<8x72xf32>
    %c1_359 = arith.constant 1 : index
    %c0_360 = arith.constant 0 : index
    %c0_361 = arith.constant 0 : index
    %336 = vector.load %arg4[%c1_359, %c0_360, %c0_361] : memref<5x72x96xf32, #tpu.memory_space<vmem>>, vector<1x72x96xf32>
    %337 = vector.shape_cast %336 : vector<1x72x96xf32> to vector<72x96xf32>
    %cst_362 = arith.constant dense<0.000000e+00> : vector<8x96xf32>
    %338 = tpu.matmul %335, %337, %cst_362 {dimension_numbers = #tpu.dot_dimension_numbers<[1], [0], [0], [1], [0, 0, 1, 1], [], []>} : vector<8x72xf32>, vector<72x96xf32>, vector<8x96xf32> -> vector<8x96xf32>
    %339 = vector.extract_strided_slice %320 {offsets = [3, 0], sizes = [8, 72], strides = [1, 1]} : vector<12x72xf32> to vector<8x72xf32>
    %c3_363 = arith.constant 3 : index
    %c0_364 = arith.constant 0 : index
    %c0_365 = arith.constant 0 : index
    %340 = vector.load %arg4[%c3_363, %c0_364, %c0_365] : memref<5x72x96xf32, #tpu.memory_space<vmem>>, vector<1x72x96xf32>
    %341 = vector.shape_cast %340 : vector<1x72x96xf32> to vector<72x96xf32>
    %cst_366 = arith.constant dense<0.000000e+00> : vector<8x96xf32>
    %342 = tpu.matmul %339, %341, %cst_366 {dimension_numbers = #tpu.dot_dimension_numbers<[1], [0], [0], [1], [0, 0, 1, 1], [], []>} : vector<8x72xf32>, vector<72x96xf32>, vector<8x96xf32> -> vector<8x96xf32>
    %343 = arith.addf %338, %342 : vector<8x96xf32>
    %344 = arith.addf %334, %343 : vector<8x96xf32>
    %c0_367 = arith.constant 0 : index
    %c0_368 = arith.constant 0 : index
    %345 = vector.load %arg5[%c0_367, %c0_368] : memref<1x96xf32, #tpu.memory_space<vmem>>, vector<1x96xf32>
    %346 = vector.broadcast %345 : vector<1x96xf32> to vector<8x96xf32>
    %347 = arith.addf %344, %346 : vector<8x96xf32>
    %cst_369 = arith.constant 0.000000e+00 : f32
    %348 = vector.broadcast %cst_369 : f32 to vector<8x96xf32>
    %349 = arith.maximumf %347, %348 : vector<8x96xf32>
    %c0_370 = arith.constant 0 : index
    %c0_371 = arith.constant 0 : index
    %c0_372 = arith.constant 0 : index
    %350 = vector.load %arg8[%c0_370, %c0_371, %c0_372] : memref<2x96x48xf32, #tpu.memory_space<vmem>>, vector<1x96x48xf32>
    %351 = vector.shape_cast %350 : vector<1x96x48xf32> to vector<96x48xf32>
    %cst_373 = arith.constant dense<0.000000e+00> : vector<8x48xf32>
    %352 = tpu.matmul %349, %351, %cst_373 {dimension_numbers = #tpu.dot_dimension_numbers<[1], [0], [0], [1], [0, 0, 1, 1], [], []>} : vector<8x96xf32>, vector<96x48xf32>, vector<8x48xf32> -> vector<8x48xf32>
    %c1_374 = arith.constant 1 : index
    %c0_375 = arith.constant 0 : index
    %c0_376 = arith.constant 0 : index
    %353 = vector.load %arg8[%c1_374, %c0_375, %c0_376] : memref<2x96x48xf32, #tpu.memory_space<vmem>>, vector<1x96x48xf32>
    %354 = vector.shape_cast %353 : vector<1x96x48xf32> to vector<96x48xf32>
    %cst_377 = arith.constant dense<0.000000e+00> : vector<8x48xf32>
    %355 = tpu.matmul %349, %354, %cst_377 {dimension_numbers = #tpu.dot_dimension_numbers<[1], [0], [0], [1], [0, 0, 1, 1], [], []>} : vector<8x96xf32>, vector<96x48xf32>, vector<8x48xf32> -> vector<8x48xf32>
    %356 = arith.maximumf %352, %355 : vector<8x48xf32>
    %c0_378 = arith.constant 0 : index
    %c0_379 = arith.constant 0 : index
    %c0_380 = arith.constant 0 : index
    %357 = vector.load %arg9[%c0_378, %c0_379, %c0_380] : memref<2x4x8xf32, #tpu.memory_space<vmem>>, vector<1x4x8xf32>
    %358 = vector.shape_cast %357 : vector<1x4x8xf32> to vector<4x8xf32>
    %cst_381 = arith.constant dense<0.000000e+00> : vector<4x48xf32>
    %359 = tpu.matmul %358, %356, %cst_381 {dimension_numbers = #tpu.dot_dimension_numbers<[1], [0], [0], [1], [0, 0, 1, 1], [], []>} : vector<4x8xf32>, vector<8x48xf32>, vector<4x48xf32> -> vector<4x48xf32>
    %c1_382 = arith.constant 1 : index
    %c0_383 = arith.constant 0 : index
    %c0_384 = arith.constant 0 : index
    %360 = vector.load %arg9[%c1_382, %c0_383, %c0_384] : memref<2x4x8xf32, #tpu.memory_space<vmem>>, vector<1x4x8xf32>
    %361 = vector.shape_cast %360 : vector<1x4x8xf32> to vector<4x8xf32>
    %cst_385 = arith.constant dense<0.000000e+00> : vector<4x48xf32>
    %362 = tpu.matmul %361, %356, %cst_385 {dimension_numbers = #tpu.dot_dimension_numbers<[1], [0], [0], [1], [0, 0, 1, 1], [], []>} : vector<4x8xf32>, vector<8x48xf32>, vector<4x48xf32> -> vector<4x48xf32>
    %363 = arith.maximumf %359, %362 : vector<4x48xf32>
    %c0_386 = arith.constant 0 : index
    %c4_387 = arith.constant 4 : index
    %c0_388 = arith.constant 0 : index
    %c0_389 = arith.constant 0 : index
    %364 = vector.load %arg1[%c0_386, %c4_387, %c0_388, %c0_389] : memref<1x8x28x28xf32, #tpu.memory_space<vmem>>, vector<1x1x24x28xf32>
    %365 = vector.shape_cast %364 : vector<1x1x24x28xf32> to vector<24x28xf32>
    %c0_390 = arith.constant 0 : index
    %c0_391 = arith.constant 0 : index
    %c0_392 = arith.constant 0 : index
    %366 = vector.load %arg2[%c0_390, %c0_391, %c0_392] : memref<5x28x144xf32, #tpu.memory_space<vmem>>, vector<1x28x144xf32>
    %367 = vector.shape_cast %366 : vector<1x28x144xf32> to vector<28x144xf32>
    %cst_393 = arith.constant dense<0.000000e+00> : vector<24x144xf32>
    %368 = tpu.matmul %365, %367, %cst_393 {dimension_numbers = #tpu.dot_dimension_numbers<[1], [0], [0], [1], [0, 0, 1, 1], [], []>} : vector<24x28xf32>, vector<28x144xf32>, vector<24x144xf32> -> vector<24x144xf32>
    %c0_394 = arith.constant 0 : index
    %c4_395 = arith.constant 4 : index
    %c2_396 = arith.constant 2 : index
    %c0_397 = arith.constant 0 : index
    %369 = vector.load %arg1[%c0_394, %c4_395, %c2_396, %c0_397] : memref<1x8x28x28xf32, #tpu.memory_space<vmem>>, vector<1x1x24x28xf32>
    %370 = vector.shape_cast %369 : vector<1x1x24x28xf32> to vector<24x28xf32>
    %c2_398 = arith.constant 2 : index
    %c0_399 = arith.constant 0 : index
    %c0_400 = arith.constant 0 : index
    %371 = vector.load %arg2[%c2_398, %c0_399, %c0_400] : memref<5x28x144xf32, #tpu.memory_space<vmem>>, vector<1x28x144xf32>
    %372 = vector.shape_cast %371 : vector<1x28x144xf32> to vector<28x144xf32>
    %cst_401 = arith.constant dense<0.000000e+00> : vector<24x144xf32>
    %373 = tpu.matmul %370, %372, %cst_401 {dimension_numbers = #tpu.dot_dimension_numbers<[1], [0], [0], [1], [0, 0, 1, 1], [], []>} : vector<24x28xf32>, vector<28x144xf32>, vector<24x144xf32> -> vector<24x144xf32>
    %374 = arith.addf %368, %373 : vector<24x144xf32>
    %c0_402 = arith.constant 0 : index
    %c4_403 = arith.constant 4 : index
    %c4_404 = arith.constant 4 : index
    %c0_405 = arith.constant 0 : index
    %375 = vector.load %arg1[%c0_402, %c4_403, %c4_404, %c0_405] : memref<1x8x28x28xf32, #tpu.memory_space<vmem>>, vector<1x1x24x28xf32>
    %376 = vector.shape_cast %375 : vector<1x1x24x28xf32> to vector<24x28xf32>
    %c4_406 = arith.constant 4 : index
    %c0_407 = arith.constant 0 : index
    %c0_408 = arith.constant 0 : index
    %377 = vector.load %arg2[%c4_406, %c0_407, %c0_408] : memref<5x28x144xf32, #tpu.memory_space<vmem>>, vector<1x28x144xf32>
    %378 = vector.shape_cast %377 : vector<1x28x144xf32> to vector<28x144xf32>
    %cst_409 = arith.constant dense<0.000000e+00> : vector<24x144xf32>
    %379 = tpu.matmul %376, %378, %cst_409 {dimension_numbers = #tpu.dot_dimension_numbers<[1], [0], [0], [1], [0, 0, 1, 1], [], []>} : vector<24x28xf32>, vector<28x144xf32>, vector<24x144xf32> -> vector<24x144xf32>
    %380 = arith.addf %374, %379 : vector<24x144xf32>
    %c0_410 = arith.constant 0 : index
    %c4_411 = arith.constant 4 : index
    %c1_412 = arith.constant 1 : index
    %c0_413 = arith.constant 0 : index
    %381 = vector.load %arg1[%c0_410, %c4_411, %c1_412, %c0_413] : memref<1x8x28x28xf32, #tpu.memory_space<vmem>>, vector<1x1x24x28xf32>
    %382 = vector.shape_cast %381 : vector<1x1x24x28xf32> to vector<24x28xf32>
    %c1_414 = arith.constant 1 : index
    %c0_415 = arith.constant 0 : index
    %c0_416 = arith.constant 0 : index
    %383 = vector.load %arg2[%c1_414, %c0_415, %c0_416] : memref<5x28x144xf32, #tpu.memory_space<vmem>>, vector<1x28x144xf32>
    %384 = vector.shape_cast %383 : vector<1x28x144xf32> to vector<28x144xf32>
    %cst_417 = arith.constant dense<0.000000e+00> : vector<24x144xf32>
    %385 = tpu.matmul %382, %384, %cst_417 {dimension_numbers = #tpu.dot_dimension_numbers<[1], [0], [0], [1], [0, 0, 1, 1], [], []>} : vector<24x28xf32>, vector<28x144xf32>, vector<24x144xf32> -> vector<24x144xf32>
    %c0_418 = arith.constant 0 : index
    %c4_419 = arith.constant 4 : index
    %c3_420 = arith.constant 3 : index
    %c0_421 = arith.constant 0 : index
    %386 = vector.load %arg1[%c0_418, %c4_419, %c3_420, %c0_421] : memref<1x8x28x28xf32, #tpu.memory_space<vmem>>, vector<1x1x24x28xf32>
    %387 = vector.shape_cast %386 : vector<1x1x24x28xf32> to vector<24x28xf32>
    %c3_422 = arith.constant 3 : index
    %c0_423 = arith.constant 0 : index
    %c0_424 = arith.constant 0 : index
    %388 = vector.load %arg2[%c3_422, %c0_423, %c0_424] : memref<5x28x144xf32, #tpu.memory_space<vmem>>, vector<1x28x144xf32>
    %389 = vector.shape_cast %388 : vector<1x28x144xf32> to vector<28x144xf32>
    %cst_425 = arith.constant dense<0.000000e+00> : vector<24x144xf32>
    %390 = tpu.matmul %387, %389, %cst_425 {dimension_numbers = #tpu.dot_dimension_numbers<[1], [0], [0], [1], [0, 0, 1, 1], [], []>} : vector<24x28xf32>, vector<28x144xf32>, vector<24x144xf32> -> vector<24x144xf32>
    %391 = arith.addf %385, %390 : vector<24x144xf32>
    %392 = arith.addf %380, %391 : vector<24x144xf32>
    %c0_426 = arith.constant 0 : index
    %c0_427 = arith.constant 0 : index
    %393 = vector.load %arg3[%c0_426, %c0_427] : memref<1x144xf32, #tpu.memory_space<vmem>>, vector<1x144xf32>
    %394 = vector.broadcast %393 : vector<1x144xf32> to vector<24x144xf32>
    %395 = arith.addf %392, %394 : vector<24x144xf32>
    %cst_428 = arith.constant 0.000000e+00 : f32
    %396 = vector.broadcast %cst_428 : f32 to vector<24x144xf32>
    %397 = arith.maximumf %395, %396 : vector<24x144xf32>
    %c0_429 = arith.constant 0 : index
    %c0_430 = arith.constant 0 : index
    %c0_431 = arith.constant 0 : index
    %398 = vector.load %arg6[%c0_429, %c0_430, %c0_431] : memref<2x144x72xf32, #tpu.memory_space<vmem>>, vector<1x144x72xf32>
    %399 = vector.shape_cast %398 : vector<1x144x72xf32> to vector<144x72xf32>
    %cst_432 = arith.constant dense<0.000000e+00> : vector<24x72xf32>
    %400 = tpu.matmul %397, %399, %cst_432 {dimension_numbers = #tpu.dot_dimension_numbers<[1], [0], [0], [1], [0, 0, 1, 1], [], []>} : vector<24x144xf32>, vector<144x72xf32>, vector<24x72xf32> -> vector<24x72xf32>
    %c1_433 = arith.constant 1 : index
    %c0_434 = arith.constant 0 : index
    %c0_435 = arith.constant 0 : index
    %401 = vector.load %arg6[%c1_433, %c0_434, %c0_435] : memref<2x144x72xf32, #tpu.memory_space<vmem>>, vector<1x144x72xf32>
    %402 = vector.shape_cast %401 : vector<1x144x72xf32> to vector<144x72xf32>
    %cst_436 = arith.constant dense<0.000000e+00> : vector<24x72xf32>
    %403 = tpu.matmul %397, %402, %cst_436 {dimension_numbers = #tpu.dot_dimension_numbers<[1], [0], [0], [1], [0, 0, 1, 1], [], []>} : vector<24x144xf32>, vector<144x72xf32>, vector<24x72xf32> -> vector<24x72xf32>
    %404 = arith.maximumf %400, %403 : vector<24x72xf32>
    %c0_437 = arith.constant 0 : index
    %c0_438 = arith.constant 0 : index
    %c0_439 = arith.constant 0 : index
    %405 = vector.load %arg7[%c0_437, %c0_438, %c0_439] : memref<2x12x24xf32, #tpu.memory_space<vmem>>, vector<1x12x24xf32>
    %406 = vector.shape_cast %405 : vector<1x12x24xf32> to vector<12x24xf32>
    %cst_440 = arith.constant dense<0.000000e+00> : vector<12x72xf32>
    %407 = tpu.matmul %406, %404, %cst_440 {dimension_numbers = #tpu.dot_dimension_numbers<[1], [0], [0], [1], [0, 0, 1, 1], [], []>} : vector<12x24xf32>, vector<24x72xf32>, vector<12x72xf32> -> vector<12x72xf32>
    %c1_441 = arith.constant 1 : index
    %c0_442 = arith.constant 0 : index
    %c0_443 = arith.constant 0 : index
    %408 = vector.load %arg7[%c1_441, %c0_442, %c0_443] : memref<2x12x24xf32, #tpu.memory_space<vmem>>, vector<1x12x24xf32>
    %409 = vector.shape_cast %408 : vector<1x12x24xf32> to vector<12x24xf32>
    %cst_444 = arith.constant dense<0.000000e+00> : vector<12x72xf32>
    %410 = tpu.matmul %409, %404, %cst_444 {dimension_numbers = #tpu.dot_dimension_numbers<[1], [0], [0], [1], [0, 0, 1, 1], [], []>} : vector<12x24xf32>, vector<24x72xf32>, vector<12x72xf32> -> vector<12x72xf32>
    %411 = arith.maximumf %407, %410 : vector<12x72xf32>
    %412 = vector.extract_strided_slice %411 {offsets = [0, 0], sizes = [8, 72], strides = [1, 1]} : vector<12x72xf32> to vector<8x72xf32>
    %c0_445 = arith.constant 0 : index
    %c0_446 = arith.constant 0 : index
    %c0_447 = arith.constant 0 : index
    %413 = vector.load %arg4[%c0_445, %c0_446, %c0_447] : memref<5x72x96xf32, #tpu.memory_space<vmem>>, vector<1x72x96xf32>
    %414 = vector.shape_cast %413 : vector<1x72x96xf32> to vector<72x96xf32>
    %cst_448 = arith.constant dense<0.000000e+00> : vector<8x96xf32>
    %415 = tpu.matmul %412, %414, %cst_448 {dimension_numbers = #tpu.dot_dimension_numbers<[1], [0], [0], [1], [0, 0, 1, 1], [], []>} : vector<8x72xf32>, vector<72x96xf32>, vector<8x96xf32> -> vector<8x96xf32>
    %416 = vector.extract_strided_slice %411 {offsets = [2, 0], sizes = [8, 72], strides = [1, 1]} : vector<12x72xf32> to vector<8x72xf32>
    %c2_449 = arith.constant 2 : index
    %c0_450 = arith.constant 0 : index
    %c0_451 = arith.constant 0 : index
    %417 = vector.load %arg4[%c2_449, %c0_450, %c0_451] : memref<5x72x96xf32, #tpu.memory_space<vmem>>, vector<1x72x96xf32>
    %418 = vector.shape_cast %417 : vector<1x72x96xf32> to vector<72x96xf32>
    %cst_452 = arith.constant dense<0.000000e+00> : vector<8x96xf32>
    %419 = tpu.matmul %416, %418, %cst_452 {dimension_numbers = #tpu.dot_dimension_numbers<[1], [0], [0], [1], [0, 0, 1, 1], [], []>} : vector<8x72xf32>, vector<72x96xf32>, vector<8x96xf32> -> vector<8x96xf32>
    %420 = arith.addf %415, %419 : vector<8x96xf32>
    %421 = vector.extract_strided_slice %411 {offsets = [4, 0], sizes = [8, 72], strides = [1, 1]} : vector<12x72xf32> to vector<8x72xf32>
    %c4_453 = arith.constant 4 : index
    %c0_454 = arith.constant 0 : index
    %c0_455 = arith.constant 0 : index
    %422 = vector.load %arg4[%c4_453, %c0_454, %c0_455] : memref<5x72x96xf32, #tpu.memory_space<vmem>>, vector<1x72x96xf32>
    %423 = vector.shape_cast %422 : vector<1x72x96xf32> to vector<72x96xf32>
    %cst_456 = arith.constant dense<0.000000e+00> : vector<8x96xf32>
    %424 = tpu.matmul %421, %423, %cst_456 {dimension_numbers = #tpu.dot_dimension_numbers<[1], [0], [0], [1], [0, 0, 1, 1], [], []>} : vector<8x72xf32>, vector<72x96xf32>, vector<8x96xf32> -> vector<8x96xf32>
    %425 = arith.addf %420, %424 : vector<8x96xf32>
    %426 = vector.extract_strided_slice %411 {offsets = [1, 0], sizes = [8, 72], strides = [1, 1]} : vector<12x72xf32> to vector<8x72xf32>
    %c1_457 = arith.constant 1 : index
    %c0_458 = arith.constant 0 : index
    %c0_459 = arith.constant 0 : index
    %427 = vector.load %arg4[%c1_457, %c0_458, %c0_459] : memref<5x72x96xf32, #tpu.memory_space<vmem>>, vector<1x72x96xf32>
    %428 = vector.shape_cast %427 : vector<1x72x96xf32> to vector<72x96xf32>
    %cst_460 = arith.constant dense<0.000000e+00> : vector<8x96xf32>
    %429 = tpu.matmul %426, %428, %cst_460 {dimension_numbers = #tpu.dot_dimension_numbers<[1], [0], [0], [1], [0, 0, 1, 1], [], []>} : vector<8x72xf32>, vector<72x96xf32>, vector<8x96xf32> -> vector<8x96xf32>
    %430 = vector.extract_strided_slice %411 {offsets = [3, 0], sizes = [8, 72], strides = [1, 1]} : vector<12x72xf32> to vector<8x72xf32>
    %c3_461 = arith.constant 3 : index
    %c0_462 = arith.constant 0 : index
    %c0_463 = arith.constant 0 : index
    %431 = vector.load %arg4[%c3_461, %c0_462, %c0_463] : memref<5x72x96xf32, #tpu.memory_space<vmem>>, vector<1x72x96xf32>
    %432 = vector.shape_cast %431 : vector<1x72x96xf32> to vector<72x96xf32>
    %cst_464 = arith.constant dense<0.000000e+00> : vector<8x96xf32>
    %433 = tpu.matmul %430, %432, %cst_464 {dimension_numbers = #tpu.dot_dimension_numbers<[1], [0], [0], [1], [0, 0, 1, 1], [], []>} : vector<8x72xf32>, vector<72x96xf32>, vector<8x96xf32> -> vector<8x96xf32>
    %434 = arith.addf %429, %433 : vector<8x96xf32>
    %435 = arith.addf %425, %434 : vector<8x96xf32>
    %c0_465 = arith.constant 0 : index
    %c0_466 = arith.constant 0 : index
    %436 = vector.load %arg5[%c0_465, %c0_466] : memref<1x96xf32, #tpu.memory_space<vmem>>, vector<1x96xf32>
    %437 = vector.broadcast %436 : vector<1x96xf32> to vector<8x96xf32>
    %438 = arith.addf %435, %437 : vector<8x96xf32>
    %cst_467 = arith.constant 0.000000e+00 : f32
    %439 = vector.broadcast %cst_467 : f32 to vector<8x96xf32>
    %440 = arith.maximumf %438, %439 : vector<8x96xf32>
    %c0_468 = arith.constant 0 : index
    %c0_469 = arith.constant 0 : index
    %c0_470 = arith.constant 0 : index
    %441 = vector.load %arg8[%c0_468, %c0_469, %c0_470] : memref<2x96x48xf32, #tpu.memory_space<vmem>>, vector<1x96x48xf32>
    %442 = vector.shape_cast %441 : vector<1x96x48xf32> to vector<96x48xf32>
    %cst_471 = arith.constant dense<0.000000e+00> : vector<8x48xf32>
    %443 = tpu.matmul %440, %442, %cst_471 {dimension_numbers = #tpu.dot_dimension_numbers<[1], [0], [0], [1], [0, 0, 1, 1], [], []>} : vector<8x96xf32>, vector<96x48xf32>, vector<8x48xf32> -> vector<8x48xf32>
    %c1_472 = arith.constant 1 : index
    %c0_473 = arith.constant 0 : index
    %c0_474 = arith.constant 0 : index
    %444 = vector.load %arg8[%c1_472, %c0_473, %c0_474] : memref<2x96x48xf32, #tpu.memory_space<vmem>>, vector<1x96x48xf32>
    %445 = vector.shape_cast %444 : vector<1x96x48xf32> to vector<96x48xf32>
    %cst_475 = arith.constant dense<0.000000e+00> : vector<8x48xf32>
    %446 = tpu.matmul %440, %445, %cst_475 {dimension_numbers = #tpu.dot_dimension_numbers<[1], [0], [0], [1], [0, 0, 1, 1], [], []>} : vector<8x96xf32>, vector<96x48xf32>, vector<8x48xf32> -> vector<8x48xf32>
    %447 = arith.maximumf %443, %446 : vector<8x48xf32>
    %c0_476 = arith.constant 0 : index
    %c0_477 = arith.constant 0 : index
    %c0_478 = arith.constant 0 : index
    %448 = vector.load %arg9[%c0_476, %c0_477, %c0_478] : memref<2x4x8xf32, #tpu.memory_space<vmem>>, vector<1x4x8xf32>
    %449 = vector.shape_cast %448 : vector<1x4x8xf32> to vector<4x8xf32>
    %cst_479 = arith.constant dense<0.000000e+00> : vector<4x48xf32>
    %450 = tpu.matmul %449, %447, %cst_479 {dimension_numbers = #tpu.dot_dimension_numbers<[1], [0], [0], [1], [0, 0, 1, 1], [], []>} : vector<4x8xf32>, vector<8x48xf32>, vector<4x48xf32> -> vector<4x48xf32>
    %c1_480 = arith.constant 1 : index
    %c0_481 = arith.constant 0 : index
    %c0_482 = arith.constant 0 : index
    %451 = vector.load %arg9[%c1_480, %c0_481, %c0_482] : memref<2x4x8xf32, #tpu.memory_space<vmem>>, vector<1x4x8xf32>
    %452 = vector.shape_cast %451 : vector<1x4x8xf32> to vector<4x8xf32>
    %cst_483 = arith.constant dense<0.000000e+00> : vector<4x48xf32>
    %453 = tpu.matmul %452, %447, %cst_483 {dimension_numbers = #tpu.dot_dimension_numbers<[1], [0], [0], [1], [0, 0, 1, 1], [], []>} : vector<4x8xf32>, vector<8x48xf32>, vector<4x48xf32> -> vector<4x48xf32>
    %454 = arith.maximumf %450, %453 : vector<4x48xf32>
    %c0_484 = arith.constant 0 : index
    %c5 = arith.constant 5 : index
    %c0_485 = arith.constant 0 : index
    %c0_486 = arith.constant 0 : index
    %455 = vector.load %arg1[%c0_484, %c5, %c0_485, %c0_486] : memref<1x8x28x28xf32, #tpu.memory_space<vmem>>, vector<1x1x24x28xf32>
    %456 = vector.shape_cast %455 : vector<1x1x24x28xf32> to vector<24x28xf32>
    %c0_487 = arith.constant 0 : index
    %c0_488 = arith.constant 0 : index
    %c0_489 = arith.constant 0 : index
    %457 = vector.load %arg2[%c0_487, %c0_488, %c0_489] : memref<5x28x144xf32, #tpu.memory_space<vmem>>, vector<1x28x144xf32>
    %458 = vector.shape_cast %457 : vector<1x28x144xf32> to vector<28x144xf32>
    %cst_490 = arith.constant dense<0.000000e+00> : vector<24x144xf32>
    %459 = tpu.matmul %456, %458, %cst_490 {dimension_numbers = #tpu.dot_dimension_numbers<[1], [0], [0], [1], [0, 0, 1, 1], [], []>} : vector<24x28xf32>, vector<28x144xf32>, vector<24x144xf32> -> vector<24x144xf32>
    %c0_491 = arith.constant 0 : index
    %c5_492 = arith.constant 5 : index
    %c2_493 = arith.constant 2 : index
    %c0_494 = arith.constant 0 : index
    %460 = vector.load %arg1[%c0_491, %c5_492, %c2_493, %c0_494] : memref<1x8x28x28xf32, #tpu.memory_space<vmem>>, vector<1x1x24x28xf32>
    %461 = vector.shape_cast %460 : vector<1x1x24x28xf32> to vector<24x28xf32>
    %c2_495 = arith.constant 2 : index
    %c0_496 = arith.constant 0 : index
    %c0_497 = arith.constant 0 : index
    %462 = vector.load %arg2[%c2_495, %c0_496, %c0_497] : memref<5x28x144xf32, #tpu.memory_space<vmem>>, vector<1x28x144xf32>
    %463 = vector.shape_cast %462 : vector<1x28x144xf32> to vector<28x144xf32>
    %cst_498 = arith.constant dense<0.000000e+00> : vector<24x144xf32>
    %464 = tpu.matmul %461, %463, %cst_498 {dimension_numbers = #tpu.dot_dimension_numbers<[1], [0], [0], [1], [0, 0, 1, 1], [], []>} : vector<24x28xf32>, vector<28x144xf32>, vector<24x144xf32> -> vector<24x144xf32>
    %465 = arith.addf %459, %464 : vector<24x144xf32>
    %c0_499 = arith.constant 0 : index
    %c5_500 = arith.constant 5 : index
    %c4_501 = arith.constant 4 : index
    %c0_502 = arith.constant 0 : index
    %466 = vector.load %arg1[%c0_499, %c5_500, %c4_501, %c0_502] : memref<1x8x28x28xf32, #tpu.memory_space<vmem>>, vector<1x1x24x28xf32>
    %467 = vector.shape_cast %466 : vector<1x1x24x28xf32> to vector<24x28xf32>
    %c4_503 = arith.constant 4 : index
    %c0_504 = arith.constant 0 : index
    %c0_505 = arith.constant 0 : index
    %468 = vector.load %arg2[%c4_503, %c0_504, %c0_505] : memref<5x28x144xf32, #tpu.memory_space<vmem>>, vector<1x28x144xf32>
    %469 = vector.shape_cast %468 : vector<1x28x144xf32> to vector<28x144xf32>
    %cst_506 = arith.constant dense<0.000000e+00> : vector<24x144xf32>
    %470 = tpu.matmul %467, %469, %cst_506 {dimension_numbers = #tpu.dot_dimension_numbers<[1], [0], [0], [1], [0, 0, 1, 1], [], []>} : vector<24x28xf32>, vector<28x144xf32>, vector<24x144xf32> -> vector<24x144xf32>
    %471 = arith.addf %465, %470 : vector<24x144xf32>
    %c0_507 = arith.constant 0 : index
    %c5_508 = arith.constant 5 : index
    %c1_509 = arith.constant 1 : index
    %c0_510 = arith.constant 0 : index
    %472 = vector.load %arg1[%c0_507, %c5_508, %c1_509, %c0_510] : memref<1x8x28x28xf32, #tpu.memory_space<vmem>>, vector<1x1x24x28xf32>
    %473 = vector.shape_cast %472 : vector<1x1x24x28xf32> to vector<24x28xf32>
    %c1_511 = arith.constant 1 : index
    %c0_512 = arith.constant 0 : index
    %c0_513 = arith.constant 0 : index
    %474 = vector.load %arg2[%c1_511, %c0_512, %c0_513] : memref<5x28x144xf32, #tpu.memory_space<vmem>>, vector<1x28x144xf32>
    %475 = vector.shape_cast %474 : vector<1x28x144xf32> to vector<28x144xf32>
    %cst_514 = arith.constant dense<0.000000e+00> : vector<24x144xf32>
    %476 = tpu.matmul %473, %475, %cst_514 {dimension_numbers = #tpu.dot_dimension_numbers<[1], [0], [0], [1], [0, 0, 1, 1], [], []>} : vector<24x28xf32>, vector<28x144xf32>, vector<24x144xf32> -> vector<24x144xf32>
    %c0_515 = arith.constant 0 : index
    %c5_516 = arith.constant 5 : index
    %c3_517 = arith.constant 3 : index
    %c0_518 = arith.constant 0 : index
    %477 = vector.load %arg1[%c0_515, %c5_516, %c3_517, %c0_518] : memref<1x8x28x28xf32, #tpu.memory_space<vmem>>, vector<1x1x24x28xf32>
    %478 = vector.shape_cast %477 : vector<1x1x24x28xf32> to vector<24x28xf32>
    %c3_519 = arith.constant 3 : index
    %c0_520 = arith.constant 0 : index
    %c0_521 = arith.constant 0 : index
    %479 = vector.load %arg2[%c3_519, %c0_520, %c0_521] : memref<5x28x144xf32, #tpu.memory_space<vmem>>, vector<1x28x144xf32>
    %480 = vector.shape_cast %479 : vector<1x28x144xf32> to vector<28x144xf32>
    %cst_522 = arith.constant dense<0.000000e+00> : vector<24x144xf32>
    %481 = tpu.matmul %478, %480, %cst_522 {dimension_numbers = #tpu.dot_dimension_numbers<[1], [0], [0], [1], [0, 0, 1, 1], [], []>} : vector<24x28xf32>, vector<28x144xf32>, vector<24x144xf32> -> vector<24x144xf32>
    %482 = arith.addf %476, %481 : vector<24x144xf32>
    %483 = arith.addf %471, %482 : vector<24x144xf32>
    %c0_523 = arith.constant 0 : index
    %c0_524 = arith.constant 0 : index
    %484 = vector.load %arg3[%c0_523, %c0_524] : memref<1x144xf32, #tpu.memory_space<vmem>>, vector<1x144xf32>
    %485 = vector.broadcast %484 : vector<1x144xf32> to vector<24x144xf32>
    %486 = arith.addf %483, %485 : vector<24x144xf32>
    %cst_525 = arith.constant 0.000000e+00 : f32
    %487 = vector.broadcast %cst_525 : f32 to vector<24x144xf32>
    %488 = arith.maximumf %486, %487 : vector<24x144xf32>
    %c0_526 = arith.constant 0 : index
    %c0_527 = arith.constant 0 : index
    %c0_528 = arith.constant 0 : index
    %489 = vector.load %arg6[%c0_526, %c0_527, %c0_528] : memref<2x144x72xf32, #tpu.memory_space<vmem>>, vector<1x144x72xf32>
    %490 = vector.shape_cast %489 : vector<1x144x72xf32> to vector<144x72xf32>
    %cst_529 = arith.constant dense<0.000000e+00> : vector<24x72xf32>
    %491 = tpu.matmul %488, %490, %cst_529 {dimension_numbers = #tpu.dot_dimension_numbers<[1], [0], [0], [1], [0, 0, 1, 1], [], []>} : vector<24x144xf32>, vector<144x72xf32>, vector<24x72xf32> -> vector<24x72xf32>
    %c1_530 = arith.constant 1 : index
    %c0_531 = arith.constant 0 : index
    %c0_532 = arith.constant 0 : index
    %492 = vector.load %arg6[%c1_530, %c0_531, %c0_532] : memref<2x144x72xf32, #tpu.memory_space<vmem>>, vector<1x144x72xf32>
    %493 = vector.shape_cast %492 : vector<1x144x72xf32> to vector<144x72xf32>
    %cst_533 = arith.constant dense<0.000000e+00> : vector<24x72xf32>
    %494 = tpu.matmul %488, %493, %cst_533 {dimension_numbers = #tpu.dot_dimension_numbers<[1], [0], [0], [1], [0, 0, 1, 1], [], []>} : vector<24x144xf32>, vector<144x72xf32>, vector<24x72xf32> -> vector<24x72xf32>
    %495 = arith.maximumf %491, %494 : vector<24x72xf32>
    %c0_534 = arith.constant 0 : index
    %c0_535 = arith.constant 0 : index
    %c0_536 = arith.constant 0 : index
    %496 = vector.load %arg7[%c0_534, %c0_535, %c0_536] : memref<2x12x24xf32, #tpu.memory_space<vmem>>, vector<1x12x24xf32>
    %497 = vector.shape_cast %496 : vector<1x12x24xf32> to vector<12x24xf32>
    %cst_537 = arith.constant dense<0.000000e+00> : vector<12x72xf32>
    %498 = tpu.matmul %497, %495, %cst_537 {dimension_numbers = #tpu.dot_dimension_numbers<[1], [0], [0], [1], [0, 0, 1, 1], [], []>} : vector<12x24xf32>, vector<24x72xf32>, vector<12x72xf32> -> vector<12x72xf32>
    %c1_538 = arith.constant 1 : index
    %c0_539 = arith.constant 0 : index
    %c0_540 = arith.constant 0 : index
    %499 = vector.load %arg7[%c1_538, %c0_539, %c0_540] : memref<2x12x24xf32, #tpu.memory_space<vmem>>, vector<1x12x24xf32>
    %500 = vector.shape_cast %499 : vector<1x12x24xf32> to vector<12x24xf32>
    %cst_541 = arith.constant dense<0.000000e+00> : vector<12x72xf32>
    %501 = tpu.matmul %500, %495, %cst_541 {dimension_numbers = #tpu.dot_dimension_numbers<[1], [0], [0], [1], [0, 0, 1, 1], [], []>} : vector<12x24xf32>, vector<24x72xf32>, vector<12x72xf32> -> vector<12x72xf32>
    %502 = arith.maximumf %498, %501 : vector<12x72xf32>
    %503 = vector.extract_strided_slice %502 {offsets = [0, 0], sizes = [8, 72], strides = [1, 1]} : vector<12x72xf32> to vector<8x72xf32>
    %c0_542 = arith.constant 0 : index
    %c0_543 = arith.constant 0 : index
    %c0_544 = arith.constant 0 : index
    %504 = vector.load %arg4[%c0_542, %c0_543, %c0_544] : memref<5x72x96xf32, #tpu.memory_space<vmem>>, vector<1x72x96xf32>
    %505 = vector.shape_cast %504 : vector<1x72x96xf32> to vector<72x96xf32>
    %cst_545 = arith.constant dense<0.000000e+00> : vector<8x96xf32>
    %506 = tpu.matmul %503, %505, %cst_545 {dimension_numbers = #tpu.dot_dimension_numbers<[1], [0], [0], [1], [0, 0, 1, 1], [], []>} : vector<8x72xf32>, vector<72x96xf32>, vector<8x96xf32> -> vector<8x96xf32>
    %507 = vector.extract_strided_slice %502 {offsets = [2, 0], sizes = [8, 72], strides = [1, 1]} : vector<12x72xf32> to vector<8x72xf32>
    %c2_546 = arith.constant 2 : index
    %c0_547 = arith.constant 0 : index
    %c0_548 = arith.constant 0 : index
    %508 = vector.load %arg4[%c2_546, %c0_547, %c0_548] : memref<5x72x96xf32, #tpu.memory_space<vmem>>, vector<1x72x96xf32>
    %509 = vector.shape_cast %508 : vector<1x72x96xf32> to vector<72x96xf32>
    %cst_549 = arith.constant dense<0.000000e+00> : vector<8x96xf32>
    %510 = tpu.matmul %507, %509, %cst_549 {dimension_numbers = #tpu.dot_dimension_numbers<[1], [0], [0], [1], [0, 0, 1, 1], [], []>} : vector<8x72xf32>, vector<72x96xf32>, vector<8x96xf32> -> vector<8x96xf32>
    %511 = arith.addf %506, %510 : vector<8x96xf32>
    %512 = vector.extract_strided_slice %502 {offsets = [4, 0], sizes = [8, 72], strides = [1, 1]} : vector<12x72xf32> to vector<8x72xf32>
    %c4_550 = arith.constant 4 : index
    %c0_551 = arith.constant 0 : index
    %c0_552 = arith.constant 0 : index
    %513 = vector.load %arg4[%c4_550, %c0_551, %c0_552] : memref<5x72x96xf32, #tpu.memory_space<vmem>>, vector<1x72x96xf32>
    %514 = vector.shape_cast %513 : vector<1x72x96xf32> to vector<72x96xf32>
    %cst_553 = arith.constant dense<0.000000e+00> : vector<8x96xf32>
    %515 = tpu.matmul %512, %514, %cst_553 {dimension_numbers = #tpu.dot_dimension_numbers<[1], [0], [0], [1], [0, 0, 1, 1], [], []>} : vector<8x72xf32>, vector<72x96xf32>, vector<8x96xf32> -> vector<8x96xf32>
    %516 = arith.addf %511, %515 : vector<8x96xf32>
    %517 = vector.extract_strided_slice %502 {offsets = [1, 0], sizes = [8, 72], strides = [1, 1]} : vector<12x72xf32> to vector<8x72xf32>
    %c1_554 = arith.constant 1 : index
    %c0_555 = arith.constant 0 : index
    %c0_556 = arith.constant 0 : index
    %518 = vector.load %arg4[%c1_554, %c0_555, %c0_556] : memref<5x72x96xf32, #tpu.memory_space<vmem>>, vector<1x72x96xf32>
    %519 = vector.shape_cast %518 : vector<1x72x96xf32> to vector<72x96xf32>
    %cst_557 = arith.constant dense<0.000000e+00> : vector<8x96xf32>
    %520 = tpu.matmul %517, %519, %cst_557 {dimension_numbers = #tpu.dot_dimension_numbers<[1], [0], [0], [1], [0, 0, 1, 1], [], []>} : vector<8x72xf32>, vector<72x96xf32>, vector<8x96xf32> -> vector<8x96xf32>
    %521 = vector.extract_strided_slice %502 {offsets = [3, 0], sizes = [8, 72], strides = [1, 1]} : vector<12x72xf32> to vector<8x72xf32>
    %c3_558 = arith.constant 3 : index
    %c0_559 = arith.constant 0 : index
    %c0_560 = arith.constant 0 : index
    %522 = vector.load %arg4[%c3_558, %c0_559, %c0_560] : memref<5x72x96xf32, #tpu.memory_space<vmem>>, vector<1x72x96xf32>
    %523 = vector.shape_cast %522 : vector<1x72x96xf32> to vector<72x96xf32>
    %cst_561 = arith.constant dense<0.000000e+00> : vector<8x96xf32>
    %524 = tpu.matmul %521, %523, %cst_561 {dimension_numbers = #tpu.dot_dimension_numbers<[1], [0], [0], [1], [0, 0, 1, 1], [], []>} : vector<8x72xf32>, vector<72x96xf32>, vector<8x96xf32> -> vector<8x96xf32>
    %525 = arith.addf %520, %524 : vector<8x96xf32>
    %526 = arith.addf %516, %525 : vector<8x96xf32>
    %c0_562 = arith.constant 0 : index
    %c0_563 = arith.constant 0 : index
    %527 = vector.load %arg5[%c0_562, %c0_563] : memref<1x96xf32, #tpu.memory_space<vmem>>, vector<1x96xf32>
    %528 = vector.broadcast %527 : vector<1x96xf32> to vector<8x96xf32>
    %529 = arith.addf %526, %528 : vector<8x96xf32>
    %cst_564 = arith.constant 0.000000e+00 : f32
    %530 = vector.broadcast %cst_564 : f32 to vector<8x96xf32>
    %531 = arith.maximumf %529, %530 : vector<8x96xf32>
    %c0_565 = arith.constant 0 : index
    %c0_566 = arith.constant 0 : index
    %c0_567 = arith.constant 0 : index
    %532 = vector.load %arg8[%c0_565, %c0_566, %c0_567] : memref<2x96x48xf32, #tpu.memory_space<vmem>>, vector<1x96x48xf32>
    %533 = vector.shape_cast %532 : vector<1x96x48xf32> to vector<96x48xf32>
    %cst_568 = arith.constant dense<0.000000e+00> : vector<8x48xf32>
    %534 = tpu.matmul %531, %533, %cst_568 {dimension_numbers = #tpu.dot_dimension_numbers<[1], [0], [0], [1], [0, 0, 1, 1], [], []>} : vector<8x96xf32>, vector<96x48xf32>, vector<8x48xf32> -> vector<8x48xf32>
    %c1_569 = arith.constant 1 : index
    %c0_570 = arith.constant 0 : index
    %c0_571 = arith.constant 0 : index
    %535 = vector.load %arg8[%c1_569, %c0_570, %c0_571] : memref<2x96x48xf32, #tpu.memory_space<vmem>>, vector<1x96x48xf32>
    %536 = vector.shape_cast %535 : vector<1x96x48xf32> to vector<96x48xf32>
    %cst_572 = arith.constant dense<0.000000e+00> : vector<8x48xf32>
    %537 = tpu.matmul %531, %536, %cst_572 {dimension_numbers = #tpu.dot_dimension_numbers<[1], [0], [0], [1], [0, 0, 1, 1], [], []>} : vector<8x96xf32>, vector<96x48xf32>, vector<8x48xf32> -> vector<8x48xf32>
    %538 = arith.maximumf %534, %537 : vector<8x48xf32>
    %c0_573 = arith.constant 0 : index
    %c0_574 = arith.constant 0 : index
    %c0_575 = arith.constant 0 : index
    %539 = vector.load %arg9[%c0_573, %c0_574, %c0_575] : memref<2x4x8xf32, #tpu.memory_space<vmem>>, vector<1x4x8xf32>
    %540 = vector.shape_cast %539 : vector<1x4x8xf32> to vector<4x8xf32>
    %cst_576 = arith.constant dense<0.000000e+00> : vector<4x48xf32>
    %541 = tpu.matmul %540, %538, %cst_576 {dimension_numbers = #tpu.dot_dimension_numbers<[1], [0], [0], [1], [0, 0, 1, 1], [], []>} : vector<4x8xf32>, vector<8x48xf32>, vector<4x48xf32> -> vector<4x48xf32>
    %c1_577 = arith.constant 1 : index
    %c0_578 = arith.constant 0 : index
    %c0_579 = arith.constant 0 : index
    %542 = vector.load %arg9[%c1_577, %c0_578, %c0_579] : memref<2x4x8xf32, #tpu.memory_space<vmem>>, vector<1x4x8xf32>
    %543 = vector.shape_cast %542 : vector<1x4x8xf32> to vector<4x8xf32>
    %cst_580 = arith.constant dense<0.000000e+00> : vector<4x48xf32>
    %544 = tpu.matmul %543, %538, %cst_580 {dimension_numbers = #tpu.dot_dimension_numbers<[1], [0], [0], [1], [0, 0, 1, 1], [], []>} : vector<4x8xf32>, vector<8x48xf32>, vector<4x48xf32> -> vector<4x48xf32>
    %545 = arith.maximumf %541, %544 : vector<4x48xf32>
    %c0_581 = arith.constant 0 : index
    %c6 = arith.constant 6 : index
    %c0_582 = arith.constant 0 : index
    %c0_583 = arith.constant 0 : index
    %546 = vector.load %arg1[%c0_581, %c6, %c0_582, %c0_583] : memref<1x8x28x28xf32, #tpu.memory_space<vmem>>, vector<1x1x24x28xf32>
    %547 = vector.shape_cast %546 : vector<1x1x24x28xf32> to vector<24x28xf32>
    %c0_584 = arith.constant 0 : index
    %c0_585 = arith.constant 0 : index
    %c0_586 = arith.constant 0 : index
    %548 = vector.load %arg2[%c0_584, %c0_585, %c0_586] : memref<5x28x144xf32, #tpu.memory_space<vmem>>, vector<1x28x144xf32>
    %549 = vector.shape_cast %548 : vector<1x28x144xf32> to vector<28x144xf32>
    %cst_587 = arith.constant dense<0.000000e+00> : vector<24x144xf32>
    %550 = tpu.matmul %547, %549, %cst_587 {dimension_numbers = #tpu.dot_dimension_numbers<[1], [0], [0], [1], [0, 0, 1, 1], [], []>} : vector<24x28xf32>, vector<28x144xf32>, vector<24x144xf32> -> vector<24x144xf32>
    %c0_588 = arith.constant 0 : index
    %c6_589 = arith.constant 6 : index
    %c2_590 = arith.constant 2 : index
    %c0_591 = arith.constant 0 : index
    %551 = vector.load %arg1[%c0_588, %c6_589, %c2_590, %c0_591] : memref<1x8x28x28xf32, #tpu.memory_space<vmem>>, vector<1x1x24x28xf32>
    %552 = vector.shape_cast %551 : vector<1x1x24x28xf32> to vector<24x28xf32>
    %c2_592 = arith.constant 2 : index
    %c0_593 = arith.constant 0 : index
    %c0_594 = arith.constant 0 : index
    %553 = vector.load %arg2[%c2_592, %c0_593, %c0_594] : memref<5x28x144xf32, #tpu.memory_space<vmem>>, vector<1x28x144xf32>
    %554 = vector.shape_cast %553 : vector<1x28x144xf32> to vector<28x144xf32>
    %cst_595 = arith.constant dense<0.000000e+00> : vector<24x144xf32>
    %555 = tpu.matmul %552, %554, %cst_595 {dimension_numbers = #tpu.dot_dimension_numbers<[1], [0], [0], [1], [0, 0, 1, 1], [], []>} : vector<24x28xf32>, vector<28x144xf32>, vector<24x144xf32> -> vector<24x144xf32>
    %556 = arith.addf %550, %555 : vector<24x144xf32>
    %c0_596 = arith.constant 0 : index
    %c6_597 = arith.constant 6 : index
    %c4_598 = arith.constant 4 : index
    %c0_599 = arith.constant 0 : index
    %557 = vector.load %arg1[%c0_596, %c6_597, %c4_598, %c0_599] : memref<1x8x28x28xf32, #tpu.memory_space<vmem>>, vector<1x1x24x28xf32>
    %558 = vector.shape_cast %557 : vector<1x1x24x28xf32> to vector<24x28xf32>
    %c4_600 = arith.constant 4 : index
    %c0_601 = arith.constant 0 : index
    %c0_602 = arith.constant 0 : index
    %559 = vector.load %arg2[%c4_600, %c0_601, %c0_602] : memref<5x28x144xf32, #tpu.memory_space<vmem>>, vector<1x28x144xf32>
    %560 = vector.shape_cast %559 : vector<1x28x144xf32> to vector<28x144xf32>
    %cst_603 = arith.constant dense<0.000000e+00> : vector<24x144xf32>
    %561 = tpu.matmul %558, %560, %cst_603 {dimension_numbers = #tpu.dot_dimension_numbers<[1], [0], [0], [1], [0, 0, 1, 1], [], []>} : vector<24x28xf32>, vector<28x144xf32>, vector<24x144xf32> -> vector<24x144xf32>
    %562 = arith.addf %556, %561 : vector<24x144xf32>
    %c0_604 = arith.constant 0 : index
    %c6_605 = arith.constant 6 : index
    %c1_606 = arith.constant 1 : index
    %c0_607 = arith.constant 0 : index
    %563 = vector.load %arg1[%c0_604, %c6_605, %c1_606, %c0_607] : memref<1x8x28x28xf32, #tpu.memory_space<vmem>>, vector<1x1x24x28xf32>
    %564 = vector.shape_cast %563 : vector<1x1x24x28xf32> to vector<24x28xf32>
    %c1_608 = arith.constant 1 : index
    %c0_609 = arith.constant 0 : index
    %c0_610 = arith.constant 0 : index
    %565 = vector.load %arg2[%c1_608, %c0_609, %c0_610] : memref<5x28x144xf32, #tpu.memory_space<vmem>>, vector<1x28x144xf32>
    %566 = vector.shape_cast %565 : vector<1x28x144xf32> to vector<28x144xf32>
    %cst_611 = arith.constant dense<0.000000e+00> : vector<24x144xf32>
    %567 = tpu.matmul %564, %566, %cst_611 {dimension_numbers = #tpu.dot_dimension_numbers<[1], [0], [0], [1], [0, 0, 1, 1], [], []>} : vector<24x28xf32>, vector<28x144xf32>, vector<24x144xf32> -> vector<24x144xf32>
    %c0_612 = arith.constant 0 : index
    %c6_613 = arith.constant 6 : index
    %c3_614 = arith.constant 3 : index
    %c0_615 = arith.constant 0 : index
    %568 = vector.load %arg1[%c0_612, %c6_613, %c3_614, %c0_615] : memref<1x8x28x28xf32, #tpu.memory_space<vmem>>, vector<1x1x24x28xf32>
    %569 = vector.shape_cast %568 : vector<1x1x24x28xf32> to vector<24x28xf32>
    %c3_616 = arith.constant 3 : index
    %c0_617 = arith.constant 0 : index
    %c0_618 = arith.constant 0 : index
    %570 = vector.load %arg2[%c3_616, %c0_617, %c0_618] : memref<5x28x144xf32, #tpu.memory_space<vmem>>, vector<1x28x144xf32>
    %571 = vector.shape_cast %570 : vector<1x28x144xf32> to vector<28x144xf32>
    %cst_619 = arith.constant dense<0.000000e+00> : vector<24x144xf32>
    %572 = tpu.matmul %569, %571, %cst_619 {dimension_numbers = #tpu.dot_dimension_numbers<[1], [0], [0], [1], [0, 0, 1, 1], [], []>} : vector<24x28xf32>, vector<28x144xf32>, vector<24x144xf32> -> vector<24x144xf32>
    %573 = arith.addf %567, %572 : vector<24x144xf32>
    %574 = arith.addf %562, %573 : vector<24x144xf32>
    %c0_620 = arith.constant 0 : index
    %c0_621 = arith.constant 0 : index
    %575 = vector.load %arg3[%c0_620, %c0_621] : memref<1x144xf32, #tpu.memory_space<vmem>>, vector<1x144xf32>
    %576 = vector.broadcast %575 : vector<1x144xf32> to vector<24x144xf32>
    %577 = arith.addf %574, %576 : vector<24x144xf32>
    %cst_622 = arith.constant 0.000000e+00 : f32
    %578 = vector.broadcast %cst_622 : f32 to vector<24x144xf32>
    %579 = arith.maximumf %577, %578 : vector<24x144xf32>
    %c0_623 = arith.constant 0 : index
    %c0_624 = arith.constant 0 : index
    %c0_625 = arith.constant 0 : index
    %580 = vector.load %arg6[%c0_623, %c0_624, %c0_625] : memref<2x144x72xf32, #tpu.memory_space<vmem>>, vector<1x144x72xf32>
    %581 = vector.shape_cast %580 : vector<1x144x72xf32> to vector<144x72xf32>
    %cst_626 = arith.constant dense<0.000000e+00> : vector<24x72xf32>
    %582 = tpu.matmul %579, %581, %cst_626 {dimension_numbers = #tpu.dot_dimension_numbers<[1], [0], [0], [1], [0, 0, 1, 1], [], []>} : vector<24x144xf32>, vector<144x72xf32>, vector<24x72xf32> -> vector<24x72xf32>
    %c1_627 = arith.constant 1 : index
    %c0_628 = arith.constant 0 : index
    %c0_629 = arith.constant 0 : index
    %583 = vector.load %arg6[%c1_627, %c0_628, %c0_629] : memref<2x144x72xf32, #tpu.memory_space<vmem>>, vector<1x144x72xf32>
    %584 = vector.shape_cast %583 : vector<1x144x72xf32> to vector<144x72xf32>
    %cst_630 = arith.constant dense<0.000000e+00> : vector<24x72xf32>
    %585 = tpu.matmul %579, %584, %cst_630 {dimension_numbers = #tpu.dot_dimension_numbers<[1], [0], [0], [1], [0, 0, 1, 1], [], []>} : vector<24x144xf32>, vector<144x72xf32>, vector<24x72xf32> -> vector<24x72xf32>
    %586 = arith.maximumf %582, %585 : vector<24x72xf32>
    %c0_631 = arith.constant 0 : index
    %c0_632 = arith.constant 0 : index
    %c0_633 = arith.constant 0 : index
    %587 = vector.load %arg7[%c0_631, %c0_632, %c0_633] : memref<2x12x24xf32, #tpu.memory_space<vmem>>, vector<1x12x24xf32>
    %588 = vector.shape_cast %587 : vector<1x12x24xf32> to vector<12x24xf32>
    %cst_634 = arith.constant dense<0.000000e+00> : vector<12x72xf32>
    %589 = tpu.matmul %588, %586, %cst_634 {dimension_numbers = #tpu.dot_dimension_numbers<[1], [0], [0], [1], [0, 0, 1, 1], [], []>} : vector<12x24xf32>, vector<24x72xf32>, vector<12x72xf32> -> vector<12x72xf32>
    %c1_635 = arith.constant 1 : index
    %c0_636 = arith.constant 0 : index
    %c0_637 = arith.constant 0 : index
    %590 = vector.load %arg7[%c1_635, %c0_636, %c0_637] : memref<2x12x24xf32, #tpu.memory_space<vmem>>, vector<1x12x24xf32>
    %591 = vector.shape_cast %590 : vector<1x12x24xf32> to vector<12x24xf32>
    %cst_638 = arith.constant dense<0.000000e+00> : vector<12x72xf32>
    %592 = tpu.matmul %591, %586, %cst_638 {dimension_numbers = #tpu.dot_dimension_numbers<[1], [0], [0], [1], [0, 0, 1, 1], [], []>} : vector<12x24xf32>, vector<24x72xf32>, vector<12x72xf32> -> vector<12x72xf32>
    %593 = arith.maximumf %589, %592 : vector<12x72xf32>
    %594 = vector.extract_strided_slice %593 {offsets = [0, 0], sizes = [8, 72], strides = [1, 1]} : vector<12x72xf32> to vector<8x72xf32>
    %c0_639 = arith.constant 0 : index
    %c0_640 = arith.constant 0 : index
    %c0_641 = arith.constant 0 : index
    %595 = vector.load %arg4[%c0_639, %c0_640, %c0_641] : memref<5x72x96xf32, #tpu.memory_space<vmem>>, vector<1x72x96xf32>
    %596 = vector.shape_cast %595 : vector<1x72x96xf32> to vector<72x96xf32>
    %cst_642 = arith.constant dense<0.000000e+00> : vector<8x96xf32>
    %597 = tpu.matmul %594, %596, %cst_642 {dimension_numbers = #tpu.dot_dimension_numbers<[1], [0], [0], [1], [0, 0, 1, 1], [], []>} : vector<8x72xf32>, vector<72x96xf32>, vector<8x96xf32> -> vector<8x96xf32>
    %598 = vector.extract_strided_slice %593 {offsets = [2, 0], sizes = [8, 72], strides = [1, 1]} : vector<12x72xf32> to vector<8x72xf32>
    %c2_643 = arith.constant 2 : index
    %c0_644 = arith.constant 0 : index
    %c0_645 = arith.constant 0 : index
    %599 = vector.load %arg4[%c2_643, %c0_644, %c0_645] : memref<5x72x96xf32, #tpu.memory_space<vmem>>, vector<1x72x96xf32>
    %600 = vector.shape_cast %599 : vector<1x72x96xf32> to vector<72x96xf32>
    %cst_646 = arith.constant dense<0.000000e+00> : vector<8x96xf32>
    %601 = tpu.matmul %598, %600, %cst_646 {dimension_numbers = #tpu.dot_dimension_numbers<[1], [0], [0], [1], [0, 0, 1, 1], [], []>} : vector<8x72xf32>, vector<72x96xf32>, vector<8x96xf32> -> vector<8x96xf32>
    %602 = arith.addf %597, %601 : vector<8x96xf32>
    %603 = vector.extract_strided_slice %593 {offsets = [4, 0], sizes = [8, 72], strides = [1, 1]} : vector<12x72xf32> to vector<8x72xf32>
    %c4_647 = arith.constant 4 : index
    %c0_648 = arith.constant 0 : index
    %c0_649 = arith.constant 0 : index
    %604 = vector.load %arg4[%c4_647, %c0_648, %c0_649] : memref<5x72x96xf32, #tpu.memory_space<vmem>>, vector<1x72x96xf32>
    %605 = vector.shape_cast %604 : vector<1x72x96xf32> to vector<72x96xf32>
    %cst_650 = arith.constant dense<0.000000e+00> : vector<8x96xf32>
    %606 = tpu.matmul %603, %605, %cst_650 {dimension_numbers = #tpu.dot_dimension_numbers<[1], [0], [0], [1], [0, 0, 1, 1], [], []>} : vector<8x72xf32>, vector<72x96xf32>, vector<8x96xf32> -> vector<8x96xf32>
    %607 = arith.addf %602, %606 : vector<8x96xf32>
    %608 = vector.extract_strided_slice %593 {offsets = [1, 0], sizes = [8, 72], strides = [1, 1]} : vector<12x72xf32> to vector<8x72xf32>
    %c1_651 = arith.constant 1 : index
    %c0_652 = arith.constant 0 : index
    %c0_653 = arith.constant 0 : index
    %609 = vector.load %arg4[%c1_651, %c0_652, %c0_653] : memref<5x72x96xf32, #tpu.memory_space<vmem>>, vector<1x72x96xf32>
    %610 = vector.shape_cast %609 : vector<1x72x96xf32> to vector<72x96xf32>
    %cst_654 = arith.constant dense<0.000000e+00> : vector<8x96xf32>
    %611 = tpu.matmul %608, %610, %cst_654 {dimension_numbers = #tpu.dot_dimension_numbers<[1], [0], [0], [1], [0, 0, 1, 1], [], []>} : vector<8x72xf32>, vector<72x96xf32>, vector<8x96xf32> -> vector<8x96xf32>
    %612 = vector.extract_strided_slice %593 {offsets = [3, 0], sizes = [8, 72], strides = [1, 1]} : vector<12x72xf32> to vector<8x72xf32>
    %c3_655 = arith.constant 3 : index
    %c0_656 = arith.constant 0 : index
    %c0_657 = arith.constant 0 : index
    %613 = vector.load %arg4[%c3_655, %c0_656, %c0_657] : memref<5x72x96xf32, #tpu.memory_space<vmem>>, vector<1x72x96xf32>
    %614 = vector.shape_cast %613 : vector<1x72x96xf32> to vector<72x96xf32>
    %cst_658 = arith.constant dense<0.000000e+00> : vector<8x96xf32>
    %615 = tpu.matmul %612, %614, %cst_658 {dimension_numbers = #tpu.dot_dimension_numbers<[1], [0], [0], [1], [0, 0, 1, 1], [], []>} : vector<8x72xf32>, vector<72x96xf32>, vector<8x96xf32> -> vector<8x96xf32>
    %616 = arith.addf %611, %615 : vector<8x96xf32>
    %617 = arith.addf %607, %616 : vector<8x96xf32>
    %c0_659 = arith.constant 0 : index
    %c0_660 = arith.constant 0 : index
    %618 = vector.load %arg5[%c0_659, %c0_660] : memref<1x96xf32, #tpu.memory_space<vmem>>, vector<1x96xf32>
    %619 = vector.broadcast %618 : vector<1x96xf32> to vector<8x96xf32>
    %620 = arith.addf %617, %619 : vector<8x96xf32>
    %cst_661 = arith.constant 0.000000e+00 : f32
    %621 = vector.broadcast %cst_661 : f32 to vector<8x96xf32>
    %622 = arith.maximumf %620, %621 : vector<8x96xf32>
    %c0_662 = arith.constant 0 : index
    %c0_663 = arith.constant 0 : index
    %c0_664 = arith.constant 0 : index
    %623 = vector.load %arg8[%c0_662, %c0_663, %c0_664] : memref<2x96x48xf32, #tpu.memory_space<vmem>>, vector<1x96x48xf32>
    %624 = vector.shape_cast %623 : vector<1x96x48xf32> to vector<96x48xf32>
    %cst_665 = arith.constant dense<0.000000e+00> : vector<8x48xf32>
    %625 = tpu.matmul %622, %624, %cst_665 {dimension_numbers = #tpu.dot_dimension_numbers<[1], [0], [0], [1], [0, 0, 1, 1], [], []>} : vector<8x96xf32>, vector<96x48xf32>, vector<8x48xf32> -> vector<8x48xf32>
    %c1_666 = arith.constant 1 : index
    %c0_667 = arith.constant 0 : index
    %c0_668 = arith.constant 0 : index
    %626 = vector.load %arg8[%c1_666, %c0_667, %c0_668] : memref<2x96x48xf32, #tpu.memory_space<vmem>>, vector<1x96x48xf32>
    %627 = vector.shape_cast %626 : vector<1x96x48xf32> to vector<96x48xf32>
    %cst_669 = arith.constant dense<0.000000e+00> : vector<8x48xf32>
    %628 = tpu.matmul %622, %627, %cst_669 {dimension_numbers = #tpu.dot_dimension_numbers<[1], [0], [0], [1], [0, 0, 1, 1], [], []>} : vector<8x96xf32>, vector<96x48xf32>, vector<8x48xf32> -> vector<8x48xf32>
    %629 = arith.maximumf %625, %628 : vector<8x48xf32>
    %c0_670 = arith.constant 0 : index
    %c0_671 = arith.constant 0 : index
    %c0_672 = arith.constant 0 : index
    %630 = vector.load %arg9[%c0_670, %c0_671, %c0_672] : memref<2x4x8xf32, #tpu.memory_space<vmem>>, vector<1x4x8xf32>
    %631 = vector.shape_cast %630 : vector<1x4x8xf32> to vector<4x8xf32>
    %cst_673 = arith.constant dense<0.000000e+00> : vector<4x48xf32>
    %632 = tpu.matmul %631, %629, %cst_673 {dimension_numbers = #tpu.dot_dimension_numbers<[1], [0], [0], [1], [0, 0, 1, 1], [], []>} : vector<4x8xf32>, vector<8x48xf32>, vector<4x48xf32> -> vector<4x48xf32>
    %c1_674 = arith.constant 1 : index
    %c0_675 = arith.constant 0 : index
    %c0_676 = arith.constant 0 : index
    %633 = vector.load %arg9[%c1_674, %c0_675, %c0_676] : memref<2x4x8xf32, #tpu.memory_space<vmem>>, vector<1x4x8xf32>
    %634 = vector.shape_cast %633 : vector<1x4x8xf32> to vector<4x8xf32>
    %cst_677 = arith.constant dense<0.000000e+00> : vector<4x48xf32>
    %635 = tpu.matmul %634, %629, %cst_677 {dimension_numbers = #tpu.dot_dimension_numbers<[1], [0], [0], [1], [0, 0, 1, 1], [], []>} : vector<4x8xf32>, vector<8x48xf32>, vector<4x48xf32> -> vector<4x48xf32>
    %636 = arith.maximumf %632, %635 : vector<4x48xf32>
    %c0_678 = arith.constant 0 : index
    %c7 = arith.constant 7 : index
    %c0_679 = arith.constant 0 : index
    %c0_680 = arith.constant 0 : index
    %637 = vector.load %arg1[%c0_678, %c7, %c0_679, %c0_680] : memref<1x8x28x28xf32, #tpu.memory_space<vmem>>, vector<1x1x24x28xf32>
    %638 = vector.shape_cast %637 : vector<1x1x24x28xf32> to vector<24x28xf32>
    %c0_681 = arith.constant 0 : index
    %c0_682 = arith.constant 0 : index
    %c0_683 = arith.constant 0 : index
    %639 = vector.load %arg2[%c0_681, %c0_682, %c0_683] : memref<5x28x144xf32, #tpu.memory_space<vmem>>, vector<1x28x144xf32>
    %640 = vector.shape_cast %639 : vector<1x28x144xf32> to vector<28x144xf32>
    %cst_684 = arith.constant dense<0.000000e+00> : vector<24x144xf32>
    %641 = tpu.matmul %638, %640, %cst_684 {dimension_numbers = #tpu.dot_dimension_numbers<[1], [0], [0], [1], [0, 0, 1, 1], [], []>} : vector<24x28xf32>, vector<28x144xf32>, vector<24x144xf32> -> vector<24x144xf32>
    %c0_685 = arith.constant 0 : index
    %c7_686 = arith.constant 7 : index
    %c2_687 = arith.constant 2 : index
    %c0_688 = arith.constant 0 : index
    %642 = vector.load %arg1[%c0_685, %c7_686, %c2_687, %c0_688] : memref<1x8x28x28xf32, #tpu.memory_space<vmem>>, vector<1x1x24x28xf32>
    %643 = vector.shape_cast %642 : vector<1x1x24x28xf32> to vector<24x28xf32>
    %c2_689 = arith.constant 2 : index
    %c0_690 = arith.constant 0 : index
    %c0_691 = arith.constant 0 : index
    %644 = vector.load %arg2[%c2_689, %c0_690, %c0_691] : memref<5x28x144xf32, #tpu.memory_space<vmem>>, vector<1x28x144xf32>
    %645 = vector.shape_cast %644 : vector<1x28x144xf32> to vector<28x144xf32>
    %cst_692 = arith.constant dense<0.000000e+00> : vector<24x144xf32>
    %646 = tpu.matmul %643, %645, %cst_692 {dimension_numbers = #tpu.dot_dimension_numbers<[1], [0], [0], [1], [0, 0, 1, 1], [], []>} : vector<24x28xf32>, vector<28x144xf32>, vector<24x144xf32> -> vector<24x144xf32>
    %647 = arith.addf %641, %646 : vector<24x144xf32>
    %c0_693 = arith.constant 0 : index
    %c7_694 = arith.constant 7 : index
    %c4_695 = arith.constant 4 : index
    %c0_696 = arith.constant 0 : index
    %648 = vector.load %arg1[%c0_693, %c7_694, %c4_695, %c0_696] : memref<1x8x28x28xf32, #tpu.memory_space<vmem>>, vector<1x1x24x28xf32>
    %649 = vector.shape_cast %648 : vector<1x1x24x28xf32> to vector<24x28xf32>
    %c4_697 = arith.constant 4 : index
    %c0_698 = arith.constant 0 : index
    %c0_699 = arith.constant 0 : index
    %650 = vector.load %arg2[%c4_697, %c0_698, %c0_699] : memref<5x28x144xf32, #tpu.memory_space<vmem>>, vector<1x28x144xf32>
    %651 = vector.shape_cast %650 : vector<1x28x144xf32> to vector<28x144xf32>
    %cst_700 = arith.constant dense<0.000000e+00> : vector<24x144xf32>
    %652 = tpu.matmul %649, %651, %cst_700 {dimension_numbers = #tpu.dot_dimension_numbers<[1], [0], [0], [1], [0, 0, 1, 1], [], []>} : vector<24x28xf32>, vector<28x144xf32>, vector<24x144xf32> -> vector<24x144xf32>
    %653 = arith.addf %647, %652 : vector<24x144xf32>
    %c0_701 = arith.constant 0 : index
    %c7_702 = arith.constant 7 : index
    %c1_703 = arith.constant 1 : index
    %c0_704 = arith.constant 0 : index
    %654 = vector.load %arg1[%c0_701, %c7_702, %c1_703, %c0_704] : memref<1x8x28x28xf32, #tpu.memory_space<vmem>>, vector<1x1x24x28xf32>
    %655 = vector.shape_cast %654 : vector<1x1x24x28xf32> to vector<24x28xf32>
    %c1_705 = arith.constant 1 : index
    %c0_706 = arith.constant 0 : index
    %c0_707 = arith.constant 0 : index
    %656 = vector.load %arg2[%c1_705, %c0_706, %c0_707] : memref<5x28x144xf32, #tpu.memory_space<vmem>>, vector<1x28x144xf32>
    %657 = vector.shape_cast %656 : vector<1x28x144xf32> to vector<28x144xf32>
    %cst_708 = arith.constant dense<0.000000e+00> : vector<24x144xf32>
    %658 = tpu.matmul %655, %657, %cst_708 {dimension_numbers = #tpu.dot_dimension_numbers<[1], [0], [0], [1], [0, 0, 1, 1], [], []>} : vector<24x28xf32>, vector<28x144xf32>, vector<24x144xf32> -> vector<24x144xf32>
    %c0_709 = arith.constant 0 : index
    %c7_710 = arith.constant 7 : index
    %c3_711 = arith.constant 3 : index
    %c0_712 = arith.constant 0 : index
    %659 = vector.load %arg1[%c0_709, %c7_710, %c3_711, %c0_712] : memref<1x8x28x28xf32, #tpu.memory_space<vmem>>, vector<1x1x24x28xf32>
    %660 = vector.shape_cast %659 : vector<1x1x24x28xf32> to vector<24x28xf32>
    %c3_713 = arith.constant 3 : index
    %c0_714 = arith.constant 0 : index
    %c0_715 = arith.constant 0 : index
    %661 = vector.load %arg2[%c3_713, %c0_714, %c0_715] : memref<5x28x144xf32, #tpu.memory_space<vmem>>, vector<1x28x144xf32>
    %662 = vector.shape_cast %661 : vector<1x28x144xf32> to vector<28x144xf32>
    %cst_716 = arith.constant dense<0.000000e+00> : vector<24x144xf32>
    %663 = tpu.matmul %660, %662, %cst_716 {dimension_numbers = #tpu.dot_dimension_numbers<[1], [0], [0], [1], [0, 0, 1, 1], [], []>} : vector<24x28xf32>, vector<28x144xf32>, vector<24x144xf32> -> vector<24x144xf32>
    %664 = arith.addf %658, %663 : vector<24x144xf32>
    %665 = arith.addf %653, %664 : vector<24x144xf32>
    %c0_717 = arith.constant 0 : index
    %c0_718 = arith.constant 0 : index
    %666 = vector.load %arg3[%c0_717, %c0_718] : memref<1x144xf32, #tpu.memory_space<vmem>>, vector<1x144xf32>
    %667 = vector.broadcast %666 : vector<1x144xf32> to vector<24x144xf32>
    %668 = arith.addf %665, %667 : vector<24x144xf32>
    %cst_719 = arith.constant 0.000000e+00 : f32
    %669 = vector.broadcast %cst_719 : f32 to vector<24x144xf32>
    %670 = arith.maximumf %668, %669 : vector<24x144xf32>
    %c0_720 = arith.constant 0 : index
    %c0_721 = arith.constant 0 : index
    %c0_722 = arith.constant 0 : index
    %671 = vector.load %arg6[%c0_720, %c0_721, %c0_722] : memref<2x144x72xf32, #tpu.memory_space<vmem>>, vector<1x144x72xf32>
    %672 = vector.shape_cast %671 : vector<1x144x72xf32> to vector<144x72xf32>
    %cst_723 = arith.constant dense<0.000000e+00> : vector<24x72xf32>
    %673 = tpu.matmul %670, %672, %cst_723 {dimension_numbers = #tpu.dot_dimension_numbers<[1], [0], [0], [1], [0, 0, 1, 1], [], []>} : vector<24x144xf32>, vector<144x72xf32>, vector<24x72xf32> -> vector<24x72xf32>
    %c1_724 = arith.constant 1 : index
    %c0_725 = arith.constant 0 : index
    %c0_726 = arith.constant 0 : index
    %674 = vector.load %arg6[%c1_724, %c0_725, %c0_726] : memref<2x144x72xf32, #tpu.memory_space<vmem>>, vector<1x144x72xf32>
    %675 = vector.shape_cast %674 : vector<1x144x72xf32> to vector<144x72xf32>
    %cst_727 = arith.constant dense<0.000000e+00> : vector<24x72xf32>
    %676 = tpu.matmul %670, %675, %cst_727 {dimension_numbers = #tpu.dot_dimension_numbers<[1], [0], [0], [1], [0, 0, 1, 1], [], []>} : vector<24x144xf32>, vector<144x72xf32>, vector<24x72xf32> -> vector<24x72xf32>
    %677 = arith.maximumf %673, %676 : vector<24x72xf32>
    %c0_728 = arith.constant 0 : index
    %c0_729 = arith.constant 0 : index
    %c0_730 = arith.constant 0 : index
    %678 = vector.load %arg7[%c0_728, %c0_729, %c0_730] : memref<2x12x24xf32, #tpu.memory_space<vmem>>, vector<1x12x24xf32>
    %679 = vector.shape_cast %678 : vector<1x12x24xf32> to vector<12x24xf32>
    %cst_731 = arith.constant dense<0.000000e+00> : vector<12x72xf32>
    %680 = tpu.matmul %679, %677, %cst_731 {dimension_numbers = #tpu.dot_dimension_numbers<[1], [0], [0], [1], [0, 0, 1, 1], [], []>} : vector<12x24xf32>, vector<24x72xf32>, vector<12x72xf32> -> vector<12x72xf32>
    %c1_732 = arith.constant 1 : index
    %c0_733 = arith.constant 0 : index
    %c0_734 = arith.constant 0 : index
    %681 = vector.load %arg7[%c1_732, %c0_733, %c0_734] : memref<2x12x24xf32, #tpu.memory_space<vmem>>, vector<1x12x24xf32>
    %682 = vector.shape_cast %681 : vector<1x12x24xf32> to vector<12x24xf32>
    %cst_735 = arith.constant dense<0.000000e+00> : vector<12x72xf32>
    %683 = tpu.matmul %682, %677, %cst_735 {dimension_numbers = #tpu.dot_dimension_numbers<[1], [0], [0], [1], [0, 0, 1, 1], [], []>} : vector<12x24xf32>, vector<24x72xf32>, vector<12x72xf32> -> vector<12x72xf32>
    %684 = arith.maximumf %680, %683 : vector<12x72xf32>
    %685 = vector.extract_strided_slice %684 {offsets = [0, 0], sizes = [8, 72], strides = [1, 1]} : vector<12x72xf32> to vector<8x72xf32>
    %c0_736 = arith.constant 0 : index
    %c0_737 = arith.constant 0 : index
    %c0_738 = arith.constant 0 : index
    %686 = vector.load %arg4[%c0_736, %c0_737, %c0_738] : memref<5x72x96xf32, #tpu.memory_space<vmem>>, vector<1x72x96xf32>
    %687 = vector.shape_cast %686 : vector<1x72x96xf32> to vector<72x96xf32>
    %cst_739 = arith.constant dense<0.000000e+00> : vector<8x96xf32>
    %688 = tpu.matmul %685, %687, %cst_739 {dimension_numbers = #tpu.dot_dimension_numbers<[1], [0], [0], [1], [0, 0, 1, 1], [], []>} : vector<8x72xf32>, vector<72x96xf32>, vector<8x96xf32> -> vector<8x96xf32>
    %689 = vector.extract_strided_slice %684 {offsets = [2, 0], sizes = [8, 72], strides = [1, 1]} : vector<12x72xf32> to vector<8x72xf32>
    %c2_740 = arith.constant 2 : index
    %c0_741 = arith.constant 0 : index
    %c0_742 = arith.constant 0 : index
    %690 = vector.load %arg4[%c2_740, %c0_741, %c0_742] : memref<5x72x96xf32, #tpu.memory_space<vmem>>, vector<1x72x96xf32>
    %691 = vector.shape_cast %690 : vector<1x72x96xf32> to vector<72x96xf32>
    %cst_743 = arith.constant dense<0.000000e+00> : vector<8x96xf32>
    %692 = tpu.matmul %689, %691, %cst_743 {dimension_numbers = #tpu.dot_dimension_numbers<[1], [0], [0], [1], [0, 0, 1, 1], [], []>} : vector<8x72xf32>, vector<72x96xf32>, vector<8x96xf32> -> vector<8x96xf32>
    %693 = arith.addf %688, %692 : vector<8x96xf32>
    %694 = vector.extract_strided_slice %684 {offsets = [4, 0], sizes = [8, 72], strides = [1, 1]} : vector<12x72xf32> to vector<8x72xf32>
    %c4_744 = arith.constant 4 : index
    %c0_745 = arith.constant 0 : index
    %c0_746 = arith.constant 0 : index
    %695 = vector.load %arg4[%c4_744, %c0_745, %c0_746] : memref<5x72x96xf32, #tpu.memory_space<vmem>>, vector<1x72x96xf32>
    %696 = vector.shape_cast %695 : vector<1x72x96xf32> to vector<72x96xf32>
    %cst_747 = arith.constant dense<0.000000e+00> : vector<8x96xf32>
    %697 = tpu.matmul %694, %696, %cst_747 {dimension_numbers = #tpu.dot_dimension_numbers<[1], [0], [0], [1], [0, 0, 1, 1], [], []>} : vector<8x72xf32>, vector<72x96xf32>, vector<8x96xf32> -> vector<8x96xf32>
    %698 = arith.addf %693, %697 : vector<8x96xf32>
    %699 = vector.extract_strided_slice %684 {offsets = [1, 0], sizes = [8, 72], strides = [1, 1]} : vector<12x72xf32> to vector<8x72xf32>
    %c1_748 = arith.constant 1 : index
    %c0_749 = arith.constant 0 : index
    %c0_750 = arith.constant 0 : index
    %700 = vector.load %arg4[%c1_748, %c0_749, %c0_750] : memref<5x72x96xf32, #tpu.memory_space<vmem>>, vector<1x72x96xf32>
    %701 = vector.shape_cast %700 : vector<1x72x96xf32> to vector<72x96xf32>
    %cst_751 = arith.constant dense<0.000000e+00> : vector<8x96xf32>
    %702 = tpu.matmul %699, %701, %cst_751 {dimension_numbers = #tpu.dot_dimension_numbers<[1], [0], [0], [1], [0, 0, 1, 1], [], []>} : vector<8x72xf32>, vector<72x96xf32>, vector<8x96xf32> -> vector<8x96xf32>
    %703 = vector.extract_strided_slice %684 {offsets = [3, 0], sizes = [8, 72], strides = [1, 1]} : vector<12x72xf32> to vector<8x72xf32>
    %c3_752 = arith.constant 3 : index
    %c0_753 = arith.constant 0 : index
    %c0_754 = arith.constant 0 : index
    %704 = vector.load %arg4[%c3_752, %c0_753, %c0_754] : memref<5x72x96xf32, #tpu.memory_space<vmem>>, vector<1x72x96xf32>
    %705 = vector.shape_cast %704 : vector<1x72x96xf32> to vector<72x96xf32>
    %cst_755 = arith.constant dense<0.000000e+00> : vector<8x96xf32>
    %706 = tpu.matmul %703, %705, %cst_755 {dimension_numbers = #tpu.dot_dimension_numbers<[1], [0], [0], [1], [0, 0, 1, 1], [], []>} : vector<8x72xf32>, vector<72x96xf32>, vector<8x96xf32> -> vector<8x96xf32>
    %707 = arith.addf %702, %706 : vector<8x96xf32>
    %708 = arith.addf %698, %707 : vector<8x96xf32>
    %c0_756 = arith.constant 0 : index
    %c0_757 = arith.constant 0 : index
    %709 = vector.load %arg5[%c0_756, %c0_757] : memref<1x96xf32, #tpu.memory_space<vmem>>, vector<1x96xf32>
    %710 = vector.broadcast %709 : vector<1x96xf32> to vector<8x96xf32>
    %711 = arith.addf %708, %710 : vector<8x96xf32>
    %cst_758 = arith.constant 0.000000e+00 : f32
    %712 = vector.broadcast %cst_758 : f32 to vector<8x96xf32>
    %713 = arith.maximumf %711, %712 : vector<8x96xf32>
    %c0_759 = arith.constant 0 : index
    %c0_760 = arith.constant 0 : index
    %c0_761 = arith.constant 0 : index
    %714 = vector.load %arg8[%c0_759, %c0_760, %c0_761] : memref<2x96x48xf32, #tpu.memory_space<vmem>>, vector<1x96x48xf32>
    %715 = vector.shape_cast %714 : vector<1x96x48xf32> to vector<96x48xf32>
    %cst_762 = arith.constant dense<0.000000e+00> : vector<8x48xf32>
    %716 = tpu.matmul %713, %715, %cst_762 {dimension_numbers = #tpu.dot_dimension_numbers<[1], [0], [0], [1], [0, 0, 1, 1], [], []>} : vector<8x96xf32>, vector<96x48xf32>, vector<8x48xf32> -> vector<8x48xf32>
    %c1_763 = arith.constant 1 : index
    %c0_764 = arith.constant 0 : index
    %c0_765 = arith.constant 0 : index
    %717 = vector.load %arg8[%c1_763, %c0_764, %c0_765] : memref<2x96x48xf32, #tpu.memory_space<vmem>>, vector<1x96x48xf32>
    %718 = vector.shape_cast %717 : vector<1x96x48xf32> to vector<96x48xf32>
    %cst_766 = arith.constant dense<0.000000e+00> : vector<8x48xf32>
    %719 = tpu.matmul %713, %718, %cst_766 {dimension_numbers = #tpu.dot_dimension_numbers<[1], [0], [0], [1], [0, 0, 1, 1], [], []>} : vector<8x96xf32>, vector<96x48xf32>, vector<8x48xf32> -> vector<8x48xf32>
    %720 = arith.maximumf %716, %719 : vector<8x48xf32>
    %c0_767 = arith.constant 0 : index
    %c0_768 = arith.constant 0 : index
    %c0_769 = arith.constant 0 : index
    %721 = vector.load %arg9[%c0_767, %c0_768, %c0_769] : memref<2x4x8xf32, #tpu.memory_space<vmem>>, vector<1x4x8xf32>
    %722 = vector.shape_cast %721 : vector<1x4x8xf32> to vector<4x8xf32>
    %cst_770 = arith.constant dense<0.000000e+00> : vector<4x48xf32>
    %723 = tpu.matmul %722, %720, %cst_770 {dimension_numbers = #tpu.dot_dimension_numbers<[1], [0], [0], [1], [0, 0, 1, 1], [], []>} : vector<4x8xf32>, vector<8x48xf32>, vector<4x48xf32> -> vector<4x48xf32>
    %c1_771 = arith.constant 1 : index
    %c0_772 = arith.constant 0 : index
    %c0_773 = arith.constant 0 : index
    %724 = vector.load %arg9[%c1_771, %c0_772, %c0_773] : memref<2x4x8xf32, #tpu.memory_space<vmem>>, vector<1x4x8xf32>
    %725 = vector.shape_cast %724 : vector<1x4x8xf32> to vector<4x8xf32>
    %cst_774 = arith.constant dense<0.000000e+00> : vector<4x48xf32>
    %726 = tpu.matmul %725, %720, %cst_774 {dimension_numbers = #tpu.dot_dimension_numbers<[1], [0], [0], [1], [0, 0, 1, 1], [], []>} : vector<4x8xf32>, vector<8x48xf32>, vector<4x48xf32> -> vector<4x48xf32>
    %727 = arith.maximumf %723, %726 : vector<4x48xf32>
    %728 = vector.extract_strided_slice %90 {offsets = [0, 0], sizes = [1, 48], strides = [1, 1]} : vector<4x48xf32> to vector<1x48xf32>
    %729 = vector.extract_strided_slice %181 {offsets = [0, 0], sizes = [1, 48], strides = [1, 1]} : vector<4x48xf32> to vector<1x48xf32>
    %730 = vector.extract_strided_slice %272 {offsets = [0, 0], sizes = [1, 48], strides = [1, 1]} : vector<4x48xf32> to vector<1x48xf32>
    %731 = vector.extract_strided_slice %363 {offsets = [0, 0], sizes = [1, 48], strides = [1, 1]} : vector<4x48xf32> to vector<1x48xf32>
    %732 = vector.extract_strided_slice %454 {offsets = [0, 0], sizes = [1, 48], strides = [1, 1]} : vector<4x48xf32> to vector<1x48xf32>
    %733 = vector.extract_strided_slice %545 {offsets = [0, 0], sizes = [1, 48], strides = [1, 1]} : vector<4x48xf32> to vector<1x48xf32>
    %734 = vector.extract_strided_slice %636 {offsets = [0, 0], sizes = [1, 48], strides = [1, 1]} : vector<4x48xf32> to vector<1x48xf32>
    %735 = vector.extract_strided_slice %727 {offsets = [0, 0], sizes = [1, 48], strides = [1, 1]} : vector<4x48xf32> to vector<1x48xf32>
    %736 = tpu.concatenate %728, %729, %730, %731, %732, %733, %734, %735 in 0 : vector<1x48xf32>, vector<1x48xf32>, vector<1x48xf32>, vector<1x48xf32>, vector<1x48xf32>, vector<1x48xf32>, vector<1x48xf32>, vector<1x48xf32> -> vector<8x48xf32>
    %c0_775 = arith.constant 0 : index
    %c0_776 = arith.constant 0 : index
    %c0_777 = arith.constant 0 : index
    %737 = vector.load %arg10[%c0_775, %c0_776, %c0_777] : memref<4x48x128xf32, #tpu.memory_space<vmem>>, vector<1x48x128xf32>
    %738 = vector.shape_cast %737 : vector<1x48x128xf32> to vector<48x128xf32>
    %cst_778 = arith.constant dense<0.000000e+00> : vector<8x128xf32>
    %739 = tpu.matmul %736, %738, %cst_778 {dimension_numbers = #tpu.dot_dimension_numbers<[1], [0], [0], [1], [0, 0, 1, 1], [], []>} : vector<8x48xf32>, vector<48x128xf32>, vector<8x128xf32> -> vector<8x128xf32>
    %740 = vector.extract_strided_slice %90 {offsets = [2, 0], sizes = [1, 48], strides = [1, 1]} : vector<4x48xf32> to vector<1x48xf32>
    %741 = vector.extract_strided_slice %181 {offsets = [2, 0], sizes = [1, 48], strides = [1, 1]} : vector<4x48xf32> to vector<1x48xf32>
    %742 = vector.extract_strided_slice %272 {offsets = [2, 0], sizes = [1, 48], strides = [1, 1]} : vector<4x48xf32> to vector<1x48xf32>
    %743 = vector.extract_strided_slice %363 {offsets = [2, 0], sizes = [1, 48], strides = [1, 1]} : vector<4x48xf32> to vector<1x48xf32>
    %744 = vector.extract_strided_slice %454 {offsets = [2, 0], sizes = [1, 48], strides = [1, 1]} : vector<4x48xf32> to vector<1x48xf32>
    %745 = vector.extract_strided_slice %545 {offsets = [2, 0], sizes = [1, 48], strides = [1, 1]} : vector<4x48xf32> to vector<1x48xf32>
    %746 = vector.extract_strided_slice %636 {offsets = [2, 0], sizes = [1, 48], strides = [1, 1]} : vector<4x48xf32> to vector<1x48xf32>
    %747 = vector.extract_strided_slice %727 {offsets = [2, 0], sizes = [1, 48], strides = [1, 1]} : vector<4x48xf32> to vector<1x48xf32>
    %748 = tpu.concatenate %740, %741, %742, %743, %744, %745, %746, %747 in 0 : vector<1x48xf32>, vector<1x48xf32>, vector<1x48xf32>, vector<1x48xf32>, vector<1x48xf32>, vector<1x48xf32>, vector<1x48xf32>, vector<1x48xf32> -> vector<8x48xf32>
    %c2_779 = arith.constant 2 : index
    %c0_780 = arith.constant 0 : index
    %c0_781 = arith.constant 0 : index
    %749 = vector.load %arg10[%c2_779, %c0_780, %c0_781] : memref<4x48x128xf32, #tpu.memory_space<vmem>>, vector<1x48x128xf32>
    %750 = vector.shape_cast %749 : vector<1x48x128xf32> to vector<48x128xf32>
    %cst_782 = arith.constant dense<0.000000e+00> : vector<8x128xf32>
    %751 = tpu.matmul %748, %750, %cst_782 {dimension_numbers = #tpu.dot_dimension_numbers<[1], [0], [0], [1], [0, 0, 1, 1], [], []>} : vector<8x48xf32>, vector<48x128xf32>, vector<8x128xf32> -> vector<8x128xf32>
    %752 = arith.addf %739, %751 : vector<8x128xf32>
    %753 = vector.extract_strided_slice %90 {offsets = [1, 0], sizes = [1, 48], strides = [1, 1]} : vector<4x48xf32> to vector<1x48xf32>
    %754 = vector.extract_strided_slice %181 {offsets = [1, 0], sizes = [1, 48], strides = [1, 1]} : vector<4x48xf32> to vector<1x48xf32>
    %755 = vector.extract_strided_slice %272 {offsets = [1, 0], sizes = [1, 48], strides = [1, 1]} : vector<4x48xf32> to vector<1x48xf32>
    %756 = vector.extract_strided_slice %363 {offsets = [1, 0], sizes = [1, 48], strides = [1, 1]} : vector<4x48xf32> to vector<1x48xf32>
    %757 = vector.extract_strided_slice %454 {offsets = [1, 0], sizes = [1, 48], strides = [1, 1]} : vector<4x48xf32> to vector<1x48xf32>
    %758 = vector.extract_strided_slice %545 {offsets = [1, 0], sizes = [1, 48], strides = [1, 1]} : vector<4x48xf32> to vector<1x48xf32>
    %759 = vector.extract_strided_slice %636 {offsets = [1, 0], sizes = [1, 48], strides = [1, 1]} : vector<4x48xf32> to vector<1x48xf32>
    %760 = vector.extract_strided_slice %727 {offsets = [1, 0], sizes = [1, 48], strides = [1, 1]} : vector<4x48xf32> to vector<1x48xf32>
    %761 = tpu.concatenate %753, %754, %755, %756, %757, %758, %759, %760 in 0 : vector<1x48xf32>, vector<1x48xf32>, vector<1x48xf32>, vector<1x48xf32>, vector<1x48xf32>, vector<1x48xf32>, vector<1x48xf32>, vector<1x48xf32> -> vector<8x48xf32>
    %c1_783 = arith.constant 1 : index
    %c0_784 = arith.constant 0 : index
    %c0_785 = arith.constant 0 : index
    %762 = vector.load %arg10[%c1_783, %c0_784, %c0_785] : memref<4x48x128xf32, #tpu.memory_space<vmem>>, vector<1x48x128xf32>
    %763 = vector.shape_cast %762 : vector<1x48x128xf32> to vector<48x128xf32>
    %cst_786 = arith.constant dense<0.000000e+00> : vector<8x128xf32>
    %764 = tpu.matmul %761, %763, %cst_786 {dimension_numbers = #tpu.dot_dimension_numbers<[1], [0], [0], [1], [0, 0, 1, 1], [], []>} : vector<8x48xf32>, vector<48x128xf32>, vector<8x128xf32> -> vector<8x128xf32>
    %765 = vector.extract_strided_slice %90 {offsets = [3, 0], sizes = [1, 48], strides = [1, 1]} : vector<4x48xf32> to vector<1x48xf32>
    %766 = vector.extract_strided_slice %181 {offsets = [3, 0], sizes = [1, 48], strides = [1, 1]} : vector<4x48xf32> to vector<1x48xf32>
    %767 = vector.extract_strided_slice %272 {offsets = [3, 0], sizes = [1, 48], strides = [1, 1]} : vector<4x48xf32> to vector<1x48xf32>
    %768 = vector.extract_strided_slice %363 {offsets = [3, 0], sizes = [1, 48], strides = [1, 1]} : vector<4x48xf32> to vector<1x48xf32>
    %769 = vector.extract_strided_slice %454 {offsets = [3, 0], sizes = [1, 48], strides = [1, 1]} : vector<4x48xf32> to vector<1x48xf32>
    %770 = vector.extract_strided_slice %545 {offsets = [3, 0], sizes = [1, 48], strides = [1, 1]} : vector<4x48xf32> to vector<1x48xf32>
    %771 = vector.extract_strided_slice %636 {offsets = [3, 0], sizes = [1, 48], strides = [1, 1]} : vector<4x48xf32> to vector<1x48xf32>
    %772 = vector.extract_strided_slice %727 {offsets = [3, 0], sizes = [1, 48], strides = [1, 1]} : vector<4x48xf32> to vector<1x48xf32>
    %773 = tpu.concatenate %765, %766, %767, %768, %769, %770, %771, %772 in 0 : vector<1x48xf32>, vector<1x48xf32>, vector<1x48xf32>, vector<1x48xf32>, vector<1x48xf32>, vector<1x48xf32>, vector<1x48xf32>, vector<1x48xf32> -> vector<8x48xf32>
    %c3_787 = arith.constant 3 : index
    %c0_788 = arith.constant 0 : index
    %c0_789 = arith.constant 0 : index
    %774 = vector.load %arg10[%c3_787, %c0_788, %c0_789] : memref<4x48x128xf32, #tpu.memory_space<vmem>>, vector<1x48x128xf32>
    %775 = vector.shape_cast %774 : vector<1x48x128xf32> to vector<48x128xf32>
    %cst_790 = arith.constant dense<0.000000e+00> : vector<8x128xf32>
    %776 = tpu.matmul %773, %775, %cst_790 {dimension_numbers = #tpu.dot_dimension_numbers<[1], [0], [0], [1], [0, 0, 1, 1], [], []>} : vector<8x48xf32>, vector<48x128xf32>, vector<8x128xf32> -> vector<8x128xf32>
    %777 = arith.addf %764, %776 : vector<8x128xf32>
    %778 = arith.addf %752, %777 : vector<8x128xf32>
    %c0_791 = arith.constant 0 : index
    %c0_792 = arith.constant 0 : index
    %779 = vector.load %arg11[%c0_791, %c0_792] : memref<1x128xf32, #tpu.memory_space<vmem>>, vector<1x128xf32>
    %780 = vector.broadcast %779 : vector<1x128xf32> to vector<8x128xf32>
    %781 = arith.addf %778, %780 : vector<8x128xf32>
    %cst_793 = arith.constant 0.000000e+00 : f32
    %782 = vector.broadcast %cst_793 : f32 to vector<8x128xf32>
    %783 = arith.maximumf %781, %782 : vector<8x128xf32>
    %c0_794 = arith.constant 0 : index
    %c0_795 = arith.constant 0 : index
    %784 = vector.load %arg12[%c0_794, %c0_795] : memref<128x128xf32, #tpu.memory_space<vmem>>, vector<128x128xf32>
    %cst_796 = arith.constant dense<0.000000e+00> : vector<8x128xf32>
    %785 = tpu.matmul %783, %784, %cst_796 {dimension_numbers = #tpu.dot_dimension_numbers<[1], [0], [0], [1], [0, 0, 1, 1], [], []>} : vector<8x128xf32>, vector<128x128xf32>, vector<8x128xf32> -> vector<8x128xf32>
    %c0_797 = arith.constant 0 : index
    %c0_798 = arith.constant 0 : index
    %786 = vector.load %arg13[%c0_797, %c0_798] : memref<1x128xf32, #tpu.memory_space<vmem>>, vector<1x128xf32>
    %787 = vector.broadcast %786 : vector<1x128xf32> to vector<8x128xf32>
    %788 = arith.addf %785, %787 : vector<8x128xf32>
    %cst_799 = arith.constant 0.000000e+00 : f32
    %789 = vector.broadcast %cst_799 : f32 to vector<8x128xf32>
    %790 = arith.maximumf %788, %789 : vector<8x128xf32>
    %c0_800 = arith.constant 0 : index
    %c0_801 = arith.constant 0 : index
    %791 = vector.load %arg14[%c0_800, %c0_801] : memref<128x128xf32, #tpu.memory_space<vmem>>, vector<128x128xf32>
    %cst_802 = arith.constant dense<0.000000e+00> : vector<8x128xf32>
    %792 = tpu.matmul %790, %791, %cst_802 {dimension_numbers = #tpu.dot_dimension_numbers<[1], [0], [0], [1], [0, 0, 1, 1], [], []>} : vector<8x128xf32>, vector<128x128xf32>, vector<8x128xf32> -> vector<8x128xf32>
    %c0_803 = arith.constant 0 : index
    %c0_804 = arith.constant 0 : index
    %793 = vector.load %arg15[%c0_803, %c0_804] : memref<1x128xf32, #tpu.memory_space<vmem>>, vector<1x128xf32>
    %794 = vector.broadcast %793 : vector<1x128xf32> to vector<8x128xf32>
    %795 = arith.addf %792, %794 : vector<8x128xf32>
    %c0_805 = arith.constant 0 : index
    %c0_806 = arith.constant 0 : index
    %c0_807 = arith.constant 0 : index
    %796 = vector.load %arg16[%c0_805, %c0_806, %c0_807] : memref<1x8x128xf32, #tpu.memory_space<vmem>>, vector<1x8x128xf32>
    %797 = vector.shape_cast %796 : vector<1x8x128xf32> to vector<8x128xf32>
    %798 = vector.shape_cast %795 : vector<8x128xf32> to vector<1x8x128xf32>
    tpu.vector_store %arg16[%c0_805, %c0_806, %c0_807], %798 {strides = array<i32>} : memref<1x8x128xf32, #tpu.memory_space<vmem>>, vector<1x8x128xf32>,
    return
  }
  func.func @transform_0(%arg0: i32) -> (i32, i32, i32, i32) {
    %c0_i32 = arith.constant 0 : i32
    %c0_i32_0 = arith.constant 0 : i32
    %c0_i32_1 = arith.constant 0 : i32
    %c0_i32_2 = arith.constant 0 : i32
    return %arg0, %c0_i32, %c0_i32_0, %c0_i32_1 : i32, i32, i32, i32
  }
  func.func @transform_1(%arg0: i32) -> (i32, i32, i32) {
    %c0_i32 = arith.constant 0 : i32
    %c0_i32_0 = arith.constant 0 : i32
    %c0_i32_1 = arith.constant 0 : i32
    %c0_i32_2 = arith.constant 0 : i32
    return %c0_i32, %c0_i32_0, %c0_i32_1 : i32, i32, i32
  }
  func.func @transform_2(%arg0: i32) -> (i32, i32) {
    %c0_i32 = arith.constant 0 : i32
    %c0_i32_0 = arith.constant 0 : i32
    %c0_i32_1 = arith.constant 0 : i32
    return %c0_i32, %c0_i32_0 : i32, i32
  }
  func.func @transform_3(%arg0: i32) -> (i32, i32, i32) {
    %c0_i32 = arith.constant 0 : i32
    %c0_i32_0 = arith.constant 0 : i32
    %c0_i32_1 = arith.constant 0 : i32
    %c0_i32_2 = arith.constant 0 : i32
    return %c0_i32, %c0_i32_0, %c0_i32_1 : i32, i32, i32
  }
  func.func @transform_4(%arg0: i32) -> (i32, i32) {
    %c0_i32 = arith.constant 0 : i32
    %c0_i32_0 = arith.constant 0 : i32
    %c0_i32_1 = arith.constant 0 : i32
    return %c0_i32, %c0_i32_0 : i32, i32
  }
  func.func @transform_5(%arg0: i32) -> (i32, i32, i32) {
    %c0_i32 = arith.constant 0 : i32
    %c0_i32_0 = arith.constant 0 : i32
    %c0_i32_1 = arith.constant 0 : i32
    %c0_i32_2 = arith.constant 0 : i32
    return %c0_i32, %c0_i32_0, %c0_i32_1 : i32, i32, i32
  }
  func.func @transform_6(%arg0: i32) -> (i32, i32, i32) {
    %c0_i32 = arith.constant 0 : i32
    %c0_i32_0 = arith.constant 0 : i32
    %c0_i32_1 = arith.constant 0 : i32
    %c0_i32_2 = arith.constant 0 : i32
    return %c0_i32, %c0_i32_0, %c0_i32_1 : i32, i32, i32
  }
  func.func @transform_7(%arg0: i32) -> (i32, i32, i32) {
    %c0_i32 = arith.constant 0 : i32
    %c0_i32_0 = arith.constant 0 : i32
    %c0_i32_1 = arith.constant 0 : i32
    %c0_i32_2 = arith.constant 0 : i32
    return %c0_i32, %c0_i32_0, %c0_i32_1 : i32, i32, i32
  }
  func.func @transform_8(%arg0: i32) -> (i32, i32, i32) {
    %c0_i32 = arith.constant 0 : i32
    %c0_i32_0 = arith.constant 0 : i32
    %c0_i32_1 = arith.constant 0 : i32
    %c0_i32_2 = arith.constant 0 : i32
    return %c0_i32, %c0_i32_0, %c0_i32_1 : i32, i32, i32
  }
  func.func @transform_9(%arg0: i32) -> (i32, i32, i32) {
    %c0_i32 = arith.constant 0 : i32
    %c0_i32_0 = arith.constant 0 : i32
    %c0_i32_1 = arith.constant 0 : i32
    %c0_i32_2 = arith.constant 0 : i32
    return %c0_i32, %c0_i32_0, %c0_i32_1 : i32, i32, i32
  }
  func.func @transform_10(%arg0: i32) -> (i32, i32) {
    %c0_i32 = arith.constant 0 : i32
    %c0_i32_0 = arith.constant 0 : i32
    %c0_i32_1 = arith.constant 0 : i32
    return %c0_i32, %c0_i32_0 : i32, i32
  }
  func.func @transform_11(%arg0: i32) -> (i32, i32) {
    %c0_i32 = arith.constant 0 : i32
    %c0_i32_0 = arith.constant 0 : i32
    %c0_i32_1 = arith.constant 0 : i32
    return %c0_i32, %c0_i32_0 : i32, i32
  }
  func.func @transform_12(%arg0: i32) -> (i32, i32) {
    %c0_i32 = arith.constant 0 : i32
    %c0_i32_0 = arith.constant 0 : i32
    %c0_i32_1 = arith.constant 0 : i32
    return %c0_i32, %c0_i32_0 : i32, i32
  }
  func.func @transform_13(%arg0: i32) -> (i32, i32) {
    %c0_i32 = arith.constant 0 : i32
    %c0_i32_0 = arith.constant 0 : i32
    %c0_i32_1 = arith.constant 0 : i32
    return %c0_i32, %c0_i32_0 : i32, i32
  }
  func.func @transform_14(%arg0: i32) -> (i32, i32) {
    %c0_i32 = arith.constant 0 : i32
    %c0_i32_0 = arith.constant 0 : i32
    %c0_i32_1 = arith.constant 0 : i32
    return %c0_i32, %c0_i32_0 : i32, i32
  }
  func.func @transform_15(%arg0: i32) -> (i32, i32, i32) {
    %c0_i32 = arith.constant 0 : i32
    %c0_i32_0 = arith.constant 0 : i32
    %c0_i32_1 = arith.constant 0 : i32
    return %arg0, %c0_i32, %c0_i32_0 : i32, i32, i32
  }
}

</mosaic_0001>

<bundles_post_ra>
// kernel: network_forward.1
= control target key start
LH: loop header
LB: loop body
LE: loop exit
PB: predicated region body
PF: predicated region fallthrough
CT: control target
= control target key end

     0   :  { %s13774_s0 = inlined_call_operand.vmem [shape: f32[2,8,28,28], index: 0, kind: input, shape index: {}]   ;;  %s13775_s1 = inlined_call_operand.vmem [shape: f32[5,28,144], index: 1, kind: input, shape index: {}]   ;;  %s13776_s2 = inlined_call_operand.vmem [shape: f32[1,144], index: 2, kind: input, shape index: {}]   ;;  %s13777_s3 = inlined_call_operand.vmem [shape: f32[5,72,96], index: 3, kind: input, shape index: {}]   ;;  %s13778_s4 = inlined_call_operand.vmem [shape: f32[1,96], index: 4, kind: input, shape index: {}]   ;;  %s13779_s5 = inlined_call_operand.vmem [shape: f32[2,144,72], index: 5, kind: input, shape index: {}]   ;;  %s13780_s6 = inlined_call_operand.vmem [shape: f32[2,12,24], index: 6, kind: input, shape index: {}]   ;;  %s13781_s7 = inlined_call_operand.vmem [shape: f32[2,96,48], index: 7, kind: input, shape index: {}]   ;;  %s13782_s8 = inlined_call_operand.vmem [shape: f32[2,4,8], index: 8, kind: input, shape index: {}]   ;;  %s13783_s9 = inlined_call_operand.vmem [shape: f32[4,48,128], index: 9, kind: input, shape index: {}]   ;;  %s13784_s10 = inlined_call_operand.vmem [shape: f32[1,128], index: 10, kind: input, shape index: {}]   ;;  %s13785_s11 = inlined_call_operand.vmem [shape: f32[128,128], index: 11, kind: input, shape index: {}]   ;;  %s13786_s12 = inlined_call_operand.vmem [shape: f32[1,128], index: 12, kind: input, shape index: {}]   ;;  %s13787_s13 = inlined_call_operand.hbm [shape: f32[128,128], index: 13, kind: input, shape index: {}]   ;;  %s13788_s14 = inlined_call_operand.vmem [shape: f32[1,128], index: 14, kind: input, shape index: {}]   ;;  %s13789_s15 = inlined_call_operand.hbm [shape: f32[2,8,128], index: 15, kind: output, shape index: {}]  }
   0x1   :  { %14129 = sst [smem:[#allocation108_spill]] %s13774_s0 }
   0x2   :  { %14130 = sst [smem:[#allocation109_spill]] %s13775_s1 }
   0x3   :  { %14131 = sst [smem:[#allocation110_spill]] %s13776_s2 }
   0x4   :  { %14132 = sst [smem:[#allocation111_spill]] %s13787_s13 }
   0x5   :  { %20 = vsyncpa [#allocation3], 0 }
   0x6   :  { %21 = vsyncpa [#allocation4], 0 }
   0x7   :  { %23 = vsyncpa [#allocation4 + $0x1], 0  ;;  %s8336_s18 = smov 0   ;;  %s8338_s19 = smov 0  }
   0x8   :  { %s8340_s20 = smov 0   ;;  %s8342_s21 = smov 0  }
   0x9 LB: > { %14133 = sst [smem:[#allocation8_spill]] %s8247_s20  ;;  %s8357_s22 = sadd.s32 4294967295, %s8251_s21   ;;  %s8251_s21 = sphi %s8342_s21, %s14834_s21   ;;  %s8247_s20 = sphi %s8340_s20, %s14836_s20   ;;  %s8243_s19 = sphi %s8338_s19, %s14838_s19   ;;  %s8239_s18 = sphi %s8336_s18, %s14837_s18  }
   0xa   : > { %s6907_s23 = sadd.s32 4294967294, %s8251_s21   ;;  %s8361_s24 = sadd.s32 1, %s8251_s21  }
   0xb   : > { %14134 = sst [smem:[#allocation9_spill]] %s8361_s24  ;;  %s356_s25 = sadd.s32 1, %s8247_s20 }
   0xc   : > { %s353_s26 = ssub.s32 %s8251_s21, %s8361_s24  ;;  %p366_p0 = scmp.ne.s32.totalorder %s8247_s20, %s8243_s19 }
   0xd   : > { %p354_p1 = scmp.eq.s32.totalorder %s353_s26, 0  ;;  %p367_p2 = scmp.eq.s32.totalorder %s8357_s22, 1 }
   0xe   : > { %p372_p3 = scmp.ne.s32.totalorder %s8243_s19, %s8239_s18  ;;  %p373_p4 = scmp.eq.s32.totalorder %s6907_s23, 1 }
   0xf   : > { %s8372_s27 = scalar_select %p354_p1, %s8247_s20, %s356_s25  }
  0x10   : > { %p8374_p5 = por %p367_p2, %p366_p0  ;;  %p8378_p6 = por %p373_p4, %p372_p3 }
  0x11   : > { %14135 = sst [smem:[#allocation10_spill]] %s8372_s27  ;;  %p6908_p7 = scmp.ge.s32.totalorder %s8251_s21, 1 }
  0x12   : > { %p380_p8 = scmp.lt.s32.totalorder %s8251_s21, 3  ;;  %p7643_p9 = scmp.eq.s32.totalorder %s8357_s22, 0 }
  0x13   : > { %s14138_s13 = sld [smem:[#allocation111_spill]]  ;;  %s8253_s23 = smov [#allocation2]  }
  0x14   : > { %p381_p10 = pnand %p6908_p7, %p380_p8  ;;  %s429_s25 = sshll.u32 %s8253_s23, 4  ;;  %s430_s25 = int_to_ptr.vmem [resolvable:$true] %s429_s25 }
  0x15   : > { %s8254_s26 = smov 128   ;;  %s8255_s27 = smov 8  }
  0x16   : > { %p7635_p11 = pneg %p381_p10  ;;  %456 = sbr.rel (%p381_p10) target bundleno = 6826 (0x1aaa), region = 80 }
  0x18   : > { %p7636_p12 = pnand %p7643_p9, %p7635_p11 }
  0x19   : > { %s427_s17 = sshll.u32 %s14138_s13, 4  ;;  %s428_s17 = int_to_ptr.hbm [resolvable:$true] %s427_s17 }
  0x1a   : > { %7638 = dma.hbm_to_vmem [thread:$0]  (!%p7636_p12), %s428_s17, 2048, %s430_s25, [#allocation3], %s8254_s26, %s8254_s26, %s8255_s27  }
  0x1b   : > { %8230 = dma.done.wait (%p7643_p9), [#allocation3], 2048  }
  0x1c   : > { %8232 = vsyncadd (%p7643_p9), [#allocation3], 4294965248  ;;  %p505_p13 = scmp.lt.s32.totalorder %s8357_s22, 1  ;;  %vm543_vm0 = vcmask 1043456   ;;  %s14139_s1 = sld [smem:[#allocation109_spill]]  ;;  %vm533_vm1 = vcmask 228352  }
  0x1d   : > { %s14140_s0 = sld [smem:[#allocation108_spill]]  ;;  %v8675_v57 = vld [vmem:[%s13779_s5 + $0x78] sm:$0xff]  ;;  %v8680_v58 = vld [vmem:[%s13779_s5 + $0x108] sm:$0xff]  ;;  %v8687_v59 = vld [vmem:[%s13779_s5 + $0x70] sm:$0xff]  ;;  %vm954_vm2 = vcmask 130048   ;;  %vm1092_vm3 = vcmask 195584  }
  0x1e   : > { %s506_s30 = scalar_select %p505_p13, %s8357_s22, 1  ;;  %14150 = vst [vmem:[#allocation20_spill] sm:$0xff] %v8680_v58  ;;  %v8692_v60 = vld [vmem:[%s13779_s5 + $0x100] sm:$0xff]  ;;  %v8699_v61 = vld [vmem:[%s13779_s5 + $0x68] sm:$0xff]  ;;  %v8709_v63 = vld [vmem:[%s13779_s5 + $0xf8] sm:$0xff]  ;;  %vm1181_vm4 = vcmask 588800  }
  0x1f   : > { %14151 = vst [vmem:[#allocation21_spill] sm:$0xff] %v8692_v60  ;;  %v8704_v62 = vld [vmem:[%s13779_s5 + $0x88] sm:$0xff]  ;;  %s14168_s2 = sld [smem:[#allocation110_spill]]  ;;  %vm1177_vm5 = vcmask 1045504   ;;  %vm1282_vm6 = vcmask 1044480   ;;  %vm1308_vm7 = vcmask 1046528  }
  0x20   : > { %s7620_s16 = sshll.u32 %s506_s30, 8  ;;  %14152 = vst [vmem:[#allocation22_spill] sm:$0xff] %v8709_v63  ;;  %vm1353_vm8 = vcmask 785408   ;;  %vm1412_vm9 = vcmask 64512   ;;  %vm6537_vm10 = vcmask 1040384   ;;  %vm6539_vm11 = vcmask 1041408  }
  0x21   : > { %vm6541_vm12 = vcmask 1042432   ;;  %vm6582_vm13 = vcmask 392192   ;;  %s502_s20 = sand.u32 1, %s8243_s19   ;;  %s8205_s23 = scalar_lea.hbm %s13789_s15, 16 }
  0x22   : > { %v6922_v0 = vld [vmem:[%s14139_s1 + $0xb0] sm:$0xf]  ;;  %v6923_v1 = vld [vmem:[%s14139_s1 + $0xb8] sm:$0xf]  ;;  %v6920_v2 = vld [vmem:[%s14139_s1 + $0xa0] sm:$0xff]  ;;  %s6913_s24 = sshll.u32 %s502_s20, 3 }
  0x23   : > { %6924 = vmatpush.msk.msra.mxu0 %vm543_vm0, %v6922_v0  ;;  %6928 = vmatpush.msk.msra.mxu1 %vm543_vm0, %v6923_v1  ;;  %v6921_v3 = vld [vmem:[%s14139_s1 + $0xa8] sm:$0xff]  ;;  %v6918_v4 = vld [vmem:[%s14139_s1 + $0x90] sm:$0xff]  ;;  %v6919_v5 = vld [vmem:[%s14139_s1 + $0x98] sm:$0xff]  ;;  %s8420_s17 = scalar_lea.vmem %s14140_s0, %s7620_s16  ;;  %s504_s0 = scalar_lea.vmem [#allocation5], %s6913_s24 }
  0x24   : > { %7621 = vmatpush.msk.msra.mxu2 %vm543_vm0, %v6923_v1  ;;  %v8425_v6 = vld [vmem:[%s14139_s1 + $0x38] sm:$0xf]  ;;  %v6916_v7 = vld [vmem:[%s14139_s1 + $0x80] sm:$0xff]  ;;  %v6917_v8 = vld [vmem:[%s14139_s1 + $0x88] sm:$0xff]  ;;  %s6821_s30 = scalar_lea.sflag [#allocation4], %s502_s20 }
  0x25   : > { %563 = vmatpush.msra.mxu0 %v6920_v2  ;;  %589 = vmatpush.msra.mxu1 %v6921_v3  ;;  %v8438_v9 = vld [vmem:[%s14139_s1 + $0x28] sm:$0xff]  ;;  %v6947_v12 = vld [vmem:[%s14139_s1 + $0x138] sm:$0xf]  ;;  %v8455_v14 = vld [vmem:[%s14139_s1 + $0x30] sm:$0xf] }
  0x26   : > { %7622 = vmatpush.msra.mxu2 %v6921_v3  ;;  %7625 = vmatpush.msk.msra.mxu3 %vm543_vm0, %v8425_v6  ;;  %v521_v10 = vld [vmem:[%s8420_s17 + $0x2] sm:$0xff]  ;;  %v522_v11 = vld [vmem:[%s8420_s17 + $0xa] sm:$0xff]  ;;  %v8449_v13 = vld [vmem:[%s14139_s1 + $0x18] sm:$0xff] }
  0x27   : > { %564 = vmatpush.msra.mxu0 %v6918_v4  ;;  %590 = vmatpush.msra.mxu1 %v6919_v5  ;;  %v6945_v15 = vld [vmem:[%s14139_s1 + $0x128] sm:$0xff]  ;;  %v8475_v18 = vld [vmem:[%s14139_s1 + $0x20] sm:$0xff]  ;;  %v6943_v19 = vld [vmem:[%s14139_s1 + $0x118] sm:$0xff] }
  0x28   : > { %7623 = vmatpush.msra.mxu2 %v6919_v5  ;;  %7626 = vmatpush.msra.mxu3 %v8438_v9  ;;  %v8465_v16 = vld [vmem:[%s14139_s1 + $0x8] sm:$0xff]  ;;  %v8488_v20 = vld [vmem:[%s14139_s1 + $0x10] sm:$0xff]  ;;  %v8493_v21 = vld [vmem:[%s14139_s1 + $0xf8] sm:$0xf] }
  0x29   : > { %565 = vmatpush.msra.mxu0 %v6916_v7  ;;  %591 = vmatpush.msra.mxu1 %v6917_v8  ;;  %v8470_v17 = vld [vmem:[%s8420_s17 + $0x8] sm:$0xff]  ;;  %v523_v23 = vld [vmem:[%s8420_s17 + $0x12] sm:$0xff]  ;;  %v8508_v25 = vld [vmem:[%s14139_s1] sm:$0xff] }
  0x2a   : > { %7624 = vmatpush.msra.mxu2 %v6917_v8  ;;  %6925 = vmatmul.msk.f32.vlgmr.msra.gmra.mxu0 %vm533_vm1, %v521_v10  ;;  %v6941_v22 = vld [vmem:[%s14139_s1 + $0x108] sm:$0xff]  ;;  %v6963_v27 = vld [vmem:[%s14139_s1 + $0x78] sm:$0xf]  ;;  %v8529_v28 = vld [vmem:[%s14139_s1 + $0xf0] sm:$0xf] }
  0x2b   : > { %6929 = vmatmul.msk.f32.vlgmr.msra.gmra.mxu1 %vm533_vm1, %v521_v10  ;;  %6930 = vmatmul.msk.f32.vlgmr.msra.gmra.mxu2 %vm533_vm1, %v522_v11  ;;  %v8503_v24 = vld [vmem:[%s8420_s17 + $0x4] sm:$0xff]  ;;  %v512_v29 = vld [vmem:[%s8420_s17 + $0x10] sm:$0xff]  ;;  %v8543_v31 = vld [vmem:[%s14139_s1 + $0xd8] sm:$0xff] }
  0x2c   : > { %6952 = vmatpush.msk.msrb.mxu1 %vm543_vm0, %v6947_v12  ;;  %7627 = vmatpush.msra.mxu3 %v8449_v13  ;;  %v8518_v26 = vld [vmem:[%s14139_s1 + $0xe8] sm:$0xff]  ;;  %v8537_v30 = vld [vmem:[%s14139_s1 + $0x130] sm:$0xf]  ;;  %v8553_v33 = vld [vmem:[%s14139_s1 + $0x120] sm:$0xff] }
  0x2d   : > { %6932 = vmatpush.msk.msrb.mxu2 %vm543_vm0, %v8455_v14  ;;  %6936 = vmatpush.msk.msrb.mxu0 %vm543_vm0, %v8425_v6  ;;  %v6961_v32 = vld [vmem:[%s14139_s1 + $0x68] sm:$0xff]  ;;  %14141 = vst [vmem:[#allocation11_spill] sm:$0xff] %v8553_v33  ;;  %v8560_v34 = vld [vmem:[%s14139_s1 + $0xe0] sm:$0xff]  ;;  %v8577_v38 = vld [vmem:[%s14139_s1 + $0x110] sm:$0xff] }
  0x2e   : > { %735 = vmatpush.msrb.mxu1 %v6945_v15  ;;  %7628 = vmatpush.msra.mxu3 %v8465_v16  ;;  %v8568_v35 = vld [vmem:[%s14139_s1 + $0xc8] sm:$0xff]  ;;  %v510_v36 = vld [vmem:[%s8420_s17] sm:$0xff]  ;;  %14142 = vst [vmem:[#allocation12_spill] sm:$0xff] %v8577_v38  ;;  %v8582_v39 = vld [vmem:[%s14139_s1 + $0x58] sm:$0xff] }
  0x2f   : > { %6938 = vmatmul.msk.f32.vlgmr.msra.gmra.mxu3 %vm533_vm1, %v8470_v17  ;;  %630 = vmatpush.msrb.mxu2 %v8475_v18  ;;  %v670_v37 = vld [vmem:[%s8420_s17 + $0xc] sm:$0xff]  ;;  %14143 = vst [vmem:[#allocation13_spill] sm:$0xff] %v8582_v39  ;;  %v8597_v41 = vld [vmem:[%s14139_s1 + $0x100] sm:$0xff]  ;;  %v671_v45 = vld [vmem:[%s8420_s17 + $0x14] sm:$0xff] }
  0x30   : > { %736 = vmatpush.msrb.mxu1 %v6943_v19  ;;  %656 = vmatpush.msrb.mxu0 %v8438_v9  ;;  %v8590_v40 = vld [vmem:[%s14139_s1 + $0xd0] sm:$0xff]  ;;  %14144 = vst [vmem:[#allocation14_spill] sm:$0xff] %v8597_v41  ;;  %v8602_v42 = vld [vmem:[%s14139_s1 + $0x48] sm:$0xff]  ;;  %v8610_v44 = vld [vmem:[%s14139_s1 + $0xc0] sm:$0xff] }
  0x31   : > { %631 = vmatpush.msrb.mxu2 %v8488_v20  ;;  %6976 = vmatpush.msk.msrb.mxu3 %vm543_vm0, %v8493_v21  ;;  %14145 = vst [vmem:[#allocation15_spill] sm:$0xff] %v8602_v42  ;;  %v766_v43 = vld [vmem:[%s8420_s17 + $0x3] sm:$0xff]  ;;  %v8621_v46 = vld [vmem:[%s14139_s1 + $0x70] sm:$0xf]  ;;  %v8718_v1 = vld [vmem:[%s13779_s5 + $0x118] sm:$0xff] }
  0x32   : > { %737 = vmatpush.msrb.mxu1 %v6941_v22  ;;  %6926 = vmatmul.msk.f32.gmra.mxu0 %vm533_vm1, %v522_v11  ;;  %14146 = vst [vmem:[#allocation16_spill] sm:$0xff] %v8621_v46  ;;  %v8630_v47 = vld [vmem:[%s14139_s1 + $0x60] sm:$0xff]  ;;  %v767_v48 = vld [vmem:[%s8420_s17 + $0xb] sm:$0xff]  ;;  %v768_v52 = vld [vmem:[%s8420_s17 + $0x13] sm:$0xff] }
  0x33   : > { %6931 = vmatmul.msk.f32.gmra.mxu2 %vm533_vm1, %v523_v23  ;;  %6953 = vmatmul.msk.f32.vlgmr.msrb.gmra.mxu1 %vm533_vm1, %v8503_v24  ;;  %14147 = vst [vmem:[#allocation17_spill] sm:$0xff] %v8630_v47  ;;  %v8638_v49 = vld [vmem:[%s14139_s1 + $0x50] sm:$0xff]  ;;  %v754_v50 = vld [vmem:[%s8420_s17 + $0x1] sm:$0xff]  ;;  %v8753_v10 = vld [vmem:[%s13779_s5 + $0x58] sm:$0xff] }
  0x34   : > { %632 = vmatpush.msrb.mxu2 %v8508_v25  ;;  %657 = vmatpush.msrb.mxu0 %v8449_v13  ;;  %14148 = vst [vmem:[#allocation18_spill] sm:$0xff] %v8638_v49  ;;  %v8647_v51 = vld [vmem:[%s14139_s1 + $0x40] sm:$0xff]  ;;  %v755_v53 = vld [vmem:[%s8420_s17 + $0x9] sm:$0xff]  ;;  %v756_v54 = vld [vmem:[%s8420_s17 + $0x11] sm:$0xff] }
  0x35   : > { %832 = vmatpush.msrb.mxu3 %v8518_v26  ;;  %6984 = vmatpush.msk.msra.mxu1 %vm543_vm0, %v6963_v27  ;;  %14149 = vst [vmem:[#allocation19_spill] sm:$0xff] %v8647_v51  ;;  %v8727_v3 = vld [vmem:[%s13779_s5 + $0x60] sm:$0xff]  ;;  %v8737_v5 = vld [vmem:[%s13779_s5 + $0xf0] sm:$0xff]  ;;  %v8758_v11 = vld [vmem:[%s13779_s5 + $0xe8] sm:$0xff] }
  0x36   : > { %658 = vmatpush.msrb.mxu0 %v8465_v16  ;;  %6972 = vmatpush.msk.msra.mxu2 %vm543_vm0, %v8529_v28  ;;  %14153 = vst [vmem:[#allocation23_spill] sm:$0xff] %v8718_v1  ;;  %v8732_v4 = vld [vmem:[%s13779_s5 + $0x80] sm:$0xff]  ;;  %v8746_v8 = vld [vmem:[%s13779_s5 + $0x110] sm:$0xff]  ;;  %v8777_v19 = vld [vmem:[%s13779_s5 + $0x48] sm:$0xff] }
  0x37   : > { %6939 = vmatmul.msk.f32.gmra.mxu3 %vm533_vm1, %v512_v29  ;;  %899 = vmatpush.msra.mxu1 %v6961_v32  ;;  %14154 = vst [vmem:[#allocation24_spill] sm:$0xff] %v8737_v5  ;;  %v8767_v15 = vld [vmem:[%s13779_s5 + $0x50] sm:$0xff]  ;;  %v8783_v22 = vld [vmem:[%s13779_s5 + $0xd8] sm:$0xff]  ;;  %v8795_v27 = vld [vmem:[%s13779_s5 + $0x40] sm:$0xff] }
  0x38   : > { %6948 = vmatpush.msk.msra.mxu0 %vm543_vm0, %v8537_v30  ;;  %833 = vmatpush.msrb.mxu3 %v8543_v31  ;;  %14155 = vst [vmem:[#allocation25_spill] sm:$0xff] %v8746_v8 }
  0x39   : > { %806 = vmatpush.msra.mxu2 %v8560_v34  ;;  %900 = vmatpush.msra.mxu1 %v8582_v39  ;;  %14156 = vst [vmem:[#allocation26_spill] sm:$0xff] %v8758_v11 }
  0x3a   : > { %709 = vmatpush.msra.mxu0 %v8553_v33  ;;  %834 = vmatpush.msrb.mxu3 %v8568_v35  ;;  %14158 = vst [vmem:[#allocation28_spill] sm:$0xff] %v8783_v22 }
  0x3b   : > { %6927 = vmatmul.msk.f32.gmra.mxu0 %vm533_vm1, %v523_v23  ;;  %6933 = vmatmul.msk.f32.vlgmr.msrb.gmra.mxu2 %vm533_vm1, %v510_v36 }
  0x3c   : > { %6954 = vmatmul.msk.f32.gmra.mxu1 %vm533_vm1, %v670_v37  ;;  %710 = vmatpush.msra.mxu0 %v8577_v38 }
  0x3d   : > { %807 = vmatpush.msra.mxu2 %v8590_v40  ;;  %901 = vmatpush.msra.mxu1 %v8602_v42 }
  0x3e   : > { %711 = vmatpush.msra.mxu0 %v8597_v41  ;;  %1004 = vmatpush.msra.mxu3 %v8704_v62 }
  0x3f   : > { %6977 = vmatmul.msk.f32.vlgmr.msrb.gmra.mxu3 %vm533_vm1, %v766_v43  ;;  %808 = vmatpush.msra.mxu2 %v8610_v44 }
  0x40   : > { %1075 = vmatpush.msrb.mxu1 %v8718_v1  ;;  %1005 = vmatpush.msra.mxu3 %v8732_v4 }
  0x41   : > { %964 = vmatpush.msrb.mxu2 %v8675_v57 }
  0x42   : > { %1076 = vmatpush.msrb.mxu1 %v8746_v8  ;;  %v918_v8 = vld [vmem:[%s14168_s2] sm:$0x3] }
  0x43   : > { %6937 = vmatmul.msk.f32.vlgmr.msrb.gmra.mxu0 %vm533_vm1, %v510_v36  ;;  %6934 = vmatmul.msk.f32.gmra.mxu2 %vm533_vm1, %v8470_v17  ;;  %v8772_v17 = vld [vmem:[%s13779_s5 + $0xe0] sm:$0xff]  ;;  %v8807_v36 = vld [vmem:[%s13779_s5 + $0x38] sm:$0xff] }
  0x44   : > { %6955 = vmatmul.msk.f32.gmra.mxu1 %vm533_vm1, %v671_v45  ;;  %6980 = vmatpush.msk.msrb.mxu0 %vm543_vm0, %v8621_v46  ;;  %14157 = vst [vmem:[#allocation27_spill] sm:$0xff] %v8772_v17 }
  0x45   : > { %965 = vmatpush.msrb.mxu2 %v8687_v59 }
  0x46   : > { %873 = vmatpush.msrb.mxu0 %v8630_v47 }
  0x47   : > { %6978 = vmatmul.msk.f32.gmra.mxu3 %vm533_vm1, %v767_v48  ;;  %966 = vmatpush.msrb.mxu2 %v8699_v61 }
  0x48   : > { %874 = vmatpush.msrb.mxu0 %v8638_v49 }
  0x49   : > { %967 = vmatpush.msrb.mxu2 %v8727_v3 }
  0x4a   : > { %875 = vmatpush.msrb.mxu0 %v8647_v51  ;;  %v8904_v51 = vperm.slane %v918_v8, 1 }
  0x4b   : > { %6949 = vmatmul.msk.f32.vlgmr.msra.gmra.mxu0 %vm533_vm1, %v8503_v24  ;;  %6935 = vmatmul.msk.f32.gmra.mxu2 %vm533_vm1, %v512_v29  ;;  %v8800_v29 = vld [vmem:[%s13779_s5 + $0xd0] sm:$0xff] }
  0x4c   : > { %6985 = vmatmul.msk.f32.vlgmr.msra.gmra.mxu1 %vm533_vm1, %v754_v50  ;;  %1035 = vmatpush.msra.mxu0 %v8680_v58  ;;  %14159 = vst [vmem:[#allocation29_spill] sm:$0xff] %v8800_v29 }
  0x4d   : > { %968 = vmatpush.msrb.mxu2 %v8753_v10  ;;  %14170 = vst [vmem:[#allocation39_spill] sm:$0xff] %v8904_v51 }
  0x4e   : > { %1036 = vmatpush.msra.mxu0 %v8692_v60 }
  0x4f   : > { %6979 = vmatmul.msk.f32.gmra.mxu3 %vm533_vm1, %v768_v52  ;;  %969 = vmatpush.msrb.mxu2 %v8767_v15 }
  0x50   : > { %1037 = vmatpush.msra.mxu0 %v8709_v63  ;;  %v8885_v63 = vld [vmem:[%s13779_s5 + $0x98] sm:$0xff] }
  0x51   : > { %970 = vmatpush.msrb.mxu2 %v8777_v19  ;;  %14167 = vst [vmem:[#allocation37_spill] sm:$0xff] %v8885_v63 }
  0x52   : > { %1038 = vmatpush.msra.mxu0 %v8737_v5 }
  0x53   : > { %6950 = vmatmul.msk.f32.gmra.mxu0 %vm533_vm1, %v670_v37  ;;  %6973 = vmatmul.msk.f32.vlgmr.msra.gmra.mxu2 %vm533_vm1, %v766_v43  ;;  %v8812_v37 = vld [vmem:[%s13779_s5 + $0xc8] sm:$0xff] }
  0x54   : > { %6986 = vmatmul.msk.f32.gmra.mxu1 %vm533_vm1, %v755_v53  ;;  %1039 = vmatpush.msra.mxu0 %v8758_v11  ;;  %14160 = vst [vmem:[#allocation30_spill] sm:$0xff] %v8812_v37  ;;  %v8867_v11 = vld [vmem:[%s13779_s5 + $0x10] sm:$0xff] }
  0x55   : > { %971 = vmatpush.msrb.mxu2 %v8795_v27 }
  0x56   : > { %1040 = vmatpush.msra.mxu0 %v8772_v17 }
  0x57   : > { %972 = vmatpush.msrb.mxu2 %v8807_v36 }
  0x58   : > { %1041 = vmatpush.msra.mxu0 %v8783_v22 }
  0x5a   : > { %1042 = vmatpush.msra.mxu0 %v8800_v29  ;;  %v8848_v29 = vld [vmem:[%s13779_s5 + $0xb0] sm:$0xff] }
  0x5b   : > { %6951 = vmatmul.msk.f32.gmra.mxu0 %vm533_vm1, %v671_v45  ;;  %6974 = vmatmul.msk.f32.gmra.mxu2 %vm533_vm1, %v767_v48  ;;  %v8819_v45 = vld [vmem:[%s13779_s5 + $0x30] sm:$0xff]  ;;  %v8824_v48 = vld [vmem:[%s13779_s5 + $0xc0] sm:$0xff]  ;;  %14163 = vst [vmem:[#allocation33_spill] sm:$0xff] %v8848_v29 }
  0x5c   : > { %6987 = vmatmul.msk.f32.gmra.mxu1 %vm533_vm1, %v756_v54  ;;  %1043 = vmatpush.msra.mxu0 %v8812_v37  ;;  %14161 = vst [vmem:[#allocation31_spill] sm:$0xff] %v8824_v48  ;;  %v8843_v37 = vld [vmem:[%s13779_s5 + $0x20] sm:$0xff] }
  0x5d   : > { %973 = vmatpush.msrb.mxu2 %v8819_v45 }
  0x5e   : > { %1044 = vmatpush.msra.mxu0 %v8824_v48  ;;  %v8855_v48 = vld [vmem:[%s13779_s5 + $0x18] sm:$0xff] }
  0x63   : > { %6981 = vmatmul.msk.f32.vlgmr.msrb.gmra.mxu0 %vm533_vm1, %v754_v50  ;;  %6975 = vmatmul.msk.f32.gmra.mxu2 %vm533_vm1, %v768_v52  ;;  %v8829_v50 = vld [vmem:[%s13779_s5 + $0x28] sm:$0xff]  ;;  %v8835_v52 = vld [vmem:[%s13779_s5 + $0xb8] sm:$0xff] }
  0x64   : > { %14162 = vst [vmem:[#allocation32_spill] sm:$0xff] %v8835_v52  ;;  %974 = vmatpush.msrb.mxu2 %v8829_v50  ;;  %1045 = vmatpush.msra.mxu0 %v8835_v52  ;;  %v8860_v52 = vld [vmem:[%s13779_s5 + $0xa8] sm:$0xff] }
  0x65   : > { %14164 = vst [vmem:[#allocation34_spill] sm:$0xff] %v8860_v52 }
  0x66   : > { %975 = vmatpush.msrb.mxu2 %v8843_v37  ;;  %1046 = vmatpush.msra.mxu0 %v8848_v29  ;;  %v8872_v29 = vld [vmem:[%s13779_s5 + $0xa0] sm:$0xff] }
  0x67   : > { %14165 = vst [vmem:[#allocation35_spill] sm:$0xff] %v8872_v29 }
  0x68   : > { %976 = vmatpush.msrb.mxu2 %v8855_v48  ;;  %1047 = vmatpush.msra.mxu0 %v8860_v52  ;;  %v8880_v52 = vld [vmem:[%s13779_s5 + $0x8] sm:$0xff] }
  0x69   : > { %14166 = vst [vmem:[#allocation36_spill] sm:$0xff] %v8880_v52 }
  0x6a   : > { %977 = vmatpush.msrb.mxu2 %v8867_v11  ;;  %1048 = vmatpush.msra.mxu0 %v8872_v29  ;;  %v8900_v29 = vld [vmem:[%s13779_s5 + $0x90] sm:$0xff] }
  0x6b   : > { %6982 = vmatmul.msk.f32.gmra.mxu0 %vm533_vm1, %v755_v53 }
  0x6c   : > { %978 = vmatpush.msrb.mxu2 %v8880_v52  ;;  %1049 = vmatpush.msra.mxu0 %v8885_v63 }
  0x6e   : > { %1050 = vmatpush.msra.mxu0 %v8900_v29 }
  0x73   : > { %6983 = vmatmul.msk.f32.gmra.mxu0 %vm533_vm1, %v756_v54 }
  0xa7   : > { %v8668_v55 = vpop.f32.mrf.mxu0 }
  0xa8   : > { %v8670_v56 = vpop.f32.mrf.mxu1 }
  0xae   : > { %v8711_v0 = vpop.f32.mrf.mxu2 }
  0xaf   : > { %v8720_v2 = vpop.f32.mrf.mxu0 }
  0xb0   : > { %v8739_v7 = vpop.f32.mrf.mxu1 }
  0xb2   : > { %v8760_v12 = vpop.f32.mrf.mxu3 }
  0xb3   : > { %v664_v49 = vadd.f32 %v8760_v12, %v8711_v0 }
  0xb6   : > { %v8786_v23 = vpop.f32.mrf.mxu2 }
  0xb8   : > { %v8789_v24 = vpop.f32.mrf.mxu0 }
  0xb9   : > { %v742_v32 = vpop.f32.mrf.mxu1 }
  0xba   : > { %v666_v43 = vpop.f32.mrf.mxu3  ;;  %v751_v33 = vadd.f32 %v742_v32, %v664_v49 }
  0xbe   : > { %v634_v53 = vpop.f32.mrf.mxu2 }
  0xc0   : > { %v660_v54 = vpop.f32.mrf.mxu0 }
  0xc1   : > { %v745_v22 = vpop.f32.mrf.mxu1  ;;  %v661_v5 = vadd.f32 %v660_v54, %v8670_v56  ;;  %v8895_v54 = vld [vmem:[%s13779_s5] sm:$0xff] }
  0xc2   : > { %v836_v17 = vpop.f32.mrf.mxu3  ;;  %14169 = vst [vmem:[#allocation38_spill] sm:$0xff] %v8895_v54  ;;  %979 = vmatpush.msrb.mxu2 %v8895_v54 }
  0xc3   : > { %v749_v58 = vadd.f32 %v8739_v7, %v661_v5 }
  0xc6   : > { %v637_v60 = vpop.f32.mrf.mxu2 }
  0xc8   : > { %v713_v56 = vpop.f32.mrf.mxu0 }
  0xc9   : > { %v903_v1 = vpop.f32.mrf.mxu1 }
  0xca   : > { %v904_v42 = vadd.f32 %v903_v1, %v836_v17  ;;  %v839_v39 = vpop.f32.mrf.mxu3 }
  0xcc   : > { %v913_v63 = vadd.f32 %v904_v42, %v749_v58  ;;  %v667_v42 = vadd.f32 %v666_v43, %v8786_v23  ;;  %v8918_v43 = vperm.slane %v918_v8, 0 }
  0xce   : > { %v925_v47 = vadd.f32 %v8904_v51, %v913_v63  ;;  %v640_v54 = vpop.f32.mrf.mxu2  ;;  %v753_v12 = vadd.f32 %v745_v22, %v667_v42  ;;  %14171 = vst [vmem:[#allocation40_spill] sm:$0xff] %v8918_v43  ;;  %v638_v42 = vadd.f32 %v637_v60, %v8720_v2 }
  0xd0   : > { %v931_v46 = vmax.f32 %v925_v47, 0.0  ;;  %v716_v41 = vpop.f32.mrf.mxu0 }
  0xd1   : > { %v906_v38 = vpop.f32.mrf.mxu1 }
  0xd2   : > { %v907_v52 = vadd.f32 %v906_v38, %v839_v39  ;;  %6988 = vmatmul.msk.f32.vlgmr.msra.gmra.mxu3 %vm954_vm2, %v931_v46  ;;  %7009 = vmatmul.msk.f32.vlgmr.msrb.gmra.mxu1 %vm954_vm2, %v931_v46  ;;  %v842_v5 = vpop.f32.mrf.mxu3 }
  0xd4   : > { %v915_v1 = vadd.f32 %v907_v52, %v751_v33  ;;  %v635_v33 = vadd.f32 %v634_v53, %v8668_v55 }
  0xd6   : > { %v927_v58 = vadd.f32 %v8904_v51, %v915_v1  ;;  %v810_v38 = vpop.f32.mrf.mxu2  ;;  %v748_v23 = vadd.f32 %v713_v56, %v635_v33 }
  0xd8   : > { %v719_v0 = vpop.f32.mrf.mxu0  ;;  %v933_v7 = vmax.f32 %v927_v58, 0.0 }
  0xd9   : > { %v909_v63 = vpop.f32.mrf.mxu1 }
  0xda   : > { %v910_v47 = vadd.f32 %v909_v63, %v842_v5  ;;  %6989 = vmatmul.msk.f32.gmra.mxu3 %vm954_vm2, %v933_v7  ;;  %7010 = vmatmul.msk.f32.gmra.mxu1 %vm954_vm2, %v933_v7  ;;  %v750_v7 = vadd.f32 %v716_v41, %v638_v42  ;;  %v641_v63 = vadd.f32 %v640_v54, %v8789_v24  ;;  %v8930_v24 = vld [vmem:[%s13777_s3 + $0x40] sm:$0xff]  ;;  %v8936_v54 = vld [vmem:[%s13777_s3 + $0x38] sm:$0xff]  ;;  %v8959_v42 = vld [vmem:[%s13777_s3 + $0x110] sm:$0xff] }
  0xdb   : > { %1213 = vmatpush.msra.mxu1 %v8930_v24  ;;  %14173 = vst [vmem:[#allocation42_spill] sm:$0xff] %v8959_v42 }
  0xdc   : > { %v917_v39 = vadd.f32 %v910_v47, %v753_v12 }
  0xdd   : > { %1214 = vmatpush.msra.mxu1 %v8936_v54 }
  0xde   : > { %v929_v49 = vadd.f32 %v8904_v51, %v917_v39  ;;  %v813_v52 = vpop.f32.mrf.mxu2  ;;  %v8984_v51 = vld [vmem:[%s13780_s6] sm:$0xff] }
  0xdf   : > { %14174 = vst [vmem:[#allocation43_spill] sm:$0xff] %v8984_v51 }
  0xe0   : > { %v877_v46 = vpop.f32.mrf.mxu0  ;;  %v935_v17 = vmax.f32 %v929_v49, 0.0 }
  0xe1   : > { %v878_v32 = vadd.f32 %v877_v46, %v810_v38  ;;  %v752_v38 = vadd.f32 %v719_v0, %v641_v63 }
  0xe2   : > { %6990 = vmatmul.msk.f32.gmra.mxu3 %vm954_vm2, %v935_v17  ;;  %7011 = vmatmul.msk.f32.gmra.mxu1 %vm954_vm2, %v935_v17 }
  0xe3   : > { %v912_v22 = vadd.f32 %v878_v32, %v748_v23  ;;  %v8941_v23 = vld [vmem:[%s13777_s3 + $0x30] sm:$0xff] }
  0xe4   : > { %1215 = vmatpush.msra.mxu1 %v8941_v23 }
  0xe5   : > { %v924_v1 = vadd.f32 %v8918_v43, %v912_v22 }
  0xe6   : > { %v816_v56 = vpop.f32.mrf.mxu2 }
  0xe7   : > { %v930_v58 = vmax.f32 %v924_v1, 0.0  ;;  %v8952_v1 = vld [vmem:[%s13777_s3 + $0x118] sm:$0xff] }
  0xe8   : > { %v880_v5 = vpop.f32.mrf.mxu0  ;;  %14172 = vst [vmem:[#allocation41_spill] sm:$0xff] %v8952_v1  ;;  %1295 = vmatpush.msrb.mxu0 %v8952_v1 }
  0xe9   : > { %v881_v55 = vadd.f32 %v880_v5, %v813_v52  ;;  %980 = vmatmul.f32.vlgmr.msrb.gmra.mxu2 %v930_v58  ;;  %1051 = vmatmul.f32.vlgmr.msra.gmra.mxu0 %v930_v58  ;;  %v8947_v52 = vld [vmem:[%s13777_s3 + $0x28] sm:$0xff]  ;;  %v8964_v5 = vld [vmem:[%s13777_s3 + $0x20] sm:$0xff] }
  0xea   : > { %1216 = vmatpush.msra.mxu1 %v8947_v52  ;;  %1296 = vmatpush.msrb.mxu0 %v8959_v42 }
  0xeb   : > { %v914_v53 = vadd.f32 %v881_v55, %v750_v7  ;;  %v8971_v7 = vld [vmem:[%s13777_s3 + $0x18] sm:$0xff]  ;;  %v8977_v55 = vld [vmem:[%s13777_s3 + $0x10] sm:$0xff] }
  0xec   : > { %1217 = vmatpush.msra.mxu1 %v8964_v5 }
  0xed   : > { %v926_v8 = vadd.f32 %v8918_v43, %v914_v53 }
  0xee   : > { %1218 = vmatpush.msra.mxu1 %v8971_v7 }
  0xef   : > { %v932_v12 = vmax.f32 %v926_v8, 0.0 }
  0xf0   : > { %v883_v47 = vpop.f32.mrf.mxu0  ;;  %1219 = vmatpush.msra.mxu1 %v8977_v55 }
  0xf1   : > { %v884_v39 = vadd.f32 %v883_v47, %v816_v56  ;;  %983 = vmatmul.f32.gmra.mxu2 %v932_v12  ;;  %1054 = vmatmul.f32.gmra.mxu0 %v932_v12 }
  0xf3   : > { %v916_v49 = vadd.f32 %v884_v39, %v752_v38 }
  0xf5   : > { %v928_v60 = vadd.f32 %v8918_v43, %v916_v49 }
  0xf7   : > { %v934_v2 = vmax.f32 %v928_v60, 0.0 }
  0xf9   : > { %986 = vmatmul.f32.gmra.mxu2 %v934_v2  ;;  %1057 = vmatmul.f32.gmra.mxu0 %v934_v2 }
 0x14f   : > { %v1078_v33 = vpop.f32.mrf.mxu1 }
 0x155   : > { %v1007_v46 = vpop.f32.mrf.mxu3 }
 0x157   : > { %v1081_v32 = vpop.f32.mrf.mxu1 }
 0x15d   : > { %v1010_v22 = vpop.f32.mrf.mxu3 }
 0x15f   : > { %v1084_v8 = vpop.f32.mrf.mxu1 }
 0x165   : > { %v1013_v56 = vpop.f32.mrf.mxu3 }
 0x166   : > { %v1052_v41 = vpop.f32.mrf.mxu0 }
 0x167   : > { %v1079_v2 = vadd.f32 %v1078_v33, %v1052_v41  ;;  %v8994_v41 = vld [vmem:[%s13777_s3 + $0xd0] sm:$0xff]  ;;  %v8999_v33 = vld [vmem:[%s13777_s3 + $0x160] sm:$0xff] }
 0x168   : > { %14176 = vst [vmem:[#allocation45_spill] sm:$0xff] %v8994_v41 }
 0x16c   : > { %v981_v17 = vpop.f32.mrf.mxu2 }
 0x16d   : > { %v1008_v39 = vadd.f32 %v1007_v46, %v981_v17  ;;  %v9008_v46 = vld [vmem:[%s13777_s3 + $0xc8] sm:$0xff]  ;;  %v9013_v17 = vld [vmem:[%s13777_s3 + $0x158] sm:$0xff] }
 0x16e   : > { %v1055_v0 = vpop.f32.mrf.mxu0  ;;  %14177 = vst [vmem:[#allocation46_spill] sm:$0xff] %v9008_v46 }
 0x16f   : > { %v1082_v49 = vadd.f32 %v1081_v32, %v1055_v0  ;;  %v1087_v1 = vmax.f32 %v1008_v39, %v1079_v2  ;;  %v9020_v0 = vld [vmem:[%s13777_s3 + $0xc0] sm:$0xff]  ;;  %v9027_v32 = vld [vmem:[%s13777_s3 + $0xb8] sm:$0xff]  ;;  %v9096_v39 = vld [vmem:[%s13777_s3 + $0x148] sm:$0xff] }
 0x170   : > { %14178 = vst [vmem:[#allocation47_spill] sm:$0xff] %v9020_v0  ;;  %v9113_v2 = vld [vmem:[%s13777_s3 + $0x140] sm:$0xff] }
 0x171   : > { %14179 = vst [vmem:[#allocation48_spill] sm:$0xff] %v9027_v32 }
 0x174   : > { %v984_v58 = vpop.f32.mrf.mxu2 }
 0x175   : > { %v1011_v12 = vadd.f32 %v1010_v22, %v984_v58  ;;  %v8989_v22 = vld [vmem:[%s13780_s6 + $0x10] sm:$0xff] }
 0x176   : > { %v1058_v53 = vpop.f32.mrf.mxu0  ;;  %14175 = vst [vmem:[#allocation44_spill] sm:$0xff] %v8989_v22  ;;  %v9043_v58 = vld [vmem:[%s13777_s3 + $0xb0] sm:$0xff] }
 0x177   : > { %v1085_v47 = vadd.f32 %v1084_v8, %v1058_v53  ;;  %v1088_v42 = vmax.f32 %v1011_v12, %v1082_v49  ;;  %14182 = vst [vmem:[#allocation51_spill] sm:$0xff] %v9043_v58  ;;  %v9053_v53 = vld [vmem:[%s13777_s3 + $0xa8] sm:$0xff]  ;;  %v9060_v8 = vld [vmem:[%s13777_s3 + $0xa0] sm:$0xff] }
 0x178   : > { %14183 = vst [vmem:[#allocation52_spill] sm:$0xff] %v9053_v53  ;;  %v9077_v12 = vld [vmem:[%s13777_s3 + $0x108] sm:$0xff]  ;;  %v9101_v49 = vld [vmem:[%s13777_s3 + $0x100] sm:$0xff] }
 0x179   : > { %14184 = vst [vmem:[#allocation53_spill] sm:$0xff] %v9060_v8  ;;  %1297 = vmatpush.msrb.mxu0 %v9077_v12 }
 0x17a   : > { %14185 = vst [vmem:[#allocation54_spill] sm:$0xff] %v9077_v12 }
 0x17b   : > { %14187 = vst [vmem:[#allocation56_spill] sm:$0xff] %v9101_v49  ;;  %1298 = vmatpush.msrb.mxu0 %v9101_v49  ;;  %v9195_v49 = vld [vmem:[%s13777_s3 + $0x68] sm:$0xff] }
 0x17c   : > { %v987_v63 = vpop.f32.mrf.mxu2  ;;  %14201 = vst [vmem:[#allocation70_spill] sm:$0xff] %v9195_v49 }
 0x17d   : > { %v1014_v38 = vadd.f32 %v1013_v56, %v987_v63  ;;  %v9065_v56 = vld [vmem:[%s13777_s3 + $0x8] sm:$0xff]  ;;  %v9072_v63 = vld [vmem:[%s13777_s3 + $0x150] sm:$0xff] }
 0x17e   : > { %1220 = vmatpush.msra.mxu1 %v9065_v56 }
 0x17f   : > { %v1089_v60 = vmax.f32 %v1014_v38, %v1085_v47  ;;  %v9082_v47 = vld [vmem:[%s13777_s3 + $0x98] sm:$0xff]  ;;  %v9089_v38 = vld [vmem:[%s13777_s3] sm:$0xff] }
 0x180   : > { %14186 = vst [vmem:[#allocation55_spill] sm:$0xff] %v9082_v47  ;;  %1221 = vmatpush.msra.mxu1 %v9089_v38 }
 0x181   : > { %1112 = vmatpush.msrb.mxu3 %v1089_v60  ;;  %1144 = vmatpush.msra.mxu2 %v1089_v60  ;;  %v9106_v60 = vld [vmem:[%s13777_s3 + $0x90] sm:$0xff] }
 0x182   : > { %14188 = vst [vmem:[#allocation57_spill] sm:$0xff] %v9106_v60 }
 0x183   : > { %1113 = vmatpush.msrb.mxu3 %v1088_v42  ;;  %1145 = vmatpush.msra.mxu2 %v1088_v42  ;;  %v9037_v42 = vld [vmem:[%s13780_s6 + $0x18] sm:$0xf] }
 0x184   : > { %14181 = vst [vmem:[#allocation50_spill] sm:$0xff] %v9037_v42 }
 0x185   : > { %1114 = vmatpush.msrb.mxu3 %v1087_v1  ;;  %1146 = vmatpush.msra.mxu2 %v1087_v1  ;;  %v9032_v1 = vld [vmem:[%s13780_s6 + $0x8] sm:$0xf] }
 0x186   : > { %7012 = vmatmul.msk.f32.vlgmr.msrb.gmra.mxu3 %vm1092_vm3, %v8984_v51  ;;  %7016 = vmatmul.msk.f32.vlgmr.msra.gmra.mxu2 %vm1092_vm3, %v8989_v22  ;;  %14180 = vst [vmem:[#allocation49_spill] sm:$0xff] %v9032_v1 }
 0x187   : > { %1191 = vmatpush.msra.mxu3 %v8994_v41  ;;  %1248 = vmatpush.msrb.mxu2 %v8999_v33 }
 0x189   : > { %1192 = vmatpush.msra.mxu3 %v9008_v46  ;;  %1249 = vmatpush.msrb.mxu2 %v9013_v17 }
 0x18b   : > { %1193 = vmatpush.msra.mxu3 %v9020_v0  ;;  %1250 = vmatpush.msrb.mxu2 %v9072_v63 }
 0x18d   : > { %1194 = vmatpush.msra.mxu3 %v9027_v32  ;;  %1251 = vmatpush.msrb.mxu2 %v9096_v39  ;;  %v9209_v32 = vld [vmem:[%s13777_s3 + $0x58] sm:$0xff] }
 0x18e   : > { %7013 = vmatmul.msk.f32.gmra.mxu3 %vm1092_vm3, %v9032_v1  ;;  %7017 = vmatmul.msk.f32.gmra.mxu2 %vm1092_vm3, %v9037_v42  ;;  %v9141_v42 = vld [vmem:[%s13777_s3 + $0x80] sm:$0xff]  ;;  %v9178_v1 = vld [vmem:[%s13777_s3 + $0x70] sm:$0xff]  ;;  %14203 = vst [vmem:[#allocation72_spill] sm:$0xff] %v9209_v32 }
 0x18f   : > { %1195 = vmatpush.msra.mxu3 %v9043_v58  ;;  %v9134_v58 = vld [vmem:[%s13777_s3 + $0xf0] sm:$0xff]  ;;  %1252 = vmatpush.msrb.mxu2 %v9113_v2  ;;  %14192 = vst [vmem:[#allocation61_spill] sm:$0xff] %v9141_v42 }
 0x190   : > { %14191 = vst [vmem:[#allocation60_spill] sm:$0xff] %v9134_v58 }
 0x191   : > { %1196 = vmatpush.msra.mxu3 %v9053_v53  ;;  %v9129_v53 = vld [vmem:[%s13777_s3 + $0x138] sm:$0xff]  ;;  %14198 = vst [vmem:[#allocation67_spill] sm:$0xff] %v9178_v1 }
 0x192   : > { %1253 = vmatpush.msrb.mxu2 %v9129_v53 }
 0x193   : > { %1197 = vmatpush.msra.mxu3 %v9060_v8  ;;  %v9123_v8 = vld [vmem:[%s13777_s3 + $0x88] sm:$0xff] }
 0x194   : > { %14190 = vst [vmem:[#allocation59_spill] sm:$0xff] %v9123_v8 }
 0x195   : > { %1198 = vmatpush.msra.mxu3 %v9082_v47  ;;  %v9118_v47 = vld [vmem:[%s13777_s3 + $0xf8] sm:$0xff] }
 0x196   : > { %14189 = vst [vmem:[#allocation58_spill] sm:$0xff] %v9118_v47  ;;  %1299 = vmatpush.msrb.mxu0 %v9118_v47  ;;  %v9155_v47 = vld [vmem:[%s13777_s3 + $0xe8] sm:$0xff] }
 0x197   : > { %1199 = vmatpush.msra.mxu3 %v9106_v60  ;;  %v9150_v60 = vld [vmem:[%s13777_s3 + $0x130] sm:$0xff]  ;;  %14194 = vst [vmem:[#allocation63_spill] sm:$0xff] %v9155_v47 }
 0x198   : > { %1300 = vmatpush.msrb.mxu0 %v9134_v58  ;;  %14193 = vst [vmem:[#allocation62_spill] sm:$0xff] %v9150_v60  ;;  %1254 = vmatpush.msrb.mxu2 %v9150_v60  ;;  %v9173_v58 = vld [vmem:[%s13777_s3 + $0xe0] sm:$0xff] }
 0x199   : > { %1321 = vmatpush.msrb.mxu3 %v9123_v8  ;;  %v9160_v8 = vld [vmem:[%s13777_s3 + $0x78] sm:$0xff]  ;;  %14197 = vst [vmem:[#allocation66_spill] sm:$0xff] %v9173_v58 }
 0x19a   : > { %14195 = vst [vmem:[#allocation64_spill] sm:$0xff] %v9160_v8  ;;  %1301 = vmatpush.msrb.mxu0 %v9155_v47  ;;  %v9190_v47 = vld [vmem:[%s13777_s3 + $0xd8] sm:$0xff] }
 0x19b   : > { %1322 = vmatpush.msrb.mxu3 %v9141_v42  ;;  %v9168_v42 = vld [vmem:[%s13777_s3 + $0x128] sm:$0xff]  ;;  %14200 = vst [vmem:[#allocation69_spill] sm:$0xff] %v9190_v47 }
 0x19c   : > { %14196 = vst [vmem:[#allocation65_spill] sm:$0xff] %v9168_v42  ;;  %1255 = vmatpush.msrb.mxu2 %v9168_v42  ;;  %1302 = vmatpush.msrb.mxu0 %v9173_v58  ;;  %v9204_v58 = vld [vmem:[%s13777_s3 + $0x60] sm:$0xff] }
 0x19d   : > { %1323 = vmatpush.msrb.mxu3 %v9160_v8  ;;  %v9185_v8 = vld [vmem:[%s13777_s3 + $0x120] sm:$0xff]  ;;  %14202 = vst [vmem:[#allocation71_spill] sm:$0xff] %v9204_v58 }
 0x19e   : > { %14199 = vst [vmem:[#allocation68_spill] sm:$0xff] %v9185_v8  ;;  %1256 = vmatpush.msrb.mxu2 %v9185_v8  ;;  %1303 = vmatpush.msrb.mxu0 %v9190_v47 }
 0x19f   : > { %1324 = vmatpush.msrb.mxu3 %v9178_v1  ;;  %v9215_v1 = vld [vmem:[%s13777_s3 + $0x50] sm:$0xff] }
 0x1a0   : > { %14204 = vst [vmem:[#allocation73_spill] sm:$0xff] %v9215_v1 }
 0x1a1   : > { %1325 = vmatpush.msrb.mxu3 %v9195_v49  ;;  %v9221_v49 = vld [vmem:[%s13777_s3 + $0x48] sm:$0xff] }
 0x1a2   : > { %14205 = vst [vmem:[#allocation74_spill] sm:$0xff] %v9221_v49 }
 0x1a3   : > { %1326 = vmatpush.msrb.mxu3 %v9204_v58 }
 0x1a5   : > { %1327 = vmatpush.msrb.mxu3 %v9209_v32 }
 0x1a7   : > { %1328 = vmatpush.msrb.mxu3 %v9215_v1 }
 0x1a9   : > { %1329 = vmatpush.msrb.mxu3 %v9221_v49 }
 0x209   : > { %v1116_v47 = vpop.f32.mrf.mxu3  ;;  %v1148_v12 = vpop.f32.mrf.mxu2 }
 0x20a   : > { %v1154_v58 = vmax.f32 %v1116_v47, %v1148_v12  ;;  %v9290_v47 = vld [vmem:[%s13781_s7 + $0x98] sm:$0xff] }
 0x20c   : > { %7028 = vmatmul.msk.f32.vlgmr.msra.gmra.mxu1 %vm1181_vm4, %v1154_v58  ;;  %v1178_v32 = vrot.slane %v1154_v58, 2  ;;  %v1236_v22 = vrot.slane %v1154_v58, 4  ;;  %v1283_v42 = vrot.slane %v1154_v58, 3 }
 0x211   : > { %v1119_v0 = vpop.f32.mrf.mxu3  ;;  %v1151_v46 = vpop.f32.mrf.mxu2 }
 0x212   : > { %v1155_v41 = vmax.f32 %v1119_v0, %v1151_v46  ;;  %v1309_v0 = vrot.slane %v1154_v58, 1  ;;  %v9278_v58 = vld [vmem:[%s13781_s7 + $0xa0] sm:$0xff] }
 0x214   : > { %v1179_v51 = vrot.slane %v1155_v41, 2  ;;  %v1237_v43 = vrot.slane %v1155_v41, 4  ;;  %v1284_v8 = vrot.slane %v1155_v41, 3  ;;  %v1310_v46 = vrot.slane %v1155_v41, 1  ;;  %v9254_v41 = vld [vmem:[%s13781_s7 + $0xb0] sm:$0xff] }
 0x216   : > { %v1180_v1 = vsel %vm1177_vm5, %v1178_v32, %v1179_v51  ;;  %v1238_v49 = vsel %vm543_vm0, %v1236_v22, %v1237_v43  ;;  %v1285_v60 = vsel %vm1282_vm6, %v1283_v42, %v1284_v8  ;;  %v1311_v12 = vsel %vm1308_vm7, %v1309_v0, %v1310_v46  ;;  %v9237_v51 = vld [vmem:[%s13781_s7 + $0x58] sm:$0xff]  ;;  %v9249_v22 = vld [vmem:[%s13781_s7 + $0x50] sm:$0xff]  ;;  %v9259_v32 = vld [vmem:[%s13781_s7 + $0x48] sm:$0xff] }
 0x217   : > { %7027 = vmatmul.msk.f32.vlgmr.msra.gmra.mxu3 %vm1181_vm4, %v1180_v1  ;;  %7038 = vmatmul.msk.f32.vlgmr.msrb.gmra.mxu2 %vm1181_vm4, %v1238_v49  ;;  %v9242_v43 = vld [vmem:[%s13781_s7 + $0xb8] sm:$0xff]  ;;  %v9264_v1 = vld [vmem:[%s13781_s7 + $0xa8] sm:$0xff]  ;;  %v9273_v42 = vld [vmem:[%s13781_s7 + $0x40] sm:$0xff] }
 0x218   : > { %7057 = vmatmul.msk.f32.vlgmr.msrb.gmra.mxu0 %vm1181_vm4, %v1285_v60  ;;  %1361 = vmatpush.msrb.mxu1 %v9237_v51  ;;  %14206 = vst [vmem:[#allocation75_spill] sm:$0xff] %v9273_v42  ;;  %v9285_v8 = vld [vmem:[%s13781_s7 + $0x38] sm:$0xff]  ;;  %v9297_v49 = vld [vmem:[%s13781_s7 + $0x30] sm:$0xff]  ;;  %v9307_v46 = vld [vmem:[%s13781_s7 + $0x28] sm:$0xff] }
 0x219   : > { %1394 = vmatpush.msra.mxu2 %v9242_v43  ;;  %14207 = vst [vmem:[#allocation76_spill] sm:$0xff] %v9285_v8  ;;  %v9302_v60 = vld [vmem:[%s13781_s7 + $0x90] sm:$0xff]  ;;  %v9312_v0 = vld [vmem:[%s13781_s7 + $0x88] sm:$0xff] }
 0x21a   : > { %1362 = vmatpush.msrb.mxu1 %v9249_v22  ;;  %14208 = vst [vmem:[#allocation77_spill] sm:$0xff] %v9297_v49 }
 0x21b   : > { %1395 = vmatpush.msra.mxu2 %v9254_v41  ;;  %14209 = vst [vmem:[#allocation78_spill] sm:$0xff] %v9307_v46 }
 0x21c   : > { %1363 = vmatpush.msrb.mxu1 %v9259_v32  ;;  %14210 = vst [vmem:[#allocation79_spill] sm:$0xff] %v9312_v0 }
 0x21d   : > { %1396 = vmatpush.msra.mxu2 %v9264_v1 }
 0x21e   : > { %1364 = vmatpush.msrb.mxu1 %v9273_v42 }
 0x21f   : > { %7058 = vmatmul.msk.f32.vlgmr.msrb.gmra.mxu3 %vm1181_vm4, %v1311_v12  ;;  %1397 = vmatpush.msra.mxu2 %v9278_v58  ;;  %v9321_v12 = vld [vmem:[%s13781_s7 + $0x20] sm:$0xff] }
 0x220   : > { %1365 = vmatpush.msrb.mxu1 %v9285_v8  ;;  %14211 = vst [vmem:[#allocation80_spill] sm:$0xff] %v9321_v12  ;;  %v9326_v8 = vld [vmem:[%s13781_s7 + $0x80] sm:$0xff] }
 0x221   : > { %1398 = vmatpush.msra.mxu2 %v9290_v47  ;;  %14212 = vst [vmem:[#allocation81_spill] sm:$0xff] %v9326_v8 }
 0x222   : > { %1366 = vmatpush.msrb.mxu1 %v9297_v49  ;;  %v9338_v49 = vld [vmem:[%s13781_s7 + $0x78] sm:$0xff] }
 0x223   : > { %1399 = vmatpush.msra.mxu2 %v9302_v60  ;;  %14214 = vst [vmem:[#allocation83_spill] sm:$0xff] %v9338_v49 }
 0x224   : > { %1367 = vmatpush.msrb.mxu1 %v9307_v46  ;;  %v9333_v46 = vld [vmem:[%s13781_s7 + $0x18] sm:$0xff] }
 0x225   : > { %1400 = vmatpush.msra.mxu2 %v9312_v0  ;;  %14213 = vst [vmem:[#allocation82_spill] sm:$0xff] %v9333_v46 }
 0x226   : > { %1368 = vmatpush.msrb.mxu1 %v9321_v12  ;;  %v9345_v12 = vld [vmem:[%s13781_s7 + $0x10] sm:$0xff] }
 0x227   : > { %1401 = vmatpush.msra.mxu2 %v9326_v8  ;;  %14215 = vst [vmem:[#allocation84_spill] sm:$0xff] %v9345_v12  ;;  %v9350_v8 = vld [vmem:[%s13781_s7 + $0x70] sm:$0xff] }
 0x228   : > { %1369 = vmatpush.msrb.mxu1 %v9333_v46  ;;  %14216 = vst [vmem:[#allocation85_spill] sm:$0xff] %v9350_v8  ;;  %v9357_v46 = vld [vmem:[%s13781_s7 + $0x8] sm:$0xff] }
 0x229   : > { %1402 = vmatpush.msra.mxu2 %v9338_v49  ;;  %14217 = vst [vmem:[#allocation86_spill] sm:$0xff] %v9357_v46  ;;  %v9362_v49 = vld [vmem:[%s13781_s7 + $0x68] sm:$0xff] }
 0x22a   : > { %1370 = vmatpush.msrb.mxu1 %v9345_v12  ;;  %14218 = vst [vmem:[#allocation87_spill] sm:$0xff] %v9362_v49  ;;  %v9369_v12 = vld [vmem:[%s13781_s7] sm:$0xff] }
 0x22b   : > { %1403 = vmatpush.msra.mxu2 %v9350_v8  ;;  %14219 = vst [vmem:[#allocation88_spill] sm:$0xff] %v9369_v12  ;;  %v9374_v8 = vld [vmem:[%s13781_s7 + $0x60] sm:$0xff] }
 0x22c   : > { %1371 = vmatpush.msrb.mxu1 %v9357_v46  ;;  %14220 = vst [vmem:[#allocation89_spill] sm:$0xff] %v9374_v8 }
 0x22d   : > { %1404 = vmatpush.msra.mxu2 %v9362_v49 }
 0x22e   : > { %1372 = vmatpush.msrb.mxu1 %v9369_v12 }
 0x22f   : > { %1405 = vmatpush.msra.mxu2 %v9374_v8 }
 0x230   : > { %7090 = vmatpush.msk.msra.mxu1 %vm543_vm0, %v8455_v14 }
 0x231   : > { %7094 = vmatpush.msk.msrb.mxu2 %vm543_vm0, %v8425_v6 }
 0x232   : > { %1552 = vmatpush.msra.mxu1 %v8475_v18 }
 0x233   : > { %1578 = vmatpush.msrb.mxu2 %v8438_v9  ;;  %v9391_v9 = vld [vmem:[%s13778_s4] ss:$0 sm:$0xff] }
 0x234   : > { %1553 = vmatpush.msra.mxu1 %v8488_v20  ;;  %v7076_v20 = vld [vmem:[%s8420_s17 + $0x20] sm:$0xff] }
 0x235   : > { %1579 = vmatpush.msrb.mxu2 %v8449_v13 }
 0x236   : > { %1554 = vmatpush.msra.mxu1 %v8508_v25  ;;  %v7078_v25 = vld [vmem:[%s8420_s17 + $0x30] sm:$0xff] }
 0x237   : > { %1580 = vmatpush.msrb.mxu2 %v8465_v16 }
 0x289   : > { %v1223_v46 = vpop.f32.mrf.mxu1 }
 0x295   : > { %v1305_v49 = vpop.f32.mrf.mxu0 }
 0x29a   : > { %v1201_v12 = vpop.f32.mrf.mxu3  ;;  %v1258_v6 = vpop.f32.mrf.mxu2 }
 0x29b   : > { %v1224_v8 = vadd.f32 %v1223_v46, %v1201_v12  ;;  %v14227_v46 = vld [vmem:[#allocation17_spill] sm:$0xff]  ;;  %v7081_v12 = vld [vmem:[%s8420_s17 + $0x32] sm:$0xff] }
 0x29d   : > { %v1261_v42 = vadd.f32 %v1258_v6, %v1224_v8  ;;  %v14226_v8 = vld [vmem:[#allocation16_spill] sm:$0xff]  ;;  %v14228_v6 = vld [vmem:[#allocation18_spill] sm:$0xff] }
 0x2a2   : > { %v1331_v0 = vpop.f32.mrf.mxu3 }
 0x2a3   : > { %v1332_v14 = vadd.f32 %v1331_v0, %v1305_v49  ;;  %v9539_v49 = vld [vmem:[%s14139_s1 + $0x78] sm:$0xf]  ;;  %v9549_v0 = vld [vmem:[%s14139_s1 + $0x68] sm:$0xff] }
 0x2a5   : > { %v1334_v13 = vadd.f32 %v1332_v14, %v1261_v42  ;;  %v7112_v42 = vld [vmem:[%s8420_s17 + $0x23] sm:$0xff] }
 0x2a6   : > { %v14229_v14 = vld [vmem:[#allocation13_spill] sm:$0xff] }
 0x2a7   : > { %v1339_v18 = vadd.f32 %v9391_v9, %v1334_v13  ;;  %v14230_v13 = vld [vmem:[#allocation19_spill] sm:$0xff] }
 0x2a9   : > { %v1340_v16 = vmax.f32 %v1339_v18, 0.0  ;;  %v14231_v18 = vld [vmem:[#allocation15_spill] sm:$0xff] }
 0x2ab   : > { %7059 = vmatmul.msk.f32.vlgmr.msrb.gmra.mxu1 %vm1353_vm8, %v1340_v16  ;;  %7072 = vmatmul.msk.f32.vlgmr.msra.gmra.mxu2 %vm1353_vm8, %v1340_v16  ;;  %v7113_v16 = vld [vmem:[%s8420_s17 + $0x2b] sm:$0xff] }
 0x2ac   : > { %7115 = vmatpush.msk.msrb.mxu1 %vm543_vm0, %v8529_v28  ;;  %7119 = vmatpush.msk.msra.mxu2 %vm543_vm0, %v8493_v21  ;;  %v7077_v21 = vld [vmem:[%s8420_s17 + $0x28] sm:$0xff] }
 0x2ae   : > { %1689 = vmatpush.msrb.mxu1 %v8560_v34  ;;  %1715 = vmatpush.msra.mxu2 %v8518_v26  ;;  %v9430_v34 = vld [vmem:[%s13782_s8] sm:$0xf] }
 0x2b0   : > { %1690 = vmatpush.msrb.mxu1 %v8590_v40  ;;  %1716 = vmatpush.msra.mxu2 %v8543_v31  ;;  %v9445_v40 = vld [vmem:[%s14139_s1 + $0xb0] sm:$0xf] }
 0x2b2   : > { %1691 = vmatpush.msrb.mxu1 %v8610_v44  ;;  %1717 = vmatpush.msra.mxu2 %v8568_v35  ;;  %v9435_v35 = vld [vmem:[%s13782_s8 + $0x4] sm:$0xf]  ;;  %v9452_v44 = vld [vmem:[%s14139_s1 + $0xb8] sm:$0xf] }
 0x2b3   : > { %7095 = vmatmul.msk.f32.vlgmr.msrb.gmra.mxu2 %vm533_vm1, %v7076_v20  ;;  %7091 = vmatmul.msk.f32.vlgmr.msra.gmra.mxu1 %vm533_vm1, %v7076_v20  ;;  %v7098_v20 = vld [vmem:[%s8420_s17 + $0x24] sm:$0xff] }
 0x2b4   : > { %1816 = vmatpush.msra.mxu1 %v8675_v57  ;;  %1856 = vmatpush.msrb.mxu2 %v8704_v62  ;;  %v9460_v57 = vld [vmem:[%s14139_s1 + $0xa0] sm:$0xff]  ;;  %v9479_v62 = vld [vmem:[%s14139_s1 + $0x98] sm:$0xff] }
 0x2b6   : > { %1817 = vmatpush.msra.mxu1 %v8687_v59  ;;  %1857 = vmatpush.msrb.mxu2 %v8732_v4  ;;  %v9466_v59 = vld [vmem:[%s14139_s1 + $0xa8] sm:$0xff]  ;;  %v9487_v4 = vld [vmem:[%s14139_s1 + $0x80] sm:$0xff] }
 0x2b8   : > { %1818 = vmatpush.msra.mxu1 %v8699_v61  ;;  %v9473_v61 = vld [vmem:[%s14139_s1 + $0x90] sm:$0xff] }
 0x2ba   : > { %1819 = vmatpush.msra.mxu1 %v8727_v3  ;;  %v7079_v3 = vld [vmem:[%s8420_s17 + $0x22] sm:$0xff] }
 0x2bb   : > { %7096 = vmatmul.msk.f32.gmra.mxu2 %vm533_vm1, %v7077_v21  ;;  %7092 = vmatmul.msk.f32.gmra.mxu1 %vm533_vm1, %v7077_v21  ;;  %v7114_v21 = vld [vmem:[%s8420_s17 + $0x33] sm:$0xff] }
 0x2bc   : > { %1820 = vmatpush.msra.mxu1 %v8753_v10  ;;  %v9493_v10 = vld [vmem:[%s14139_s1 + $0x88] sm:$0xff] }
 0x2be   : > { %1821 = vmatpush.msra.mxu1 %v8767_v15  ;;  %v14221_v15 = vld [vmem:[#allocation36_spill] sm:$0xff] }
 0x2c0   : > { %1822 = vmatpush.msra.mxu1 %v8777_v19  ;;  %v14222_v19 = vld [vmem:[#allocation11_spill] sm:$0xff] }
 0x2c2   : > { %1823 = vmatpush.msra.mxu1 %v8795_v27  ;;  %v9512_v27 = vld [vmem:[%s14139_s1 + $0x128] sm:$0xff] }
 0x2c3   : > { %7097 = vmatmul.msk.f32.gmra.mxu2 %vm533_vm1, %v7078_v25  ;;  %7093 = vmatmul.msk.f32.gmra.mxu1 %vm533_vm1, %v7078_v25  ;;  %v14232_v25 = vld [vmem:[#allocation20_spill] sm:$0xff] }
 0x2c4   : > { %1824 = vmatpush.msra.mxu1 %v8807_v36  ;;  %v7080_v36 = vld [vmem:[%s8420_s17 + $0x2a] sm:$0xff] }
 0x2c6   : > { %1825 = vmatpush.msra.mxu1 %v8819_v45  ;;  %v9521_v45 = vld [vmem:[%s14139_s1 + $0x118] sm:$0xff] }
 0x2c8   : > { %1826 = vmatpush.msra.mxu1 %v8829_v50  ;;  %v9528_v50 = vld [vmem:[%s14139_s1 + $0x108] sm:$0xff] }
 0x2ca   : > { %1827 = vmatpush.msra.mxu1 %v8843_v37  ;;  %v14224_v37 = vld [vmem:[#allocation12_spill] sm:$0xff] }
 0x2cb   : > { %7116 = vmatmul.msk.f32.vlgmr.msrb.gmra.mxu1 %vm533_vm1, %v7112_v42  ;;  %7120 = vmatmul.msk.f32.vlgmr.msra.gmra.mxu2 %vm533_vm1, %v7112_v42  ;;  %v14241_v42 = vld [vmem:[#allocation29_spill] sm:$0xff] }
 0x2cc   : > { %1828 = vmatpush.msra.mxu1 %v8855_v48  ;;  %v14225_v48 = vld [vmem:[#allocation14_spill] sm:$0xff] }
 0x2ce   : > { %1829 = vmatpush.msra.mxu1 %v8867_v11  ;;  %v9503_v11 = vld [vmem:[%s14139_s1 + $0x138] sm:$0xf] }
 0x2d0   : > { %1830 = vmatpush.msra.mxu1 %v14221_v15  ;;  %v14236_v15 = vld [vmem:[#allocation22_spill] sm:$0xff] }
 0x2d3   : > { %7117 = vmatmul.msk.f32.gmra.mxu1 %vm533_vm1, %v7113_v16  ;;  %7121 = vmatmul.msk.f32.gmra.mxu2 %vm533_vm1, %v7113_v16  ;;  %v7110_v16 = vld [vmem:[%s8420_s17 + $0x29] sm:$0xff] }
 0x2db   : > { %7118 = vmatmul.msk.f32.gmra.mxu1 %vm533_vm1, %v7114_v21  ;;  %7122 = vmatmul.msk.f32.gmra.mxu2 %vm533_vm1, %v7114_v21 }
 0x328   : > { %v1374_v26 = vpop.f32.mrf.mxu1 }
 0x32e   : > { %v1407_v28 = vpop.f32.mrf.mxu2 }
 0x32f   : > { %v1410_v31 = vmax.f32 %v1374_v26, %v1407_v28  ;;  %v14233_v26 = vld [vmem:[#allocation23_spill] sm:$0xff]  ;;  %v14234_v28 = vld [vmem:[#allocation21_spill] sm:$0xff] }
 0x331   : > { %1431 = vmatpush.msra.mxu0 %v1410_v31  ;;  %1456 = vmatpush.msra.mxu3 %v1410_v31  ;;  %v14235_v31 = vld [vmem:[#allocation25_spill] sm:$0xff] }
 0x332   : > { %7073 = vmatmul.msk.f32.vlgmr.msra.gmra.mxu0 %vm1412_vm9, %v9430_v34  ;;  %7075 = vmatmul.msk.f32.vlgmr.msra.gmra.mxu3 %vm1412_vm9, %v9435_v35 }
 0x333   : > { %7082 = vmatpush.msk.msrb.mxu0 %vm543_vm0, %v9445_v40  ;;  %7086 = vmatpush.msk.msrb.mxu3 %vm543_vm0, %v9452_v44 }
 0x335   : > { %1491 = vmatpush.msrb.mxu0 %v9460_v57  ;;  %1517 = vmatpush.msrb.mxu3 %v9466_v59 }
 0x337   : > { %1492 = vmatpush.msrb.mxu0 %v9473_v61  ;;  %1518 = vmatpush.msrb.mxu3 %v9479_v62 }
 0x339   : > { %1493 = vmatpush.msrb.mxu0 %v9487_v4  ;;  %1519 = vmatpush.msrb.mxu3 %v9493_v10 }
 0x33a   : > { %7083 = vmatmul.msk.f32.vlgmr.msrb.gmra.mxu0 %vm533_vm1, %v7079_v3  ;;  %7087 = vmatmul.msk.f32.vlgmr.msrb.gmra.mxu3 %vm533_vm1, %v7079_v3  ;;  %v7099_v3 = vld [vmem:[%s8420_s17 + $0x2c] sm:$0xff] }
 0x33b   : > { %7101 = vmatpush.msk.msra.mxu0 %vm543_vm0, %v8537_v30  ;;  %7105 = vmatpush.msk.msra.mxu3 %vm543_vm0, %v9503_v11  ;;  %v14223_v30 = vld [vmem:[#allocation38_spill] sm:$0xff] }
 0x33c   : > { %1831 = vmatpush.msra.mxu1 %v14223_v30  ;;  %v14238_v30 = vld [vmem:[#allocation26_spill] sm:$0xff] }
 0x33d   : > { %1616 = vmatpush.msra.mxu0 %v14222_v19  ;;  %1642 = vmatpush.msra.mxu3 %v9512_v27  ;;  %v14237_v19 = vld [vmem:[#allocation24_spill] sm:$0xff] }
 0x33f   : > { %1617 = vmatpush.msra.mxu0 %v14224_v37  ;;  %1643 = vmatpush.msra.mxu3 %v9521_v45  ;;  %v7100_v37 = vld [vmem:[%s8420_s17 + $0x34] sm:$0xff] }
 0x341   : > { %1618 = vmatpush.msra.mxu0 %v14225_v48  ;;  %1644 = vmatpush.msra.mxu3 %v9528_v50  ;;  %v14240_v48 = vld [vmem:[#allocation28_spill] sm:$0xff] }
 0x342   : > { %7084 = vmatmul.msk.f32.gmra.mxu0 %vm533_vm1, %v7080_v36  ;;  %7088 = vmatmul.msk.f32.gmra.mxu3 %vm533_vm1, %v7080_v36  ;;  %v14239_v36 = vld [vmem:[#allocation27_spill] sm:$0xff] }
 0x343   : > { %7123 = vmatpush.msk.msrb.mxu0 %vm543_vm0, %v14226_v8  ;;  %7127 = vmatpush.msk.msrb.mxu3 %vm543_vm0, %v9539_v49  ;;  %v14242_v8 = vld [vmem:[#allocation30_spill] sm:$0xff] }
 0x345   : > { %1750 = vmatpush.msrb.mxu0 %v14227_v46  ;;  %1776 = vmatpush.msrb.mxu3 %v9549_v0  ;;  %v14243_v46 = vld [vmem:[#allocation31_spill] sm:$0xff] }
 0x347   : > { %1751 = vmatpush.msrb.mxu0 %v14228_v6  ;;  %1777 = vmatpush.msrb.mxu3 %v14229_v14  ;;  %v14244_v6 = vld [vmem:[#allocation32_spill] sm:$0xff]  ;;  %v14245_v14 = vld [vmem:[#allocation33_spill] sm:$0xff] }
 0x349   : > { %1752 = vmatpush.msrb.mxu0 %v14230_v13  ;;  %1778 = vmatpush.msrb.mxu3 %v14231_v18  ;;  %v14246_v13 = vld [vmem:[#allocation34_spill] sm:$0xff]  ;;  %v14247_v18 = vld [vmem:[#allocation35_spill] sm:$0xff] }
 0x34a   : > { %7085 = vmatmul.msk.f32.gmra.mxu0 %vm533_vm1, %v7081_v12  ;;  %7089 = vmatmul.msk.f32.gmra.mxu3 %vm533_vm1, %v7081_v12  ;;  %v7109_v12 = vld [vmem:[%s8420_s17 + $0x21] sm:$0xff] }
 0x352   : > { %7102 = vmatmul.msk.f32.vlgmr.msra.gmra.mxu0 %vm533_vm1, %v7098_v20  ;;  %7106 = vmatmul.msk.f32.vlgmr.msra.gmra.mxu3 %vm533_vm1, %v7098_v20  ;;  %v14248_v20 = vld [vmem:[#allocation37_spill] sm:$0xff] }
 0x353   : > { %1868 = vmatpush.msra.mxu0 %v14232_v25  ;;  %1908 = vmatpush.msra.mxu3 %v14233_v26 }
 0x355   : > { %1869 = vmatpush.msra.mxu0 %v14234_v28  ;;  %1909 = vmatpush.msra.mxu3 %v14235_v31 }
 0x357   : > { %1870 = vmatpush.msra.mxu0 %v14236_v15 }
 0x359   : > { %1871 = vmatpush.msra.mxu0 %v14237_v19 }
 0x35a   : > { %7103 = vmatmul.msk.f32.gmra.mxu0 %vm533_vm1, %v7099_v3  ;;  %7107 = vmatmul.msk.f32.gmra.mxu3 %vm533_vm1, %v7099_v3 }
 0x35b   : > { %1872 = vmatpush.msra.mxu0 %v14238_v30 }
 0x35d   : > { %1873 = vmatpush.msra.mxu0 %v14239_v36 }
 0x35f   : > { %1874 = vmatpush.msra.mxu0 %v14240_v48 }
 0x361   : > { %1875 = vmatpush.msra.mxu0 %v14241_v42 }
 0x362   : > { %7104 = vmatmul.msk.f32.gmra.mxu0 %vm533_vm1, %v7100_v37  ;;  %7108 = vmatmul.msk.f32.gmra.mxu3 %vm533_vm1, %v7100_v37 }
 0x363   : > { %1876 = vmatpush.msra.mxu0 %v14242_v8 }
 0x365   : > { %1877 = vmatpush.msra.mxu0 %v14243_v46 }
 0x367   : > { %1878 = vmatpush.msra.mxu0 %v14244_v6 }
 0x369   : > { %1879 = vmatpush.msra.mxu0 %v14245_v14  ;;  %v14254_v14 = vld [vmem:[#allocation40_spill] sm:$0xff] }
 0x36a   : > { %7124 = vmatmul.msk.f32.vlgmr.msrb.gmra.mxu0 %vm533_vm1, %v7109_v12  ;;  %7128 = vmatmul.msk.f32.vlgmr.msrb.gmra.mxu3 %vm533_vm1, %v7109_v12 }
 0x36b   : > { %1880 = vmatpush.msra.mxu0 %v14246_v13  ;;  %2007 = vmatpush.msrb.mxu3 %v8930_v24  ;;  %v7111_v24 = vld [vmem:[%s8420_s17 + $0x31] sm:$0xff] }
 0x36d   : > { %1881 = vmatpush.msra.mxu0 %v14247_v18  ;;  %2008 = vmatpush.msrb.mxu3 %v8936_v54  ;;  %v14250_v54 = vld [vmem:[#allocation65_spill] sm:$0xff] }
 0x36f   : > { %1882 = vmatpush.msra.mxu0 %v14248_v20  ;;  %2009 = vmatpush.msrb.mxu3 %v8941_v23  ;;  %v14251_v23 = vld [vmem:[#allocation68_spill] sm:$0xff] }
 0x371   : > { %1883 = vmatpush.msra.mxu0 %v8900_v29  ;;  %2010 = vmatpush.msrb.mxu3 %v8947_v52  ;;  %v14249_v29 = vld [vmem:[#allocation62_spill] sm:$0xff] }
 0x372   : > { %7125 = vmatmul.msk.f32.gmra.mxu0 %vm533_vm1, %v7110_v16  ;;  %7129 = vmatmul.msk.f32.gmra.mxu3 %vm533_vm1, %v7110_v16 }
 0x373   : > { %2011 = vmatpush.msrb.mxu3 %v8964_v5  ;;  %2032 = vmatpush.msrb.mxu0 %v8999_v33 }
 0x375   : > { %2012 = vmatpush.msrb.mxu3 %v8971_v7  ;;  %2033 = vmatpush.msrb.mxu0 %v9013_v17  ;;  %v1556_v17 = vpop.f32.mrf.mxu1 }
 0x377   : > { %2013 = vmatpush.msrb.mxu3 %v8977_v55  ;;  %2034 = vmatpush.msrb.mxu0 %v9072_v63 }
 0x379   : > { %2014 = vmatpush.msrb.mxu3 %v9065_v56  ;;  %2035 = vmatpush.msrb.mxu0 %v9096_v39 }
 0x37a   : > { %7126 = vmatmul.msk.f32.gmra.mxu0 %vm533_vm1, %v7111_v24  ;;  %7130 = vmatmul.msk.f32.gmra.mxu3 %vm533_vm1, %v7111_v24 }
 0x37b   : > { %2015 = vmatpush.msrb.mxu3 %v9089_v38  ;;  %2036 = vmatpush.msrb.mxu0 %v9113_v2  ;;  %v1582_v38 = vpop.f32.mrf.mxu2 }
 0x37d   : > { %2037 = vmatpush.msrb.mxu0 %v9129_v53  ;;  %v1559_v53 = vpop.f32.mrf.mxu1 }
 0x37f   : > { %2038 = vmatpush.msrb.mxu0 %v14249_v29 }
 0x381   : > { %2039 = vmatpush.msrb.mxu0 %v14250_v54 }
 0x383   : > { %2040 = vmatpush.msrb.mxu0 %v14251_v23  ;;  %v1585_v21 = vpop.f32.mrf.mxu2 }
 0x385   : > { %v1562_v28 = vpop.f32.mrf.mxu1 }
 0x38b   : > { %v1588_v3 = vpop.f32.mrf.mxu2 }
 0x38d   : > { %v1693_v19 = vpop.f32.mrf.mxu1 }
 0x393   : > { %v1719_v48 = vpop.f32.mrf.mxu2 }
 0x395   : > { %v1696_v12 = vpop.f32.mrf.mxu1 }
 0x3af   : > { %v9619_v52 = vpop.f32.mrf.mxu0 }
 0x3b0   : > { %14252 = vst [vmem:[#allocation36_spill] sm:$0xff] %v9619_v52 }
 0x3b5   : > { %v9621_v5 = vpop.f32.mrf.mxu3 }
 0x3b6   : > { %14253 = vst [vmem:[#allocation11_spill] sm:$0xff] %v9621_v5 }
 0x3b7   : > { %v1495_v7 = vpop.f32.mrf.mxu0 }
 0x3b8   : > { %v1557_v36 = vadd.f32 %v1556_v17, %v1495_v7  ;;  %v1722_v7 = vpop.f32.mrf.mxu2  ;;  %v14255_v17 = vld [vmem:[#allocation39_spill] sm:$0xff] }
 0x3bd   : > { %v1521_v55 = vpop.f32.mrf.mxu3 }
 0x3be   : > { %v1583_v6 = vadd.f32 %v1582_v38, %v1521_v55 }
 0x3bf   : > { %v1498_v33 = vpop.f32.mrf.mxu0 }
 0x3c0   : > { %v1560_v16 = vadd.f32 %v1559_v53, %v1498_v33 }
 0x3c5   : > { %v1524_v56 = vpop.f32.mrf.mxu3 }
 0x3c6   : > { %v1586_v55 = vadd.f32 %v1585_v21, %v1524_v56  ;;  %v1725_v21 = vpop.f32.mrf.mxu2 }
 0x3c7   : > { %v1501_v63 = vpop.f32.mrf.mxu0 }
 0x3cd   : > { %v9623_v39 = vpop.f32.mrf.mxu3 }
 0x3cf   : > { %v1620_v2 = vpop.f32.mrf.mxu0 }
 0x3d0   : > { %v1655_v42 = vadd.f32 %v1620_v2, %v1557_v36 }
 0x3d5   : > { %v1646_v25 = vpop.f32.mrf.mxu3 }
 0x3d6   : > { %v1656_v20 = vadd.f32 %v1646_v25, %v1583_v6  ;;  %v1699_v25 = vpop.f32.mrf.mxu1 }
 0x3d7   : > { %v1623_v26 = vpop.f32.mrf.mxu0 }
 0x3d8   : > { %v1657_v23 = vadd.f32 %v1623_v26, %v1560_v16  ;;  %v1563_v26 = vadd.f32 %v1562_v28, %v1501_v63  ;;  %v14266_v16 = vld [vmem:[#allocation82_spill] sm:$0xff] }
 0x3dd   : > { %v1649_v31 = vpop.f32.mrf.mxu3 }
 0x3de   : > { %v1658_v36 = vadd.f32 %v1649_v31, %v1586_v55 }
 0x3df   : > { %v1626_v15 = vpop.f32.mrf.mxu0 }
 0x3e5   : > { %v1652_v30 = vpop.f32.mrf.mxu3 }
 0x3e7   : > { %v1754_v37 = vpop.f32.mrf.mxu0 }
 0x3e8   : > { %v1755_v8 = vadd.f32 %v1754_v37, %v1693_v19 }
 0x3ea   : > { %v1789_v46 = vadd.f32 %v1755_v8, %v1655_v42  ;;  %v14261_v8 = vld [vmem:[#allocation83_spill] sm:$0xff] }
 0x3ec   : > { %v1795_v13 = vadd.f32 %v1789_v46, %v14254_v14 }
 0x3ed   : > { %v1780_v18 = vpop.f32.mrf.mxu3 }
 0x3ee   : > { %v1801_v24 = vmax.f32 %v1795_v13, 0.0  ;;  %v1781_v29 = vadd.f32 %v1780_v18, %v1719_v48  ;;  %v14257_v48 = vld [vmem:[#allocation79_spill] sm:$0xff]  ;;  %v14264_v13 = vld [vmem:[#allocation80_spill] sm:$0xff] }
 0x3ef   : > { %v1757_v54 = vpop.f32.mrf.mxu0  ;;  %v14265_v18 = vld [vmem:[#allocation87_spill] sm:$0xff] }
 0x3f0   : > { %v1790_v52 = vadd.f32 %v1781_v29, %v1656_v20  ;;  %v1758_v5 = vadd.f32 %v1757_v54, %v1696_v12  ;;  %1832 = vmatmul.f32.vlgmr.msra.gmra.mxu1 %v1801_v24  ;;  %1884 = vmatmul.f32.vlgmr.msra.gmra.mxu0 %v1801_v24  ;;  %v14263_v12 = vld [vmem:[#allocation85_spill] sm:$0xff]  ;;  %v14268_v24 = vld [vmem:[#allocation84_spill] sm:$0xff]  ;;  %v14269_v29 = vld [vmem:[#allocation86_spill] sm:$0xff] }
 0x3f1   : > { %2126 = vmatpush.msra.mxu0 %v9242_v43  ;;  %v14267_v20 = vld [vmem:[#allocation89_spill] sm:$0xff]  ;;  %v14270_v54 = vld [vmem:[#allocation88_spill] sm:$0xff] }
 0x3f2   : > { %v1796_v2 = vadd.f32 %v1790_v52, %v14255_v17  ;;  %v1791_v19 = vadd.f32 %v1758_v5, %v1657_v23 }
 0x3f3   : > { %2127 = vmatpush.msra.mxu0 %v9254_v41  ;;  %v1659_v41 = vadd.f32 %v1626_v15, %v1563_v26  ;;  %v14256_v15 = vld [vmem:[#allocation75_spill] sm:$0xff] }
 0x3f4   : > { %v1802_v38 = vmax.f32 %v1796_v2, 0.0  ;;  %v1797_v33 = vadd.f32 %v1791_v19, %v14254_v14 }
 0x3f5   : > { %v1783_v53 = vpop.f32.mrf.mxu3  ;;  %2128 = vmatpush.msra.mxu0 %v9264_v1 }
 0x3f6   : > { %v1784_v37 = vadd.f32 %v1783_v53, %v1722_v7  ;;  %7131 = vmatmul.msk.f32.vlgmr.msrb.gmra.mxu2 %vm954_vm2, %v1802_v38  ;;  %7134 = vmatmul.msk.f32.vlgmr.msra.gmra.mxu3 %vm954_vm2, %v1802_v38  ;;  %v1803_v43 = vmax.f32 %v1797_v33, 0.0 }
 0x3f7   : > { %v1760_v52 = vpop.f32.mrf.mxu0  ;;  %2106 = vmatpush.msra.mxu3 %v9237_v51  ;;  %2129 = vmatpush.msra.mxu0 %v9278_v58  ;;  %v1589_v51 = vadd.f32 %v1588_v3, %v9623_v39  ;;  %v14260_v3 = vld [vmem:[#allocation77_spill] sm:$0xff] }
 0x3f8   : > { %v1792_v5 = vadd.f32 %v1784_v37, %v1658_v36  ;;  %v1761_v56 = vadd.f32 %v1760_v52, %v1699_v25  ;;  %1835 = vmatmul.f32.gmra.mxu1 %v1803_v43  ;;  %1887 = vmatmul.f32.gmra.mxu0 %v1803_v43 }
 0x3f9   : > { %2107 = vmatpush.msra.mxu3 %v9249_v22  ;;  %2130 = vmatpush.msra.mxu0 %v9290_v47  ;;  %v1660_v22 = vadd.f32 %v1652_v30, %v1589_v51  ;;  %v14262_v30 = vld [vmem:[#allocation78_spill] sm:$0xff] }
 0x3fa   : > { %v1793_v1 = vadd.f32 %v1761_v56, %v1659_v41  ;;  %v1798_v63 = vadd.f32 %v1792_v5, %v14255_v17 }
 0x3fb   : > { %2108 = vmatpush.msra.mxu3 %v9259_v32  ;;  %2131 = vmatpush.msra.mxu0 %v9302_v60  ;;  %v14258_v32 = vld [vmem:[#allocation76_spill] sm:$0xff]  ;;  %v14259_v60 = vld [vmem:[#allocation81_spill] sm:$0xff] }
 0x3fc   : > { %v1804_v58 = vmax.f32 %v1798_v63, 0.0  ;;  %v1799_v28 = vadd.f32 %v1793_v1, %v14254_v14 }
 0x3fd   : > { %v1786_v31 = vpop.f32.mrf.mxu3  ;;  %2109 = vmatpush.msra.mxu3 %v14256_v15  ;;  %2132 = vmatpush.msra.mxu0 %v14257_v48  ;;  %v14274_v15 = vld [vmem:[#allocation41_spill] sm:$0xff]  ;;  %v14275_v48 = vld [vmem:[#allocation46_spill] sm:$0xff] }
 0x3fe   : > { %v1787_v47 = vadd.f32 %v1786_v31, %v1725_v21  ;;  %7132 = vmatmul.msk.f32.gmra.mxu2 %vm954_vm2, %v1804_v58  ;;  %7135 = vmatmul.msk.f32.gmra.mxu3 %vm954_vm2, %v1804_v58  ;;  %v1805_v42 = vmax.f32 %v1799_v28, 0.0  ;;  %v14271_v58 = vld [vmem:[#allocation43_spill] sm:$0xff]  ;;  %v14272_v28 = vld [vmem:[#allocation44_spill] sm:$0xff]  ;;  %v14273_v31 = vld [vmem:[#allocation45_spill] sm:$0xff] }
 0x3ff   : > { %2110 = vmatpush.msra.mxu3 %v14258_v32  ;;  %2133 = vmatpush.msra.mxu0 %v14259_v60  ;;  %v14279_v32 = vld [vmem:[#allocation48_spill] sm:$0xff] }
 0x400   : > { %v1794_v39 = vadd.f32 %v1787_v47, %v1660_v22  ;;  %1838 = vmatmul.f32.gmra.mxu1 %v1805_v42  ;;  %1890 = vmatmul.f32.gmra.mxu0 %v1805_v42  ;;  %v14276_v22 = vld [vmem:[#allocation42_spill] sm:$0xff]  ;;  %v14277_v47 = vld [vmem:[#allocation47_spill] sm:$0xff]  ;;  %v14280_v60 = vld [vmem:[#allocation56_spill] sm:$0xff] }
 0x401   : > { %2111 = vmatpush.msra.mxu3 %v14260_v3  ;;  %2134 = vmatpush.msra.mxu0 %v14261_v8  ;;  %v14278_v42 = vld [vmem:[#allocation54_spill] sm:$0xff]  ;;  %v14283_v8 = vld [vmem:[#allocation51_spill] sm:$0xff] }
 0x402   : > { %v1800_v46 = vadd.f32 %v1794_v39, %v14255_v17  ;;  %v14281_v39 = vld [vmem:[#allocation49_spill] sm:$0xff]  ;;  %v14282_v3 = vld [vmem:[#allocation50_spill] sm:$0xff] }
 0x403   : > { %2112 = vmatpush.msra.mxu3 %v14262_v30  ;;  %2135 = vmatpush.msra.mxu0 %v14263_v12  ;;  %v14285_v30 = vld [vmem:[#allocation52_spill] sm:$0xff] }
 0x404   : > { %v1806_v6 = vmax.f32 %v1800_v46, 0.0  ;;  %v14284_v46 = vld [vmem:[#allocation58_spill] sm:$0xff]  ;;  %v14286_v12 = vld [vmem:[#allocation60_spill] sm:$0xff] }
 0x405   : > { %2113 = vmatpush.msra.mxu3 %v14264_v13  ;;  %2136 = vmatpush.msra.mxu0 %v14265_v18  ;;  %v14288_v13 = vld [vmem:[#allocation63_spill] sm:$0xff] }
 0x406   : > { %7133 = vmatmul.msk.f32.gmra.mxu2 %vm954_vm2, %v1806_v6  ;;  %7136 = vmatmul.msk.f32.gmra.mxu3 %vm954_vm2, %v1806_v6  ;;  %v14287_v6 = vld [vmem:[#allocation53_spill] sm:$0xff]  ;;  %v14289_v18 = vld [vmem:[#allocation55_spill] sm:$0xff] }
 0x407   : > { %2114 = vmatpush.msra.mxu3 %v14266_v16  ;;  %2137 = vmatpush.msra.mxu0 %v14267_v20  ;;  %v14290_v16 = vld [vmem:[#allocation66_spill] sm:$0xff]  ;;  %v14291_v20 = vld [vmem:[#allocation57_spill] sm:$0xff] }
 0x409   : > { %2115 = vmatpush.msra.mxu3 %v14268_v24  ;;  %v14292_v24 = vld [vmem:[#allocation69_spill] sm:$0xff] }
 0x40b   : > { %2116 = vmatpush.msra.mxu3 %v14269_v29  ;;  %v14293_v29 = vld [vmem:[#allocation59_spill] sm:$0xff] }
 0x40d   : > { %2117 = vmatpush.msra.mxu3 %v14270_v54  ;;  %v14294_v54 = vld [vmem:[#allocation61_spill] sm:$0xff] }
 0x46d   : > { %v1833_v23 = vpop.f32.mrf.mxu1  ;;  %v1885_v7 = vpop.f32.mrf.mxu0 }
 0x475   : > { %v1836_v55 = vpop.f32.mrf.mxu1  ;;  %v1888_v38 = vpop.f32.mrf.mxu0 }
 0x479   : > { %v1859_v2 = vpop.f32.mrf.mxu2  ;;  %v1911_v19 = vpop.f32.mrf.mxu3 }
 0x47a   : > { %v1860_v56 = vadd.f32 %v1859_v2, %v1833_v23  ;;  %v1912_v1 = vadd.f32 %v1911_v19, %v1885_v7  ;;  %v14295_v23 = vld [vmem:[#allocation64_spill] sm:$0xff]  ;;  %v14296_v7 = vld [vmem:[#allocation67_spill] sm:$0xff]  ;;  %v14297_v2 = vld [vmem:[#allocation70_spill] sm:$0xff] }
 0x47b   : > { %v14298_v19 = vld [vmem:[#allocation71_spill] sm:$0xff] }
 0x47c   : > { %v1920_v51 = vmax.f32 %v1860_v56, %v1912_v1 }
 0x47d   : > { %v1839_v25 = vpop.f32.mrf.mxu1  ;;  %v1891_v26 = vpop.f32.mrf.mxu0 }
 0x481   : > { %v1862_v33 = vpop.f32.mrf.mxu2  ;;  %v1914_v53 = vpop.f32.mrf.mxu3 }
 0x482   : > { %v1863_v43 = vadd.f32 %v1862_v33, %v1836_v55  ;;  %v1915_v52 = vadd.f32 %v1914_v53, %v1888_v38  ;;  %v14299_v55 = vld [vmem:[#allocation72_spill] sm:$0xff]  ;;  %v14300_v38 = vld [vmem:[#allocation73_spill] sm:$0xff]  ;;  %v14301_v33 = vld [vmem:[#allocation74_spill] sm:$0xff] }
 0x484   : > { %v1921_v21 = vmax.f32 %v1863_v43, %v1915_v52  ;;  %v9708_v43 = vld [vmem:[%s14139_s1 + $0x20] sm:$0xff] }
 0x489   : > { %v1865_v36 = vpop.f32.mrf.mxu2  ;;  %v1917_v37 = vpop.f32.mrf.mxu3 }
 0x48a   : > { %v1866_v41 = vadd.f32 %v1865_v36, %v1839_v25  ;;  %v1918_v5 = vadd.f32 %v1917_v37, %v1891_v26  ;;  %v9701_v36 = vld [vmem:[%s14139_s1 + $0x30] sm:$0xf] }
 0x48c   : > { %v1922_v63 = vmax.f32 %v1866_v41, %v1918_v5  ;;  %v9714_v41 = vld [vmem:[%s14139_s1 + $0x10] sm:$0xff] }
 0x48e   : > { %1936 = vmatpush.msra.mxu2 %v1922_v63  ;;  %1959 = vmatpush.msrb.mxu1 %v1922_v63  ;;  %v9720_v63 = vld [vmem:[%s14139_s1] sm:$0xff] }
 0x490   : > { %1937 = vmatpush.msra.mxu2 %v1921_v21  ;;  %1960 = vmatpush.msrb.mxu1 %v1921_v21 }
 0x492   : > { %1938 = vmatpush.msra.mxu2 %v1920_v51  ;;  %1961 = vmatpush.msrb.mxu1 %v1920_v51 }
 0x493   : > { %7137 = vmatmul.msk.f32.vlgmr.msra.gmra.mxu2 %vm1092_vm3, %v14271_v58  ;;  %7139 = vmatmul.msk.f32.vlgmr.msrb.gmra.mxu1 %vm1092_vm3, %v14272_v28 }
 0x494   : > { %1985 = vmatpush.msrb.mxu2 %v14273_v31  ;;  %2058 = vmatpush.msra.mxu1 %v14274_v15 }
 0x496   : > { %1986 = vmatpush.msrb.mxu2 %v14275_v48  ;;  %2059 = vmatpush.msra.mxu1 %v14276_v22  ;;  %v9734_v22 = vld [vmem:[%s14139_s1 + $0x38] sm:$0xf] }
 0x498   : > { %1987 = vmatpush.msrb.mxu2 %v14277_v47  ;;  %2060 = vmatpush.msra.mxu1 %v14278_v42  ;;  %v9742_v42 = vld [vmem:[%s14139_s1 + $0x28] sm:$0xff] }
 0x49a   : > { %1988 = vmatpush.msrb.mxu2 %v14279_v32  ;;  %2061 = vmatpush.msra.mxu1 %v14280_v60  ;;  %v9758_v60 = vld [vmem:[%s14139_s1 + $0x8] sm:$0xff] }
 0x49b   : > { %7138 = vmatmul.msk.f32.gmra.mxu2 %vm1092_vm3, %v14281_v39  ;;  %7140 = vmatmul.msk.f32.gmra.mxu1 %vm1092_vm3, %v14282_v3  ;;  %v9777_v39 = vld [vmem:[%s14139_s1 + $0x110] sm:$0xff]  ;;  %v9783_v3 = vld [vmem:[%s14139_s1 + $0x100] sm:$0xff] }
 0x49c   : > { %1989 = vmatpush.msrb.mxu2 %v14283_v8  ;;  %2062 = vmatpush.msra.mxu1 %v14284_v46  ;;  %v9787_v8 = vld [vmem:[%s8420_s17 + $0x42] sm:$0xff]  ;;  %v9794_v46 = vld [vmem:[%s14139_s1 + $0x70] sm:$0xf] }
 0x49e   : > { %1990 = vmatpush.msrb.mxu2 %v14285_v30  ;;  %2063 = vmatpush.msra.mxu1 %v14286_v12  ;;  %v9801_v30 = vld [vmem:[%s14139_s1 + $0x60] sm:$0xff]  ;;  %v9805_v12 = vld [vmem:[%s8420_s17 + $0x4a] sm:$0xff] }
 0x4a0   : > { %1991 = vmatpush.msrb.mxu2 %v14287_v6  ;;  %2064 = vmatpush.msra.mxu1 %v14288_v13  ;;  %v9810_v6 = vld [vmem:[%s14139_s1 + $0x50] sm:$0xff]  ;;  %v9816_v13 = vld [vmem:[%s14139_s1 + $0x40] sm:$0xff] }
 0x4a2   : > { %1992 = vmatpush.msrb.mxu2 %v14289_v18  ;;  %2065 = vmatpush.msra.mxu1 %v14290_v16  ;;  %v9822_v18 = vld [vmem:[%s8420_s17 + $0x52] sm:$0xff] }
 0x4a4   : > { %1993 = vmatpush.msrb.mxu2 %v14291_v20  ;;  %2066 = vmatpush.msra.mxu1 %v14292_v24 }
 0x4a6   : > { %2083 = vmatpush.msra.mxu2 %v14293_v29 }
 0x4a8   : > { %2084 = vmatpush.msra.mxu2 %v14294_v54  ;;  %v9827_v54 = vld [vmem:[%s8420_s17 + $0x44] sm:$0xff] }
 0x4aa   : > { %2085 = vmatpush.msra.mxu2 %v14295_v23 }
 0x4ac   : > { %2086 = vmatpush.msra.mxu2 %v14296_v7 }
 0x4ae   : > { %2087 = vmatpush.msra.mxu2 %v14297_v2 }
 0x4b0   : > { %2088 = vmatpush.msra.mxu2 %v14298_v19 }
 0x4b2   : > { %2089 = vmatpush.msra.mxu2 %v14299_v55 }
 0x4b4   : > { %2090 = vmatpush.msra.mxu2 %v14300_v38  ;;  %v9834_v38 = vld [vmem:[%s13779_s5 + $0x108] sm:$0xff] }
 0x4b6   : > { %2091 = vmatpush.msra.mxu2 %v14301_v33 }
 0x510   : > { %v1963_v53 = vpop.f32.mrf.mxu1 }
 0x516   : > { %v1940_v25 = vpop.f32.mrf.mxu2 }
 0x517   : > { %v1969_v26 = vmax.f32 %v1940_v25, %v1963_v53  ;;  %v9841_v53 = vld [vmem:[%s13779_s5 + $0x100] sm:$0xff] }
 0x518   : > { %v1966_v37 = vpop.f32.mrf.mxu1 }
 0x519   : > { %7142 = vmatmul.msk.f32.vlgmr.msrb.gmra.mxu3 %vm1181_vm4, %v1969_v26  ;;  %v1973_v56 = vrot.slane %v1969_v26, 2  ;;  %v2020_v1 = vrot.slane %v1969_v26, 4  ;;  %v2046_v28 = vrot.slane %v1969_v26, 3  ;;  %v2071_v32 = vrot.slane %v1969_v26, 1  ;;  %v9847_v26 = vld [vmem:[%s13779_s5 + $0xf8] sm:$0xff] }
 0x51a   : > { %7164 = vmatpush.msk.msrb.mxu3 %vm543_vm0, %v9701_v36 }
 0x51c   : > { %2274 = vmatpush.msrb.mxu3 %v9708_v43 }
 0x51e   : > { %v1943_v52 = vpop.f32.mrf.mxu2  ;;  %2275 = vmatpush.msrb.mxu3 %v9714_v41 }
 0x51f   : > { %v1970_v5 = vmax.f32 %v1943_v52, %v1966_v37  ;;  %v9862_v37 = vld [vmem:[%s14139_s1 + $0xf8] sm:$0xf]  ;;  %v9869_v52 = vld [vmem:[%s13779_s5 + $0xf0] sm:$0xff] }
 0x520   : > { %2276 = vmatpush.msrb.mxu3 %v9720_v63  ;;  %14302 = vst [vmem:[#allocation38_spill] sm:$0xff] %v9869_v52 }
 0x521   : > { %v1974_v21 = vrot.slane %v1970_v5, 2  ;;  %v2021_v51 = vrot.slane %v1970_v5, 4  ;;  %v2047_v58 = vrot.slane %v1970_v5, 3  ;;  %v2072_v47 = vrot.slane %v1970_v5, 1  ;;  %v9875_v5 = vld [vmem:[%s14139_s1 + $0xe0] sm:$0xff] }
 0x523   : > { %v1975_v31 = vsel %vm1177_vm5, %v1973_v56, %v1974_v21  ;;  %v2022_v15 = vsel %vm543_vm0, %v2020_v1, %v2021_v51  ;;  %v2048_v48 = vsel %vm1282_vm6, %v2046_v28, %v2047_v58  ;;  %v9881_v56 = vld [vmem:[%s14139_s1 + $0xe8] sm:$0xff]  ;;  %v7150_v21 = vld [vmem:[%s8420_s17 + $0x40] sm:$0xff]  ;;  %v9894_v51 = vld [vmem:[%s14139_s1 + $0xd0] sm:$0xff] }
 0x524   : > { %7141 = vmatmul.msk.f32.vlgmr.msrb.gmra.mxu2 %vm1181_vm4, %v1975_v31  ;;  %7143 = vmatmul.msk.f32.vlgmr.msrb.gmra.mxu0 %vm1181_vm4, %v2022_v15  ;;  %v9887_v1 = vld [vmem:[%s13779_s5 + $0xe8] sm:$0xff]  ;;  %v9900_v58 = vld [vmem:[%s14139_s1 + $0xd8] sm:$0xff]  ;;  %v9906_v28 = vld [vmem:[%s13779_s5 + $0xe0] sm:$0xff] }
 0x525   : > { %7144 = vmatmul.msk.f32.vlgmr.msra.gmra.mxu1 %vm1181_vm4, %v2048_v48  ;;  %7156 = vmatpush.msk.msrb.mxu2 %vm543_vm0, %v9445_v40  ;;  %v9749_v40 = vld [vmem:[%s14139_s1 + $0x18] sm:$0xff]  ;;  %14303 = vst [vmem:[#allocation12_spill] sm:$0xff] %v9887_v1  ;;  %v9912_v31 = vld [vmem:[%s14139_s1 + $0xc0] sm:$0xff]  ;;  %v9918_v15 = vld [vmem:[%s14139_s1 + $0xc8] sm:$0xff] }
 0x526   : > { %7168 = vmatpush.msk.msrb.mxu0 %vm543_vm0, %v9734_v22  ;;  %14304 = vst [vmem:[#allocation14_spill] sm:$0xff] %v9906_v28  ;;  %v9926_v48 = vld [vmem:[%s13779_s5 + $0x78] sm:$0xff] }
 0x527   : > { %2213 = vmatpush.msrb.mxu2 %v9460_v57  ;;  %v2073_v57 = vsel %vm1308_vm7, %v2071_v32, %v2072_v47  ;;  %v9932_v47 = vld [vmem:[%s13779_s5 + $0xd8] sm:$0xff]  ;;  %v9938_v32 = vld [vmem:[%s13779_s5 + $0x88] sm:$0xff] }
 0x528   : > { %2300 = vmatpush.msrb.mxu0 %v9742_v42  ;;  %14305 = vst [vmem:[#allocation16_spill] sm:$0xff] %v9932_v47 }
 0x529   : > { %2214 = vmatpush.msrb.mxu2 %v9473_v61  ;;  %v9764_v61 = vld [vmem:[%s14139_s1 + $0x130] sm:$0xf] }
 0x52a   : > { %2301 = vmatpush.msrb.mxu0 %v9749_v40 }
 0x52b   : > { %2215 = vmatpush.msrb.mxu2 %v9487_v4  ;;  %v9771_v4 = vld [vmem:[%s14139_s1 + $0x120] sm:$0xff] }
 0x52c   : > { %7145 = vmatmul.msk.f32.vlgmr.msra.gmra.mxu2 %vm1181_vm4, %v2073_v57  ;;  %2302 = vmatpush.msrb.mxu0 %v9758_v60  ;;  %v9944_v57 = vld [vmem:[%s13779_s5 + $0x70] sm:$0xff] }
 0x52d   : > { %7175 = vmatpush.msk.msra.mxu2 %vm543_vm0, %v9764_v61 }
 0x52f   : > { %2338 = vmatpush.msra.mxu2 %v9771_v4 }
 0x531   : > { %2339 = vmatpush.msra.mxu2 %v9777_v39 }
 0x533   : > { %2340 = vmatpush.msra.mxu2 %v9783_v3 }
 0x534   : > { %7157 = vmatmul.msk.f32.vlgmr.msrb.gmra.mxu2 %vm533_vm1, %v9787_v8 }
 0x535   : > { %7197 = vmatpush.msk.msrb.mxu2 %vm543_vm0, %v9794_v46 }
 0x537   : > { %2472 = vmatpush.msrb.mxu2 %v9801_v30 }
 0x539   : > { %2473 = vmatpush.msrb.mxu2 %v9810_v6 }
 0x53b   : > { %2474 = vmatpush.msrb.mxu2 %v9816_v13 }
 0x53c   : > { %7158 = vmatmul.msk.f32.gmra.mxu2 %vm533_vm1, %v9805_v12 }
 0x544   : > { %7159 = vmatmul.msk.f32.gmra.mxu2 %vm533_vm1, %v9822_v18 }
 0x54c   : > { %7176 = vmatmul.msk.f32.vlgmr.msra.gmra.mxu2 %vm533_vm1, %v9827_v54 }
 0x54d   : > { %2590 = vmatpush.msra.mxu2 %v9834_v38 }
 0x54f   : > { %2591 = vmatpush.msra.mxu2 %v9841_v53 }
 0x551   : > { %2592 = vmatpush.msra.mxu2 %v9847_v26 }
 0x553   : > { %2593 = vmatpush.msra.mxu2 %v9869_v52 }
 0x555   : > { %2594 = vmatpush.msra.mxu2 %v9887_v1  ;;  %v10129_v1 = vld [vmem:[%s8420_s17 + $0x49] sm:$0xff] }
 0x557   : > { %2595 = vmatpush.msra.mxu2 %v9906_v28  ;;  %v10109_v28 = vld [vmem:[%s8420_s17 + $0x41] sm:$0xff] }
 0x559   : > { %2596 = vmatpush.msra.mxu2 %v9932_v47  ;;  %v10076_v47 = vld [vmem:[%s13779_s5 + $0x10] sm:$0xff] }
 0x55a   : > { %14322 = vst [vmem:[#allocation31_spill] sm:$0xff] %v10076_v47 }
 0x59c   : > { %v2017_v20 = vpop.f32.mrf.mxu3 }
 0x5a1   : > { %v2042_v29 = vpop.f32.mrf.mxu0 }
 0x5a2   : > { %v2068_v23 = vpop.f32.mrf.mxu1 }
 0x5a7   : > { %v1995_v16 = vpop.f32.mrf.mxu2 }
 0x5a8   : > { %v2018_v24 = vadd.f32 %v2017_v20, %v1995_v16  ;;  %v9950_v16 = vld [vmem:[%s13779_s5 + $0xd0] sm:$0xff]  ;;  %v9956_v20 = vld [vmem:[%s13779_s5 + $0x80] sm:$0xff] }
 0x5a9   : > { %14306 = vst [vmem:[#allocation17_spill] sm:$0xff] %v9950_v16  ;;  %2597 = vmatpush.msra.mxu2 %v9950_v16  ;;  %v10064_v16 = vld [vmem:[%s13779_s5 + $0x20] sm:$0xff] }
 0x5aa   : > { %v2045_v2 = vadd.f32 %v2042_v29, %v2018_v24  ;;  %v9962_v24 = vld [vmem:[%s13779_s5 + $0x68] sm:$0xff]  ;;  %14320 = vst [vmem:[#allocation29_spill] sm:$0xff] %v10064_v16 }
 0x5ab   : > { %v9968_v29 = vld [vmem:[%s13779_s5 + $0xc8] sm:$0xff] }
 0x5ac   : > { %14307 = vst [vmem:[#allocation18_spill] sm:$0xff] %v9968_v29  ;;  %2598 = vmatpush.msra.mxu2 %v9968_v29  ;;  %v10046_v29 = vld [vmem:[%s13779_s5 + $0x30] sm:$0xff] }
 0x5ad   : > { %14317 = vst [vmem:[#allocation26_spill] sm:$0xff] %v10046_v29 }
 0x5af   : > { %v2093_v7 = vpop.f32.mrf.mxu2 }
 0x5b0   : > { %v2094_v19 = vadd.f32 %v2093_v7, %v2068_v23  ;;  %v9974_v23 = vld [vmem:[%s13779_s5 + $0x60] sm:$0xff] }
 0x5b1   : > { %v9980_v7 = vld [vmem:[%s13779_s5 + $0xc0] sm:$0xff] }
 0x5b2   : > { %v2096_v55 = vadd.f32 %v2094_v19, %v2045_v2  ;;  %14308 = vst [vmem:[#allocation13_spill] sm:$0xff] %v9980_v7  ;;  %2599 = vmatpush.msra.mxu2 %v9980_v7  ;;  %v9986_v2 = vld [vmem:[%s13779_s5 + $0x58] sm:$0xff] }
 0x5b3   : > { %v9992_v19 = vld [vmem:[%s13779_s5 + $0xb8] sm:$0xff] }
 0x5b4   : > { %v2097_v33 = vadd.f32 %v9391_v9, %v2096_v55  ;;  %v9855_v9 = vld [vmem:[%s14139_s1 + $0xf0] sm:$0xf]  ;;  %14309 = vst [vmem:[#allocation19_spill] sm:$0xff] %v9992_v19  ;;  %2600 = vmatpush.msra.mxu2 %v9992_v19  ;;  %v10022_v19 = vld [vmem:[%s13779_s5 + $0x40] sm:$0xff]  ;;  %v10034_v7 = vld [vmem:[%s13779_s5 + $0x38] sm:$0xff] }
 0x5b5   : > { %v9998_v55 = vld [vmem:[%s13779_s5 + $0x50] sm:$0xff]  ;;  %14313 = vst [vmem:[#allocation21_spill] sm:$0xff] %v10022_v19 }
 0x5b6   : > { %v2098_v25 = vmax.f32 %v2097_v33, 0.0  ;;  %v10004_v33 = vld [vmem:[%s13779_s5 + $0xb0] sm:$0xff]  ;;  %14315 = vst [vmem:[#allocation22_spill] sm:$0xff] %v10034_v7 }
 0x5b7   : > { %14310 = vst [vmem:[#allocation15_spill] sm:$0xff] %v10004_v33  ;;  %2601 = vmatpush.msra.mxu2 %v10004_v33  ;;  %v10028_v33 = vld [vmem:[%s13779_s5 + $0xa0] sm:$0xff] }
 0x5b8   : > { %7146 = vmatmul.msk.f32.vlgmr.msra.gmra.mxu3 %vm1353_vm8, %v2098_v25  ;;  %7147 = vmatmul.msk.f32.vlgmr.msra.gmra.mxu0 %vm1353_vm8, %v2098_v25  ;;  %v10010_v25 = vld [vmem:[%s13779_s5 + $0x48] sm:$0xff]  ;;  %14314 = vst [vmem:[#allocation25_spill] sm:$0xff] %v10028_v33 }
 0x5b9   : > { %7189 = vmatpush.msk.msra.mxu3 %vm543_vm0, %v9855_v9  ;;  %7193 = vmatpush.msk.msra.mxu0 %vm543_vm0, %v9862_v37  ;;  %14311 = vst [vmem:[#allocation20_spill] sm:$0xff] %v10010_v25 }
 0x5bb   : > { %2411 = vmatpush.msra.mxu3 %v9875_v5  ;;  %2437 = vmatpush.msra.mxu0 %v9881_v56 }
 0x5bd   : > { %2412 = vmatpush.msra.mxu3 %v9894_v51  ;;  %2438 = vmatpush.msra.mxu0 %v9900_v58 }
 0x5bf   : > { %2413 = vmatpush.msra.mxu3 %v9912_v31  ;;  %2439 = vmatpush.msra.mxu0 %v9918_v15 }
 0x5c0   : > { %7165 = vmatmul.msk.f32.vlgmr.msrb.gmra.mxu3 %vm533_vm1, %v7150_v21  ;;  %7169 = vmatmul.msk.f32.vlgmr.msrb.gmra.mxu0 %vm533_vm1, %v7150_v21  ;;  %v10016_v21 = vld [vmem:[%s13779_s5 + $0xa8] sm:$0xff] }
 0x5c1   : > { %2538 = vmatpush.msrb.mxu3 %v9926_v48  ;;  %2578 = vmatpush.msrb.mxu0 %v9938_v32  ;;  %14312 = vst [vmem:[#allocation23_spill] sm:$0xff] %v10016_v21 }
 0x5c2   : > { %2602 = vmatpush.msra.mxu2 %v10016_v21  ;;  %v10040_v21 = vld [vmem:[%s13779_s5 + $0x98] sm:$0xff] }
 0x5c3   : > { %2539 = vmatpush.msrb.mxu3 %v9944_v57  ;;  %2579 = vmatpush.msrb.mxu0 %v9956_v20  ;;  %14316 = vst [vmem:[#allocation24_spill] sm:$0xff] %v10040_v21 }
 0x5c4   : > { %2603 = vmatpush.msra.mxu2 %v10028_v33  ;;  %v10052_v33 = vld [vmem:[%s13779_s5 + $0x90] sm:$0xff] }
 0x5c5   : > { %2540 = vmatpush.msrb.mxu3 %v9962_v24  ;;  %14318 = vst [vmem:[#allocation27_spill] sm:$0xff] %v10052_v33 }
 0x5c6   : > { %2604 = vmatpush.msra.mxu2 %v10040_v21  ;;  %v10058_v21 = vld [vmem:[%s13779_s5 + $0x28] sm:$0xff] }
 0x5c7   : > { %2541 = vmatpush.msrb.mxu3 %v9974_v23  ;;  %14319 = vst [vmem:[#allocation28_spill] sm:$0xff] %v10058_v21 }
 0x5c8   : > { %2605 = vmatpush.msra.mxu2 %v10052_v33  ;;  %v10070_v33 = vld [vmem:[%s13779_s5 + $0x18] sm:$0xff] }
 0x5c9   : > { %2542 = vmatpush.msrb.mxu3 %v9986_v2  ;;  %14321 = vst [vmem:[#allocation30_spill] sm:$0xff] %v10070_v33 }
 0x5cb   : > { %2543 = vmatpush.msrb.mxu3 %v9998_v55 }
 0x5cd   : > { %2544 = vmatpush.msrb.mxu3 %v10010_v25 }
 0x5cf   : > { %2545 = vmatpush.msrb.mxu3 %v10022_v19  ;;  %v7185_v19 = vld [vmem:[%s8420_s17 + $0x51] sm:$0xff] }
 0x5d1   : > { %2546 = vmatpush.msrb.mxu3 %v10034_v7  ;;  %v7187_v7 = vld [vmem:[%s8420_s17 + $0x4b] sm:$0xff] }
 0x5d3   : > { %2547 = vmatpush.msrb.mxu3 %v10046_v29  ;;  %v10093_v29 = vld [vmem:[%s8420_s17 + $0x4c] sm:$0xff] }
 0x5d4   : > { %7177 = vmatmul.msk.f32.gmra.mxu2 %vm533_vm1, %v10093_v29 }
 0x5d5   : > { %2548 = vmatpush.msrb.mxu3 %v10058_v21  ;;  %v7151_v21 = vld [vmem:[%s8420_s17 + $0x48] sm:$0xff] }
 0x5d6   : > { %7166 = vmatmul.msk.f32.gmra.mxu3 %vm533_vm1, %v7151_v21  ;;  %7170 = vmatmul.msk.f32.gmra.mxu0 %vm533_vm1, %v7151_v21  ;;  %v10118_v21 = vld [vmem:[%s13777_s3 + $0x160] sm:$0xff] }
 0x5d7   : > { %2549 = vmatpush.msrb.mxu3 %v10064_v16  ;;  %v10082_v16 = vld [vmem:[%s13779_s5 + $0x8] sm:$0xff]  ;;  %14325 = vst [vmem:[#allocation34_spill] sm:$0xff] %v10118_v21 }
 0x5d8   : > { %14323 = vst [vmem:[#allocation32_spill] sm:$0xff] %v10082_v16 }
 0x5d9   : > { %2550 = vmatpush.msrb.mxu3 %v10070_v33  ;;  %v10088_v33 = vld [vmem:[%s13779_s5] sm:$0xff] }
 0x5da   : > { %14324 = vst [vmem:[#allocation33_spill] sm:$0xff] %v10088_v33 }
 0x5db   : > { %2551 = vmatpush.msrb.mxu3 %v10076_v47  ;;  %v10101_v47 = vld [vmem:[%s8420_s17 + $0x54] sm:$0xff] }
 0x5dc   : > { %7178 = vmatmul.msk.f32.gmra.mxu2 %vm533_vm1, %v10101_v47 }
 0x5dd   : > { %2552 = vmatpush.msrb.mxu3 %v10082_v16  ;;  %v7152_v16 = vld [vmem:[%s8420_s17 + $0x50] sm:$0xff] }
 0x5de   : > { %7167 = vmatmul.msk.f32.gmra.mxu3 %vm533_vm1, %v7152_v16  ;;  %7171 = vmatmul.msk.f32.gmra.mxu0 %vm533_vm1, %v7152_v16  ;;  %v10124_v16 = vld [vmem:[%s13777_s3 + $0x158] sm:$0xff] }
 0x5df   : > { %2553 = vmatpush.msrb.mxu3 %v10088_v33  ;;  %v7186_v33 = vld [vmem:[%s8420_s17 + $0x43] sm:$0xff]  ;;  %14326 = vst [vmem:[#allocation35_spill] sm:$0xff] %v10124_v16 }
 0x5e4   : > { %7198 = vmatmul.msk.f32.vlgmr.msrb.gmra.mxu2 %vm533_vm1, %v10109_v28 }
 0x5e5   : > { %2754 = vmatpush.msrb.mxu2 %v10118_v21  ;;  %v10140_v21 = vld [vmem:[%s13777_s3 + $0x148] sm:$0xff] }
 0x5e6   : > { %7190 = vmatmul.msk.f32.vlgmr.msra.gmra.mxu3 %vm533_vm1, %v7186_v33  ;;  %7194 = vmatmul.msk.f32.vlgmr.msra.gmra.mxu0 %vm533_vm1, %v7186_v33  ;;  %v10134_v33 = vld [vmem:[%s13777_s3 + $0x150] sm:$0xff]  ;;  %14328 = vst [vmem:[#allocation62_spill] sm:$0xff] %v10140_v21 }
 0x5e7   : > { %2755 = vmatpush.msrb.mxu2 %v10124_v16  ;;  %14327 = vst [vmem:[#allocation37_spill] sm:$0xff] %v10134_v33  ;;  %v10150_v16 = vld [vmem:[%s13777_s3 + $0x140] sm:$0xff] }
 0x5e8   : > { %14329 = vst [vmem:[#allocation65_spill] sm:$0xff] %v10150_v16 }
 0x5e9   : > { %2756 = vmatpush.msrb.mxu2 %v10134_v33  ;;  %v10156_v33 = vld [vmem:[%s13777_s3 + $0x138] sm:$0xff] }
 0x5ea   : > { %14330 = vst [vmem:[#allocation68_spill] sm:$0xff] %v10156_v33 }
 0x5eb   : > { %2757 = vmatpush.msrb.mxu2 %v10140_v21  ;;  %v7188_v21 = vld [vmem:[%s8420_s17 + $0x53] sm:$0xff] }
 0x5ec   : > { %7199 = vmatmul.msk.f32.gmra.mxu2 %vm533_vm1, %v10129_v1 }
 0x5ed   : > { %2758 = vmatpush.msrb.mxu2 %v10150_v16  ;;  %v10170_v16 = vld [vmem:[%s13777_s3 + $0x128] sm:$0xff] }
 0x5ee   : > { %7191 = vmatmul.msk.f32.gmra.mxu3 %vm533_vm1, %v7187_v7  ;;  %7195 = vmatmul.msk.f32.gmra.mxu0 %vm533_vm1, %v7187_v7  ;;  %v10164_v7 = vld [vmem:[%s13777_s3 + $0x130] sm:$0xff] }
 0x5ef   : > { %2759 = vmatpush.msrb.mxu2 %v10156_v33  ;;  %14331 = vst [vmem:[#allocation40_spill] sm:$0xff] %v10164_v7  ;;  %v10179_v33 = vld [vmem:[%s13777_s3 + $0x120] sm:$0xff] }
 0x5f1   : > { %2760 = vmatpush.msrb.mxu2 %v10164_v7 }
 0x5f3   : > { %2761 = vmatpush.msrb.mxu2 %v10170_v16 }
 0x5f4   : > { %7200 = vmatmul.msk.f32.gmra.mxu2 %vm533_vm1, %v7185_v19 }
 0x5f5   : > { %2762 = vmatpush.msrb.mxu2 %v10179_v33 }
 0x5f6   : > { %7192 = vmatmul.msk.f32.gmra.mxu3 %vm533_vm1, %v7188_v21  ;;  %7196 = vmatmul.msk.f32.gmra.mxu0 %vm533_vm1, %v7188_v21 }
 0x635   : > { %v2139_v7 = vpop.f32.mrf.mxu0 }
 0x63b   : > { %v2119_v52 = vpop.f32.mrf.mxu3 }
 0x63c   : > { %v2142_v25 = vmax.f32 %v2119_v52, %v2139_v7 }
 0x63e   : > { %2158 = vmatpush.msrb.mxu1 %v2142_v25 }
 0x63f   : > { %7148 = vmatmul.msk.f32.vlgmr.msrb.gmra.mxu1 %vm1412_vm9, %v9430_v34  ;;  %v10204_v34 = vld [vmem:[%s14139_s1 + $0x58] sm:$0xff] }
 0x640   : > { %2178 = vmatpush.msra.mxu1 %v2142_v25 }
 0x642   : > { %7160 = vmatpush.msk.msrb.mxu1 %vm543_vm0, %v9452_v44  ;;  %v10222_v44 = vld [vmem:[%s13779_s5 + $0x118] sm:$0xff] }
 0x643   : > { %14332 = vst [vmem:[#allocation39_spill] sm:$0xff] %v10222_v44 }
 0x644   : > { %2239 = vmatpush.msrb.mxu1 %v9466_v59  ;;  %v10228_v59 = vld [vmem:[%s13779_s5 + $0x110] sm:$0xff] }
 0x645   : > { %14333 = vst [vmem:[#allocation75_spill] sm:$0xff] %v10228_v59 }
 0x646   : > { %2240 = vmatpush.msrb.mxu1 %v9479_v62  ;;  %v2217_v62 = vpop.f32.mrf.mxu2 }
 0x647   : > { %7149 = vmatmul.msk.f32.vlgmr.msra.gmra.mxu1 %vm1412_vm9, %v9435_v35  ;;  %v10212_v35 = vld [vmem:[%s14139_s1 + $0x48] sm:$0xff] }
 0x648   : > { %2241 = vmatpush.msrb.mxu1 %v9493_v10 }
 0x64a   : > { %7179 = vmatpush.msk.msra.mxu1 %vm543_vm0, %v9503_v11  ;;  %v10240_v11 = vld [vmem:[%s13777_s3 + $0x40] sm:$0xff] }
 0x64b   : > { %14334 = vst [vmem:[#allocation79_spill] sm:$0xff] %v10240_v11 }
 0x64c   : > { %2364 = vmatpush.msra.mxu1 %v9512_v27  ;;  %v10246_v27 = vld [vmem:[%s13777_s3 + $0x38] sm:$0xff] }
 0x64d   : > { %14335 = vst [vmem:[#allocation76_spill] sm:$0xff] %v10246_v27 }
 0x64e   : > { %2365 = vmatpush.msra.mxu1 %v9521_v45  ;;  %v2220_v10 = vpop.f32.mrf.mxu2  ;;  %v10252_v45 = vld [vmem:[%s13777_s3 + $0x30] sm:$0xff] }
 0x64f   : > { %7161 = vmatmul.msk.f32.vlgmr.msrb.gmra.mxu1 %vm533_vm1, %v9787_v8  ;;  %14336 = vst [vmem:[#allocation81_spill] sm:$0xff] %v10252_v45  ;;  %v10272_v8 = vld [vmem:[%s13777_s3 + $0x18] sm:$0xff] }
 0x650   : > { %2366 = vmatpush.msra.mxu1 %v9528_v50  ;;  %14339 = vst [vmem:[#allocation78_spill] sm:$0xff] %v10272_v8 }
 0x652   : > { %7201 = vmatpush.msk.msrb.mxu1 %vm543_vm0, %v9539_v49  ;;  %v10258_v49 = vld [vmem:[%s13777_s3 + $0x28] sm:$0xff] }
 0x653   : > { %14337 = vst [vmem:[#allocation77_spill] sm:$0xff] %v10258_v49 }
 0x654   : > { %2498 = vmatpush.msrb.mxu1 %v9549_v0  ;;  %v10266_v0 = vld [vmem:[%s13777_s3 + $0x20] sm:$0xff] }
 0x655   : > { %14338 = vst [vmem:[#allocation83_spill] sm:$0xff] %v10266_v0 }
 0x656   : > { %2499 = vmatpush.msrb.mxu1 %v10204_v34  ;;  %v2223_v50 = vpop.f32.mrf.mxu2 }
 0x657   : > { %7162 = vmatmul.msk.f32.gmra.mxu1 %vm533_vm1, %v9805_v12  ;;  %v10278_v12 = vld [vmem:[%s13777_s3 + $0x10] sm:$0xff] }
 0x658   : > { %2500 = vmatpush.msrb.mxu1 %v10212_v35  ;;  %14340 = vst [vmem:[#allocation85_spill] sm:$0xff] %v10278_v12 }
 0x65e   : > { %v2342_v52 = vpop.f32.mrf.mxu2 }
 0x65f   : > { %7163 = vmatmul.msk.f32.gmra.mxu1 %vm533_vm1, %v9822_v18  ;;  %v10284_v18 = vld [vmem:[%s13777_s3 + $0x8] sm:$0xff] }
 0x660   : > { %14341 = vst [vmem:[#allocation80_spill] sm:$0xff] %v10284_v18 }
 0x667   : > { %7180 = vmatmul.msk.f32.vlgmr.msra.gmra.mxu1 %vm533_vm1, %v9827_v54  ;;  %v2278_v54 = vpop.f32.mrf.mxu3 }
 0x668   : > { %2630 = vmatpush.msra.mxu1 %v10222_v44  ;;  %v2279_v21 = vadd.f32 %v2278_v54, %v2217_v62 }
 0x66a   : > { %2631 = vmatpush.msra.mxu1 %v10228_v59  ;;  %v2377_v7 = vadd.f32 %v2342_v52, %v2279_v21  ;;  %v10331_v52 = vld [vmem:[%s13781_s7 + $0x90] sm:$0xff]  ;;  %v10350_v21 = vld [vmem:[%s13781_s7 + $0x78] sm:$0xff] }
 0x66b   : > { %14348 = vst [vmem:[#allocation43_spill] sm:$0xff] %v10331_v52 }
 0x66c   : > { %14351 = vst [vmem:[#allocation41_spill] sm:$0xff] %v10350_v21 }
 0x66f   : > { %7181 = vmatmul.msk.f32.gmra.mxu1 %vm533_vm1, %v10093_v29 }
 0x677   : > { %7182 = vmatmul.msk.f32.gmra.mxu1 %vm533_vm1, %v10101_v47  ;;  %v2345_v47 = vpop.f32.mrf.mxu2 }
 0x67f   : > { %7202 = vmatmul.msk.f32.vlgmr.msrb.gmra.mxu1 %vm533_vm1, %v10109_v28  ;;  %v2281_v28 = vpop.f32.mrf.mxu3  ;;  %v2348_v25 = vpop.f32.mrf.mxu2 }
 0x680   : > { %2729 = vmatpush.msrb.mxu1 %v10240_v11 }
 0x682   : > { %2730 = vmatpush.msrb.mxu1 %v10246_v27 }
 0x684   : > { %2731 = vmatpush.msrb.mxu1 %v10252_v45 }
 0x686   : > { %2732 = vmatpush.msrb.mxu1 %v10258_v49 }
 0x687   : > { %7203 = vmatmul.msk.f32.gmra.mxu1 %vm533_vm1, %v10129_v1  ;;  %v10291_v1 = vld [vmem:[%s13777_s3] sm:$0xff]  ;;  %v2284_v29 = vpop.f32.mrf.mxu3 }
 0x688   : > { %2733 = vmatpush.msrb.mxu1 %v10266_v0  ;;  %14342 = vst [vmem:[#allocation87_spill] sm:$0xff] %v10291_v1  ;;  %v2282_v0 = vadd.f32 %v2281_v28, %v2220_v10  ;;  %v2285_v62 = vadd.f32 %v2284_v29, %v2223_v50  ;;  %v10304_v10 = vld [vmem:[%s13781_s7 + $0xb0] sm:$0xff] }
 0x689   : > { %14343 = vst [vmem:[#allocation82_spill] sm:$0xff] %v10304_v10 }
 0x68a   : > { %2734 = vmatpush.msrb.mxu1 %v10272_v8  ;;  %v2476_v8 = vpop.f32.mrf.mxu2  ;;  %v2379_v45 = vadd.f32 %v2345_v47, %v2282_v0  ;;  %v10338_v47 = vld [vmem:[%s13781_s7 + $0x88] sm:$0xff] }
 0x68b   : > { %14349 = vst [vmem:[#allocation44_spill] sm:$0xff] %v10338_v47 }
 0x68c   : > { %2735 = vmatpush.msrb.mxu1 %v10278_v12 }
 0x68e   : > { %2736 = vmatpush.msrb.mxu1 %v10284_v18 }
 0x68f   : > { %7204 = vmatmul.msk.f32.gmra.mxu1 %vm533_vm1, %v7185_v19  ;;  %v2415_v12 = vpop.f32.mrf.mxu3 }
 0x690   : > { %2737 = vmatpush.msrb.mxu1 %v10291_v1  ;;  %v2477_v18 = vadd.f32 %v2476_v8, %v2415_v12  ;;  %v10298_v1 = vld [vmem:[%s13781_s7 + $0xb8] sm:$0xff] }
 0x691   : > { %v10323_v12 = vld [vmem:[%s13781_s7 + $0x98] sm:$0xff] }
 0x692   : > { %v2511_v19 = vadd.f32 %v2477_v18, %v2377_v7  ;;  %v2479_v59 = vpop.f32.mrf.mxu2  ;;  %14346 = vst [vmem:[#allocation86_spill] sm:$0xff] %v10323_v12 }
 0x694   : > { %v2517_v49 = vadd.f32 %v2511_v19, %v14254_v14  ;;  %v10358_v19 = vld [vmem:[%s13781_s7 + $0x70] sm:$0xff] }
 0x695   : > { %14353 = vst [vmem:[#allocation42_spill] sm:$0xff] %v10358_v19 }
 0x696   : > { %v2523_v27 = vmax.f32 %v2517_v49, 0.0 }
 0x697   : > { %v2418_v11 = vpop.f32.mrf.mxu3 }
 0x698   : > { %v2480_v44 = vadd.f32 %v2479_v59, %v2418_v11  ;;  %2554 = vmatmul.f32.vlgmr.msrb.gmra.mxu3 %v2523_v27  ;;  %2606 = vmatmul.f32.vlgmr.msra.gmra.mxu2 %v2523_v27  ;;  %v10311_v11 = vld [vmem:[%s13781_s7 + $0xa8] sm:$0xff]  ;;  %v2381_v27 = vadd.f32 %v2348_v25, %v2285_v62  ;;  %v10344_v25 = vld [vmem:[%s13781_s7 + $0x80] sm:$0xff] }
 0x699   : > { %2848 = vmatpush.msra.mxu2 %v10298_v1  ;;  %14344 = vst [vmem:[#allocation89_spill] sm:$0xff] %v10311_v11  ;;  %v10364_v62 = vld [vmem:[%s13781_s7 + $0x68] sm:$0xff] }
 0x69a   : > { %v2513_v8 = vadd.f32 %v2480_v44, %v2379_v45  ;;  %v2482_v44 = vpop.f32.mrf.mxu2  ;;  %v10317_v45 = vld [vmem:[%s13781_s7 + $0xa0] sm:$0xff]  ;;  %14350 = vst [vmem:[#allocation45_spill] sm:$0xff] %v10344_v25 }
 0x69b   : > { %2849 = vmatpush.msra.mxu2 %v10304_v10  ;;  %14345 = vst [vmem:[#allocation84_spill] sm:$0xff] %v10317_v45 }
 0x69c   : > { %v2519_v59 = vadd.f32 %v2513_v8, %v14254_v14  ;;  %14354 = vst [vmem:[#allocation47_spill] sm:$0xff] %v10364_v62  ;;  %v10370_v8 = vld [vmem:[%s13781_s7 + $0x60] sm:$0xff] }
 0x69d   : > { %2850 = vmatpush.msra.mxu2 %v10311_v11  ;;  %14355 = vst [vmem:[#allocation54_spill] sm:$0xff] %v10370_v8 }
 0x69e   : > { %v2525_v49 = vmax.f32 %v2519_v59, 0.0 }
 0x69f   : > { %v2421_v50 = vpop.f32.mrf.mxu3  ;;  %2851 = vmatpush.msra.mxu2 %v10317_v45 }
 0x6a0   : > { %v2483_v0 = vadd.f32 %v2482_v44, %v2421_v50  ;;  %2557 = vmatmul.f32.gmra.mxu3 %v2525_v49  ;;  %2609 = vmatmul.f32.gmra.mxu2 %v2525_v49  ;;  %v2304_v49 = vpop.f32.mrf.mxu0 }
 0x6a1   : > { %2852 = vmatpush.msra.mxu2 %v10323_v12 }
 0x6a2   : > { %v2515_v54 = vadd.f32 %v2483_v0, %v2381_v27 }
 0x6a3   : > { %2853 = vmatpush.msra.mxu2 %v10331_v52 }
 0x6a4   : > { %v2521_v28 = vadd.f32 %v2515_v54, %v14254_v14 }
 0x6a5   : > { %2854 = vmatpush.msra.mxu2 %v10338_v47 }
 0x6a6   : > { %v2527_v29 = vmax.f32 %v2521_v28, 0.0 }
 0x6a7   : > { %2855 = vmatpush.msra.mxu2 %v10344_v25 }
 0x6a8   : > { %2560 = vmatmul.f32.gmra.mxu3 %v2527_v29  ;;  %2612 = vmatmul.f32.gmra.mxu2 %v2527_v29  ;;  %v2307_v44 = vpop.f32.mrf.mxu0 }
 0x6a9   : > { %2856 = vmatpush.msra.mxu2 %v10350_v21 }
 0x6ab   : > { %2857 = vmatpush.msra.mxu2 %v10358_v19 }
 0x6ad   : > { %2858 = vmatpush.msra.mxu2 %v10364_v62 }
 0x6af   : > { %2859 = vmatpush.msra.mxu2 %v10370_v8 }
 0x6b0   : > { %v2310_v28 = vpop.f32.mrf.mxu0 }
 0x6bc   : > { %v10326_v18 = vpop.f32.mrf.mxu1 }
 0x6bd   : > { %14347 = vst [vmem:[#allocation88_spill] sm:$0xff] %v10326_v18  ;;  %v2441_v18 = vpop.f32.mrf.mxu0 }
 0x6c4   : > { %v10353_v7 = vpop.f32.mrf.mxu1 }
 0x6c5   : > { %14352 = vst [vmem:[#allocation46_spill] sm:$0xff] %v10353_v7  ;;  %v2444_v47 = vpop.f32.mrf.mxu0 }
 0x6cc   : > { %v2243_v59 = vpop.f32.mrf.mxu1 }
 0x6cd   : > { %v2305_v7 = vadd.f32 %v2304_v49, %v2243_v59  ;;  %v10379_v59 = vld [vmem:[%s13781_s7 + $0x58] sm:$0xff] }
 0x6ce   : > { %14356 = vst [vmem:[#allocation48_spill] sm:$0xff] %v10379_v59 }
 0x6d4   : > { %v2246_v27 = vpop.f32.mrf.mxu1 }
 0x6d5   : > { %v2308_v12 = vadd.f32 %v2307_v44, %v2246_v27  ;;  %v10412_v27 = vld [vmem:[%s13781_s7 + $0x30] sm:$0xff] }
 0x6d6   : > { %14361 = vst [vmem:[#allocation58_spill] sm:$0xff] %v10412_v27 }
 0x6dc   : > { %v2249_v50 = vpop.f32.mrf.mxu1 }
 0x6e4   : > { %v2368_v0 = vpop.f32.mrf.mxu1 }
 0x6e5   : > { %v2378_v62 = vadd.f32 %v2368_v0, %v2305_v7  ;;  %v10425_v0 = vld [vmem:[%s13781_s7 + $0x20] sm:$0xff] }
 0x6e6   : > { %14363 = vst [vmem:[#allocation60_spill] sm:$0xff] %v10425_v0 }
 0x6ec   : > { %v2371_v54 = vpop.f32.mrf.mxu1 }
 0x6ed   : > { %v2380_v11 = vadd.f32 %v2371_v54, %v2308_v12  ;;  %v2447_v12 = vpop.f32.mrf.mxu0  ;;  %v10433_v54 = vld [vmem:[%s13781_s7 + $0x18] sm:$0xff] }
 0x6ee   : > { %14364 = vst [vmem:[#allocation53_spill] sm:$0xff] %v10433_v54 }
 0x6f4   : > { %v2374_v29 = vpop.f32.mrf.mxu1 }
 0x6fc   : > { %v2502_v19 = vpop.f32.mrf.mxu1 }
 0x6fd   : > { %v2503_v21 = vadd.f32 %v2502_v19, %v2441_v18 }
 0x6ff   : > { %v2512_v25 = vadd.f32 %v2503_v21, %v2378_v62  ;;  %v10406_v62 = vld [vmem:[%s13781_s7 + $0x38] sm:$0xff] }
 0x700   : > { %14360 = vst [vmem:[#allocation51_spill] sm:$0xff] %v10406_v62 }
 0x701   : > { %v2518_v52 = vadd.f32 %v2512_v25, %v14255_v17  ;;  %v10385_v25 = vld [vmem:[%s13781_s7 + $0x50] sm:$0xff] }
 0x702   : > { %14357 = vst [vmem:[#allocation56_spill] sm:$0xff] %v10385_v25 }
 0x703   : > { %v2524_v8 = vmax.f32 %v2518_v52, 0.0  ;;  %v10392_v52 = vld [vmem:[%s13781_s7 + $0x48] sm:$0xff] }
 0x704   : > { %v2505_v45 = vpop.f32.mrf.mxu1  ;;  %14358 = vst [vmem:[#allocation49_spill] sm:$0xff] %v10392_v52 }
 0x705   : > { %v2506_v10 = vadd.f32 %v2505_v45, %v2444_v47  ;;  %7205 = vmatmul.msk.f32.vlgmr.msrb.gmra.mxu0 %vm954_vm2, %v2524_v8  ;;  %7208 = vmatmul.msk.f32.vlgmr.msra.gmra.mxu1 %vm954_vm2, %v2524_v8  ;;  %v2311_v47 = vadd.f32 %v2310_v28, %v2249_v50  ;;  %v10419_v50 = vld [vmem:[%s13781_s7 + $0x28] sm:$0xff]  ;;  %v10439_v28 = vld [vmem:[%s13781_s7 + $0x10] sm:$0xff] }
 0x706   : > { %2828 = vmatpush.msra.mxu1 %v10379_v59  ;;  %14362 = vst [vmem:[#allocation52_spill] sm:$0xff] %v10419_v50  ;;  %v10457_v59 = vld [vmem:[%s13780_s6 + $0x10] sm:$0xff] }
 0x707   : > { %v2514_v18 = vadd.f32 %v2506_v10, %v2380_v11  ;;  %v10398_v11 = vld [vmem:[%s13781_s7 + $0x40] sm:$0xff]  ;;  %v2382_v7 = vadd.f32 %v2374_v29, %v2311_v47  ;;  %14365 = vst [vmem:[#allocation63_spill] sm:$0xff] %v10439_v28  ;;  %v10445_v29 = vld [vmem:[%s13781_s7 + $0x8] sm:$0xff] }
 0x708   : > { %2829 = vmatpush.msra.mxu1 %v10385_v25  ;;  %14359 = vst [vmem:[#allocation50_spill] sm:$0xff] %v10398_v11 }
 0x709   : > { %v2520_v45 = vadd.f32 %v2514_v18, %v14255_v17  ;;  %14366 = vst [vmem:[#allocation55_spill] sm:$0xff] %v10445_v29  ;;  %v10451_v18 = vld [vmem:[%s13781_s7] sm:$0xff] }
 0x70a   : > { %2830 = vmatpush.msra.mxu1 %v10392_v52  ;;  %14367 = vst [vmem:[#allocation66_spill] sm:$0xff] %v10451_v18 }
 0x70b   : > { %v2526_v21 = vmax.f32 %v2520_v45, 0.0  ;;  %14368 = vst [vmem:[#allocation57_spill] sm:$0xff] %v10457_v59 }
 0x70c   : > { %v2508_v10 = vpop.f32.mrf.mxu1  ;;  %2831 = vmatpush.msra.mxu1 %v10398_v11 }
 0x70d   : > { %v2509_v19 = vadd.f32 %v2508_v10, %v2447_v12  ;;  %7206 = vmatmul.msk.f32.gmra.mxu0 %vm954_vm2, %v2526_v21  ;;  %7209 = vmatmul.msk.f32.gmra.mxu1 %vm954_vm2, %v2526_v21 }
 0x70e   : > { %2832 = vmatpush.msra.mxu1 %v10406_v62 }
 0x70f   : > { %v2516_v8 = vadd.f32 %v2509_v19, %v2382_v7 }
 0x710   : > { %2833 = vmatpush.msra.mxu1 %v10412_v27 }
 0x711   : > { %v2522_v49 = vadd.f32 %v2516_v8, %v14255_v17 }
 0x712   : > { %2834 = vmatpush.msra.mxu1 %v10419_v50 }
 0x713   : > { %v2528_v44 = vmax.f32 %v2522_v49, 0.0 }
 0x714   : > { %2835 = vmatpush.msra.mxu1 %v10425_v0 }
 0x715   : > { %7207 = vmatmul.msk.f32.gmra.mxu0 %vm954_vm2, %v2528_v44  ;;  %7210 = vmatmul.msk.f32.gmra.mxu1 %vm954_vm2, %v2528_v44 }
 0x716   : > { %2836 = vmatpush.msra.mxu1 %v10433_v54 }
 0x718   : > { %2837 = vmatpush.msra.mxu1 %v10439_v28 }
 0x71a   : > { %2838 = vmatpush.msra.mxu1 %v10445_v29 }
 0x71b   : > { %v2555_v45 = vpop.f32.mrf.mxu3  ;;  %v2607_v12 = vpop.f32.mrf.mxu2 }
 0x71c   : > { %2839 = vmatpush.msra.mxu1 %v10451_v18 }
 0x723   : > { %v2558_v10 = vpop.f32.mrf.mxu3  ;;  %v2610_v7 = vpop.f32.mrf.mxu2 }
 0x72b   : > { %v2561_v49 = vpop.f32.mrf.mxu3  ;;  %v2613_v44 = vpop.f32.mrf.mxu2 }
 0x782   : > { %v2581_v47 = vpop.f32.mrf.mxu0  ;;  %v2633_v21 = vpop.f32.mrf.mxu1 }
 0x783   : > { %v2582_v62 = vadd.f32 %v2581_v47, %v2555_v45  ;;  %v2634_v11 = vadd.f32 %v2633_v21, %v2607_v12  ;;  %v10533_v45 = vld [vmem:[%s13777_s3 + $0xb0] sm:$0xff]  ;;  %v10539_v12 = vld [vmem:[%s13777_s3 + $0xf8] sm:$0xff]  ;;  %v10545_v47 = vld [vmem:[%s13777_s3 + $0xa8] sm:$0xff] }
 0x784   : > { %14376 = vst [vmem:[#allocation72_spill] sm:$0xff] %v10539_v12  ;;  %v10551_v21 = vld [vmem:[%s13777_s3 + $0xf0] sm:$0xff] }
 0x785   : > { %v2642_v25 = vmax.f32 %v2582_v62, %v2634_v11  ;;  %v10483_v11 = vld [vmem:[%s13777_s3 + $0xc8] sm:$0xff]  ;;  %v10489_v62 = vld [vmem:[%s13777_s3 + $0x110] sm:$0xff]  ;;  %14377 = vst [vmem:[#allocation73_spill] sm:$0xff] %v10551_v21 }
 0x786   : > { %14371 = vst [vmem:[#allocation61_spill] sm:$0xff] %v10489_v62 }
 0x78a   : > { %v2584_v19 = vpop.f32.mrf.mxu0  ;;  %v2636_v8 = vpop.f32.mrf.mxu1 }
 0x78b   : > { %v2585_v29 = vadd.f32 %v2584_v19, %v2558_v10  ;;  %v2637_v0 = vadd.f32 %v2636_v8, %v2610_v7  ;;  %v10557_v10 = vld [vmem:[%s13777_s3 + $0xa0] sm:$0xff]  ;;  %v10563_v7 = vld [vmem:[%s13777_s3 + $0xe8] sm:$0xff]  ;;  %v10569_v19 = vld [vmem:[%s13777_s3 + $0x98] sm:$0xff] }
 0x78c   : > { %14378 = vst [vmem:[#allocation74_spill] sm:$0xff] %v10563_v7  ;;  %v10575_v8 = vld [vmem:[%s13777_s3 + $0xe0] sm:$0xff] }
 0x78d   : > { %v2643_v18 = vmax.f32 %v2585_v29, %v2637_v0  ;;  %v10501_v0 = vld [vmem:[%s13777_s3 + $0x108] sm:$0xff]  ;;  %v10519_v29 = vld [vmem:[%s13780_s6 + $0x18] sm:$0xf]  ;;  %14379 = vst [vmem:[#allocation90_spill] sm:$0xff] %v10575_v8 }
 0x78e   : > { %14372 = vst [vmem:[#allocation64_spill] sm:$0xff] %v10501_v0 }
 0x78f   : > { %14374 = vst [vmem:[#allocation70_spill] sm:$0xff] %v10519_v29 }
 0x792   : > { %v2587_v28 = vpop.f32.mrf.mxu0  ;;  %v2639_v54 = vpop.f32.mrf.mxu1 }
 0x793   : > { %v2588_v50 = vadd.f32 %v2587_v28, %v2561_v49  ;;  %v2640_v27 = vadd.f32 %v2639_v54, %v2613_v44  ;;  %v10507_v54 = vld [vmem:[%s13777_s3 + $0xb8] sm:$0xff]  ;;  %v10513_v28 = vld [vmem:[%s13777_s3 + $0x100] sm:$0xff]  ;;  %v10581_v49 = vld [vmem:[%s13777_s3 + $0x90] sm:$0xff] }
 0x794   : > { %14373 = vst [vmem:[#allocation67_spill] sm:$0xff] %v10513_v28  ;;  %v10587_v44 = vld [vmem:[%s13777_s3 + $0xd8] sm:$0xff] }
 0x795   : > { %v2644_v52 = vmax.f32 %v2588_v50, %v2640_v27  ;;  %v10464_v27 = vld [vmem:[%s13780_s6] sm:$0xff]  ;;  %14380 = vst [vmem:[#allocation91_spill] sm:$0xff] %v10587_v44 }
 0x796   : > { %14369 = vst [vmem:[#allocation69_spill] sm:$0xff] %v10464_v27  ;;  %v10495_v50 = vld [vmem:[%s13777_s3 + $0xc0] sm:$0xff] }
 0x797   : > { %2658 = vmatpush.msra.mxu0 %v2644_v52  ;;  %2681 = vmatpush.msra.mxu3 %v2644_v52  ;;  %v10477_v52 = vld [vmem:[%s13777_s3 + $0x118] sm:$0xff] }
 0x798   : > { %14370 = vst [vmem:[#allocation59_spill] sm:$0xff] %v10477_v52 }
 0x799   : > { %2659 = vmatpush.msra.mxu0 %v2643_v18  ;;  %2682 = vmatpush.msra.mxu3 %v2643_v18  ;;  %v10526_v18 = vld [vmem:[%s13780_s6 + $0x8] sm:$0xf] }
 0x79a   : > { %14375 = vst [vmem:[#allocation71_spill] sm:$0xff] %v10526_v18 }
 0x79b   : > { %2660 = vmatpush.msra.mxu0 %v2642_v25  ;;  %2683 = vmatpush.msra.mxu3 %v2642_v25  ;;  %v10471_v25 = vld [vmem:[%s13777_s3 + $0xd0] sm:$0xff] }
 0x79c   : > { %7213 = vmatmul.msk.f32.vlgmr.msra.gmra.mxu3 %vm1092_vm3, %v10457_v59  ;;  %7211 = vmatmul.msk.f32.vlgmr.msra.gmra.mxu0 %vm1092_vm3, %v10464_v27 }
 0x79d   : > { %2707 = vmatpush.msrb.mxu0 %v10471_v25  ;;  %2780 = vmatpush.msrb.mxu3 %v10477_v52 }
 0x79f   : > { %2708 = vmatpush.msrb.mxu0 %v10483_v11  ;;  %2781 = vmatpush.msrb.mxu3 %v10489_v62 }
 0x7a1   : > { %2709 = vmatpush.msrb.mxu0 %v10495_v50  ;;  %2782 = vmatpush.msrb.mxu3 %v10501_v0  ;;  %v10641_v0 = vld [vmem:[%s13777_s3 + $0x48] sm:$0xff] }
 0x7a2   : > { %14388 = vst [vmem:[#allocation99_spill] sm:$0xff] %v10641_v0 }
 0x7a3   : > { %2710 = vmatpush.msrb.mxu0 %v10507_v54  ;;  %2783 = vmatpush.msrb.mxu3 %v10513_v28  ;;  %v10635_v28 = vld [vmem:[%s13777_s3 + $0x50] sm:$0xff] }
 0x7a4   : > { %7214 = vmatmul.msk.f32.gmra.mxu3 %vm1092_vm3, %v10519_v29  ;;  %7212 = vmatmul.msk.f32.gmra.mxu0 %vm1092_vm3, %v10526_v18  ;;  %v10623_v29 = vld [vmem:[%s13777_s3 + $0x60] sm:$0xff]  ;;  %v10629_v18 = vld [vmem:[%s13777_s3 + $0x58] sm:$0xff]  ;;  %14387 = vst [vmem:[#allocation98_spill] sm:$0xff] %v10635_v28 }
 0x7a5   : > { %2711 = vmatpush.msrb.mxu0 %v10533_v45  ;;  %2784 = vmatpush.msrb.mxu3 %v10539_v12  ;;  %v10617_v12 = vld [vmem:[%s13777_s3 + $0x68] sm:$0xff]  ;;  %14385 = vst [vmem:[#allocation96_spill] sm:$0xff] %v10623_v29 }
 0x7a6   : > { %14384 = vst [vmem:[#allocation95_spill] sm:$0xff] %v10617_v12 }
 0x7a7   : > { %2712 = vmatpush.msrb.mxu0 %v10545_v47  ;;  %2785 = vmatpush.msrb.mxu3 %v10551_v21  ;;  %v10605_v21 = vld [vmem:[%s13777_s3 + $0x78] sm:$0xff]  ;;  %14386 = vst [vmem:[#allocation97_spill] sm:$0xff] %v10629_v18 }
 0x7a8   : > { %14382 = vst [vmem:[#allocation93_spill] sm:$0xff] %v10605_v21 }
 0x7a9   : > { %2713 = vmatpush.msrb.mxu0 %v10557_v10  ;;  %2786 = vmatpush.msrb.mxu3 %v10563_v7  ;;  %v10593_v7 = vld [vmem:[%s13777_s3 + $0x88] sm:$0xff] }
 0x7ab   : > { %2714 = vmatpush.msrb.mxu0 %v10569_v19  ;;  %2787 = vmatpush.msrb.mxu3 %v10575_v8  ;;  %v10599_v8 = vld [vmem:[%s13777_s3 + $0x80] sm:$0xff] }
 0x7ac   : > { %14381 = vst [vmem:[#allocation92_spill] sm:$0xff] %v10599_v8 }
 0x7ad   : > { %2715 = vmatpush.msrb.mxu0 %v10581_v49  ;;  %2788 = vmatpush.msrb.mxu3 %v10587_v44  ;;  %v10611_v44 = vld [vmem:[%s13777_s3 + $0x70] sm:$0xff] }
 0x7ae   : > { %14383 = vst [vmem:[#allocation94_spill] sm:$0xff] %v10611_v44 }
 0x7af   : > { %2805 = vmatpush.msra.mxu0 %v10593_v7 }
 0x7b1   : > { %2806 = vmatpush.msra.mxu0 %v10599_v8 }
 0x7b3   : > { %2807 = vmatpush.msra.mxu0 %v10605_v21 }
 0x7b5   : > { %2808 = vmatpush.msra.mxu0 %v10611_v44 }
 0x7b7   : > { %2809 = vmatpush.msra.mxu0 %v10617_v12 }
 0x7b9   : > { %2810 = vmatpush.msra.mxu0 %v10623_v29 }
 0x7bb   : > { %2811 = vmatpush.msra.mxu0 %v10629_v18 }
 0x7bd   : > { %2812 = vmatpush.msra.mxu0 %v10635_v28 }
 0x7bf   : > { %2813 = vmatpush.msra.mxu0 %v10641_v0 }
 0x819   : > { %v2662_v62 = vpop.f32.mrf.mxu0 }
 0x81f   : > { %v2685_v52 = vpop.f32.mrf.mxu3 }
 0x820   : > { %v2691_v59 = vmax.f32 %v2662_v62, %v2685_v52 }
 0x821   : > { %v2665_v27 = vpop.f32.mrf.mxu0 }
 0x822   : > { %7216 = vmatmul.msk.f32.vlgmr.msrb.gmra.mxu1 %vm1181_vm4, %v2691_v59  ;;  %v2695_v29 = vrot.slane %v2691_v59, 2  ;;  %v2742_v12 = vrot.slane %v2691_v59, 4  ;;  %v2768_v52 = vrot.slane %v2691_v59, 3 }
 0x823   : > { %7238 = vmatpush.msk.msrb.mxu1 %vm543_vm0, %v9701_v36 }
 0x825   : > { %2996 = vmatpush.msrb.mxu1 %v9708_v43  ;;  %v10659_v43 = vld [vmem:[%s14139_s1 + $0xb0] sm:$0xf] }
 0x827   : > { %v2688_v18 = vpop.f32.mrf.mxu3  ;;  %2997 = vmatpush.msrb.mxu1 %v9714_v41 }
 0x828   : > { %v2692_v28 = vmax.f32 %v2665_v27, %v2688_v18  ;;  %v2793_v27 = vrot.slane %v2691_v59, 1 }
 0x829   : > { %2998 = vmatpush.msrb.mxu1 %v9720_v63  ;;  %v10668_v63 = vld [vmem:[%s14139_s1 + $0xa0] sm:$0xff] }
 0x82a   : > { %v2696_v0 = vrot.slane %v2692_v28, 2  ;;  %v2743_v44 = vrot.slane %v2692_v28, 4  ;;  %v2769_v21 = vrot.slane %v2692_v28, 3  ;;  %v2794_v41 = vrot.slane %v2692_v28, 1  ;;  %v10683_v28 = vld [vmem:[%s14139_s1 + $0x80] sm:$0xff] }
 0x82c   : > { %v2697_v62 = vsel %vm1177_vm5, %v2695_v29, %v2696_v0  ;;  %v2744_v8 = vsel %vm543_vm0, %v2742_v12, %v2743_v44  ;;  %v2770_v36 = vsel %vm1282_vm6, %v2768_v52, %v2769_v21  ;;  %v10675_v0 = vld [vmem:[%s14139_s1 + $0x90] sm:$0xff]  ;;  %v14400_v12 = vld [vmem:[#allocation30_spill] sm:$0xff] }
 0x82d   : > { %7215 = vmatmul.msk.f32.vlgmr.msrb.gmra.mxu0 %vm1181_vm4, %v2697_v62  ;;  %7217 = vmatmul.msk.f32.vlgmr.msrb.gmra.mxu2 %vm1181_vm4, %v2744_v8  ;;  %v10782_v44 = vld [vmem:[%s8420_s17 + $0x61] sm:$0xff] }
 0x82e   : > { %7218 = vmatmul.msk.f32.vlgmr.msrb.gmra.mxu3 %vm1181_vm4, %v2770_v36  ;;  %7230 = vmatpush.msk.msrb.mxu0 %vm543_vm0, %v10659_v43  ;;  %v14401_v62 = vld [vmem:[#allocation18_spill] sm:$0xff]  ;;  %v14402_v36 = vld [vmem:[#allocation31_spill] sm:$0xff] }
 0x82f   : > { %7242 = vmatpush.msk.msrb.mxu2 %vm543_vm0, %v9734_v22  ;;  %v2795_v22 = vsel %vm1308_vm7, %v2793_v27, %v2794_v41  ;;  %v10791_v41 = vld [vmem:[%s13782_s8] sm:$0xf]  ;;  %v7261_v27 = vld [vmem:[%s8420_s17 + $0x6b] sm:$0xff] }
 0x830   : > { %2935 = vmatpush.msrb.mxu0 %v10668_v63 }
 0x831   : > { %3022 = vmatpush.msrb.mxu2 %v9742_v42  ;;  %v10694_v42 = vld [vmem:[%s8420_s17 + $0x62] sm:$0xff] }
 0x832   : > { %2936 = vmatpush.msrb.mxu0 %v10675_v0 }
 0x833   : > { %3023 = vmatpush.msrb.mxu2 %v9749_v40 }
 0x834   : > { %2937 = vmatpush.msrb.mxu0 %v10683_v28 }
 0x835   : > { %7219 = vmatmul.msk.f32.vlgmr.msra.gmra.mxu0 %vm1181_vm4, %v2795_v22  ;;  %3024 = vmatpush.msrb.mxu2 %v9758_v60  ;;  %v14403_v22 = vld [vmem:[#allocation13_spill] sm:$0xff] }
 0x836   : > { %7249 = vmatpush.msk.msra.mxu0 %vm543_vm0, %v9764_v61 }
 0x838   : > { %3060 = vmatpush.msra.mxu0 %v9771_v4 }
 0x83a   : > { %3061 = vmatpush.msra.mxu0 %v9777_v39 }
 0x83c   : > { %3062 = vmatpush.msra.mxu0 %v9783_v3 }
 0x83d   : > { %7231 = vmatmul.msk.f32.vlgmr.msrb.gmra.mxu0 %vm533_vm1, %v10694_v42 }
 0x83e   : > { %7271 = vmatpush.msk.msrb.mxu0 %vm543_vm0, %v9794_v46  ;;  %v10706_v46 = vld [vmem:[%s13778_s4] ss:$0 sm:$0xff] }
 0x840   : > { %3194 = vmatpush.msrb.mxu0 %v9801_v30 }
 0x842   : > { %3195 = vmatpush.msrb.mxu0 %v9810_v6 }
 0x844   : > { %3196 = vmatpush.msrb.mxu0 %v9816_v13  ;;  %v10722_v13 = vld [vmem:[%s8420_s17 + $0x6a] sm:$0xff] }
 0x845   : > { %7232 = vmatmul.msk.f32.gmra.mxu0 %vm533_vm1, %v10722_v13 }
 0x89f   : > { %v2739_v60 = vpop.f32.mrf.mxu1 }
 0x8aa   : > { %v2717_v40 = vpop.f32.mrf.mxu0 }
 0x8ab   : > { %v2740_v4 = vadd.f32 %v2739_v60, %v2717_v40  ;;  %v14404_v40 = vld [vmem:[#allocation32_spill] sm:$0xff] }
 0x8ac   : > { %v10801_v60 = vld [vmem:[%s14139_s1 + $0xb8] sm:$0xf] }
 0x8b0   : > { %v2764_v61 = vpop.f32.mrf.mxu2 }
 0x8b1   : > { %v2790_v39 = vpop.f32.mrf.mxu3  ;;  %v2767_v59 = vadd.f32 %v2764_v61, %v2740_v4  ;;  %v14405_v61 = vld [vmem:[#allocation19_spill] sm:$0xff]  ;;  %v10811_v4 = vld [vmem:[%s14139_s1 + $0xa8] sm:$0xff] }
 0x8b2   : > { %v2815_v3 = vpop.f32.mrf.mxu0 }
 0x8b3   : > { %v2816_v29 = vadd.f32 %v2815_v3, %v2790_v39  ;;  %v7258_v39 = vld [vmem:[%s8420_s17 + $0x69] sm:$0xff]  ;;  %v14406_v3 = vld [vmem:[#allocation33_spill] sm:$0xff] }
 0x8b5   : > { %v2818_v18 = vadd.f32 %v2816_v29, %v2767_v59  ;;  %v14407_v59 = vld [vmem:[#allocation15_spill] sm:$0xff]  ;;  %v10820_v29 = vld [vmem:[%s14139_s1 + $0x98] sm:$0xff] }
 0x8b7   : > { %v2819_v30 = vadd.f32 %v10706_v46, %v2818_v18  ;;  %v10827_v18 = vld [vmem:[%s13782_s8 + $0x4] sm:$0xf] }
 0x8b9   : > { %v2820_v6 = vmax.f32 %v2819_v30, 0.0  ;;  %v7262_v30 = vld [vmem:[%s8420_s17 + $0x73] sm:$0xff] }
 0x8bb   : > { %7220 = vmatmul.msk.f32.vlgmr.msra.gmra.mxu1 %vm1353_vm8, %v2820_v6  ;;  %7221 = vmatmul.msk.f32.vlgmr.msra.gmra.mxu2 %vm1353_vm8, %v2820_v6  ;;  %v14408_v6 = vld [vmem:[#allocation23_spill] sm:$0xff] }
 0x8bc   : > { %7263 = vmatpush.msk.msra.mxu1 %vm543_vm0, %v9855_v9  ;;  %7267 = vmatpush.msk.msra.mxu2 %vm543_vm0, %v9862_v37  ;;  %v10727_v9 = vld [vmem:[%s8420_s17 + $0x72] sm:$0xff]  ;;  %v7224_v37 = vld [vmem:[%s8420_s17 + $0x60] sm:$0xff] }
 0x8bd   : > { %7233 = vmatmul.msk.f32.gmra.mxu0 %vm533_vm1, %v10727_v9 }
 0x8be   : > { %3133 = vmatpush.msra.mxu1 %v9875_v5  ;;  %3159 = vmatpush.msra.mxu2 %v9881_v56  ;;  %v10737_v5 = vld [vmem:[%s8420_s17 + $0x64] sm:$0xff] }
 0x8bf   : > { %v7225_v56 = vld [vmem:[%s8420_s17 + $0x68] sm:$0xff] }
 0x8c0   : > { %3134 = vmatpush.msra.mxu1 %v9894_v51  ;;  %3160 = vmatpush.msra.mxu2 %v9900_v58  ;;  %v10752_v51 = vld [vmem:[%s8420_s17 + $0x6c] sm:$0xff] }
 0x8c1   : > { %v7226_v58 = vld [vmem:[%s8420_s17 + $0x70] sm:$0xff] }
 0x8c2   : > { %3135 = vmatpush.msra.mxu1 %v9912_v31  ;;  %3161 = vmatpush.msra.mxu2 %v9918_v15  ;;  %v14390_v31 = vld [vmem:[#allocation38_spill] sm:$0xff]  ;;  %v14391_v15 = vld [vmem:[#allocation21_spill] sm:$0xff] }
 0x8c3   : > { %7239 = vmatmul.msk.f32.vlgmr.msrb.gmra.mxu1 %vm533_vm1, %v7224_v37  ;;  %7243 = vmatmul.msk.f32.vlgmr.msrb.gmra.mxu2 %vm533_vm1, %v7224_v37  ;;  %v10836_v37 = vld [vmem:[%s14139_s1 + $0x88] sm:$0xff] }
 0x8c4   : > { %3260 = vmatpush.msrb.mxu1 %v9926_v48  ;;  %3300 = vmatpush.msrb.mxu2 %v9938_v32  ;;  %v10767_v48 = vld [vmem:[%s8420_s17 + $0x74] sm:$0xff]  ;;  %v14394_v32 = vld [vmem:[#allocation14_spill] sm:$0xff] }
 0x8c5   : > { %7250 = vmatmul.msk.f32.vlgmr.msra.gmra.mxu0 %vm533_vm1, %v10737_v5 }
 0x8c6   : > { %3261 = vmatpush.msrb.mxu1 %v9944_v57  ;;  %3301 = vmatpush.msrb.mxu2 %v9956_v20  ;;  %v14395_v57 = vld [vmem:[#allocation26_spill] sm:$0xff]  ;;  %v14396_v20 = vld [vmem:[#allocation28_spill] sm:$0xff] }
 0x8c7   : > { %3312 = vmatpush.msra.mxu0 %v9834_v38  ;;  %v14389_v38 = vld [vmem:[#allocation20_spill] sm:$0xff] }
 0x8c8   : > { %3262 = vmatpush.msrb.mxu1 %v9962_v24  ;;  %v7260_v24 = vld [vmem:[%s8420_s17 + $0x63] sm:$0xff] }
 0x8c9   : > { %3313 = vmatpush.msra.mxu0 %v9841_v53  ;;  %v14392_v53 = vld [vmem:[#allocation12_spill] sm:$0xff] }
 0x8ca   : > { %3263 = vmatpush.msrb.mxu1 %v9974_v23  ;;  %v14397_v23 = vld [vmem:[#allocation16_spill] sm:$0xff] }
 0x8cb   : > { %7240 = vmatmul.msk.f32.gmra.mxu1 %vm533_vm1, %v7225_v56  ;;  %7244 = vmatmul.msk.f32.gmra.mxu2 %vm533_vm1, %v7225_v56  ;;  %v10842_v56 = vld [vmem:[%s14139_s1 + $0x138] sm:$0xf] }
 0x8cc   : > { %3264 = vmatpush.msrb.mxu1 %v9986_v2  ;;  %3314 = vmatpush.msra.mxu0 %v9847_v26  ;;  %v14393_v26 = vld [vmem:[#allocation22_spill] sm:$0xff]  ;;  %v14398_v2 = vld [vmem:[#allocation29_spill] sm:$0xff] }
 0x8cd   : > { %7251 = vmatmul.msk.f32.gmra.mxu0 %vm533_vm1, %v10752_v51 }
 0x8ce   : > { %3265 = vmatpush.msrb.mxu1 %v9998_v55  ;;  %3315 = vmatpush.msra.mxu0 %v14390_v31  ;;  %v14399_v55 = vld [vmem:[#allocation17_spill] sm:$0xff]  ;;  %v7259_v31 = vld [vmem:[%s8420_s17 + $0x71] sm:$0xff] }
 0x8d0   : > { %3266 = vmatpush.msrb.mxu1 %v14389_v38  ;;  %3316 = vmatpush.msra.mxu0 %v14392_v53  ;;  %v14409_v38 = vld [vmem:[#allocation25_spill] sm:$0xff]  ;;  %v10860_v53 = vld [vmem:[%s14139_s1 + $0x118] sm:$0xff] }
 0x8d2   : > { %3267 = vmatpush.msrb.mxu1 %v14391_v15  ;;  %3317 = vmatpush.msra.mxu0 %v14394_v32  ;;  %v14410_v15 = vld [vmem:[#allocation24_spill] sm:$0xff]  ;;  %v10870_v32 = vld [vmem:[%s14139_s1 + $0x108] sm:$0xff] }
 0x8d3   : > { %7241 = vmatmul.msk.f32.gmra.mxu1 %vm533_vm1, %v7226_v58  ;;  %7245 = vmatmul.msk.f32.gmra.mxu2 %vm533_vm1, %v7226_v58  ;;  %v10852_v58 = vld [vmem:[%s14139_s1 + $0x128] sm:$0xff] }
 0x8d4   : > { %3268 = vmatpush.msrb.mxu1 %v14393_v26  ;;  %3318 = vmatpush.msra.mxu0 %v14397_v23  ;;  %v14411_v26 = vld [vmem:[#allocation27_spill] sm:$0xff]  ;;  %v14414_v23 = vld [vmem:[#allocation37_spill] sm:$0xff] }
 0x8d5   : > { %7252 = vmatmul.msk.f32.gmra.mxu0 %vm533_vm1, %v10767_v48 }
 0x8d6   : > { %3269 = vmatpush.msrb.mxu1 %v14395_v57  ;;  %3319 = vmatpush.msra.mxu0 %v14399_v55  ;;  %v14412_v57 = vld [vmem:[#allocation34_spill] sm:$0xff]  ;;  %v14416_v55 = vld [vmem:[#allocation65_spill] sm:$0xff] }
 0x8d8   : > { %3270 = vmatpush.msrb.mxu1 %v14396_v20  ;;  %3320 = vmatpush.msra.mxu0 %v14401_v62  ;;  %v10877_v20 = vld [vmem:[%s14139_s1 + $0x78] sm:$0xf] }
 0x8da   : > { %3271 = vmatpush.msrb.mxu1 %v14398_v2  ;;  %3321 = vmatpush.msra.mxu0 %v14403_v22  ;;  %v14415_v2 = vld [vmem:[#allocation62_spill] sm:$0xff] }
 0x8db   : > { %7264 = vmatmul.msk.f32.vlgmr.msra.gmra.mxu1 %vm533_vm1, %v7260_v24  ;;  %7268 = vmatmul.msk.f32.vlgmr.msra.gmra.mxu2 %vm533_vm1, %v7260_v24  ;;  %v10885_v24 = vld [vmem:[%s14139_s1 + $0x68] sm:$0xff] }
 0x8dc   : > { %3272 = vmatpush.msrb.mxu1 %v14400_v12  ;;  %3322 = vmatpush.msra.mxu0 %v14405_v61  ;;  %v14417_v12 = vld [vmem:[#allocation68_spill] sm:$0xff] }
 0x8dd   : > { %7272 = vmatmul.msk.f32.vlgmr.msrb.gmra.mxu0 %vm533_vm1, %v10782_v44 }
 0x8de   : > { %3273 = vmatpush.msrb.mxu1 %v14402_v36  ;;  %3323 = vmatpush.msra.mxu0 %v14407_v59  ;;  %v14423_v59 = vld [vmem:[#allocation89_spill] sm:$0xff] }
 0x8e0   : > { %3274 = vmatpush.msrb.mxu1 %v14404_v40  ;;  %3324 = vmatpush.msra.mxu0 %v14408_v6 }
 0x8e2   : > { %3275 = vmatpush.msrb.mxu1 %v14406_v3  ;;  %3325 = vmatpush.msra.mxu0 %v14409_v38 }
 0x8e3   : > { %7265 = vmatmul.msk.f32.gmra.mxu1 %vm533_vm1, %v7261_v27  ;;  %7269 = vmatmul.msk.f32.gmra.mxu2 %vm533_vm1, %v7261_v27 }
 0x8e4   : > { %3326 = vmatpush.msra.mxu0 %v14410_v15 }
 0x8e5   : > { %7273 = vmatmul.msk.f32.gmra.mxu0 %vm533_vm1, %v7258_v39 }
 0x8e6   : > { %3327 = vmatpush.msra.mxu0 %v14411_v26  ;;  %v14425_v26 = vld [vmem:[#allocation84_spill] sm:$0xff] }
 0x8e8   : > { %3476 = vmatpush.msrb.mxu0 %v14412_v57 }
 0x8eb   : > { %7266 = vmatmul.msk.f32.gmra.mxu1 %vm533_vm1, %v7262_v30  ;;  %7270 = vmatmul.msk.f32.gmra.mxu2 %vm533_vm1, %v7262_v30 }
 0x8ed   : > { %7274 = vmatmul.msk.f32.gmra.mxu0 %vm533_vm1, %v7259_v31 }
 0x938   : > { %v2841_v21 = vpop.f32.mrf.mxu1 }
 0x93e   : > { %v2861_v8 = vpop.f32.mrf.mxu2 }
 0x93f   : > { %v2864_v52 = vmax.f32 %v2841_v21, %v2861_v8  ;;  %v14418_v21 = vld [vmem:[#allocation40_spill] sm:$0xff] }
 0x941   : > { %2880 = vmatpush.msra.mxu3 %v2864_v52 }
 0x942   : > { %7222 = vmatmul.msk.f32.vlgmr.msra.gmra.mxu3 %vm1412_vm9, %v10791_v41 }
 0x943   : > { %2900 = vmatpush.msrb.mxu3 %v2864_v52 }
 0x945   : > { %7234 = vmatpush.msk.msra.mxu3 %vm543_vm0, %v10801_v60 }
 0x947   : > { %2961 = vmatpush.msra.mxu3 %v10811_v4 }
 0x949   : > { %2962 = vmatpush.msra.mxu3 %v10820_v29 }
 0x94a   : > { %7223 = vmatmul.msk.f32.vlgmr.msrb.gmra.mxu3 %vm1412_vm9, %v10827_v18 }
 0x94b   : > { %2963 = vmatpush.msra.mxu3 %v10836_v37 }
 0x94d   : > { %7253 = vmatpush.msk.msrb.mxu3 %vm543_vm0, %v10842_v56 }
 0x94f   : > { %3086 = vmatpush.msrb.mxu3 %v10852_v58 }
 0x951   : > { %3087 = vmatpush.msrb.mxu3 %v10860_v53 }
 0x952   : > { %7235 = vmatmul.msk.f32.vlgmr.msra.gmra.mxu3 %vm533_vm1, %v10694_v42  ;;  %v14413_v42 = vld [vmem:[#allocation35_spill] sm:$0xff] }
 0x953   : > { %3088 = vmatpush.msrb.mxu3 %v10870_v32  ;;  %3477 = vmatpush.msrb.mxu0 %v14413_v42 }
 0x955   : > { %7275 = vmatpush.msk.msra.mxu3 %vm543_vm0, %v10877_v20  ;;  %3478 = vmatpush.msrb.mxu0 %v14414_v23  ;;  %v14427_v23 = vld [vmem:[#allocation43_spill] sm:$0xff] }
 0x957   : > { %3220 = vmatpush.msra.mxu3 %v10885_v24  ;;  %3479 = vmatpush.msrb.mxu0 %v14415_v2 }
 0x959   : > { %3221 = vmatpush.msra.mxu3 %v10204_v34  ;;  %3480 = vmatpush.msrb.mxu0 %v14416_v55  ;;  %v14419_v34 = vld [vmem:[#allocation39_spill] sm:$0xff]  ;;  %v14428_v55 = vld [vmem:[#allocation44_spill] sm:$0xff] }
 0x95a   : > { %7236 = vmatmul.msk.f32.gmra.mxu3 %vm533_vm1, %v10722_v13  ;;  %v14420_v13 = vld [vmem:[#allocation75_spill] sm:$0xff] }
 0x95b   : > { %3222 = vmatpush.msra.mxu3 %v10212_v35  ;;  %3481 = vmatpush.msrb.mxu0 %v14417_v12 }
 0x95d   : > { %3482 = vmatpush.msrb.mxu0 %v14418_v21 }
 0x95f   : > { %3483 = vmatpush.msrb.mxu0 %v10170_v16  ;;  %v2939_v16 = vpop.f32.mrf.mxu0 }
 0x961   : > { %3484 = vmatpush.msrb.mxu0 %v10179_v33 }
 0x962   : > { %7237 = vmatmul.msk.f32.gmra.mxu3 %vm533_vm1, %v10727_v9 }
 0x967   : > { %v2942_v33 = vpop.f32.mrf.mxu0 }
 0x96a   : > { %7254 = vmatmul.msk.f32.vlgmr.msrb.gmra.mxu3 %vm533_vm1, %v10737_v5 }
 0x96b   : > { %3352 = vmatpush.msrb.mxu3 %v14419_v34  ;;  %v14429_v34 = vld [vmem:[#allocation45_spill] sm:$0xff] }
 0x96d   : > { %3353 = vmatpush.msrb.mxu3 %v14420_v13  ;;  %v14430_v13 = vld [vmem:[#allocation41_spill] sm:$0xff] }
 0x96f   : > { %v2945_v35 = vpop.f32.mrf.mxu0 }
 0x972   : > { %7255 = vmatmul.msk.f32.gmra.mxu3 %vm533_vm1, %v10752_v51 }
 0x97a   : > { %7256 = vmatmul.msk.f32.gmra.mxu3 %vm533_vm1, %v10767_v48 }
 0x982   : > { %7276 = vmatmul.msk.f32.vlgmr.msra.gmra.mxu3 %vm533_vm1, %v10782_v44 }
 0x983   : > { %3429 = vmatpush.msra.mxu3 %v10471_v25  ;;  %v3000_v25 = vpop.f32.mrf.mxu1 }
 0x985   : > { %3430 = vmatpush.msra.mxu3 %v10483_v11  ;;  %v3064_v11 = vpop.f32.mrf.mxu0 }
 0x987   : > { %3431 = vmatpush.msra.mxu3 %v10495_v50 }
 0x989   : > { %3432 = vmatpush.msra.mxu3 %v10507_v54 }
 0x98a   : > { %7277 = vmatmul.msk.f32.gmra.mxu3 %vm533_vm1, %v7258_v39  ;;  %v14422_v39 = vld [vmem:[#allocation82_spill] sm:$0xff] }
 0x98b   : > { %3433 = vmatpush.msra.mxu3 %v10533_v45  ;;  %v3003_v50 = vpop.f32.mrf.mxu1  ;;  %v3001_v45 = vadd.f32 %v3000_v25, %v2939_v16  ;;  %v14431_v16 = vld [vmem:[#allocation42_spill] sm:$0xff] }
 0x98c   : > { %v14433_v25 = vld [vmem:[#allocation54_spill] sm:$0xff] }
 0x98d   : > { %3434 = vmatpush.msra.mxu3 %v10545_v47  ;;  %v3067_v54 = vpop.f32.mrf.mxu0  ;;  %v3099_v51 = vadd.f32 %v3064_v11, %v3001_v45  ;;  %v3026_v11 = vpop.f32.mrf.mxu2 }
 0x98f   : > { %3435 = vmatpush.msra.mxu3 %v10557_v10  ;;  %v3004_v10 = vadd.f32 %v3003_v50, %v2942_v33  ;;  %v14432_v33 = vld [vmem:[#allocation47_spill] sm:$0xff] }
 0x991   : > { %3436 = vmatpush.msra.mxu3 %v10569_v19 }
 0x992   : > { %7278 = vmatmul.msk.f32.gmra.mxu3 %vm533_vm1, %v7259_v31 }
 0x993   : > { %3437 = vmatpush.msra.mxu3 %v10581_v49  ;;  %v3006_v9 = vpop.f32.mrf.mxu1  ;;  %v3101_v49 = vadd.f32 %v3067_v54, %v3004_v10 }
 0x994   : > { %v3007_v40 = vadd.f32 %v3006_v9, %v2945_v35 }
 0x995   : > { %v3070_v5 = vpop.f32.mrf.mxu0  ;;  %v3029_v54 = vpop.f32.mrf.mxu2 }
 0x996   : > { %v3103_v6 = vadd.f32 %v3070_v5, %v3007_v40 }
 0x99b   : > { %v3137_v48 = vpop.f32.mrf.mxu1 }
 0x99d   : > { %v3198_v47 = vpop.f32.mrf.mxu0  ;;  %v3032_v45 = vpop.f32.mrf.mxu2 }
 0x99e   : > { %v3199_v8 = vadd.f32 %v3198_v47, %v3137_v48 }
 0x9a0   : > { %v3233_v44 = vadd.f32 %v3199_v8, %v3099_v51 }
 0x9a2   : > { %v3239_v19 = vadd.f32 %v3233_v44, %v14254_v14 }
 0x9a3   : > { %v3140_v36 = vpop.f32.mrf.mxu1 }
 0x9a4   : > { %v3245_v62 = vmax.f32 %v3239_v19, 0.0 }
 0x9a5   : > { %v3201_v27 = vpop.f32.mrf.mxu0  ;;  %v3163_v48 = vpop.f32.mrf.mxu2 }
 0x9a6   : > { %v3202_v22 = vadd.f32 %v3201_v27, %v3140_v36  ;;  %3276 = vmatmul.f32.vlgmr.msrb.gmra.mxu1 %v3245_v62  ;;  %3328 = vmatmul.f32.vlgmr.msra.gmra.mxu0 %v3245_v62 }
 0x9a7   : > { %3570 = vmatpush.msra.mxu0 %v10298_v1  ;;  %v14426_v1 = vld [vmem:[#allocation86_spill] sm:$0xff] }
 0x9a8   : > { %v3235_v61 = vadd.f32 %v3202_v22, %v3101_v49 }
 0x9a9   : > { %3571 = vmatpush.msra.mxu0 %v14422_v39 }
 0x9aa   : > { %v3241_v3 = vadd.f32 %v3235_v61, %v14254_v14 }
 0x9ab   : > { %3572 = vmatpush.msra.mxu0 %v14423_v59  ;;  %v3143_v31 = vpop.f32.mrf.mxu1 }
 0x9ac   : > { %v3247_v38 = vmax.f32 %v3241_v3, 0.0  ;;  %v14434_v3 = vld [vmem:[#allocation92_spill] sm:$0xff] }
 0x9ad   : > { %v3204_v15 = vpop.f32.mrf.mxu0  ;;  %3573 = vmatpush.msra.mxu0 %v14425_v26  ;;  %v3166_v49 = vpop.f32.mrf.mxu2 }
 0x9ae   : > { %v3205_v57 = vadd.f32 %v3204_v15, %v3143_v31  ;;  %3279 = vmatmul.f32.gmra.mxu1 %v3247_v38  ;;  %3331 = vmatmul.f32.gmra.mxu0 %v3247_v38  ;;  %v14435_v38 = vld [vmem:[#allocation93_spill] sm:$0xff] }
 0x9af   : > { %3574 = vmatpush.msra.mxu0 %v14426_v1 }
 0x9b0   : > { %v3237_v42 = vadd.f32 %v3205_v57, %v3103_v6  ;;  %v14436_v57 = vld [vmem:[#allocation94_spill] sm:$0xff] }
 0x9b1   : > { %3575 = vmatpush.msra.mxu0 %v14427_v23 }
 0x9b2   : > { %v3243_v2 = vadd.f32 %v3237_v42, %v14254_v14 }
 0x9b3   : > { %3576 = vmatpush.msra.mxu0 %v14428_v55 }
 0x9b4   : > { %v3249_v21 = vmax.f32 %v3243_v2, 0.0  ;;  %v14438_v2 = vld [vmem:[#allocation96_spill] sm:$0xff] }
 0x9b5   : > { %3577 = vmatpush.msra.mxu0 %v14429_v34  ;;  %v3169_v6 = vpop.f32.mrf.mxu2  ;;  %v14440_v34 = vld [vmem:[#allocation98_spill] sm:$0xff] }
 0x9b6   : > { %3282 = vmatmul.f32.gmra.mxu1 %v3249_v21  ;;  %3334 = vmatmul.f32.gmra.mxu0 %v3249_v21 }
 0x9b7   : > { %3578 = vmatpush.msra.mxu0 %v14430_v13  ;;  %v14441_v13 = vld [vmem:[#allocation99_spill] sm:$0xff] }
 0x9b9   : > { %3579 = vmatpush.msra.mxu0 %v14431_v16 }
 0x9bb   : > { %3580 = vmatpush.msra.mxu0 %v14432_v33 }
 0x9bd   : > { %3581 = vmatpush.msra.mxu0 %v14433_v25 }
 0x9c5   : > { %v10923_v52 = vpop.f32.mrf.mxu3 }
 0x9c6   : > { %14421 = vst [vmem:[#allocation20_spill] sm:$0xff] %v10923_v52  ;;  %v11310_v52 = vld [vmem:[%s13779_s5 + $0x48] sm:$0xff] }
 0x9c7   : > { %14485 = vst [vmem:[#allocation30_spill] sm:$0xff] %v11310_v52 }
 0x9cd   : > { %v10929_v30 = vpop.f32.mrf.mxu3 }
 0x9ce   : > { %14424 = vst [vmem:[#allocation38_spill] sm:$0xff] %v10929_v30  ;;  %v11316_v30 = vld [vmem:[%s13779_s5 + $0xa8] sm:$0xff] }
 0x9cf   : > { %14486 = vst [vmem:[#allocation18_spill] sm:$0xff] %v11316_v30 }
 0x9d5   : > { %v2965_v12 = vpop.f32.mrf.mxu3 }
 0x9d6   : > { %v3027_v47 = vadd.f32 %v3026_v11, %v2965_v12  ;;  %v14439_v12 = vld [vmem:[#allocation97_spill] sm:$0xff] }
 0x9dd   : > { %v2968_v35 = vpop.f32.mrf.mxu3 }
 0x9de   : > { %v3030_v36 = vadd.f32 %v3029_v54, %v2968_v35 }
 0x9e5   : > { %v2971_v50 = vpop.f32.mrf.mxu3 }
 0x9e6   : > { %v3033_v31 = vadd.f32 %v3032_v45, %v2971_v50 }
 0x9ed   : > { %v3090_v9 = vpop.f32.mrf.mxu3 }
 0x9ee   : > { %v3100_v10 = vadd.f32 %v3090_v9, %v3027_v47 }
 0x9f5   : > { %v3093_v5 = vpop.f32.mrf.mxu3 }
 0x9f6   : > { %v3102_v40 = vadd.f32 %v3093_v5, %v3030_v36 }
 0x9fd   : > { %v3096_v51 = vpop.f32.mrf.mxu3 }
 0x9fe   : > { %v3104_v1 = vadd.f32 %v3096_v51, %v3033_v31  ;;  %v14450_v31 = vld [vmem:[#allocation77_spill] sm:$0xff] }
 0xa05   : > { %v3224_v8 = vpop.f32.mrf.mxu3 }
 0xa06   : > { %v3225_v44 = vadd.f32 %v3224_v8, %v3163_v48 }
 0xa08   : > { %v3234_v19 = vadd.f32 %v3225_v44, %v3100_v10 }
 0xa0a   : > { %v3240_v62 = vadd.f32 %v3234_v19, %v14255_v17 }
 0xa0c   : > { %v3246_v27 = vmax.f32 %v3240_v62, 0.0 }
 0xa0d   : > { %v3227_v22 = vpop.f32.mrf.mxu3 }
 0xa0e   : > { %v3228_v61 = vadd.f32 %v3227_v22, %v3166_v49  ;;  %7279 = vmatmul.msk.f32.vlgmr.msrb.gmra.mxu2 %vm954_vm2, %v3246_v27  ;;  %7282 = vmatmul.msk.f32.vlgmr.msrb.gmra.mxu3 %vm954_vm2, %v3246_v27  ;;  %v14442_v22 = vld [vmem:[#allocation69_spill] sm:$0xff] }
 0xa0f   : > { %3527 = vmatpush.msrb.mxu3 %v10593_v7  ;;  %v14437_v7 = vld [vmem:[#allocation95_spill] sm:$0xff] }
 0xa10   : > { %v3236_v39 = vadd.f32 %v3228_v61, %v3102_v40  ;;  %v14443_v40 = vld [vmem:[#allocation57_spill] sm:$0xff]  ;;  %v14444_v61 = vld [vmem:[#allocation79_spill] sm:$0xff] }
 0xa11   : > { %3528 = vmatpush.msrb.mxu3 %v14434_v3  ;;  %v14446_v3 = vld [vmem:[#allocation76_spill] sm:$0xff] }
 0xa12   : > { %v3242_v59 = vadd.f32 %v3236_v39, %v14255_v17  ;;  %v14445_v39 = vld [vmem:[#allocation59_spill] sm:$0xff] }
 0xa13   : > { %3529 = vmatpush.msrb.mxu3 %v14435_v38  ;;  %v14449_v38 = vld [vmem:[#allocation64_spill] sm:$0xff] }
 0xa14   : > { %v3248_v15 = vmax.f32 %v3242_v59, 0.0  ;;  %v14447_v59 = vld [vmem:[#allocation61_spill] sm:$0xff] }
 0xa15   : > { %v3230_v26 = vpop.f32.mrf.mxu3  ;;  %3530 = vmatpush.msrb.mxu3 %v14436_v57  ;;  %v14453_v57 = vld [vmem:[#allocation70_spill] sm:$0xff] }
 0xa16   : > { %v3231_v42 = vadd.f32 %v3230_v26, %v3169_v6  ;;  %7280 = vmatmul.msk.f32.gmra.mxu2 %vm954_vm2, %v3248_v15  ;;  %7283 = vmatmul.msk.f32.gmra.mxu3 %vm954_vm2, %v3248_v15  ;;  %v14448_v6 = vld [vmem:[#allocation81_spill] sm:$0xff]  ;;  %v14451_v15 = vld [vmem:[#allocation67_spill] sm:$0xff] }
 0xa17   : > { %3531 = vmatpush.msrb.mxu3 %v14437_v7  ;;  %v14452_v26 = vld [vmem:[#allocation71_spill] sm:$0xff]  ;;  %v14456_v7 = vld [vmem:[#allocation78_spill] sm:$0xff] }
 0xa18   : > { %v3238_v23 = vadd.f32 %v3231_v42, %v3104_v1  ;;  %v14454_v1 = vld [vmem:[#allocation83_spill] sm:$0xff]  ;;  %v14455_v42 = vld [vmem:[#allocation72_spill] sm:$0xff] }
 0xa19   : > { %3532 = vmatpush.msrb.mxu3 %v14438_v2  ;;  %v14458_v2 = vld [vmem:[#allocation85_spill] sm:$0xff] }
 0xa1a   : > { %v3244_v55 = vadd.f32 %v3238_v23, %v14255_v17  ;;  %v14457_v23 = vld [vmem:[#allocation73_spill] sm:$0xff] }
 0xa1b   : > { %3533 = vmatpush.msrb.mxu3 %v14439_v12  ;;  %v14460_v12 = vld [vmem:[#allocation80_spill] sm:$0xff] }
 0xa1c   : > { %v3250_v21 = vmax.f32 %v3244_v55, 0.0  ;;  %v14459_v55 = vld [vmem:[#allocation74_spill] sm:$0xff] }
 0xa1d   : > { %3534 = vmatpush.msrb.mxu3 %v14440_v34  ;;  %v14462_v34 = vld [vmem:[#allocation87_spill] sm:$0xff] }
 0xa1e   : > { %7281 = vmatmul.msk.f32.gmra.mxu2 %vm954_vm2, %v3250_v21  ;;  %7284 = vmatmul.msk.f32.gmra.mxu3 %vm954_vm2, %v3250_v21  ;;  %v14461_v21 = vld [vmem:[#allocation90_spill] sm:$0xff] }
 0xa1f   : > { %3535 = vmatpush.msrb.mxu3 %v14441_v13  ;;  %v14463_v13 = vld [vmem:[#allocation91_spill] sm:$0xff] }
 0xa23   : > { %v3277_v16 = vpop.f32.mrf.mxu1  ;;  %v3329_v33 = vpop.f32.mrf.mxu0 }
 0xa2b   : > { %v3280_v11 = vpop.f32.mrf.mxu1  ;;  %v3332_v50 = vpop.f32.mrf.mxu0 }
 0xa33   : > { %v3283_v5 = vpop.f32.mrf.mxu1  ;;  %v3335_v45 = vpop.f32.mrf.mxu0 }
 0xa91   : > { %v3303_v35 = vpop.f32.mrf.mxu2  ;;  %v3355_v25 = vpop.f32.mrf.mxu3 }
 0xa92   : > { %v3304_v19 = vadd.f32 %v3303_v35, %v3277_v16  ;;  %v3356_v49 = vadd.f32 %v3355_v25, %v3329_v33  ;;  %v14464_v16 = vld [vmem:[#allocation48_spill] sm:$0xff]  ;;  %v14466_v35 = vld [vmem:[#allocation49_spill] sm:$0xff]  ;;  %v14467_v25 = vld [vmem:[#allocation50_spill] sm:$0xff] }
 0xa93   : > { %v14465_v33 = vld [vmem:[#allocation56_spill] sm:$0xff] }
 0xa94   : > { %v3364_v27 = vmax.f32 %v3304_v19, %v3356_v49  ;;  %v11008_v49 = vld [vmem:[%s14139_s1 + $0x20] sm:$0xff] }
 0xa99   : > { %v3306_v54 = vpop.f32.mrf.mxu2  ;;  %v3358_v9 = vpop.f32.mrf.mxu3 }
 0xa9a   : > { %v3307_v47 = vadd.f32 %v3306_v54, %v3280_v11  ;;  %v3359_v8 = vadd.f32 %v3358_v9, %v3332_v50  ;;  %v14468_v11 = vld [vmem:[#allocation51_spill] sm:$0xff]  ;;  %v14469_v50 = vld [vmem:[#allocation58_spill] sm:$0xff]  ;;  %v14470_v54 = vld [vmem:[#allocation52_spill] sm:$0xff] }
 0xa9b   : > { %v14471_v9 = vld [vmem:[#allocation60_spill] sm:$0xff] }
 0xa9c   : > { %v3365_v36 = vmax.f32 %v3307_v47, %v3359_v8 }
 0xaa1   : > { %v3309_v51 = vpop.f32.mrf.mxu2  ;;  %v3361_v48 = vpop.f32.mrf.mxu3 }
 0xaa2   : > { %v3310_v10 = vadd.f32 %v3309_v51, %v3283_v5  ;;  %v3362_v44 = vadd.f32 %v3361_v48, %v3335_v45  ;;  %v14472_v5 = vld [vmem:[#allocation53_spill] sm:$0xff]  ;;  %v14473_v45 = vld [vmem:[#allocation63_spill] sm:$0xff]  ;;  %v14475_v48 = vld [vmem:[#allocation66_spill] sm:$0xff] }
 0xaa3   : > { %v14474_v51 = vld [vmem:[#allocation55_spill] sm:$0xff] }
 0xaa4   : > { %v3366_v62 = vmax.f32 %v3310_v10, %v3362_v44  ;;  %v11001_v44 = vld [vmem:[%s14139_s1 + $0x30] sm:$0xf] }
 0xaa6   : > { %3380 = vmatpush.msra.mxu2 %v3366_v62  ;;  %3403 = vmatpush.msra.mxu1 %v3366_v62 }
 0xaa8   : > { %3381 = vmatpush.msra.mxu2 %v3365_v36  ;;  %3404 = vmatpush.msra.mxu1 %v3365_v36  ;;  %v11014_v36 = vld [vmem:[%s14139_s1 + $0x10] sm:$0xff] }
 0xaaa   : > { %3382 = vmatpush.msra.mxu2 %v3364_v27  ;;  %3405 = vmatpush.msra.mxu1 %v3364_v27 }
 0xaab   : > { %7285 = vmatmul.msk.f32.vlgmr.msra.gmra.mxu2 %vm1092_vm3, %v14442_v22  ;;  %7287 = vmatmul.msk.f32.vlgmr.msra.gmra.mxu1 %vm1092_vm3, %v14443_v40 }
 0xaac   : > { %3451 = vmatpush.msrb.mxu2 %v14444_v61  ;;  %3502 = vmatpush.msrb.mxu1 %v14445_v39  ;;  %v11020_v61 = vld [vmem:[%s14139_s1] sm:$0xff] }
 0xaae   : > { %3452 = vmatpush.msrb.mxu2 %v14446_v3  ;;  %3503 = vmatpush.msrb.mxu1 %v14447_v59 }
 0xab0   : > { %3453 = vmatpush.msrb.mxu2 %v14448_v6  ;;  %3504 = vmatpush.msrb.mxu1 %v14449_v38 }
 0xab2   : > { %3454 = vmatpush.msrb.mxu2 %v14450_v31  ;;  %3505 = vmatpush.msrb.mxu1 %v14451_v15 }
 0xab3   : > { %7286 = vmatmul.msk.f32.gmra.mxu2 %vm1092_vm3, %v14452_v26  ;;  %7288 = vmatmul.msk.f32.gmra.mxu1 %vm1092_vm3, %v14453_v57  ;;  %v11034_v26 = vld [vmem:[%s14139_s1 + $0x38] sm:$0xf] }
 0xab4   : > { %3455 = vmatpush.msrb.mxu2 %v14454_v1  ;;  %3506 = vmatpush.msrb.mxu1 %v14455_v42  ;;  %v11042_v1 = vld [vmem:[%s14139_s1 + $0x28] sm:$0xff] }
 0xab6   : > { %3456 = vmatpush.msrb.mxu2 %v14456_v7  ;;  %3507 = vmatpush.msrb.mxu1 %v14457_v23  ;;  %v11058_v7 = vld [vmem:[%s14139_s1 + $0x8] sm:$0xff]  ;;  %v11077_v23 = vld [vmem:[%s14139_s1 + $0x110] sm:$0xff] }
 0xab8   : > { %3457 = vmatpush.msrb.mxu2 %v14458_v2  ;;  %3508 = vmatpush.msrb.mxu1 %v14459_v55  ;;  %v11083_v2 = vld [vmem:[%s14139_s1 + $0x100] sm:$0xff] }
 0xab9   : > { %v11087_v55 = vld [vmem:[%s8420_s17 + $0x82] sm:$0xff] }
 0xaba   : > { %3458 = vmatpush.msrb.mxu2 %v14460_v12  ;;  %3509 = vmatpush.msrb.mxu1 %v14461_v21  ;;  %v11094_v12 = vld [vmem:[%s14139_s1 + $0x70] sm:$0xf]  ;;  %v11101_v21 = vld [vmem:[%s14139_s1 + $0x60] sm:$0xff] }
 0xabc   : > { %3459 = vmatpush.msrb.mxu2 %v14462_v34  ;;  %3510 = vmatpush.msrb.mxu1 %v14463_v13  ;;  %v11105_v34 = vld [vmem:[%s8420_s17 + $0x8a] sm:$0xff] }
 0xabd   : > { %v11110_v13 = vld [vmem:[%s14139_s1 + $0x50] sm:$0xff] }
 0xabe   : > { %3550 = vmatpush.msra.mxu2 %v14464_v16  ;;  %v11116_v16 = vld [vmem:[%s14139_s1 + $0x40] sm:$0xff] }
 0xac0   : > { %3551 = vmatpush.msra.mxu2 %v14465_v33  ;;  %v11122_v33 = vld [vmem:[%s8420_s17 + $0x92] sm:$0xff] }
 0xac2   : > { %3552 = vmatpush.msra.mxu2 %v14466_v35 }
 0xac4   : > { %3553 = vmatpush.msra.mxu2 %v14467_v25 }
 0xac6   : > { %3554 = vmatpush.msra.mxu2 %v14468_v11 }
 0xac8   : > { %3555 = vmatpush.msra.mxu2 %v14469_v50 }
 0xaca   : > { %3556 = vmatpush.msra.mxu2 %v14470_v54  ;;  %v11127_v54 = vld [vmem:[%s8420_s17 + $0x84] sm:$0xff] }
 0xacc   : > { %3557 = vmatpush.msra.mxu2 %v14471_v9 }
 0xace   : > { %3558 = vmatpush.msra.mxu2 %v14472_v5 }
 0xad0   : > { %3559 = vmatpush.msra.mxu2 %v14473_v45 }
 0xad2   : > { %3560 = vmatpush.msra.mxu2 %v14474_v51 }
 0xad4   : > { %3561 = vmatpush.msra.mxu2 %v14475_v48 }
 0xb28   : > { %v3407_v47 = vpop.f32.mrf.mxu1 }
 0xb2e   : > { %v3384_v8 = vpop.f32.mrf.mxu2 }
 0xb2f   : > { %v3413_v10 = vmax.f32 %v3384_v8, %v3407_v47  ;;  %v11134_v47 = vld [vmem:[%s13779_s5 + $0x108] sm:$0xff] }
 0xb30   : > { %v3410_v19 = vpop.f32.mrf.mxu1 }
 0xb31   : > { %7290 = vmatmul.msk.f32.vlgmr.msrb.gmra.mxu2 %vm1181_vm4, %v3413_v10  ;;  %v3417_v22 = vrot.slane %v3413_v10, 2  ;;  %v3464_v40 = vrot.slane %v3413_v10, 4  ;;  %v3490_v6 = vrot.slane %v3413_v10, 3  ;;  %v3515_v42 = vrot.slane %v3413_v10, 1  ;;  %v11141_v10 = vld [vmem:[%s13779_s5 + $0x100] sm:$0xff] }
 0xb32   : > { %7312 = vmatpush.msk.msrb.mxu2 %vm543_vm0, %v11001_v44 }
 0xb34   : > { %3718 = vmatpush.msrb.mxu2 %v11008_v49 }
 0xb36   : > { %v3387_v62 = vpop.f32.mrf.mxu2  ;;  %3719 = vmatpush.msrb.mxu2 %v11014_v36 }
 0xb37   : > { %v3414_v27 = vmax.f32 %v3387_v62, %v3410_v19  ;;  %v11147_v62 = vld [vmem:[%s13779_s5 + $0xf8] sm:$0xff] }
 0xb38   : > { %3720 = vmatpush.msrb.mxu2 %v11020_v61 }
 0xb39   : > { %v3418_v39 = vrot.slane %v3414_v27, 2  ;;  %v3465_v3 = vrot.slane %v3414_v27, 4  ;;  %v3491_v59 = vrot.slane %v3414_v27, 3  ;;  %v3516_v57 = vrot.slane %v3414_v27, 1  ;;  %v11162_v27 = vld [vmem:[%s14139_s1 + $0xf8] sm:$0xf] }
 0xb3b   : > { %v3419_v38 = vsel %vm1177_vm5, %v3417_v22, %v3418_v39  ;;  %v3466_v31 = vsel %vm543_vm0, %v3464_v40, %v3465_v3  ;;  %v3492_v15 = vsel %vm1282_vm6, %v3490_v6, %v3491_v59  ;;  %v11169_v22 = vld [vmem:[%s13779_s5 + $0xf0] sm:$0xff]  ;;  %v11175_v40 = vld [vmem:[%s14139_s1 + $0xe0] sm:$0xff]  ;;  %v11181_v39 = vld [vmem:[%s14139_s1 + $0xe8] sm:$0xff] }
 0xb3c   : > { %7289 = vmatmul.msk.f32.vlgmr.msra.gmra.mxu3 %vm1181_vm4, %v3419_v38  ;;  %7291 = vmatmul.msk.f32.vlgmr.msrb.gmra.mxu0 %vm1181_vm4, %v3466_v31  ;;  %14476 = vst [vmem:[#allocation21_spill] sm:$0xff] %v11169_v22  ;;  %v11187_v3 = vld [vmem:[%s13779_s5 + $0xe8] sm:$0xff]  ;;  %v7298_v59 = vld [vmem:[%s8420_s17 + $0x80] sm:$0xff]  ;;  %v11194_v6 = vld [vmem:[%s14139_s1 + $0xd0] sm:$0xff] }
 0xb3d   : > { %7292 = vmatmul.msk.f32.vlgmr.msrb.gmra.mxu1 %vm1181_vm4, %v3492_v15  ;;  %7304 = vmatpush.msk.msra.mxu3 %vm543_vm0, %v10659_v43  ;;  %v11049_v43 = vld [vmem:[%s14139_s1 + $0x18] sm:$0xff]  ;;  %14477 = vst [vmem:[#allocation12_spill] sm:$0xff] %v11187_v3  ;;  %v11206_v31 = vld [vmem:[%s13779_s5 + $0xe0] sm:$0xff] }
 0xb3e   : > { %7316 = vmatpush.msk.msrb.mxu0 %vm543_vm0, %v11034_v26  ;;  %v11200_v38 = vld [vmem:[%s14139_s1 + $0xd8] sm:$0xff]  ;;  %14478 = vst [vmem:[#allocation22_spill] sm:$0xff] %v11206_v31  ;;  %v11212_v15 = vld [vmem:[%s14139_s1 + $0xc0] sm:$0xff] }
 0xb3f   : > { %3657 = vmatpush.msra.mxu3 %v10668_v63  ;;  %v3517_v63 = vsel %vm1308_vm7, %v3515_v42, %v3516_v57  ;;  %v11218_v57 = vld [vmem:[%s14139_s1 + $0xc8] sm:$0xff]  ;;  %v11226_v42 = vld [vmem:[%s13779_s5 + $0x78] sm:$0xff] }
 0xb40   : > { %3744 = vmatpush.msrb.mxu0 %v11042_v1 }
 0xb41   : > { %3658 = vmatpush.msra.mxu3 %v10675_v0  ;;  %v11064_v0 = vld [vmem:[%s14139_s1 + $0x130] sm:$0xf] }
 0xb42   : > { %3745 = vmatpush.msrb.mxu0 %v11049_v43 }
 0xb43   : > { %3659 = vmatpush.msra.mxu3 %v10683_v28  ;;  %v11071_v28 = vld [vmem:[%s14139_s1 + $0x120] sm:$0xff] }
 0xb44   : > { %7293 = vmatmul.msk.f32.vlgmr.msrb.gmra.mxu3 %vm1181_vm4, %v3517_v63  ;;  %3746 = vmatpush.msrb.mxu0 %v11058_v7  ;;  %v11232_v63 = vld [vmem:[%s13779_s5 + $0xd8] sm:$0xff] }
 0xb45   : > { %7323 = vmatpush.msk.msrb.mxu3 %vm543_vm0, %v11064_v0  ;;  %14479 = vst [vmem:[#allocation14_spill] sm:$0xff] %v11232_v63 }
 0xb47   : > { %3782 = vmatpush.msrb.mxu3 %v11071_v28 }
 0xb49   : > { %3783 = vmatpush.msrb.mxu3 %v11077_v23 }
 0xb4b   : > { %3784 = vmatpush.msrb.mxu3 %v11083_v2 }
 0xb4c   : > { %7305 = vmatmul.msk.f32.vlgmr.msra.gmra.mxu3 %vm533_vm1, %v11087_v55 }
 0xb4d   : > { %7345 = vmatpush.msk.msra.mxu3 %vm543_vm0, %v11094_v12 }
 0xb4f   : > { %3916 = vmatpush.msra.mxu3 %v11101_v21 }
 0xb51   : > { %3917 = vmatpush.msra.mxu3 %v11110_v13 }
 0xb53   : > { %3918 = vmatpush.msra.mxu3 %v11116_v16 }
 0xb54   : > { %7306 = vmatmul.msk.f32.gmra.mxu3 %vm533_vm1, %v11105_v34 }
 0xb5c   : > { %7307 = vmatmul.msk.f32.gmra.mxu3 %vm533_vm1, %v11122_v33 }
 0xb64   : > { %7324 = vmatmul.msk.f32.vlgmr.msrb.gmra.mxu3 %vm533_vm1, %v11127_v54 }
 0xb65   : > { %4034 = vmatpush.msrb.mxu3 %v11134_v47 }
 0xb67   : > { %4035 = vmatpush.msrb.mxu3 %v11141_v10 }
 0xb69   : > { %4036 = vmatpush.msrb.mxu3 %v11147_v62 }
 0xb6b   : > { %4037 = vmatpush.msrb.mxu3 %v11169_v22 }
 0xb6d   : > { %4038 = vmatpush.msrb.mxu3 %v11187_v3  ;;  %v11429_v3 = vld [vmem:[%s8420_s17 + $0x89] sm:$0xff] }
 0xb6f   : > { %4039 = vmatpush.msrb.mxu3 %v11206_v31  ;;  %v11409_v31 = vld [vmem:[%s8420_s17 + $0x81] sm:$0xff] }
 0xb71   : > { %4040 = vmatpush.msrb.mxu3 %v11232_v63  ;;  %v11376_v63 = vld [vmem:[%s13779_s5 + $0x10] sm:$0xff] }
 0xb72   : > { %14496 = vst [vmem:[#allocation27_spill] sm:$0xff] %v11376_v63 }
 0xbb4   : > { %v3461_v25 = vpop.f32.mrf.mxu2 }
 0xbb9   : > { %v3486_v50 = vpop.f32.mrf.mxu0 }
 0xbba   : > { %v3512_v9 = vpop.f32.mrf.mxu1 }
 0xbbf   : > { %v3439_v35 = vpop.f32.mrf.mxu3 }
 0xbc0   : > { %v3462_v11 = vadd.f32 %v3461_v25, %v3439_v35  ;;  %v11238_v35 = vld [vmem:[%s13779_s5 + $0x88] sm:$0xff]  ;;  %v11244_v25 = vld [vmem:[%s13779_s5 + $0x70] sm:$0xff] }
 0xbc2   : > { %v3489_v45 = vadd.f32 %v3486_v50, %v3462_v11  ;;  %v11250_v11 = vld [vmem:[%s13779_s5 + $0xd0] sm:$0xff]  ;;  %v11256_v50 = vld [vmem:[%s13779_s5 + $0x80] sm:$0xff] }
 0xbc3   : > { %14480 = vst [vmem:[#allocation26_spill] sm:$0xff] %v11250_v11  ;;  %4041 = vmatpush.msrb.mxu3 %v11250_v11  ;;  %v11364_v11 = vld [vmem:[%s13779_s5 + $0x20] sm:$0xff] }
 0xbc4   : > { %14494 = vst [vmem:[#allocation25_spill] sm:$0xff] %v11364_v11 }
 0xbc7   : > { %v3537_v5 = vpop.f32.mrf.mxu3 }
 0xbc8   : > { %v3538_v51 = vadd.f32 %v3537_v5, %v3512_v9  ;;  %v11262_v9 = vld [vmem:[%s13779_s5 + $0x68] sm:$0xff] }
 0xbc9   : > { %v11268_v5 = vld [vmem:[%s13779_s5 + $0xc8] sm:$0xff] }
 0xbca   : > { %v3540_v48 = vadd.f32 %v3538_v51, %v3489_v45  ;;  %14481 = vst [vmem:[#allocation28_spill] sm:$0xff] %v11268_v5  ;;  %4042 = vmatpush.msrb.mxu3 %v11268_v5  ;;  %v11274_v45 = vld [vmem:[%s13779_s5 + $0x60] sm:$0xff]  ;;  %v11346_v5 = vld [vmem:[%s13779_s5 + $0x30] sm:$0xff] }
 0xbcb   : > { %v11280_v51 = vld [vmem:[%s13779_s5 + $0xc0] sm:$0xff]  ;;  %14491 = vst [vmem:[#allocation33_spill] sm:$0xff] %v11346_v5 }
 0xbcc   : > { %v3541_v8 = vadd.f32 %v10706_v46, %v3540_v48  ;;  %v11155_v46 = vld [vmem:[%s14139_s1 + $0xf0] sm:$0xf]  ;;  %14482 = vst [vmem:[#allocation16_spill] sm:$0xff] %v11280_v51  ;;  %4043 = vmatpush.msrb.mxu3 %v11280_v51  ;;  %v11286_v48 = vld [vmem:[%s13779_s5 + $0x58] sm:$0xff] }
 0xbcd   : > { %v11334_v51 = vld [vmem:[%s13779_s5 + $0x38] sm:$0xff] }
 0xbce   : > { %v3542_v19 = vmax.f32 %v3541_v8, 0.0  ;;  %v11292_v8 = vld [vmem:[%s13779_s5 + $0xb8] sm:$0xff]  ;;  %14489 = vst [vmem:[#allocation32_spill] sm:$0xff] %v11334_v51 }
 0xbcf   : > { %14483 = vst [vmem:[#allocation29_spill] sm:$0xff] %v11292_v8  ;;  %4044 = vmatpush.msrb.mxu3 %v11292_v8  ;;  %v11322_v8 = vld [vmem:[%s13779_s5 + $0x40] sm:$0xff] }
 0xbd0   : > { %7294 = vmatmul.msk.f32.vlgmr.msra.gmra.mxu2 %vm1353_vm8, %v3542_v19  ;;  %7295 = vmatmul.msk.f32.vlgmr.msra.gmra.mxu0 %vm1353_vm8, %v3542_v19  ;;  %v11298_v19 = vld [vmem:[%s13779_s5 + $0x50] sm:$0xff]  ;;  %14487 = vst [vmem:[#allocation31_spill] sm:$0xff] %v11322_v8 }
 0xbd1   : > { %7337 = vmatpush.msk.msra.mxu2 %vm543_vm0, %v11155_v46  ;;  %7341 = vmatpush.msk.msra.mxu0 %vm543_vm0, %v11162_v27 }
 0xbd3   : > { %3855 = vmatpush.msra.mxu2 %v11175_v40  ;;  %3881 = vmatpush.msra.mxu0 %v11181_v39 }
 0xbd5   : > { %3856 = vmatpush.msra.mxu2 %v11194_v6  ;;  %3882 = vmatpush.msra.mxu0 %v11200_v38 }
 0xbd7   : > { %3857 = vmatpush.msra.mxu2 %v11212_v15  ;;  %3883 = vmatpush.msra.mxu0 %v11218_v57 }
 0xbd8   : > { %7313 = vmatmul.msk.f32.vlgmr.msrb.gmra.mxu2 %vm533_vm1, %v7298_v59  ;;  %7317 = vmatmul.msk.f32.vlgmr.msrb.gmra.mxu0 %vm533_vm1, %v7298_v59  ;;  %v11304_v59 = vld [vmem:[%s13779_s5 + $0xb0] sm:$0xff] }
 0xbd9   : > { %3982 = vmatpush.msrb.mxu2 %v11226_v42  ;;  %4022 = vmatpush.msrb.mxu0 %v11238_v35  ;;  %14484 = vst [vmem:[#allocation17_spill] sm:$0xff] %v11304_v59 }
 0xbda   : > { %4045 = vmatpush.msrb.mxu3 %v11304_v59  ;;  %v11328_v59 = vld [vmem:[%s13779_s5 + $0xa0] sm:$0xff] }
 0xbdb   : > { %3983 = vmatpush.msrb.mxu2 %v11244_v25  ;;  %4023 = vmatpush.msrb.mxu0 %v11256_v50  ;;  %14488 = vst [vmem:[#allocation13_spill] sm:$0xff] %v11328_v59 }
 0xbdc   : > { %4046 = vmatpush.msrb.mxu3 %v11316_v30  ;;  %v11340_v30 = vld [vmem:[%s13779_s5 + $0x98] sm:$0xff] }
 0xbdd   : > { %3984 = vmatpush.msrb.mxu2 %v11262_v9  ;;  %14490 = vst [vmem:[#allocation19_spill] sm:$0xff] %v11340_v30 }
 0xbde   : > { %4047 = vmatpush.msrb.mxu3 %v11328_v59  ;;  %v11352_v59 = vld [vmem:[%s13779_s5 + $0x90] sm:$0xff] }
 0xbdf   : > { %3985 = vmatpush.msrb.mxu2 %v11274_v45  ;;  %14492 = vst [vmem:[#allocation15_spill] sm:$0xff] %v11352_v59 }
 0xbe0   : > { %4048 = vmatpush.msrb.mxu3 %v11340_v30  ;;  %v11358_v30 = vld [vmem:[%s13779_s5 + $0x28] sm:$0xff] }
 0xbe1   : > { %3986 = vmatpush.msrb.mxu2 %v11286_v48  ;;  %14493 = vst [vmem:[#allocation23_spill] sm:$0xff] %v11358_v30 }
 0xbe2   : > { %4049 = vmatpush.msrb.mxu3 %v11352_v59  ;;  %v11370_v59 = vld [vmem:[%s13779_s5 + $0x18] sm:$0xff] }
 0xbe3   : > { %3987 = vmatpush.msrb.mxu2 %v11298_v19  ;;  %14495 = vst [vmem:[#allocation24_spill] sm:$0xff] %v11370_v59 }
 0xbe5   : > { %3988 = vmatpush.msrb.mxu2 %v11310_v52 }
 0xbe7   : > { %3989 = vmatpush.msrb.mxu2 %v11322_v8  ;;  %v7333_v8 = vld [vmem:[%s8420_s17 + $0x91] sm:$0xff] }
 0xbe9   : > { %3990 = vmatpush.msrb.mxu2 %v11334_v51  ;;  %v7335_v51 = vld [vmem:[%s8420_s17 + $0x8b] sm:$0xff] }
 0xbeb   : > { %3991 = vmatpush.msrb.mxu2 %v11346_v5  ;;  %v11393_v5 = vld [vmem:[%s8420_s17 + $0x8c] sm:$0xff] }
 0xbec   : > { %7325 = vmatmul.msk.f32.gmra.mxu3 %vm533_vm1, %v11393_v5 }
 0xbed   : > { %3992 = vmatpush.msrb.mxu2 %v11358_v30  ;;  %v7299_v30 = vld [vmem:[%s8420_s17 + $0x88] sm:$0xff] }
 0xbee   : > { %7314 = vmatmul.msk.f32.gmra.mxu2 %vm533_vm1, %v7299_v30  ;;  %7318 = vmatmul.msk.f32.gmra.mxu0 %vm533_vm1, %v7299_v30  ;;  %v11418_v30 = vld [vmem:[%s13777_s3 + $0x160] sm:$0xff] }
 0xbef   : > { %3993 = vmatpush.msrb.mxu2 %v11364_v11  ;;  %v11382_v11 = vld [vmem:[%s13779_s5 + $0x8] sm:$0xff]  ;;  %14499 = vst [vmem:[#allocation37_spill] sm:$0xff] %v11418_v30 }
 0xbf0   : > { %14497 = vst [vmem:[#allocation34_spill] sm:$0xff] %v11382_v11 }
 0xbf1   : > { %3994 = vmatpush.msrb.mxu2 %v11370_v59  ;;  %v11388_v59 = vld [vmem:[%s13779_s5] sm:$0xff] }
 0xbf2   : > { %14498 = vst [vmem:[#allocation35_spill] sm:$0xff] %v11388_v59 }
 0xbf3   : > { %3995 = vmatpush.msrb.mxu2 %v11376_v63  ;;  %v11401_v63 = vld [vmem:[%s8420_s17 + $0x94] sm:$0xff] }
 0xbf4   : > { %7326 = vmatmul.msk.f32.gmra.mxu3 %vm533_vm1, %v11401_v63 }
 0xbf5   : > { %3996 = vmatpush.msrb.mxu2 %v11382_v11  ;;  %v7300_v11 = vld [vmem:[%s8420_s17 + $0x90] sm:$0xff] }
 0xbf6   : > { %7315 = vmatmul.msk.f32.gmra.mxu2 %vm533_vm1, %v7300_v11  ;;  %7319 = vmatmul.msk.f32.gmra.mxu0 %vm533_vm1, %v7300_v11  ;;  %v11424_v11 = vld [vmem:[%s13777_s3 + $0x158] sm:$0xff] }
 0xbf7   : > { %3997 = vmatpush.msrb.mxu2 %v11388_v59  ;;  %v7334_v59 = vld [vmem:[%s8420_s17 + $0x83] sm:$0xff]  ;;  %14500 = vst [vmem:[#allocation62_spill] sm:$0xff] %v11424_v11 }
 0xbfc   : > { %7346 = vmatmul.msk.f32.vlgmr.msra.gmra.mxu3 %vm533_vm1, %v11409_v31 }
 0xbfd   : > { %4198 = vmatpush.msra.mxu3 %v11418_v30  ;;  %v11440_v30 = vld [vmem:[%s13777_s3 + $0x148] sm:$0xff] }
 0xbfe   : > { %7338 = vmatmul.msk.f32.vlgmr.msra.gmra.mxu2 %vm533_vm1, %v7334_v59  ;;  %7342 = vmatmul.msk.f32.vlgmr.msra.gmra.mxu0 %vm533_vm1, %v7334_v59  ;;  %v11434_v59 = vld [vmem:[%s13777_s3 + $0x150] sm:$0xff]  ;;  %14502 = vst [vmem:[#allocation68_spill] sm:$0xff] %v11440_v30 }
 0xbff   : > { %4199 = vmatpush.msra.mxu3 %v11424_v11  ;;  %14501 = vst [vmem:[#allocation65_spill] sm:$0xff] %v11434_v59  ;;  %v11450_v11 = vld [vmem:[%s13777_s3 + $0x140] sm:$0xff] }
 0xc00   : > { %14503 = vst [vmem:[#allocation40_spill] sm:$0xff] %v11450_v11 }
 0xc01   : > { %4200 = vmatpush.msra.mxu3 %v11434_v59  ;;  %v11456_v59 = vld [vmem:[%s13777_s3 + $0x138] sm:$0xff] }
 0xc02   : > { %14504 = vst [vmem:[#allocation39_spill] sm:$0xff] %v11456_v59 }
 0xc03   : > { %4201 = vmatpush.msra.mxu3 %v11440_v30  ;;  %v7336_v30 = vld [vmem:[%s8420_s17 + $0x93] sm:$0xff] }
 0xc04   : > { %7347 = vmatmul.msk.f32.gmra.mxu3 %vm533_vm1, %v11429_v3 }
 0xc05   : > { %4202 = vmatpush.msra.mxu3 %v11450_v11  ;;  %v11470_v11 = vld [vmem:[%s13777_s3 + $0x128] sm:$0xff] }
 0xc06   : > { %7339 = vmatmul.msk.f32.gmra.mxu2 %vm533_vm1, %v7335_v51  ;;  %7343 = vmatmul.msk.f32.gmra.mxu0 %vm533_vm1, %v7335_v51  ;;  %v11464_v51 = vld [vmem:[%s13777_s3 + $0x130] sm:$0xff] }
 0xc07   : > { %4203 = vmatpush.msra.mxu3 %v11456_v59  ;;  %14505 = vst [vmem:[#allocation75_spill] sm:$0xff] %v11464_v51  ;;  %v11479_v59 = vld [vmem:[%s13777_s3 + $0x120] sm:$0xff] }
 0xc09   : > { %4204 = vmatpush.msra.mxu3 %v11464_v51 }
 0xc0b   : > { %4205 = vmatpush.msra.mxu3 %v11470_v11 }
 0xc0c   : > { %7348 = vmatmul.msk.f32.gmra.mxu3 %vm533_vm1, %v7333_v8 }
 0xc0d   : > { %4206 = vmatpush.msra.mxu3 %v11479_v59 }
 0xc0e   : > { %7340 = vmatmul.msk.f32.gmra.mxu2 %vm533_vm1, %v7336_v30  ;;  %7344 = vmatmul.msk.f32.gmra.mxu0 %vm533_vm1, %v7336_v30 }
 0xc4d   : > { %v3583_v51 = vpop.f32.mrf.mxu0 }
 0xc53   : > { %v3563_v22 = vpop.f32.mrf.mxu2 }
 0xc54   : > { %v3586_v52 = vmax.f32 %v3563_v22, %v3583_v51  ;;  %v11591_v22 = vld [vmem:[%s13777_s3 + $0x90] sm:$0xff] }
 0xc55   : > { %14516 = vst [vmem:[#allocation54_spill] sm:$0xff] %v11591_v22 }
 0xc56   : > { %3602 = vmatpush.msra.mxu1 %v3586_v52 }
 0xc57   : > { %7296 = vmatmul.msk.f32.vlgmr.msra.gmra.mxu1 %vm1412_vm9, %v10791_v41  ;;  %v11504_v41 = vld [vmem:[%s14139_s1 + $0x58] sm:$0xff] }
 0xc58   : > { %3622 = vmatpush.msrb.mxu1 %v3586_v52  ;;  %v11572_v52 = vld [vmem:[%s13777_s3 + $0xa8] sm:$0xff] }
 0xc59   : > { %14513 = vst [vmem:[#allocation41_spill] sm:$0xff] %v11572_v52 }
 0xc5a   : > { %7308 = vmatpush.msk.msra.mxu1 %vm543_vm0, %v10801_v60  ;;  %v11512_v60 = vld [vmem:[%s14139_s1 + $0x48] sm:$0xff] }
 0xc5c   : > { %3683 = vmatpush.msra.mxu1 %v10811_v4  ;;  %v11522_v4 = vld [vmem:[%s13779_s5 + $0x118] sm:$0xff] }
 0xc5d   : > { %14506 = vst [vmem:[#allocation82_spill] sm:$0xff] %v11522_v4 }
 0xc5e   : > { %3684 = vmatpush.msra.mxu1 %v10820_v29  ;;  %v11528_v29 = vld [vmem:[%s13779_s5 + $0x110] sm:$0xff] }
 0xc5f   : > { %7297 = vmatmul.msk.f32.vlgmr.msrb.gmra.mxu1 %vm1412_vm9, %v10827_v18  ;;  %14507 = vst [vmem:[#allocation89_spill] sm:$0xff] %v11528_v29  ;;  %v3661_v18 = vpop.f32.mrf.mxu3 }
 0xc60   : > { %3685 = vmatpush.msra.mxu1 %v10836_v37 }
 0xc62   : > { %7327 = vmatpush.msk.msrb.mxu1 %vm543_vm0, %v10842_v56  ;;  %v11540_v56 = vld [vmem:[%s13777_s3 + $0xd0] sm:$0xff] }
 0xc63   : > { %14508 = vst [vmem:[#allocation84_spill] sm:$0xff] %v11540_v56 }
 0xc64   : > { %3808 = vmatpush.msrb.mxu1 %v10852_v58  ;;  %v11546_v58 = vld [vmem:[%s13777_s3 + $0xc8] sm:$0xff] }
 0xc65   : > { %14509 = vst [vmem:[#allocation86_spill] sm:$0xff] %v11546_v58 }
 0xc66   : > { %3809 = vmatpush.msrb.mxu1 %v10860_v53  ;;  %v11552_v53 = vld [vmem:[%s13777_s3 + $0xc0] sm:$0xff] }
 0xc67   : > { %7309 = vmatmul.msk.f32.vlgmr.msra.gmra.mxu1 %vm533_vm1, %v11087_v55  ;;  %v3664_v37 = vpop.f32.mrf.mxu3  ;;  %14510 = vst [vmem:[#allocation43_spill] sm:$0xff] %v11552_v53  ;;  %v11578_v55 = vld [vmem:[%s13777_s3 + $0xa0] sm:$0xff] }
 0xc68   : > { %3810 = vmatpush.msrb.mxu1 %v10870_v32  ;;  %14514 = vst [vmem:[#allocation42_spill] sm:$0xff] %v11578_v55 }
 0xc6a   : > { %7349 = vmatpush.msk.msra.mxu1 %vm543_vm0, %v10877_v20  ;;  %v11558_v20 = vld [vmem:[%s13777_s3 + $0xb8] sm:$0xff] }
 0xc6b   : > { %14511 = vst [vmem:[#allocation44_spill] sm:$0xff] %v11558_v20 }
 0xc6c   : > { %3942 = vmatpush.msra.mxu1 %v10885_v24  ;;  %v11566_v24 = vld [vmem:[%s13777_s3 + $0xb0] sm:$0xff] }
 0xc6d   : > { %14512 = vst [vmem:[#allocation45_spill] sm:$0xff] %v11566_v24 }
 0xc6e   : > { %3943 = vmatpush.msra.mxu1 %v11504_v41 }
 0xc6f   : > { %7310 = vmatmul.msk.f32.gmra.mxu1 %vm533_vm1, %v11105_v34  ;;  %v3667_v32 = vpop.f32.mrf.mxu3  ;;  %v11584_v34 = vld [vmem:[%s13777_s3 + $0x98] sm:$0xff] }
 0xc70   : > { %3944 = vmatpush.msra.mxu1 %v11512_v60  ;;  %14515 = vst [vmem:[#allocation47_spill] sm:$0xff] %v11584_v34 }
 0xc77   : > { %7311 = vmatmul.msk.f32.gmra.mxu1 %vm533_vm1, %v11122_v33  ;;  %v3722_v33 = vpop.f32.mrf.mxu2 }
 0xc78   : > { %v3723_v30 = vadd.f32 %v3722_v33, %v3661_v18 }
 0xc7f   : > { %7328 = vmatmul.msk.f32.vlgmr.msrb.gmra.mxu1 %vm533_vm1, %v11127_v54  ;;  %v3786_v54 = vpop.f32.mrf.mxu3 }
 0xc80   : > { %4074 = vmatpush.msrb.mxu1 %v11522_v4  ;;  %v3821_v51 = vadd.f32 %v3786_v54, %v3723_v30  ;;  %v11631_v54 = vld [vmem:[%s13781_s7 + $0x90] sm:$0xff]  ;;  %v11650_v30 = vld [vmem:[%s13781_s7 + $0x78] sm:$0xff] }
 0xc81   : > { %14522 = vst [vmem:[#allocation97_spill] sm:$0xff] %v11631_v54 }
 0xc82   : > { %4075 = vmatpush.msrb.mxu1 %v11528_v29  ;;  %14525 = vst [vmem:[#allocation69_spill] sm:$0xff] %v11650_v30 }
 0xc87   : > { %7329 = vmatmul.msk.f32.gmra.mxu1 %vm533_vm1, %v11393_v5 }
 0xc8f   : > { %7330 = vmatmul.msk.f32.gmra.mxu1 %vm533_vm1, %v11401_v63 }
 0xc97   : > { %7350 = vmatmul.msk.f32.vlgmr.msra.gmra.mxu1 %vm533_vm1, %v11409_v31  ;;  %v3789_v31 = vpop.f32.mrf.mxu3 }
 0xc98   : > { %4151 = vmatpush.msra.mxu1 %v11540_v56 }
 0xc9a   : > { %4152 = vmatpush.msra.mxu1 %v11546_v58 }
 0xc9c   : > { %4153 = vmatpush.msra.mxu1 %v11552_v53 }
 0xc9e   : > { %4154 = vmatpush.msra.mxu1 %v11558_v20 }
 0xc9f   : > { %7351 = vmatmul.msk.f32.gmra.mxu1 %vm533_vm1, %v11429_v3  ;;  %v3725_v3 = vpop.f32.mrf.mxu2  ;;  %v3792_v5 = vpop.f32.mrf.mxu3 }
 0xca0   : > { %4155 = vmatpush.msra.mxu1 %v11566_v24  ;;  %v3726_v24 = vadd.f32 %v3725_v3, %v3664_v37  ;;  %v11604_v37 = vld [vmem:[%s13781_s7 + $0xb0] sm:$0xff] }
 0xca1   : > { %14517 = vst [vmem:[#allocation92_spill] sm:$0xff] %v11604_v37 }
 0xca2   : > { %4156 = vmatpush.msra.mxu1 %v11572_v52  ;;  %v3823_v53 = vadd.f32 %v3789_v31, %v3726_v24  ;;  %v11638_v31 = vld [vmem:[%s13781_s7 + $0x88] sm:$0xff] }
 0xca3   : > { %14523 = vst [vmem:[#allocation98_spill] sm:$0xff] %v11638_v31 }
 0xca4   : > { %4157 = vmatpush.msra.mxu1 %v11578_v55 }
 0xca6   : > { %4158 = vmatpush.msra.mxu1 %v11584_v34 }
 0xca7   : > { %7352 = vmatmul.msk.f32.gmra.mxu1 %vm533_vm1, %v7333_v8  ;;  %v3728_v63 = vpop.f32.mrf.mxu2  ;;  %v3920_v52 = vpop.f32.mrf.mxu3 }
 0xca8   : > { %4159 = vmatpush.msra.mxu1 %v11591_v22  ;;  %v11598_v22 = vld [vmem:[%s13781_s7 + $0xb8] sm:$0xff]  ;;  %v3729_v18 = vadd.f32 %v3728_v63, %v3667_v32 }
 0xcaf   : > { %v3859_v55 = vpop.f32.mrf.mxu2  ;;  %v3923_v29 = vpop.f32.mrf.mxu3 }
 0xcb0   : > { %v3921_v34 = vadd.f32 %v3920_v52, %v3859_v55  ;;  %v11623_v55 = vld [vmem:[%s13781_s7 + $0x98] sm:$0xff] }
 0xcb1   : > { %14520 = vst [vmem:[#allocation95_spill] sm:$0xff] %v11623_v55 }
 0xcb2   : > { %v3955_v8 = vadd.f32 %v3921_v34, %v3821_v51 }
 0xcb4   : > { %v3961_v20 = vadd.f32 %v3955_v8, %v14254_v14  ;;  %v11658_v8 = vld [vmem:[%s13781_s7 + $0x70] sm:$0xff] }
 0xcb5   : > { %14527 = vst [vmem:[#allocation79_spill] sm:$0xff] %v11658_v8 }
 0xcb6   : > { %v3967_v58 = vmax.f32 %v3961_v20, 0.0 }
 0xcb7   : > { %v3862_v56 = vpop.f32.mrf.mxu2 }
 0xcb8   : > { %v3924_v4 = vadd.f32 %v3923_v29, %v3862_v56  ;;  %3998 = vmatmul.f32.vlgmr.msrb.gmra.mxu2 %v3967_v58  ;;  %4050 = vmatmul.f32.vlgmr.msrb.gmra.mxu3 %v3967_v58  ;;  %v11611_v56 = vld [vmem:[%s13781_s7 + $0xa8] sm:$0xff]  ;;  %v3825_v58 = vadd.f32 %v3792_v5, %v3729_v18  ;;  %v11644_v5 = vld [vmem:[%s13781_s7 + $0x80] sm:$0xff] }
 0xcb9   : > { %4292 = vmatpush.msrb.mxu3 %v11598_v22  ;;  %14518 = vst [vmem:[#allocation93_spill] sm:$0xff] %v11611_v56  ;;  %v11664_v18 = vld [vmem:[%s13781_s7 + $0x68] sm:$0xff] }
 0xcba   : > { %v3957_v52 = vadd.f32 %v3924_v4, %v3823_v53  ;;  %v3926_v4 = vpop.f32.mrf.mxu3  ;;  %v11617_v53 = vld [vmem:[%s13781_s7 + $0xa0] sm:$0xff]  ;;  %14524 = vst [vmem:[#allocation99_spill] sm:$0xff] %v11644_v5 }
 0xcbb   : > { %4293 = vmatpush.msrb.mxu3 %v11604_v37  ;;  %14519 = vst [vmem:[#allocation94_spill] sm:$0xff] %v11617_v53 }
 0xcbc   : > { %v3963_v29 = vadd.f32 %v3957_v52, %v14254_v14  ;;  %14528 = vst [vmem:[#allocation59_spill] sm:$0xff] %v11664_v18  ;;  %v11670_v52 = vld [vmem:[%s13781_s7 + $0x60] sm:$0xff] }
 0xcbd   : > { %4294 = vmatpush.msrb.mxu3 %v11611_v56  ;;  %14529 = vst [vmem:[#allocation76_spill] sm:$0xff] %v11670_v52 }
 0xcbe   : > { %v3969_v20 = vmax.f32 %v3963_v29, 0.0 }
 0xcbf   : > { %v3865_v32 = vpop.f32.mrf.mxu2  ;;  %4295 = vmatpush.msrb.mxu3 %v11617_v53 }
 0xcc0   : > { %v3927_v24 = vadd.f32 %v3926_v4, %v3865_v32  ;;  %4001 = vmatmul.f32.gmra.mxu2 %v3969_v20  ;;  %4053 = vmatmul.f32.gmra.mxu3 %v3969_v20  ;;  %v3748_v20 = vpop.f32.mrf.mxu0 }
 0xcc1   : > { %4296 = vmatpush.msrb.mxu3 %v11623_v55 }
 0xcc2   : > { %v3959_v33 = vadd.f32 %v3927_v24, %v3825_v58 }
 0xcc3   : > { %4297 = vmatpush.msrb.mxu3 %v11631_v54 }
 0xcc4   : > { %v3965_v3 = vadd.f32 %v3959_v33, %v14254_v14 }
 0xcc5   : > { %4298 = vmatpush.msrb.mxu3 %v11638_v31 }
 0xcc6   : > { %v3971_v63 = vmax.f32 %v3965_v3, 0.0 }
 0xcc7   : > { %4299 = vmatpush.msrb.mxu3 %v11644_v5 }
 0xcc8   : > { %4004 = vmatmul.f32.gmra.mxu2 %v3971_v63  ;;  %4056 = vmatmul.f32.gmra.mxu3 %v3971_v63  ;;  %v3751_v4 = vpop.f32.mrf.mxu0 }
 0xcc9   : > { %4300 = vmatpush.msrb.mxu3 %v11650_v30 }
 0xccb   : > { %4301 = vmatpush.msrb.mxu3 %v11658_v8 }
 0xccd   : > { %4302 = vmatpush.msrb.mxu3 %v11664_v18 }
 0xccf   : > { %4303 = vmatpush.msrb.mxu3 %v11670_v52 }
 0xcd0   : > { %v3754_v3 = vpop.f32.mrf.mxu0 }
 0xcd4   : > { %v11626_v34 = vpop.f32.mrf.mxu1 }
 0xcd5   : > { %14521 = vst [vmem:[#allocation96_spill] sm:$0xff] %v11626_v34 }
 0xcd8   : > { %v3885_v34 = vpop.f32.mrf.mxu0 }
 0xcdc   : > { %v11653_v51 = vpop.f32.mrf.mxu1 }
 0xcdd   : > { %14526 = vst [vmem:[#allocation57_spill] sm:$0xff] %v11653_v51 }
 0xce0   : > { %v3888_v31 = vpop.f32.mrf.mxu0 }
 0xce4   : > { %v3687_v29 = vpop.f32.mrf.mxu1 }
 0xce5   : > { %v3749_v51 = vadd.f32 %v3748_v20, %v3687_v29  ;;  %v11679_v29 = vld [vmem:[%s13777_s3 + $0x88] sm:$0xff] }
 0xce6   : > { %14530 = vst [vmem:[#allocation61_spill] sm:$0xff] %v11679_v29 }
 0xcec   : > { %v3690_v58 = vpop.f32.mrf.mxu1 }
 0xced   : > { %v3752_v55 = vadd.f32 %v3751_v4, %v3690_v58  ;;  %v11712_v58 = vld [vmem:[%s13777_s3 + $0x60] sm:$0xff] }
 0xcee   : > { %14535 = vst [vmem:[#allocation71_spill] sm:$0xff] %v11712_v58 }
 0xcf4   : > { %v3693_v32 = vpop.f32.mrf.mxu1 }
 0xcfc   : > { %v3812_v24 = vpop.f32.mrf.mxu1 }
 0xcfd   : > { %v3822_v18 = vadd.f32 %v3812_v24, %v3749_v51  ;;  %v11725_v24 = vld [vmem:[%s13777_s3 + $0x50] sm:$0xff] }
 0xcfe   : > { %14537 = vst [vmem:[#allocation83_spill] sm:$0xff] %v11725_v24 }
 0xd04   : > { %v3815_v33 = vpop.f32.mrf.mxu1 }
 0xd05   : > { %v3824_v56 = vadd.f32 %v3815_v33, %v3752_v55  ;;  %v3891_v55 = vpop.f32.mrf.mxu0  ;;  %v11733_v33 = vld [vmem:[%s13777_s3 + $0x48] sm:$0xff] }
 0xd06   : > { %14538 = vst [vmem:[#allocation72_spill] sm:$0xff] %v11733_v33 }
 0xd0c   : > { %v3818_v63 = vpop.f32.mrf.mxu1 }
 0xd14   : > { %v3946_v8 = vpop.f32.mrf.mxu1 }
 0xd15   : > { %v3947_v30 = vadd.f32 %v3946_v8, %v3885_v34 }
 0xd17   : > { %v3956_v5 = vadd.f32 %v3947_v30, %v3822_v18  ;;  %v11706_v18 = vld [vmem:[%s13777_s3 + $0x68] sm:$0xff] }
 0xd18   : > { %14534 = vst [vmem:[#allocation67_spill] sm:$0xff] %v11706_v18 }
 0xd19   : > { %v3962_v54 = vadd.f32 %v3956_v5, %v14255_v17  ;;  %v11685_v5 = vld [vmem:[%s13777_s3 + $0x80] sm:$0xff] }
 0xd1a   : > { %14531 = vst [vmem:[#allocation81_spill] sm:$0xff] %v11685_v5 }
 0xd1b   : > { %v3968_v52 = vmax.f32 %v3962_v54, 0.0  ;;  %v11692_v54 = vld [vmem:[%s13777_s3 + $0x78] sm:$0xff] }
 0xd1c   : > { %v3949_v53 = vpop.f32.mrf.mxu1  ;;  %14532 = vst [vmem:[#allocation64_spill] sm:$0xff] %v11692_v54 }
 0xd1d   : > { %v3950_v37 = vadd.f32 %v3949_v53, %v3888_v31  ;;  %7353 = vmatmul.msk.f32.vlgmr.msrb.gmra.mxu0 %vm954_vm2, %v3968_v52  ;;  %7356 = vmatmul.msk.f32.vlgmr.msrb.gmra.mxu1 %vm954_vm2, %v3968_v52  ;;  %v3755_v31 = vadd.f32 %v3754_v3, %v3693_v32  ;;  %v11719_v32 = vld [vmem:[%s13777_s3 + $0x58] sm:$0xff] }
 0xd1e   : > { %4249 = vmatpush.msrb.mxu1 %v11679_v29  ;;  %14536 = vst [vmem:[#allocation70_spill] sm:$0xff] %v11719_v32  ;;  %v11739_v29 = vld [vmem:[%s13780_s6 + $0x10] sm:$0xff] }
 0xd1f   : > { %v3958_v34 = vadd.f32 %v3950_v37, %v3824_v56  ;;  %v11698_v56 = vld [vmem:[%s13777_s3 + $0x70] sm:$0xff]  ;;  %v3826_v51 = vadd.f32 %v3818_v63, %v3755_v31 }
 0xd20   : > { %4250 = vmatpush.msrb.mxu1 %v11685_v5  ;;  %14533 = vst [vmem:[#allocation77_spill] sm:$0xff] %v11698_v56 }
 0xd21   : > { %v3964_v53 = vadd.f32 %v3958_v34, %v14255_v17 }
 0xd22   : > { %4251 = vmatpush.msrb.mxu1 %v11692_v54 }
 0xd23   : > { %v3970_v30 = vmax.f32 %v3964_v53, 0.0 }
 0xd24   : > { %v3952_v37 = vpop.f32.mrf.mxu1  ;;  %4252 = vmatpush.msrb.mxu1 %v11698_v56 }
 0xd25   : > { %v3953_v8 = vadd.f32 %v3952_v37, %v3891_v55  ;;  %7354 = vmatmul.msk.f32.gmra.mxu0 %vm954_vm2, %v3970_v30  ;;  %7357 = vmatmul.msk.f32.gmra.mxu1 %vm954_vm2, %v3970_v30 }
 0xd26   : > { %4253 = vmatpush.msrb.mxu1 %v11706_v18 }
 0xd27   : > { %v3960_v52 = vadd.f32 %v3953_v8, %v3826_v51 }
 0xd28   : > { %4254 = vmatpush.msrb.mxu1 %v11712_v58 }
 0xd29   : > { %v3966_v20 = vadd.f32 %v3960_v52, %v14255_v17 }
 0xd2a   : > { %4255 = vmatpush.msrb.mxu1 %v11719_v32 }
 0xd2b   : > { %v3972_v4 = vmax.f32 %v3966_v20, 0.0 }
 0xd2c   : > { %4256 = vmatpush.msrb.mxu1 %v11725_v24 }
 0xd2d   : > { %7355 = vmatmul.msk.f32.gmra.mxu0 %vm954_vm2, %v3972_v4  ;;  %7358 = vmatmul.msk.f32.gmra.mxu1 %vm954_vm2, %v3972_v4 }
 0xd2e   : > { %4257 = vmatpush.msrb.mxu1 %v11733_v33 }
 0xd3b   : > { %v3999_v3 = vpop.f32.mrf.mxu2  ;;  %v4051_v63 = vpop.f32.mrf.mxu3 }
 0xd43   : > { %v4002_v55 = vpop.f32.mrf.mxu2  ;;  %v4054_v31 = vpop.f32.mrf.mxu3 }
 0xd4b   : > { %v4005_v51 = vpop.f32.mrf.mxu2  ;;  %v4057_v8 = vpop.f32.mrf.mxu3 }
 0xd9a   : > { %v4025_v34 = vpop.f32.mrf.mxu0  ;;  %v4077_v53 = vpop.f32.mrf.mxu1 }
 0xd9b   : > { %v4026_v18 = vadd.f32 %v4025_v34, %v3999_v3  ;;  %v4078_v56 = vadd.f32 %v4077_v53, %v4051_v63  ;;  %v11795_v3 = vld [vmem:[%s13777_s3 + $0x100] sm:$0xff]  ;;  %v11801_v63 = vld [vmem:[%s13780_s6 + $0x18] sm:$0xf]  ;;  %v11808_v34 = vld [vmem:[%s13780_s6 + $0x8] sm:$0xf] }
 0xd9c   : > { %14539 = vst [vmem:[#allocation78_spill] sm:$0xff] %v11801_v63  ;;  %v11815_v53 = vld [vmem:[%s13777_s3 + $0x20] sm:$0xff] }
 0xd9d   : > { %v4086_v5 = vmax.f32 %v4026_v18, %v4078_v56  ;;  %v11765_v56 = vld [vmem:[%s13777_s3 + $0x38] sm:$0xff]  ;;  %v11771_v18 = vld [vmem:[%s13777_s3 + $0x110] sm:$0xff]  ;;  %14540 = vst [vmem:[#allocation73_spill] sm:$0xff] %v11808_v34 }
 0xd9e   : > { %14541 = vst [vmem:[#allocation85_spill] sm:$0xff] %v11815_v53 }
 0xda2   : > { %v4028_v30 = vpop.f32.mrf.mxu0  ;;  %v4080_v37 = vpop.f32.mrf.mxu1 }
 0xda3   : > { %v4029_v4 = vadd.f32 %v4028_v30, %v4002_v55  ;;  %v4081_v24 = vadd.f32 %v4080_v37, %v4054_v31  ;;  %v11821_v55 = vld [vmem:[%s13777_s3 + $0xf8] sm:$0xff]  ;;  %v11833_v30 = vld [vmem:[%s13777_s3 + $0xf0] sm:$0xff] }
 0xda4   : > { %14542 = vst [vmem:[#allocation74_spill] sm:$0xff] %v11821_v55  ;;  %v11827_v31 = vld [vmem:[%s13777_s3 + $0x18] sm:$0xff]  ;;  %v11839_v37 = vld [vmem:[%s13777_s3 + $0x10] sm:$0xff] }
 0xda5   : > { %v4087_v33 = vmax.f32 %v4029_v4, %v4081_v24  ;;  %v11783_v24 = vld [vmem:[%s13777_s3 + $0x108] sm:$0xff]  ;;  %14543 = vst [vmem:[#allocation80_spill] sm:$0xff] %v11827_v31  ;;  %v11869_v4 = vld [vmem:[%s13777_s3 + $0xd8] sm:$0xff] }
 0xda6   : > { %14544 = vst [vmem:[#allocation90_spill] sm:$0xff] %v11833_v30 }
 0xda7   : > { %14545 = vst [vmem:[#allocation87_spill] sm:$0xff] %v11839_v37 }
 0xda8   : > { %14550 = vst [vmem:[#allocation50_spill] sm:$0xff] %v11869_v4 }
 0xdaa   : > { %v4031_v52 = vpop.f32.mrf.mxu0  ;;  %v4083_v20 = vpop.f32.mrf.mxu1 }
 0xdab   : > { %v4032_v32 = vadd.f32 %v4031_v52, %v4005_v51  ;;  %v4084_v58 = vadd.f32 %v4083_v20, %v4057_v8  ;;  %v11845_v51 = vld [vmem:[%s13777_s3 + $0xe8] sm:$0xff]  ;;  %v11857_v52 = vld [vmem:[%s13777_s3 + $0xe0] sm:$0xff] }
 0xdac   : > { %14546 = vst [vmem:[#allocation91_spill] sm:$0xff] %v11845_v51  ;;  %v11851_v8 = vld [vmem:[%s13777_s3 + $0x8] sm:$0xff]  ;;  %v11863_v20 = vld [vmem:[%s13777_s3] sm:$0xff] }
 0xdad   : > { %v4088_v54 = vmax.f32 %v4032_v32, %v4084_v58  ;;  %v11746_v58 = vld [vmem:[%s13780_s6] sm:$0xff]  ;;  %v11777_v32 = vld [vmem:[%s13777_s3 + $0x30] sm:$0xff]  ;;  %14547 = vst [vmem:[#allocation48_spill] sm:$0xff] %v11851_v8 }
 0xdae   : > { %14548 = vst [vmem:[#allocation56_spill] sm:$0xff] %v11857_v52 }
 0xdaf   : > { %4102 = vmatpush.msra.mxu0 %v4088_v54  ;;  %4125 = vmatpush.msra.mxu2 %v4088_v54  ;;  %v11759_v54 = vld [vmem:[%s13777_s3 + $0x118] sm:$0xff]  ;;  %14549 = vst [vmem:[#allocation49_spill] sm:$0xff] %v11863_v20 }
 0xdb1   : > { %4103 = vmatpush.msra.mxu0 %v4087_v33  ;;  %4126 = vmatpush.msra.mxu2 %v4087_v33  ;;  %v11789_v33 = vld [vmem:[%s13777_s3 + $0x28] sm:$0xff] }
 0xdb3   : > { %4104 = vmatpush.msra.mxu0 %v4086_v5  ;;  %4127 = vmatpush.msra.mxu2 %v4086_v5  ;;  %v11753_v5 = vld [vmem:[%s13777_s3 + $0x40] sm:$0xff] }
 0xdb4   : > { %7361 = vmatmul.msk.f32.vlgmr.msra.gmra.mxu2 %vm1092_vm3, %v11739_v29  ;;  %7359 = vmatmul.msk.f32.vlgmr.msra.gmra.mxu0 %vm1092_vm3, %v11746_v58 }
 0xdb5   : > { %4173 = vmatpush.msrb.mxu0 %v11753_v5  ;;  %4224 = vmatpush.msrb.mxu2 %v11759_v54 }
 0xdb7   : > { %4174 = vmatpush.msrb.mxu0 %v11765_v56  ;;  %4225 = vmatpush.msrb.mxu2 %v11771_v18 }
 0xdb9   : > { %4175 = vmatpush.msrb.mxu0 %v11777_v32  ;;  %4226 = vmatpush.msrb.mxu2 %v11783_v24 }
 0xdbb   : > { %4176 = vmatpush.msrb.mxu0 %v11789_v33  ;;  %4227 = vmatpush.msrb.mxu2 %v11795_v3 }
 0xdbc   : > { %7362 = vmatmul.msk.f32.gmra.mxu2 %vm1092_vm3, %v11801_v63  ;;  %7360 = vmatmul.msk.f32.gmra.mxu0 %vm1092_vm3, %v11808_v34 }
 0xdbd   : > { %4177 = vmatpush.msrb.mxu0 %v11815_v53  ;;  %4228 = vmatpush.msrb.mxu2 %v11821_v55 }
 0xdbf   : > { %4178 = vmatpush.msrb.mxu0 %v11827_v31  ;;  %4229 = vmatpush.msrb.mxu2 %v11833_v30 }
 0xdc1   : > { %4179 = vmatpush.msrb.mxu0 %v11839_v37  ;;  %4230 = vmatpush.msrb.mxu2 %v11845_v51 }
 0xdc3   : > { %4180 = vmatpush.msrb.mxu0 %v11851_v8  ;;  %4231 = vmatpush.msrb.mxu2 %v11857_v52  ;;  %v11875_v8 = vld [vmem:[%s13781_s7 + $0x58] sm:$0xff]  ;;  %v11881_v52 = vld [vmem:[%s13781_s7 + $0x50] sm:$0xff] }
 0xdc4   : > { %14551 = vst [vmem:[#allocation51_spill] sm:$0xff] %v11875_v8 }
 0xdc5   : > { %4181 = vmatpush.msrb.mxu0 %v11863_v20  ;;  %4232 = vmatpush.msrb.mxu2 %v11869_v4  ;;  %14552 = vst [vmem:[#allocation58_spill] sm:$0xff] %v11881_v52  ;;  %v11887_v20 = vld [vmem:[%s13781_s7 + $0x48] sm:$0xff]  ;;  %v11893_v4 = vld [vmem:[%s13781_s7 + $0x40] sm:$0xff] }
 0xdc6   : > { %14553 = vst [vmem:[#allocation52_spill] sm:$0xff] %v11887_v20 }
 0xdc7   : > { %4272 = vmatpush.msra.mxu0 %v11875_v8  ;;  %14554 = vst [vmem:[#allocation60_spill] sm:$0xff] %v11893_v4  ;;  %v11899_v8 = vld [vmem:[%s13781_s7 + $0x38] sm:$0xff] }
 0xdc8   : > { %14555 = vst [vmem:[#allocation53_spill] sm:$0xff] %v11899_v8 }
 0xdc9   : > { %4273 = vmatpush.msra.mxu0 %v11881_v52  ;;  %v11905_v52 = vld [vmem:[%s13781_s7 + $0x30] sm:$0xff] }
 0xdca   : > { %14556 = vst [vmem:[#allocation63_spill] sm:$0xff] %v11905_v52 }
 0xdcb   : > { %4274 = vmatpush.msra.mxu0 %v11887_v20  ;;  %v11911_v20 = vld [vmem:[%s13781_s7 + $0x28] sm:$0xff] }
 0xdcc   : > { %14557 = vst [vmem:[#allocation55_spill] sm:$0xff] %v11911_v20 }
 0xdcd   : > { %4275 = vmatpush.msra.mxu0 %v11893_v4  ;;  %v11917_v4 = vld [vmem:[%s13781_s7 + $0x20] sm:$0xff] }
 0xdce   : > { %14558 = vst [vmem:[#allocation66_spill] sm:$0xff] %v11917_v4 }
 0xdcf   : > { %4276 = vmatpush.msra.mxu0 %v11899_v8  ;;  %v11923_v8 = vld [vmem:[%s13781_s7 + $0x18] sm:$0xff] }
 0xdd0   : > { %14559 = vst [vmem:[#allocation100_spill] sm:$0xff] %v11923_v8 }
 0xdd1   : > { %4277 = vmatpush.msra.mxu0 %v11905_v52  ;;  %v11929_v52 = vld [vmem:[%s13781_s7 + $0x10] sm:$0xff] }
 0xdd2   : > { %14560 = vst [vmem:[#allocation101_spill] sm:$0xff] %v11929_v52 }
 0xdd3   : > { %4278 = vmatpush.msra.mxu0 %v11911_v20  ;;  %v11935_v20 = vld [vmem:[%s13781_s7 + $0x8] sm:$0xff] }
 0xdd4   : > { %14561 = vst [vmem:[#allocation102_spill] sm:$0xff] %v11935_v20 }
 0xdd5   : > { %4279 = vmatpush.msra.mxu0 %v11917_v4  ;;  %v11941_v4 = vld [vmem:[%s13781_s7] sm:$0xff] }
 0xdd6   : > { %14562 = vst [vmem:[#allocation103_spill] sm:$0xff] %v11941_v4 }
 0xdd7   : > { %4280 = vmatpush.msra.mxu0 %v11923_v8 }
 0xdd9   : > { %4281 = vmatpush.msra.mxu0 %v11929_v52 }
 0xddb   : > { %4282 = vmatpush.msra.mxu0 %v11935_v20 }
 0xddd   : > { %4283 = vmatpush.msra.mxu0 %v11941_v4 }
 0xe31   : > { %v4106_v8 = vpop.f32.mrf.mxu0 }
 0xe37   : > { %v4129_v51 = vpop.f32.mrf.mxu2 }
 0xe38   : > { %v4135_v37 = vmax.f32 %v4106_v8, %v4129_v51 }
 0xe39   : > { %v4109_v52 = vpop.f32.mrf.mxu0 }
 0xe3a   : > { %7364 = vmatmul.msk.f32.vlgmr.msrb.gmra.mxu0 %vm1181_vm4, %v4135_v37  ;;  %v4139_v31 = vrot.slane %v4135_v37, 2  ;;  %v4186_v55 = vrot.slane %v4135_v37, 4  ;;  %v4212_v51 = vrot.slane %v4135_v37, 3 }
 0xe3b   : > { %7386 = vmatpush.msk.msrb.mxu0 %vm543_vm0, %v11001_v44 }
 0xe3d   : > { %4440 = vmatpush.msrb.mxu0 %v11008_v49  ;;  %v11959_v49 = vld [vmem:[%s14139_s1 + $0xb0] sm:$0xf] }
 0xe3f   : > { %v4132_v30 = vpop.f32.mrf.mxu2  ;;  %4441 = vmatpush.msrb.mxu0 %v11014_v36 }
 0xe40   : > { %v4136_v20 = vmax.f32 %v4109_v52, %v4132_v30 }
 0xe41   : > { %4442 = vmatpush.msrb.mxu0 %v11020_v61  ;;  %v11968_v61 = vld [vmem:[%s14139_s1 + $0xa0] sm:$0xff] }
 0xe42   : > { %v4140_v4 = vrot.slane %v4136_v20, 2  ;;  %v4187_v53 = vrot.slane %v4136_v20, 4  ;;  %v4213_v63 = vrot.slane %v4136_v20, 3  ;;  %v4238_v36 = vrot.slane %v4136_v20, 1 }
 0xe44   : > { %v4141_v8 = vsel %vm1177_vm5, %v4139_v31, %v4140_v4  ;;  %v4188_v34 = vsel %vm543_vm0, %v4186_v55, %v4187_v53  ;;  %v4214_v44 = vsel %vm1282_vm6, %v4212_v51, %v4213_v63  ;;  %v4237_v63 = vrot.slane %v4135_v37, 1  ;;  %v11983_v53 = vld [vmem:[%s14139_s1 + $0x80] sm:$0xff]  ;;  %v14574_v37 = vld [vmem:[#allocation24_spill] sm:$0xff] }
 0xe45   : > { %7363 = vmatmul.msk.f32.vlgmr.msra.gmra.mxu1 %vm1181_vm4, %v4141_v8  ;;  %7365 = vmatmul.msk.f32.vlgmr.msra.gmra.mxu3 %vm1181_vm4, %v4188_v34  ;;  %v11975_v34 = vld [vmem:[%s14139_s1 + $0x90] sm:$0xff]  ;;  %v12082_v4 = vld [vmem:[%s8420_s17 + $0xa1] sm:$0xff]  ;;  %v14575_v8 = vld [vmem:[#allocation28_spill] sm:$0xff] }
 0xe46   : > { %7366 = vmatmul.msk.f32.vlgmr.msrb.gmra.mxu2 %vm1181_vm4, %v4214_v44  ;;  %7378 = vmatpush.msk.msra.mxu1 %vm543_vm0, %v11959_v49  ;;  %v14576_v44 = vld [vmem:[#allocation27_spill] sm:$0xff] }
 0xe47   : > { %7390 = vmatpush.msk.msra.mxu3 %vm543_vm0, %v11034_v26  ;;  %v4239_v26 = vsel %vm1308_vm7, %v4237_v63, %v4238_v36  ;;  %v12091_v36 = vld [vmem:[%s13782_s8] sm:$0xf]  ;;  %v7409_v63 = vld [vmem:[%s8420_s17 + $0xab] sm:$0xff] }
 0xe48   : > { %4379 = vmatpush.msra.mxu1 %v11968_v61 }
 0xe49   : > { %4466 = vmatpush.msra.mxu3 %v11042_v1  ;;  %v11994_v1 = vld [vmem:[%s8420_s17 + $0xa2] sm:$0xff] }
 0xe4a   : > { %4380 = vmatpush.msra.mxu1 %v11975_v34 }
 0xe4b   : > { %4467 = vmatpush.msra.mxu3 %v11049_v43 }
 0xe4c   : > { %4381 = vmatpush.msra.mxu1 %v11983_v53 }
 0xe4d   : > { %7367 = vmatmul.msk.f32.vlgmr.msrb.gmra.mxu1 %vm1181_vm4, %v4239_v26  ;;  %4468 = vmatpush.msra.mxu3 %v11058_v7  ;;  %v14577_v26 = vld [vmem:[#allocation16_spill] sm:$0xff] }
 0xe4e   : > { %7397 = vmatpush.msk.msrb.mxu1 %vm543_vm0, %v11064_v0 }
 0xe50   : > { %4504 = vmatpush.msrb.mxu1 %v11071_v28 }
 0xe52   : > { %4505 = vmatpush.msrb.mxu1 %v11077_v23 }
 0xe54   : > { %4506 = vmatpush.msrb.mxu1 %v11083_v2 }
 0xe55   : > { %7379 = vmatmul.msk.f32.vlgmr.msra.gmra.mxu1 %vm533_vm1, %v11994_v1 }
 0xe56   : > { %7419 = vmatpush.msk.msra.mxu1 %vm543_vm0, %v11094_v12  ;;  %v12006_v12 = vld [vmem:[%s13778_s4] ss:$0 sm:$0xff] }
 0xe58   : > { %4638 = vmatpush.msra.mxu1 %v11101_v21 }
 0xe5a   : > { %4639 = vmatpush.msra.mxu1 %v11110_v13 }
 0xe5c   : > { %4640 = vmatpush.msra.mxu1 %v11116_v16  ;;  %v12022_v16 = vld [vmem:[%s8420_s17 + $0xaa] sm:$0xff] }
 0xe5d   : > { %7380 = vmatmul.msk.f32.gmra.mxu1 %vm533_vm1, %v12022_v16 }
 0xeb7   : > { %v4183_v7 = vpop.f32.mrf.mxu0 }
 0xec2   : > { %v4161_v43 = vpop.f32.mrf.mxu1 }
 0xec3   : > { %v4184_v28 = vadd.f32 %v4183_v7, %v4161_v43  ;;  %v14578_v43 = vld [vmem:[#allocation34_spill] sm:$0xff]  ;;  %v12101_v7 = vld [vmem:[%s14139_s1 + $0xb8] sm:$0xf] }
 0xec8   : > { %v4208_v0 = vpop.f32.mrf.mxu3 }
 0xec9   : > { %v4234_v23 = vpop.f32.mrf.mxu2  ;;  %v4211_v55 = vadd.f32 %v4208_v0, %v4184_v28  ;;  %v14579_v0 = vld [vmem:[#allocation29_spill] sm:$0xff]  ;;  %v12111_v28 = vld [vmem:[%s14139_s1 + $0xa8] sm:$0xff] }
 0xeca   : > { %v4259_v2 = vpop.f32.mrf.mxu1 }
 0xecb   : > { %v4260_v31 = vadd.f32 %v4259_v2, %v4234_v23  ;;  %v7406_v23 = vld [vmem:[%s8420_s17 + $0xa9] sm:$0xff] }
 0xecc   : > { %v14580_v2 = vld [vmem:[#allocation35_spill] sm:$0xff] }
 0xecd   : > { %v4262_v30 = vadd.f32 %v4260_v31, %v4211_v55  ;;  %v14581_v55 = vld [vmem:[#allocation17_spill] sm:$0xff]  ;;  %v12120_v31 = vld [vmem:[%s14139_s1 + $0x98] sm:$0xff] }
 0xecf   : > { %v4263_v21 = vadd.f32 %v12006_v12, %v4262_v30  ;;  %v12127_v30 = vld [vmem:[%s13782_s8 + $0x4] sm:$0xf] }
 0xed1   : > { %v4264_v13 = vmax.f32 %v4263_v21, 0.0  ;;  %v7410_v21 = vld [vmem:[%s8420_s17 + $0xb3] sm:$0xff] }
 0xed3   : > { %7368 = vmatmul.msk.f32.vlgmr.msra.gmra.mxu0 %vm1353_vm8, %v4264_v13  ;;  %7369 = vmatmul.msk.f32.vlgmr.msrb.gmra.mxu3 %vm1353_vm8, %v4264_v13  ;;  %v14582_v13 = vld [vmem:[#allocation18_spill] sm:$0xff] }
 0xed4   : > { %7411 = vmatpush.msk.msra.mxu0 %vm543_vm0, %v11155_v46  ;;  %7415 = vmatpush.msk.msrb.mxu3 %vm543_vm0, %v11162_v27  ;;  %v12027_v46 = vld [vmem:[%s8420_s17 + $0xb2] sm:$0xff]  ;;  %v7372_v27 = vld [vmem:[%s8420_s17 + $0xa0] sm:$0xff] }
 0xed5   : > { %7381 = vmatmul.msk.f32.gmra.mxu1 %vm533_vm1, %v12027_v46 }
 0xed6   : > { %4577 = vmatpush.msra.mxu0 %v11175_v40  ;;  %4603 = vmatpush.msrb.mxu3 %v11181_v39  ;;  %v12037_v40 = vld [vmem:[%s8420_s17 + $0xa4] sm:$0xff] }
 0xed7   : > { %v7373_v39 = vld [vmem:[%s8420_s17 + $0xa8] sm:$0xff] }
 0xed8   : > { %4578 = vmatpush.msra.mxu0 %v11194_v6  ;;  %4604 = vmatpush.msrb.mxu3 %v11200_v38  ;;  %v12052_v6 = vld [vmem:[%s8420_s17 + $0xac] sm:$0xff] }
 0xed9   : > { %v7374_v38 = vld [vmem:[%s8420_s17 + $0xb0] sm:$0xff] }
 0xeda   : > { %4579 = vmatpush.msra.mxu0 %v11212_v15  ;;  %4605 = vmatpush.msrb.mxu3 %v11218_v57  ;;  %v14564_v15 = vld [vmem:[#allocation21_spill] sm:$0xff]  ;;  %v14565_v57 = vld [vmem:[#allocation31_spill] sm:$0xff] }
 0xedb   : > { %7387 = vmatmul.msk.f32.vlgmr.msrb.gmra.mxu0 %vm533_vm1, %v7372_v27  ;;  %7391 = vmatmul.msk.f32.vlgmr.msra.gmra.mxu3 %vm533_vm1, %v7372_v27  ;;  %v12136_v27 = vld [vmem:[%s14139_s1 + $0x88] sm:$0xff] }
 0xedc   : > { %4704 = vmatpush.msrb.mxu0 %v11226_v42  ;;  %4744 = vmatpush.msra.mxu3 %v11238_v35  ;;  %v12067_v42 = vld [vmem:[%s8420_s17 + $0xb4] sm:$0xff]  ;;  %v14568_v35 = vld [vmem:[#allocation22_spill] sm:$0xff] }
 0xedd   : > { %7398 = vmatmul.msk.f32.vlgmr.msrb.gmra.mxu1 %vm533_vm1, %v12037_v40 }
 0xede   : > { %4705 = vmatpush.msrb.mxu0 %v11244_v25  ;;  %4745 = vmatpush.msra.mxu3 %v11256_v50  ;;  %v14569_v25 = vld [vmem:[#allocation33_spill] sm:$0xff]  ;;  %v14570_v50 = vld [vmem:[#allocation23_spill] sm:$0xff] }
 0xedf   : > { %4756 = vmatpush.msrb.mxu1 %v11134_v47  ;;  %v14563_v47 = vld [vmem:[#allocation30_spill] sm:$0xff] }
 0xee0   : > { %4706 = vmatpush.msrb.mxu0 %v11262_v9  ;;  %v7408_v9 = vld [vmem:[%s8420_s17 + $0xa3] sm:$0xff] }
 0xee1   : > { %4757 = vmatpush.msrb.mxu1 %v11141_v10  ;;  %v14566_v10 = vld [vmem:[#allocation12_spill] sm:$0xff] }
 0xee2   : > { %4707 = vmatpush.msrb.mxu0 %v11274_v45  ;;  %v14571_v45 = vld [vmem:[#allocation14_spill] sm:$0xff] }
 0xee3   : > { %7388 = vmatmul.msk.f32.gmra.mxu0 %vm533_vm1, %v7373_v39  ;;  %7392 = vmatmul.msk.f32.gmra.mxu3 %vm533_vm1, %v7373_v39  ;;  %v12142_v39 = vld [vmem:[%s14139_s1 + $0x138] sm:$0xf] }
 0xee4   : > { %4708 = vmatpush.msrb.mxu0 %v11286_v48  ;;  %4758 = vmatpush.msrb.mxu1 %v11147_v62  ;;  %v14567_v62 = vld [vmem:[#allocation32_spill] sm:$0xff]  ;;  %v14572_v48 = vld [vmem:[#allocation25_spill] sm:$0xff] }
 0xee5   : > { %7399 = vmatmul.msk.f32.gmra.mxu1 %vm533_vm1, %v12052_v6 }
 0xee6   : > { %4709 = vmatpush.msrb.mxu0 %v11298_v19  ;;  %4759 = vmatpush.msrb.mxu1 %v14564_v15  ;;  %v14573_v19 = vld [vmem:[#allocation26_spill] sm:$0xff]  ;;  %v7407_v15 = vld [vmem:[%s8420_s17 + $0xb1] sm:$0xff] }
 0xee8   : > { %4710 = vmatpush.msrb.mxu0 %v14563_v47  ;;  %4760 = vmatpush.msrb.mxu1 %v14566_v10  ;;  %v14583_v47 = vld [vmem:[#allocation13_spill] sm:$0xff]  ;;  %v12160_v10 = vld [vmem:[%s14139_s1 + $0x118] sm:$0xff] }
 0xeea   : > { %4711 = vmatpush.msrb.mxu0 %v14565_v57  ;;  %4761 = vmatpush.msrb.mxu1 %v14568_v35  ;;  %v14584_v57 = vld [vmem:[#allocation19_spill] sm:$0xff]  ;;  %v12170_v35 = vld [vmem:[%s14139_s1 + $0x108] sm:$0xff] }
 0xeeb   : > { %7389 = vmatmul.msk.f32.gmra.mxu0 %vm533_vm1, %v7374_v38  ;;  %7393 = vmatmul.msk.f32.gmra.mxu3 %vm533_vm1, %v7374_v38  ;;  %v12152_v38 = vld [vmem:[%s14139_s1 + $0x128] sm:$0xff] }
 0xeec   : > { %4712 = vmatpush.msrb.mxu0 %v14567_v62  ;;  %4762 = vmatpush.msrb.mxu1 %v14571_v45  ;;  %v14585_v62 = vld [vmem:[#allocation15_spill] sm:$0xff]  ;;  %v14588_v45 = vld [vmem:[#allocation65_spill] sm:$0xff] }
 0xeed   : > { %7400 = vmatmul.msk.f32.gmra.mxu1 %vm533_vm1, %v12067_v42 }
 0xeee   : > { %4713 = vmatpush.msrb.mxu0 %v14569_v25  ;;  %4763 = vmatpush.msrb.mxu1 %v14573_v19  ;;  %v14586_v25 = vld [vmem:[#allocation37_spill] sm:$0xff]  ;;  %v14590_v19 = vld [vmem:[#allocation40_spill] sm:$0xff] }
 0xef0   : > { %4714 = vmatpush.msrb.mxu0 %v14570_v50  ;;  %4764 = vmatpush.msrb.mxu1 %v14575_v8  ;;  %v12177_v50 = vld [vmem:[%s14139_s1 + $0x78] sm:$0xf] }
 0xef2   : > { %4715 = vmatpush.msrb.mxu0 %v14572_v48  ;;  %4765 = vmatpush.msrb.mxu1 %v14577_v26  ;;  %v14589_v48 = vld [vmem:[#allocation68_spill] sm:$0xff] }
 0xef3   : > { %7412 = vmatmul.msk.f32.vlgmr.msra.gmra.mxu0 %vm533_vm1, %v7408_v9  ;;  %7416 = vmatmul.msk.f32.vlgmr.msrb.gmra.mxu3 %vm533_vm1, %v7408_v9  ;;  %v12185_v9 = vld [vmem:[%s14139_s1 + $0x68] sm:$0xff] }
 0xef4   : > { %4716 = vmatpush.msrb.mxu0 %v14574_v37  ;;  %4766 = vmatpush.msrb.mxu1 %v14579_v0  ;;  %v14591_v37 = vld [vmem:[#allocation39_spill] sm:$0xff] }
 0xef5   : > { %7420 = vmatmul.msk.f32.vlgmr.msra.gmra.mxu1 %vm533_vm1, %v12082_v4 }
 0xef6   : > { %4717 = vmatpush.msrb.mxu0 %v14576_v44  ;;  %4767 = vmatpush.msrb.mxu1 %v14581_v55 }
 0xef8   : > { %4718 = vmatpush.msrb.mxu0 %v14578_v43  ;;  %4768 = vmatpush.msrb.mxu1 %v14582_v13 }
 0xefa   : > { %4719 = vmatpush.msrb.mxu0 %v14580_v2  ;;  %4769 = vmatpush.msrb.mxu1 %v14583_v47 }
 0xefb   : > { %7413 = vmatmul.msk.f32.gmra.mxu0 %vm533_vm1, %v7409_v63  ;;  %7417 = vmatmul.msk.f32.gmra.mxu3 %vm533_vm1, %v7409_v63 }
 0xefc   : > { %4770 = vmatpush.msrb.mxu1 %v14584_v57 }
 0xefd   : > { %7421 = vmatmul.msk.f32.gmra.mxu1 %vm533_vm1, %v7406_v23 }
 0xefe   : > { %4771 = vmatpush.msrb.mxu1 %v14585_v62 }
 0xf00   : > { %4920 = vmatpush.msra.mxu1 %v14586_v25 }
 0xf03   : > { %7414 = vmatmul.msk.f32.gmra.mxu0 %vm533_vm1, %v7410_v21  ;;  %7418 = vmatmul.msk.f32.gmra.mxu3 %vm533_vm1, %v7410_v21 }
 0xf05   : > { %7422 = vmatmul.msk.f32.gmra.mxu1 %vm533_vm1, %v7407_v15 }
 0xf50   : > { %v4285_v52 = vpop.f32.mrf.mxu0 }
 0xf56   : > { %v4305_v20 = vpop.f32.mrf.mxu3 }
 0xf57   : > { %v4308_v51 = vmax.f32 %v4285_v52, %v4305_v20  ;;  %v14592_v52 = vld [vmem:[#allocation75_spill] sm:$0xff]  ;;  %v4383_v20 = vpop.f32.mrf.mxu1 }
 0xf58   : > { %v4444_v63 = vpop.f32.mrf.mxu0 }
 0xf59   : > { %4324 = vmatpush.msra.mxu2 %v4308_v51  ;;  %v4445_v55 = vadd.f32 %v4444_v63, %v4383_v20 }
 0xf5a   : > { %7370 = vmatmul.msk.f32.vlgmr.msra.gmra.mxu2 %vm1412_vm9, %v12091_v36 }
 0xf5b   : > { %4344 = vmatpush.msrb.mxu2 %v4308_v51  ;;  %v14601_v51 = vld [vmem:[#allocation42_spill] sm:$0xff] }
 0xf5d   : > { %7382 = vmatpush.msk.msra.mxu2 %vm543_vm0, %v12101_v7 }
 0xf5f   : > { %4405 = vmatpush.msra.mxu2 %v12111_v28  ;;  %v4386_v8 = vpop.f32.mrf.mxu1 }
 0xf60   : > { %v4447_v43 = vpop.f32.mrf.mxu0 }
 0xf61   : > { %4406 = vmatpush.msra.mxu2 %v12120_v31  ;;  %v4448_v62 = vadd.f32 %v4447_v43, %v4386_v8 }
 0xf62   : > { %7371 = vmatmul.msk.f32.vlgmr.msrb.gmra.mxu2 %vm1412_vm9, %v12127_v30 }
 0xf63   : > { %4407 = vmatpush.msra.mxu2 %v12136_v27 }
 0xf65   : > { %7401 = vmatpush.msk.msrb.mxu2 %vm543_vm0, %v12142_v39 }
 0xf67   : > { %4530 = vmatpush.msrb.mxu2 %v12152_v38  ;;  %v4389_v44 = vpop.f32.mrf.mxu1 }
 0xf69   : > { %4531 = vmatpush.msrb.mxu2 %v12160_v10 }
 0xf6a   : > { %7383 = vmatmul.msk.f32.vlgmr.msra.gmra.mxu2 %vm533_vm1, %v11994_v1  ;;  %v14587_v1 = vld [vmem:[#allocation62_spill] sm:$0xff] }
 0xf6b   : > { %4532 = vmatpush.msrb.mxu2 %v12170_v35  ;;  %4921 = vmatpush.msra.mxu1 %v14587_v1 }
 0xf6d   : > { %7423 = vmatpush.msk.msra.mxu2 %vm543_vm0, %v12177_v50  ;;  %4922 = vmatpush.msra.mxu1 %v14588_v45 }
 0xf6f   : > { %4664 = vmatpush.msra.mxu2 %v12185_v9  ;;  %4923 = vmatpush.msra.mxu1 %v14589_v48  ;;  %v4508_v26 = vpop.f32.mrf.mxu1 }
 0xf70   : > { %v4543_v21 = vadd.f32 %v4508_v26, %v4445_v55  ;;  %v14611_v26 = vld [vmem:[#allocation98_spill] sm:$0xff]  ;;  %v14614_v55 = vld [vmem:[#allocation79_spill] sm:$0xff] }
 0xf71   : > { %4665 = vmatpush.msra.mxu2 %v11504_v41  ;;  %4924 = vmatpush.msra.mxu1 %v14590_v19  ;;  %v14593_v41 = vld [vmem:[#allocation82_spill] sm:$0xff] }
 0xf72   : > { %7384 = vmatmul.msk.f32.gmra.mxu2 %vm533_vm1, %v12022_v16  ;;  %v14594_v16 = vld [vmem:[#allocation89_spill] sm:$0xff] }
 0xf73   : > { %4666 = vmatpush.msra.mxu2 %v11512_v60  ;;  %4925 = vmatpush.msra.mxu1 %v14591_v37  ;;  %v14596_v60 = vld [vmem:[#allocation86_spill] sm:$0xff] }
 0xf75   : > { %4926 = vmatpush.msra.mxu1 %v14592_v52 }
 0xf77   : > { %4927 = vmatpush.msra.mxu1 %v11470_v11  ;;  %v14595_v11 = vld [vmem:[#allocation84_spill] sm:$0xff]  ;;  %v4511_v0 = vpop.f32.mrf.mxu1 }
 0xf78   : > { %v4545_v45 = vadd.f32 %v4511_v0, %v4448_v62 }
 0xf79   : > { %4928 = vmatpush.msra.mxu1 %v11479_v59  ;;  %v14597_v59 = vld [vmem:[#allocation43_spill] sm:$0xff] }
 0xf7a   : > { %7385 = vmatmul.msk.f32.gmra.mxu2 %vm533_vm1, %v12027_v46  ;;  %v14598_v46 = vld [vmem:[#allocation44_spill] sm:$0xff] }
 0xf7f   : > { %v4514_v2 = vpop.f32.mrf.mxu1 }
 0xf82   : > { %7402 = vmatmul.msk.f32.vlgmr.msrb.gmra.mxu2 %vm533_vm1, %v12037_v40  ;;  %v14599_v40 = vld [vmem:[#allocation45_spill] sm:$0xff] }
 0xf83   : > { %4796 = vmatpush.msrb.mxu2 %v14593_v41 }
 0xf85   : > { %4797 = vmatpush.msrb.mxu2 %v14594_v16 }
 0xf87   : > { %v4642_v47 = vpop.f32.mrf.mxu1 }
 0xf8a   : > { %7403 = vmatmul.msk.f32.gmra.mxu2 %vm533_vm1, %v12052_v6  ;;  %v14600_v6 = vld [vmem:[#allocation41_spill] sm:$0xff] }
 0xf8f   : > { %v4645_v37 = vpop.f32.mrf.mxu1 }
 0xf92   : > { %7404 = vmatmul.msk.f32.gmra.mxu2 %vm533_vm1, %v12067_v42  ;;  %v14602_v42 = vld [vmem:[#allocation47_spill] sm:$0xff] }
 0xf9a   : > { %7424 = vmatmul.msk.f32.vlgmr.msra.gmra.mxu2 %vm533_vm1, %v12082_v4  ;;  %v14603_v4 = vld [vmem:[#allocation54_spill] sm:$0xff] }
 0xf9b   : > { %4873 = vmatpush.msra.mxu2 %v14595_v11  ;;  %v14605_v11 = vld [vmem:[#allocation92_spill] sm:$0xff] }
 0xf9d   : > { %4874 = vmatpush.msra.mxu2 %v14596_v60 }
 0xf9f   : > { %4875 = vmatpush.msra.mxu2 %v14597_v59  ;;  %v14606_v59 = vld [vmem:[#allocation93_spill] sm:$0xff] }
 0xfa1   : > { %4876 = vmatpush.msra.mxu2 %v14598_v46 }
 0xfa2   : > { %7425 = vmatmul.msk.f32.gmra.mxu2 %vm533_vm1, %v7406_v23  ;;  %v4450_v23 = vpop.f32.mrf.mxu0 }
 0xfa3   : > { %4877 = vmatpush.msra.mxu2 %v14599_v40  ;;  %v4451_v41 = vadd.f32 %v4450_v23, %v4389_v44  ;;  %v14610_v44 = vld [vmem:[#allocation97_spill] sm:$0xff]  ;;  %v14612_v23 = vld [vmem:[#allocation99_spill] sm:$0xff] }
 0xfa5   : > { %4878 = vmatpush.msra.mxu2 %v14600_v6  ;;  %v4547_v40 = vadd.f32 %v4514_v2, %v4451_v41  ;;  %v14613_v2 = vld [vmem:[#allocation69_spill] sm:$0xff] }
 0xfa7   : > { %4879 = vmatpush.msra.mxu2 %v14601_v51  ;;  %v4648_v51 = vpop.f32.mrf.mxu1 }
 0xfa9   : > { %4880 = vmatpush.msra.mxu2 %v14602_v42  ;;  %v14608_v42 = vld [vmem:[#allocation94_spill] sm:$0xff] }
 0xfaa   : > { %7426 = vmatmul.msk.f32.gmra.mxu2 %vm533_vm1, %v7407_v15  ;;  %v4581_v13 = vpop.f32.mrf.mxu0 }
 0xfab   : > { %4881 = vmatpush.msra.mxu2 %v14603_v4  ;;  %v4643_v57 = vadd.f32 %v4642_v47, %v4581_v13  ;;  %v14616_v47 = vld [vmem:[#allocation76_spill] sm:$0xff] }
 0xfad   : > { %v4677_v25 = vadd.f32 %v4643_v57, %v4543_v21  ;;  %v14615_v21 = vld [vmem:[#allocation59_spill] sm:$0xff]  ;;  %v4470_v57 = vpop.f32.mrf.mxu3 }
 0xfaf   : > { %v4683_v1 = vadd.f32 %v4677_v25, %v14254_v14 }
 0xfb1   : > { %v4689_v48 = vmax.f32 %v4683_v1, 0.0 }
 0xfb2   : > { %v4584_v19 = vpop.f32.mrf.mxu0 }
 0xfb3   : > { %v4646_v52 = vadd.f32 %v4645_v37, %v4584_v19  ;;  %4720 = vmatmul.f32.vlgmr.msrb.gmra.mxu0 %v4689_v48  ;;  %4772 = vmatmul.f32.vlgmr.msrb.gmra.mxu1 %v4689_v48 }
 0xfb4   : > { %5014 = vmatpush.msrb.mxu1 %v11598_v22  ;;  %v14609_v22 = vld [vmem:[#allocation95_spill] sm:$0xff] }
 0xfb5   : > { %v4679_v16 = vadd.f32 %v4646_v52, %v4545_v45  ;;  %v4473_v25 = vpop.f32.mrf.mxu3 }
 0xfb6   : > { %5015 = vmatpush.msrb.mxu1 %v14605_v11 }
 0xfb7   : > { %v4685_v60 = vadd.f32 %v4679_v16, %v14254_v14 }
 0xfb8   : > { %5016 = vmatpush.msrb.mxu1 %v14606_v59 }
 0xfb9   : > { %v4691_v20 = vmax.f32 %v4685_v60, 0.0 }
 0xfba   : > { %v4587_v6 = vpop.f32.mrf.mxu0  ;;  %5017 = vmatpush.msrb.mxu1 %v14608_v42 }
 0xfbb   : > { %v4649_v4 = vadd.f32 %v4648_v51, %v4587_v6  ;;  %4723 = vmatmul.f32.gmra.mxu0 %v4691_v20  ;;  %4775 = vmatmul.f32.gmra.mxu1 %v4691_v20 }
 0xfbc   : > { %5018 = vmatpush.msrb.mxu1 %v14609_v22  ;;  %v14617_v22 = vld [vmem:[#allocation61_spill] sm:$0xff] }
 0xfbd   : > { %v4681_v8 = vadd.f32 %v4649_v4, %v4547_v40  ;;  %v4476_v48 = vpop.f32.mrf.mxu3 }
 0xfbe   : > { %5019 = vmatpush.msrb.mxu1 %v14610_v44  ;;  %v14618_v44 = vld [vmem:[#allocation81_spill] sm:$0xff] }
 0xfbf   : > { %v4687_v63 = vadd.f32 %v4681_v8, %v14254_v14 }
 0xfc0   : > { %5020 = vmatpush.msrb.mxu1 %v14611_v26 }
 0xfc1   : > { %v4693_v0 = vmax.f32 %v4687_v63, 0.0 }
 0xfc2   : > { %5021 = vmatpush.msrb.mxu1 %v14612_v23 }
 0xfc3   : > { %4726 = vmatmul.f32.gmra.mxu0 %v4693_v0  ;;  %4778 = vmatmul.f32.gmra.mxu1 %v4693_v0 }
 0xfc4   : > { %5022 = vmatpush.msrb.mxu1 %v14613_v2 }
 0xfc5   : > { %v4607_v37 = vpop.f32.mrf.mxu3 }
 0xfc6   : > { %5023 = vmatpush.msrb.mxu1 %v14614_v55  ;;  %v14620_v55 = vld [vmem:[#allocation77_spill] sm:$0xff] }
 0xfc8   : > { %5024 = vmatpush.msrb.mxu1 %v14615_v21 }
 0xfca   : > { %5025 = vmatpush.msrb.mxu1 %v14616_v47  ;;  %v14621_v47 = vld [vmem:[#allocation67_spill] sm:$0xff] }
 0xfcd   : > { %v4610_v59 = vpop.f32.mrf.mxu3 }
 0xfd5   : > { %v4613_v26 = vpop.f32.mrf.mxu3 }
 0xfdd   : > { %v12223_v15 = vpop.f32.mrf.mxu2 }
 0xfde   : > { %14604 = vst [vmem:[#allocation30_spill] sm:$0xff] %v12223_v15  ;;  %v12610_v15 = vld [vmem:[%s13779_s5 + $0x48] sm:$0xff] }
 0xfdf   : > { %14659 = vst [vmem:[#allocation24_spill] sm:$0xff] %v12610_v15 }
 0xfe5   : > { %v12229_v46 = vpop.f32.mrf.mxu2 }
 0xfe6   : > { %14607 = vst [vmem:[#allocation21_spill] sm:$0xff] %v12229_v46  ;;  %v12616_v46 = vld [vmem:[%s13779_s5 + $0xa8] sm:$0xff] }
 0xfe7   : > { %14660 = vst [vmem:[#allocation28_spill] sm:$0xff] %v12616_v46 }
 0xfed   : > { %v4409_v43 = vpop.f32.mrf.mxu2 }
 0xfee   : > { %v4471_v52 = vadd.f32 %v4470_v57, %v4409_v43  ;;  %v14619_v43 = vld [vmem:[#allocation64_spill] sm:$0xff] }
 0xff5   : > { %v4412_v13 = vpop.f32.mrf.mxu2 }
 0xff6   : > { %v4474_v20 = vadd.f32 %v4473_v25, %v4412_v13  ;;  %v14622_v25 = vld [vmem:[#allocation71_spill] sm:$0xff] }
 0xffd   : > { %v4415_v62 = vpop.f32.mrf.mxu2 }
 0xffe   : > { %v4477_v0 = vadd.f32 %v4476_v48, %v4415_v62  ;;  %v14624_v48 = vld [vmem:[#allocation83_spill] sm:$0xff] }
0x1005   : > { %v4534_v1 = vpop.f32.mrf.mxu2 }
0x1006   : > { %v4544_v16 = vadd.f32 %v4534_v1, %v4471_v52 }
0x100d   : > { %v4537_v45 = vpop.f32.mrf.mxu2 }
0x100e   : > { %v4546_v42 = vadd.f32 %v4537_v45, %v4474_v20  ;;  %v14623_v45 = vld [vmem:[#allocation70_spill] sm:$0xff] }
0x1015   : > { %v4540_v19 = vpop.f32.mrf.mxu2 }
0x1016   : > { %v4548_v21 = vadd.f32 %v4540_v19, %v4477_v0  ;;  %v14625_v19 = vld [vmem:[#allocation72_spill] sm:$0xff] }
0x101d   : > { %v4668_v41 = vpop.f32.mrf.mxu2 }
0x101e   : > { %v4669_v11 = vadd.f32 %v4668_v41, %v4607_v37 }
0x1020   : > { %v4678_v60 = vadd.f32 %v4669_v11, %v4544_v16 }
0x1022   : > { %v4684_v40 = vadd.f32 %v4678_v60, %v14255_v17 }
0x1024   : > { %v4690_v6 = vmax.f32 %v4684_v40, 0.0 }
0x1025   : > { %v4671_v51 = vpop.f32.mrf.mxu2 }
0x1026   : > { %v4672_v4 = vadd.f32 %v4671_v51, %v4610_v59  ;;  %7427 = vmatmul.msk.f32.vlgmr.msra.gmra.mxu3 %vm954_vm2, %v4690_v6  ;;  %7430 = vmatmul.msk.f32.vlgmr.msrb.gmra.mxu2 %vm954_vm2, %v4690_v6 }
0x1027   : > { %4971 = vmatpush.msrb.mxu2 %v14617_v22 }
0x1028   : > { %v4680_v8 = vadd.f32 %v4672_v4, %v4546_v42 }
0x1029   : > { %4972 = vmatpush.msrb.mxu2 %v14618_v44 }
0x102a   : > { %v4686_v63 = vadd.f32 %v4680_v8, %v14255_v17 }
0x102b   : > { %4973 = vmatpush.msrb.mxu2 %v14619_v43 }
0x102c   : > { %v4692_v23 = vmax.f32 %v4686_v63, 0.0 }
0x102d   : > { %v4674_v2 = vpop.f32.mrf.mxu2  ;;  %4974 = vmatpush.msrb.mxu2 %v14620_v55  ;;  %v14637_v55 = vld [vmem:[#allocation50_spill] sm:$0xff] }
0x102e   : > { %v4675_v13 = vadd.f32 %v4674_v2, %v4613_v26  ;;  %7428 = vmatmul.msk.f32.gmra.mxu3 %vm954_vm2, %v4692_v23  ;;  %7431 = vmatmul.msk.f32.gmra.mxu2 %vm954_vm2, %v4692_v23  ;;  %v14636_v2 = vld [vmem:[#allocation49_spill] sm:$0xff] }
0x102f   : > { %4975 = vmatpush.msrb.mxu2 %v14621_v47  ;;  %v14640_v47 = vld [vmem:[#allocation52_spill] sm:$0xff] }
0x1030   : > { %v4682_v57 = vadd.f32 %v4675_v13, %v4548_v21  ;;  %v4721_v37 = vpop.f32.mrf.mxu0  ;;  %v4773_v52 = vpop.f32.mrf.mxu1  ;;  %v14638_v21 = vld [vmem:[#allocation51_spill] sm:$0xff]  ;;  %v14639_v13 = vld [vmem:[#allocation58_spill] sm:$0xff] }
0x1031   : > { %4976 = vmatpush.msrb.mxu2 %v14622_v25  ;;  %v14642_v25 = vld [vmem:[#allocation53_spill] sm:$0xff] }
0x1032   : > { %v4688_v1 = vadd.f32 %v4682_v57, %v14255_v17  ;;  %v14641_v57 = vld [vmem:[#allocation60_spill] sm:$0xff] }
0x1033   : > { %4977 = vmatpush.msrb.mxu2 %v14623_v45  ;;  %v14644_v45 = vld [vmem:[#allocation55_spill] sm:$0xff] }
0x1034   : > { %v4694_v62 = vmax.f32 %v4688_v1, 0.0  ;;  %v14643_v1 = vld [vmem:[#allocation63_spill] sm:$0xff] }
0x1035   : > { %4978 = vmatpush.msrb.mxu2 %v14624_v48  ;;  %v14646_v48 = vld [vmem:[#allocation100_spill] sm:$0xff] }
0x1036   : > { %7429 = vmatmul.msk.f32.gmra.mxu3 %vm954_vm2, %v4694_v62  ;;  %7432 = vmatmul.msk.f32.gmra.mxu2 %vm954_vm2, %v4694_v62  ;;  %v14645_v62 = vld [vmem:[#allocation66_spill] sm:$0xff] }
0x1037   : > { %4979 = vmatpush.msrb.mxu2 %v14625_v19  ;;  %v14647_v19 = vld [vmem:[#allocation101_spill] sm:$0xff] }
0x1038   : > { %v4724_v11 = vpop.f32.mrf.mxu0  ;;  %v4776_v60 = vpop.f32.mrf.mxu1 }
0x1040   : > { %v4727_v20 = vpop.f32.mrf.mxu0  ;;  %v4779_v6 = vpop.f32.mrf.mxu1 }
0x10a9   : > { %v4747_v41 = vpop.f32.mrf.mxu3  ;;  %v4799_v16 = vpop.f32.mrf.mxu2 }
0x10aa   : > { %v4748_v63 = vadd.f32 %v4747_v41, %v4721_v37  ;;  %v4800_v26 = vadd.f32 %v4799_v16, %v4773_v52  ;;  %v14648_v37 = vld [vmem:[#allocation102_spill] sm:$0xff]  ;;  %v14649_v52 = vld [vmem:[#allocation103_spill] sm:$0xff] }
0x10ac   : > { %v4808_v23 = vmax.f32 %v4748_v63, %v4800_v26 }
0x10b1   : > { %v4750_v59 = vpop.f32.mrf.mxu3  ;;  %v4802_v40 = vpop.f32.mrf.mxu2 }
0x10b2   : > { %v4751_v4 = vadd.f32 %v4750_v59, %v4724_v11  ;;  %v4803_v22 = vadd.f32 %v4802_v40, %v4776_v60  ;;  %v12301_v60 = vld [vmem:[%s14139_s1 + $0x30] sm:$0xf]  ;;  %v12308_v40 = vld [vmem:[%s14139_s1 + $0x20] sm:$0xff] }
0x10b4   : > { %v4809_v0 = vmax.f32 %v4751_v4, %v4803_v22  ;;  %v12320_v22 = vld [vmem:[%s14139_s1] sm:$0xff] }
0x10b9   : > { %v4753_v51 = vpop.f32.mrf.mxu3  ;;  %v4805_v42 = vpop.f32.mrf.mxu2 }
0x10ba   : > { %v4754_v8 = vadd.f32 %v4753_v51, %v4727_v20  ;;  %v4806_v44 = vadd.f32 %v4805_v42, %v4779_v6  ;;  %v12314_v6 = vld [vmem:[%s14139_s1 + $0x10] sm:$0xff] }
0x10bc   : > { %v4810_v43 = vmax.f32 %v4754_v8, %v4806_v44 }
0x10be   : > { %4824 = vmatpush.msrb.mxu3 %v4810_v43  ;;  %4847 = vmatpush.msra.mxu0 %v4810_v43 }
0x10c0   : > { %4825 = vmatpush.msrb.mxu3 %v4809_v0  ;;  %4848 = vmatpush.msra.mxu0 %v4809_v0 }
0x10c2   : > { %4826 = vmatpush.msrb.mxu3 %v4808_v23  ;;  %4849 = vmatpush.msra.mxu0 %v4808_v23 }
0x10c3   : > { %7433 = vmatmul.msk.f32.vlgmr.msrb.gmra.mxu3 %vm1092_vm3, %v11746_v58  ;;  %7435 = vmatmul.msk.f32.vlgmr.msra.gmra.mxu0 %vm1092_vm3, %v11739_v29  ;;  %v14626_v58 = vld [vmem:[#allocation73_spill] sm:$0xff]  ;;  %v14627_v29 = vld [vmem:[#allocation78_spill] sm:$0xff] }
0x10c4   : > { %4895 = vmatpush.msra.mxu3 %v11753_v5  ;;  %4946 = vmatpush.msrb.mxu0 %v11759_v54  ;;  %v14628_v5 = vld [vmem:[#allocation85_spill] sm:$0xff]  ;;  %v14629_v54 = vld [vmem:[#allocation74_spill] sm:$0xff] }
0x10c6   : > { %4896 = vmatpush.msra.mxu3 %v11765_v56  ;;  %4947 = vmatpush.msrb.mxu0 %v11771_v18  ;;  %v14630_v56 = vld [vmem:[#allocation80_spill] sm:$0xff]  ;;  %v14631_v18 = vld [vmem:[#allocation90_spill] sm:$0xff] }
0x10c8   : > { %4897 = vmatpush.msra.mxu3 %v11777_v32  ;;  %4948 = vmatpush.msrb.mxu0 %v11783_v24  ;;  %v14632_v32 = vld [vmem:[#allocation87_spill] sm:$0xff] }
0x10c9   : > { %v14633_v24 = vld [vmem:[#allocation91_spill] sm:$0xff] }
0x10ca   : > { %4898 = vmatpush.msra.mxu3 %v11789_v33  ;;  %4949 = vmatpush.msrb.mxu0 %v11795_v3  ;;  %v14634_v33 = vld [vmem:[#allocation48_spill] sm:$0xff] }
0x10cb   : > { %7434 = vmatmul.msk.f32.gmra.mxu3 %vm1092_vm3, %v14626_v58  ;;  %7436 = vmatmul.msk.f32.gmra.mxu0 %vm1092_vm3, %v14627_v29  ;;  %v14635_v3 = vld [vmem:[#allocation56_spill] sm:$0xff] }
0x10cc   : > { %4899 = vmatpush.msra.mxu3 %v14628_v5  ;;  %4950 = vmatpush.msrb.mxu0 %v14629_v54  ;;  %v12334_v58 = vld [vmem:[%s14139_s1 + $0x38] sm:$0xf]  ;;  %v12342_v5 = vld [vmem:[%s14139_s1 + $0x28] sm:$0xff] }
0x10ce   : > { %4900 = vmatpush.msra.mxu3 %v14630_v56  ;;  %4951 = vmatpush.msrb.mxu0 %v14631_v18  ;;  %v12358_v56 = vld [vmem:[%s14139_s1 + $0x8] sm:$0xff]  ;;  %v12377_v18 = vld [vmem:[%s14139_s1 + $0x110] sm:$0xff] }
0x10d0   : > { %4901 = vmatpush.msra.mxu3 %v14632_v32  ;;  %4952 = vmatpush.msrb.mxu0 %v14633_v24  ;;  %v12383_v32 = vld [vmem:[%s14139_s1 + $0x100] sm:$0xff] }
0x10d1   : > { %v12387_v24 = vld [vmem:[%s8420_s17 + $0xc2] sm:$0xff] }
0x10d2   : > { %4902 = vmatpush.msra.mxu3 %v14634_v33  ;;  %4953 = vmatpush.msrb.mxu0 %v14635_v3  ;;  %v12394_v33 = vld [vmem:[%s14139_s1 + $0x70] sm:$0xf]  ;;  %v12401_v3 = vld [vmem:[%s14139_s1 + $0x60] sm:$0xff] }
0x10d4   : > { %4903 = vmatpush.msra.mxu3 %v14636_v2  ;;  %4954 = vmatpush.msrb.mxu0 %v14637_v55  ;;  %v12405_v2 = vld [vmem:[%s8420_s17 + $0xca] sm:$0xff] }
0x10d5   : > { %v12410_v55 = vld [vmem:[%s14139_s1 + $0x50] sm:$0xff] }
0x10d6   : > { %4994 = vmatpush.msrb.mxu3 %v14638_v21  ;;  %v12416_v21 = vld [vmem:[%s14139_s1 + $0x40] sm:$0xff] }
0x10d8   : > { %4995 = vmatpush.msrb.mxu3 %v14639_v13  ;;  %v12422_v13 = vld [vmem:[%s8420_s17 + $0xd2] sm:$0xff] }
0x10da   : > { %4996 = vmatpush.msrb.mxu3 %v14640_v47 }
0x10dc   : > { %4997 = vmatpush.msrb.mxu3 %v14641_v57 }
0x10de   : > { %4998 = vmatpush.msrb.mxu3 %v14642_v25 }
0x10e0   : > { %4999 = vmatpush.msrb.mxu3 %v14643_v1 }
0x10e2   : > { %5000 = vmatpush.msrb.mxu3 %v14644_v45  ;;  %v12427_v45 = vld [vmem:[%s8420_s17 + $0xc4] sm:$0xff] }
0x10e4   : > { %5001 = vmatpush.msrb.mxu3 %v14645_v62 }
0x10e6   : > { %5002 = vmatpush.msrb.mxu3 %v14646_v48 }
0x10e8   : > { %5003 = vmatpush.msrb.mxu3 %v14647_v19 }
0x10ea   : > { %5004 = vmatpush.msrb.mxu3 %v14648_v37 }
0x10ec   : > { %5005 = vmatpush.msrb.mxu3 %v14649_v52 }
0x1140   : > { %v4851_v41 = vpop.f32.mrf.mxu0 }
0x1146   : > { %v4828_v16 = vpop.f32.mrf.mxu3 }
0x1147   : > { %v4857_v11 = vmax.f32 %v4828_v16, %v4851_v41  ;;  %v12434_v41 = vld [vmem:[%s13779_s5 + $0x108] sm:$0xff] }
0x1148   : > { %v4854_v59 = vpop.f32.mrf.mxu0 }
0x1149   : > { %7438 = vmatmul.msk.f32.vlgmr.msra.gmra.mxu3 %vm1181_vm4, %v4857_v11  ;;  %v4861_v42 = vrot.slane %v4857_v11, 2  ;;  %v4908_v4 = vrot.slane %v4857_v11, 4  ;;  %v4934_v26 = vrot.slane %v4857_v11, 3  ;;  %v4959_v54 = vrot.slane %v4857_v11, 1  ;;  %v12441_v11 = vld [vmem:[%s13779_s5 + $0x100] sm:$0xff] }
0x114a   : > { %7460 = vmatpush.msk.msra.mxu3 %vm543_vm0, %v12301_v60 }
0x114c   : > { %5162 = vmatpush.msra.mxu3 %v12308_v40 }
0x114e   : > { %v4831_v20 = vpop.f32.mrf.mxu3  ;;  %5163 = vmatpush.msra.mxu3 %v12314_v6 }
0x114f   : > { %v4858_v51 = vmax.f32 %v4831_v20, %v4854_v59  ;;  %v12447_v20 = vld [vmem:[%s13779_s5 + $0xf8] sm:$0xff] }
0x1150   : > { %5164 = vmatpush.msra.mxu3 %v12320_v22 }
0x1151   : > { %v4862_v8 = vrot.slane %v4858_v51, 2  ;;  %v4909_v44 = vrot.slane %v4858_v51, 4  ;;  %v4935_v63 = vrot.slane %v4858_v51, 3  ;;  %v4960_v29 = vrot.slane %v4858_v51, 1  ;;  %v12462_v51 = vld [vmem:[%s14139_s1 + $0xf8] sm:$0xf] }
0x1153   : > { %v4863_v43 = vsel %vm1177_vm5, %v4861_v42, %v4862_v8  ;;  %v4910_v0 = vsel %vm543_vm0, %v4908_v4, %v4909_v44  ;;  %v4936_v23 = vsel %vm1282_vm6, %v4934_v26, %v4935_v63  ;;  %v12469_v42 = vld [vmem:[%s13779_s5 + $0xf0] sm:$0xff]  ;;  %v12475_v4 = vld [vmem:[%s14139_s1 + $0xe0] sm:$0xff]  ;;  %v12481_v8 = vld [vmem:[%s14139_s1 + $0xe8] sm:$0xff] }
0x1154   : > { %7437 = vmatmul.msk.f32.vlgmr.msra.gmra.mxu2 %vm1181_vm4, %v4863_v43  ;;  %7439 = vmatmul.msk.f32.vlgmr.msra.gmra.mxu1 %vm1181_vm4, %v4910_v0  ;;  %14650 = vst [vmem:[#allocation31_spill] sm:$0xff] %v12469_v42  ;;  %v12487_v44 = vld [vmem:[%s13779_s5 + $0xe8] sm:$0xff]  ;;  %v7446_v63 = vld [vmem:[%s8420_s17 + $0xc0] sm:$0xff]  ;;  %v12494_v26 = vld [vmem:[%s14139_s1 + $0xd0] sm:$0xff] }
0x1155   : > { %7440 = vmatmul.msk.f32.vlgmr.msrb.gmra.mxu0 %vm1181_vm4, %v4936_v23  ;;  %7452 = vmatpush.msk.msra.mxu2 %vm543_vm0, %v11959_v49  ;;  %v12349_v49 = vld [vmem:[%s14139_s1 + $0x18] sm:$0xff]  ;;  %14651 = vst [vmem:[#allocation12_spill] sm:$0xff] %v12487_v44  ;;  %v12506_v0 = vld [vmem:[%s13779_s5 + $0xe0] sm:$0xff] }
0x1156   : > { %7464 = vmatpush.msk.msra.mxu1 %vm543_vm0, %v12334_v58  ;;  %v12500_v43 = vld [vmem:[%s14139_s1 + $0xd8] sm:$0xff]  ;;  %14652 = vst [vmem:[#allocation32_spill] sm:$0xff] %v12506_v0  ;;  %v12512_v23 = vld [vmem:[%s14139_s1 + $0xc0] sm:$0xff] }
0x1157   : > { %5101 = vmatpush.msra.mxu2 %v11968_v61  ;;  %v4961_v61 = vsel %vm1308_vm7, %v4959_v54, %v4960_v29  ;;  %v12518_v29 = vld [vmem:[%s14139_s1 + $0xc8] sm:$0xff]  ;;  %v12526_v54 = vld [vmem:[%s13779_s5 + $0x78] sm:$0xff] }
0x1158   : > { %5188 = vmatpush.msra.mxu1 %v12342_v5 }
0x1159   : > { %5102 = vmatpush.msra.mxu2 %v11975_v34  ;;  %v12364_v34 = vld [vmem:[%s14139_s1 + $0x130] sm:$0xf] }
0x115a   : > { %5189 = vmatpush.msra.mxu1 %v12349_v49 }
0x115b   : > { %5103 = vmatpush.msra.mxu2 %v11983_v53  ;;  %v12371_v53 = vld [vmem:[%s14139_s1 + $0x120] sm:$0xff] }
0x115c   : > { %7441 = vmatmul.msk.f32.vlgmr.msrb.gmra.mxu2 %vm1181_vm4, %v4961_v61  ;;  %5190 = vmatpush.msra.mxu1 %v12358_v56  ;;  %v12532_v61 = vld [vmem:[%s13779_s5 + $0xd8] sm:$0xff] }
0x115d   : > { %7471 = vmatpush.msk.msrb.mxu2 %vm543_vm0, %v12364_v34  ;;  %14653 = vst [vmem:[#allocation22_spill] sm:$0xff] %v12532_v61 }
0x115f   : > { %5226 = vmatpush.msrb.mxu2 %v12371_v53 }
0x1161   : > { %5227 = vmatpush.msrb.mxu2 %v12377_v18 }
0x1163   : > { %5228 = vmatpush.msrb.mxu2 %v12383_v32 }
0x1164   : > { %7453 = vmatmul.msk.f32.vlgmr.msra.gmra.mxu2 %vm533_vm1, %v12387_v24 }
0x1165   : > { %7493 = vmatpush.msk.msra.mxu2 %vm543_vm0, %v12394_v33 }
0x1167   : > { %5360 = vmatpush.msra.mxu2 %v12401_v3 }
0x1169   : > { %5361 = vmatpush.msra.mxu2 %v12410_v55 }
0x116b   : > { %5362 = vmatpush.msra.mxu2 %v12416_v21 }
0x116c   : > { %7454 = vmatmul.msk.f32.gmra.mxu2 %vm533_vm1, %v12405_v2 }
0x1174   : > { %7455 = vmatmul.msk.f32.gmra.mxu2 %vm533_vm1, %v12422_v13 }
0x117c   : > { %7472 = vmatmul.msk.f32.vlgmr.msrb.gmra.mxu2 %vm533_vm1, %v12427_v45 }
0x117d   : > { %5478 = vmatpush.msrb.mxu2 %v12434_v41 }
0x117f   : > { %5479 = vmatpush.msrb.mxu2 %v12441_v11 }
0x1181   : > { %5480 = vmatpush.msrb.mxu2 %v12447_v20 }
0x1183   : > { %5481 = vmatpush.msrb.mxu2 %v12469_v42 }
0x1185   : > { %5482 = vmatpush.msrb.mxu2 %v12487_v44  ;;  %v12729_v44 = vld [vmem:[%s8420_s17 + $0xc9] sm:$0xff] }
0x1187   : > { %5483 = vmatpush.msrb.mxu2 %v12506_v0  ;;  %v12709_v0 = vld [vmem:[%s8420_s17 + $0xc1] sm:$0xff] }
0x1189   : > { %5484 = vmatpush.msrb.mxu2 %v12532_v61  ;;  %v12676_v61 = vld [vmem:[%s13779_s5 + $0x10] sm:$0xff] }
0x118a   : > { %14670 = vst [vmem:[#allocation15_spill] sm:$0xff] %v12676_v61 }
0x11cc   : > { %v4905_v57 = vpop.f32.mrf.mxu3 }
0x11d1   : > { %v4930_v1 = vpop.f32.mrf.mxu1 }
0x11d2   : > { %v4956_v62 = vpop.f32.mrf.mxu0 }
0x11d7   : > { %v4883_v47 = vpop.f32.mrf.mxu2 }
0x11d8   : > { %v4906_v25 = vadd.f32 %v4905_v57, %v4883_v47  ;;  %v12538_v47 = vld [vmem:[%s13779_s5 + $0x88] sm:$0xff]  ;;  %v12544_v57 = vld [vmem:[%s13779_s5 + $0x70] sm:$0xff] }
0x11da   : > { %v4933_v19 = vadd.f32 %v4930_v1, %v4906_v25  ;;  %v12550_v25 = vld [vmem:[%s13779_s5 + $0xd0] sm:$0xff]  ;;  %v12556_v1 = vld [vmem:[%s13779_s5 + $0x80] sm:$0xff] }
0x11db   : > { %14654 = vst [vmem:[#allocation33_spill] sm:$0xff] %v12550_v25  ;;  %5485 = vmatpush.msrb.mxu2 %v12550_v25  ;;  %v12664_v25 = vld [vmem:[%s13779_s5 + $0x20] sm:$0xff] }
0x11dc   : > { %14668 = vst [vmem:[#allocation13_spill] sm:$0xff] %v12664_v25 }
0x11df   : > { %v4981_v48 = vpop.f32.mrf.mxu2 }
0x11e0   : > { %v4982_v37 = vadd.f32 %v4981_v48, %v4956_v62  ;;  %v12562_v62 = vld [vmem:[%s13779_s5 + $0x68] sm:$0xff] }
0x11e1   : > { %v12568_v48 = vld [vmem:[%s13779_s5 + $0xc8] sm:$0xff] }
0x11e2   : > { %v4984_v52 = vadd.f32 %v4982_v37, %v4933_v19  ;;  %14655 = vst [vmem:[#allocation23_spill] sm:$0xff] %v12568_v48  ;;  %5486 = vmatpush.msrb.mxu2 %v12568_v48  ;;  %v12574_v19 = vld [vmem:[%s13779_s5 + $0x60] sm:$0xff]  ;;  %v12646_v48 = vld [vmem:[%s13779_s5 + $0x30] sm:$0xff] }
0x11e3   : > { %v12580_v37 = vld [vmem:[%s13779_s5 + $0xc0] sm:$0xff]  ;;  %14665 = vst [vmem:[#allocation35_spill] sm:$0xff] %v12646_v48 }
0x11e4   : > { %v4985_v16 = vadd.f32 %v12006_v12, %v4984_v52  ;;  %v12455_v12 = vld [vmem:[%s14139_s1 + $0xf0] sm:$0xf]  ;;  %14656 = vst [vmem:[#allocation14_spill] sm:$0xff] %v12580_v37  ;;  %5487 = vmatpush.msrb.mxu2 %v12580_v37  ;;  %v12586_v52 = vld [vmem:[%s13779_s5 + $0x58] sm:$0xff] }
0x11e5   : > { %v12634_v37 = vld [vmem:[%s13779_s5 + $0x38] sm:$0xff] }
0x11e6   : > { %v4986_v59 = vmax.f32 %v4985_v16, 0.0  ;;  %v12592_v16 = vld [vmem:[%s13779_s5 + $0xb8] sm:$0xff]  ;;  %14663 = vst [vmem:[#allocation34_spill] sm:$0xff] %v12634_v37 }
0x11e7   : > { %14657 = vst [vmem:[#allocation25_spill] sm:$0xff] %v12592_v16  ;;  %5488 = vmatpush.msrb.mxu2 %v12592_v16  ;;  %v12622_v16 = vld [vmem:[%s13779_s5 + $0x40] sm:$0xff] }
0x11e8   : > { %7442 = vmatmul.msk.f32.vlgmr.msrb.gmra.mxu3 %vm1353_vm8, %v4986_v59  ;;  %7443 = vmatmul.msk.f32.vlgmr.msrb.gmra.mxu1 %vm1353_vm8, %v4986_v59  ;;  %v12598_v59 = vld [vmem:[%s13779_s5 + $0x50] sm:$0xff]  ;;  %14661 = vst [vmem:[#allocation27_spill] sm:$0xff] %v12622_v16 }
0x11e9   : > { %7485 = vmatpush.msk.msrb.mxu3 %vm543_vm0, %v12455_v12  ;;  %7489 = vmatpush.msk.msrb.mxu1 %vm543_vm0, %v12462_v51 }
0x11eb   : > { %5299 = vmatpush.msrb.mxu3 %v12475_v4  ;;  %5325 = vmatpush.msrb.mxu1 %v12481_v8 }
0x11ed   : > { %5300 = vmatpush.msrb.mxu3 %v12494_v26  ;;  %5326 = vmatpush.msrb.mxu1 %v12500_v43 }
0x11ef   : > { %5301 = vmatpush.msrb.mxu3 %v12512_v23  ;;  %5327 = vmatpush.msrb.mxu1 %v12518_v29 }
0x11f0   : > { %7461 = vmatmul.msk.f32.vlgmr.msra.gmra.mxu3 %vm533_vm1, %v7446_v63  ;;  %7465 = vmatmul.msk.f32.vlgmr.msra.gmra.mxu1 %vm533_vm1, %v7446_v63  ;;  %v12604_v63 = vld [vmem:[%s13779_s5 + $0xb0] sm:$0xff] }
0x11f1   : > { %5426 = vmatpush.msra.mxu3 %v12526_v54  ;;  %5466 = vmatpush.msra.mxu1 %v12538_v47  ;;  %14658 = vst [vmem:[#allocation26_spill] sm:$0xff] %v12604_v63 }
0x11f2   : > { %5489 = vmatpush.msrb.mxu2 %v12604_v63  ;;  %v12628_v63 = vld [vmem:[%s13779_s5 + $0xa0] sm:$0xff] }
0x11f3   : > { %5427 = vmatpush.msra.mxu3 %v12544_v57  ;;  %5467 = vmatpush.msra.mxu1 %v12556_v1  ;;  %14662 = vst [vmem:[#allocation16_spill] sm:$0xff] %v12628_v63 }
0x11f4   : > { %5490 = vmatpush.msrb.mxu2 %v12616_v46  ;;  %v12640_v46 = vld [vmem:[%s13779_s5 + $0x98] sm:$0xff] }
0x11f5   : > { %5428 = vmatpush.msra.mxu3 %v12562_v62  ;;  %14664 = vst [vmem:[#allocation29_spill] sm:$0xff] %v12640_v46 }
0x11f6   : > { %5491 = vmatpush.msrb.mxu2 %v12628_v63  ;;  %v12652_v63 = vld [vmem:[%s13779_s5 + $0x90] sm:$0xff] }
0x11f7   : > { %5429 = vmatpush.msra.mxu3 %v12574_v19  ;;  %14666 = vst [vmem:[#allocation17_spill] sm:$0xff] %v12652_v63 }
0x11f8   : > { %5492 = vmatpush.msrb.mxu2 %v12640_v46  ;;  %v12658_v46 = vld [vmem:[%s13779_s5 + $0x28] sm:$0xff] }
0x11f9   : > { %5430 = vmatpush.msra.mxu3 %v12586_v52  ;;  %14667 = vst [vmem:[#allocation18_spill] sm:$0xff] %v12658_v46 }
0x11fa   : > { %5493 = vmatpush.msrb.mxu2 %v12652_v63  ;;  %v12670_v63 = vld [vmem:[%s13779_s5 + $0x18] sm:$0xff] }
0x11fb   : > { %5431 = vmatpush.msra.mxu3 %v12598_v59  ;;  %14669 = vst [vmem:[#allocation19_spill] sm:$0xff] %v12670_v63 }
0x11fd   : > { %5432 = vmatpush.msra.mxu3 %v12610_v15 }
0x11ff   : > { %5433 = vmatpush.msra.mxu3 %v12622_v16  ;;  %v7481_v16 = vld [vmem:[%s8420_s17 + $0xd1] sm:$0xff] }
0x1201   : > { %5434 = vmatpush.msra.mxu3 %v12634_v37  ;;  %v7483_v37 = vld [vmem:[%s8420_s17 + $0xcb] sm:$0xff] }
0x1203   : > { %5435 = vmatpush.msra.mxu3 %v12646_v48  ;;  %v12693_v48 = vld [vmem:[%s8420_s17 + $0xcc] sm:$0xff] }
0x1204   : > { %7473 = vmatmul.msk.f32.gmra.mxu2 %vm533_vm1, %v12693_v48 }
0x1205   : > { %5436 = vmatpush.msra.mxu3 %v12658_v46  ;;  %v7447_v46 = vld [vmem:[%s8420_s17 + $0xc8] sm:$0xff] }
0x1206   : > { %7462 = vmatmul.msk.f32.gmra.mxu3 %vm533_vm1, %v7447_v46  ;;  %7466 = vmatmul.msk.f32.gmra.mxu1 %vm533_vm1, %v7447_v46  ;;  %v12718_v46 = vld [vmem:[%s13777_s3 + $0x160] sm:$0xff] }
0x1207   : > { %5437 = vmatpush.msra.mxu3 %v12664_v25  ;;  %v12682_v25 = vld [vmem:[%s13779_s5 + $0x8] sm:$0xff]  ;;  %14673 = vst [vmem:[#allocation65_spill] sm:$0xff] %v12718_v46 }
0x1208   : > { %14671 = vst [vmem:[#allocation37_spill] sm:$0xff] %v12682_v25 }
0x1209   : > { %5438 = vmatpush.msra.mxu3 %v12670_v63  ;;  %v12688_v63 = vld [vmem:[%s13779_s5] sm:$0xff] }
0x120a   : > { %14672 = vst [vmem:[#allocation62_spill] sm:$0xff] %v12688_v63 }
0x120b   : > { %5439 = vmatpush.msra.mxu3 %v12676_v61  ;;  %v12701_v61 = vld [vmem:[%s8420_s17 + $0xd4] sm:$0xff] }
0x120c   : > { %7474 = vmatmul.msk.f32.gmra.mxu2 %vm533_vm1, %v12701_v61 }
0x120d   : > { %5440 = vmatpush.msra.mxu3 %v12682_v25  ;;  %v7448_v25 = vld [vmem:[%s8420_s17 + $0xd0] sm:$0xff] }
0x120e   : > { %7463 = vmatmul.msk.f32.gmra.mxu3 %vm533_vm1, %v7448_v25  ;;  %7467 = vmatmul.msk.f32.gmra.mxu1 %vm533_vm1, %v7448_v25  ;;  %v12724_v25 = vld [vmem:[%s13777_s3 + $0x158] sm:$0xff] }
0x120f   : > { %5441 = vmatpush.msra.mxu3 %v12688_v63  ;;  %v7482_v63 = vld [vmem:[%s8420_s17 + $0xc3] sm:$0xff]  ;;  %14674 = vst [vmem:[#allocation68_spill] sm:$0xff] %v12724_v25 }
0x1214   : > { %7494 = vmatmul.msk.f32.vlgmr.msra.gmra.mxu2 %vm533_vm1, %v12709_v0 }
0x1215   : > { %5642 = vmatpush.msra.mxu2 %v12718_v46  ;;  %v12740_v46 = vld [vmem:[%s13777_s3 + $0x148] sm:$0xff] }
0x1216   : > { %7486 = vmatmul.msk.f32.vlgmr.msrb.gmra.mxu3 %vm533_vm1, %v7482_v63  ;;  %7490 = vmatmul.msk.f32.vlgmr.msrb.gmra.mxu1 %vm533_vm1, %v7482_v63  ;;  %v12734_v63 = vld [vmem:[%s13777_s3 + $0x150] sm:$0xff]  ;;  %14676 = vst [vmem:[#allocation39_spill] sm:$0xff] %v12740_v46 }
0x1217   : > { %5643 = vmatpush.msra.mxu2 %v12724_v25  ;;  %14675 = vst [vmem:[#allocation40_spill] sm:$0xff] %v12734_v63  ;;  %v12750_v25 = vld [vmem:[%s13777_s3 + $0x140] sm:$0xff] }
0x1218   : > { %14677 = vst [vmem:[#allocation75_spill] sm:$0xff] %v12750_v25 }
0x1219   : > { %5644 = vmatpush.msra.mxu2 %v12734_v63  ;;  %v12756_v63 = vld [vmem:[%s13777_s3 + $0x138] sm:$0xff] }
0x121a   : > { %14678 = vst [vmem:[#allocation82_spill] sm:$0xff] %v12756_v63 }
0x121b   : > { %5645 = vmatpush.msra.mxu2 %v12740_v46  ;;  %v7484_v46 = vld [vmem:[%s8420_s17 + $0xd3] sm:$0xff] }
0x121c   : > { %7495 = vmatmul.msk.f32.gmra.mxu2 %vm533_vm1, %v12729_v44 }
0x121d   : > { %5646 = vmatpush.msra.mxu2 %v12750_v25  ;;  %v12770_v25 = vld [vmem:[%s13777_s3 + $0x128] sm:$0xff] }
0x121e   : > { %7487 = vmatmul.msk.f32.gmra.mxu3 %vm533_vm1, %v7483_v37  ;;  %7491 = vmatmul.msk.f32.gmra.mxu1 %vm533_vm1, %v7483_v37  ;;  %v12764_v37 = vld [vmem:[%s13777_s3 + $0x130] sm:$0xff] }
0x121f   : > { %5647 = vmatpush.msra.mxu2 %v12756_v63  ;;  %14679 = vst [vmem:[#allocation89_spill] sm:$0xff] %v12764_v37  ;;  %v12779_v63 = vld [vmem:[%s13777_s3 + $0x120] sm:$0xff] }
0x1221   : > { %5648 = vmatpush.msra.mxu2 %v12764_v37 }
0x1223   : > { %5649 = vmatpush.msra.mxu2 %v12770_v25 }
0x1224   : > { %7496 = vmatmul.msk.f32.gmra.mxu2 %vm533_vm1, %v7481_v16 }
0x1225   : > { %5650 = vmatpush.msra.mxu2 %v12779_v63 }
0x1226   : > { %7488 = vmatmul.msk.f32.gmra.mxu3 %vm533_vm1, %v7484_v46  ;;  %7492 = vmatmul.msk.f32.gmra.mxu1 %vm533_vm1, %v7484_v46 }
0x1265   : > { %v5027_v37 = vpop.f32.mrf.mxu1 }
0x126b   : > { %v5007_v42 = vpop.f32.mrf.mxu3 }
0x126c   : > { %v5030_v15 = vmax.f32 %v5007_v42, %v5027_v37  ;;  %v12891_v42 = vld [vmem:[%s13777_s3 + $0x90] sm:$0xff] }
0x126d   : > { %14690 = vst [vmem:[#allocation93_spill] sm:$0xff] %v12891_v42 }
0x126e   : > { %5046 = vmatpush.msra.mxu0 %v5030_v15 }
0x126f   : > { %7444 = vmatmul.msk.f32.vlgmr.msra.gmra.mxu0 %vm1412_vm9, %v12091_v36  ;;  %v12804_v36 = vld [vmem:[%s14139_s1 + $0x58] sm:$0xff] }
0x1270   : > { %5066 = vmatpush.msrb.mxu0 %v5030_v15  ;;  %v12872_v15 = vld [vmem:[%s13777_s3 + $0xa8] sm:$0xff] }
0x1271   : > { %14687 = vst [vmem:[#allocation47_spill] sm:$0xff] %v12872_v15 }
0x1272   : > { %7456 = vmatpush.msk.msra.mxu0 %vm543_vm0, %v12101_v7  ;;  %v12812_v7 = vld [vmem:[%s14139_s1 + $0x48] sm:$0xff] }
0x1274   : > { %5127 = vmatpush.msra.mxu0 %v12111_v28  ;;  %v12822_v28 = vld [vmem:[%s13779_s5 + $0x118] sm:$0xff] }
0x1275   : > { %14680 = vst [vmem:[#allocation84_spill] sm:$0xff] %v12822_v28 }
0x1276   : > { %5128 = vmatpush.msra.mxu0 %v12120_v31  ;;  %v12828_v31 = vld [vmem:[%s13779_s5 + $0x110] sm:$0xff] }
0x1277   : > { %7445 = vmatmul.msk.f32.vlgmr.msrb.gmra.mxu0 %vm1412_vm9, %v12127_v30  ;;  %14681 = vst [vmem:[#allocation86_spill] sm:$0xff] %v12828_v31  ;;  %v5105_v30 = vpop.f32.mrf.mxu2 }
0x1278   : > { %5129 = vmatpush.msra.mxu0 %v12136_v27 }
0x127a   : > { %7475 = vmatpush.msk.msrb.mxu0 %vm543_vm0, %v12142_v39  ;;  %v12840_v39 = vld [vmem:[%s13777_s3 + $0xd0] sm:$0xff] }
0x127b   : > { %14682 = vst [vmem:[#allocation43_spill] sm:$0xff] %v12840_v39 }
0x127c   : > { %5252 = vmatpush.msrb.mxu0 %v12152_v38  ;;  %v12846_v38 = vld [vmem:[%s13777_s3 + $0xc8] sm:$0xff] }
0x127d   : > { %14683 = vst [vmem:[#allocation44_spill] sm:$0xff] %v12846_v38 }
0x127e   : > { %5253 = vmatpush.msrb.mxu0 %v12160_v10  ;;  %v12852_v10 = vld [vmem:[%s13777_s3 + $0xc0] sm:$0xff] }
0x127f   : > { %7457 = vmatmul.msk.f32.vlgmr.msra.gmra.mxu0 %vm533_vm1, %v12387_v24  ;;  %v5108_v27 = vpop.f32.mrf.mxu2  ;;  %14684 = vst [vmem:[#allocation45_spill] sm:$0xff] %v12852_v10  ;;  %v12878_v24 = vld [vmem:[%s13777_s3 + $0xa0] sm:$0xff] }
0x1280   : > { %5254 = vmatpush.msrb.mxu0 %v12170_v35  ;;  %14688 = vst [vmem:[#allocation54_spill] sm:$0xff] %v12878_v24 }
0x1282   : > { %7497 = vmatpush.msk.msra.mxu0 %vm543_vm0, %v12177_v50  ;;  %v12858_v50 = vld [vmem:[%s13777_s3 + $0xb8] sm:$0xff] }
0x1283   : > { %14685 = vst [vmem:[#allocation41_spill] sm:$0xff] %v12858_v50 }
0x1284   : > { %5386 = vmatpush.msra.mxu0 %v12185_v9  ;;  %v12866_v9 = vld [vmem:[%s13777_s3 + $0xb0] sm:$0xff] }
0x1285   : > { %14686 = vst [vmem:[#allocation42_spill] sm:$0xff] %v12866_v9 }
0x1286   : > { %5387 = vmatpush.msra.mxu0 %v12804_v36 }
0x1287   : > { %7458 = vmatmul.msk.f32.gmra.mxu0 %vm533_vm1, %v12405_v2  ;;  %v5111_v35 = vpop.f32.mrf.mxu2  ;;  %v12884_v2 = vld [vmem:[%s13777_s3 + $0x98] sm:$0xff] }
0x1288   : > { %5388 = vmatpush.msra.mxu0 %v12812_v7  ;;  %14689 = vst [vmem:[#allocation92_spill] sm:$0xff] %v12884_v2 }
0x128f   : > { %7459 = vmatmul.msk.f32.gmra.mxu0 %vm533_vm1, %v12422_v13  ;;  %v5166_v13 = vpop.f32.mrf.mxu3 }
0x1290   : > { %v5167_v46 = vadd.f32 %v5166_v13, %v5105_v30 }
0x1297   : > { %7476 = vmatmul.msk.f32.vlgmr.msrb.gmra.mxu0 %vm533_vm1, %v12427_v45  ;;  %v5230_v45 = vpop.f32.mrf.mxu2 }
0x1298   : > { %5518 = vmatpush.msrb.mxu0 %v12822_v28  ;;  %v5265_v37 = vadd.f32 %v5230_v45, %v5167_v46  ;;  %v12931_v45 = vld [vmem:[%s13781_s7 + $0x90] sm:$0xff]  ;;  %v12950_v46 = vld [vmem:[%s13781_s7 + $0x78] sm:$0xff] }
0x1299   : > { %14696 = vst [vmem:[#allocation69_spill] sm:$0xff] %v12931_v45 }
0x129a   : > { %5519 = vmatpush.msrb.mxu0 %v12828_v31  ;;  %14699 = vst [vmem:[#allocation76_spill] sm:$0xff] %v12950_v46 }
0x129f   : > { %7477 = vmatmul.msk.f32.gmra.mxu0 %vm533_vm1, %v12693_v48 }
0x12a7   : > { %7478 = vmatmul.msk.f32.gmra.mxu0 %vm533_vm1, %v12701_v61 }
0x12af   : > { %7498 = vmatmul.msk.f32.vlgmr.msra.gmra.mxu0 %vm533_vm1, %v12709_v0  ;;  %v5233_v0 = vpop.f32.mrf.mxu2 }
0x12b0   : > { %5595 = vmatpush.msra.mxu0 %v12840_v39 }
0x12b2   : > { %5596 = vmatpush.msra.mxu0 %v12846_v38 }
0x12b4   : > { %5597 = vmatpush.msra.mxu0 %v12852_v10 }
0x12b6   : > { %5598 = vmatpush.msra.mxu0 %v12858_v50 }
0x12b7   : > { %7499 = vmatmul.msk.f32.gmra.mxu0 %vm533_vm1, %v12729_v44  ;;  %v5169_v44 = vpop.f32.mrf.mxu3  ;;  %v5236_v48 = vpop.f32.mrf.mxu2 }
0x12b8   : > { %5599 = vmatpush.msra.mxu0 %v12866_v9  ;;  %v5170_v9 = vadd.f32 %v5169_v44, %v5108_v27  ;;  %v12904_v27 = vld [vmem:[%s13781_s7 + $0xb0] sm:$0xff] }
0x12b9   : > { %14691 = vst [vmem:[#allocation94_spill] sm:$0xff] %v12904_v27 }
0x12ba   : > { %5600 = vmatpush.msra.mxu0 %v12872_v15  ;;  %v5267_v10 = vadd.f32 %v5233_v0, %v5170_v9  ;;  %v12938_v0 = vld [vmem:[%s13781_s7 + $0x88] sm:$0xff] }
0x12bb   : > { %14697 = vst [vmem:[#allocation79_spill] sm:$0xff] %v12938_v0 }
0x12bc   : > { %5601 = vmatpush.msra.mxu0 %v12878_v24 }
0x12be   : > { %5602 = vmatpush.msra.mxu0 %v12884_v2 }
0x12bf   : > { %7500 = vmatmul.msk.f32.gmra.mxu0 %vm533_vm1, %v7481_v16  ;;  %v5172_v61 = vpop.f32.mrf.mxu3  ;;  %v5364_v15 = vpop.f32.mrf.mxu2 }
0x12c0   : > { %5603 = vmatpush.msra.mxu0 %v12891_v42  ;;  %v12898_v42 = vld [vmem:[%s13781_s7 + $0xb8] sm:$0xff]  ;;  %v5173_v30 = vadd.f32 %v5172_v61, %v5111_v35 }
0x12c7   : > { %v5303_v24 = vpop.f32.mrf.mxu3  ;;  %v5367_v31 = vpop.f32.mrf.mxu2 }
0x12c8   : > { %v5365_v2 = vadd.f32 %v5364_v15, %v5303_v24  ;;  %v12923_v24 = vld [vmem:[%s13781_s7 + $0x98] sm:$0xff] }
0x12c9   : > { %14694 = vst [vmem:[#allocation98_spill] sm:$0xff] %v12923_v24 }
0x12ca   : > { %v5399_v16 = vadd.f32 %v5365_v2, %v5265_v37 }
0x12cc   : > { %v5405_v50 = vadd.f32 %v5399_v16, %v14254_v14  ;;  %v12958_v16 = vld [vmem:[%s13781_s7 + $0x70] sm:$0xff] }
0x12cd   : > { %14701 = vst [vmem:[#allocation81_spill] sm:$0xff] %v12958_v16 }
0x12ce   : > { %v5411_v38 = vmax.f32 %v5405_v50, 0.0 }
0x12cf   : > { %v5306_v39 = vpop.f32.mrf.mxu3 }
0x12d0   : > { %v5368_v28 = vadd.f32 %v5367_v31, %v5306_v39  ;;  %5442 = vmatmul.f32.vlgmr.msra.gmra.mxu3 %v5411_v38  ;;  %5494 = vmatmul.f32.vlgmr.msrb.gmra.mxu2 %v5411_v38  ;;  %v12911_v39 = vld [vmem:[%s13781_s7 + $0xa8] sm:$0xff]  ;;  %v5269_v38 = vadd.f32 %v5236_v48, %v5173_v30  ;;  %v12944_v48 = vld [vmem:[%s13781_s7 + $0x80] sm:$0xff] }
0x12d1   : > { %5736 = vmatpush.msrb.mxu2 %v12898_v42  ;;  %14692 = vst [vmem:[#allocation95_spill] sm:$0xff] %v12911_v39  ;;  %v12964_v30 = vld [vmem:[%s13781_s7 + $0x68] sm:$0xff] }
0x12d2   : > { %v5401_v15 = vadd.f32 %v5368_v28, %v5267_v10  ;;  %v5370_v28 = vpop.f32.mrf.mxu2  ;;  %v12917_v10 = vld [vmem:[%s13781_s7 + $0xa0] sm:$0xff]  ;;  %14698 = vst [vmem:[#allocation59_spill] sm:$0xff] %v12944_v48 }
0x12d3   : > { %5737 = vmatpush.msrb.mxu2 %v12904_v27  ;;  %14693 = vst [vmem:[#allocation97_spill] sm:$0xff] %v12917_v10 }
0x12d4   : > { %v5407_v31 = vadd.f32 %v5401_v15, %v14254_v14  ;;  %14702 = vst [vmem:[#allocation64_spill] sm:$0xff] %v12964_v30  ;;  %v12970_v15 = vld [vmem:[%s13781_s7 + $0x60] sm:$0xff] }
0x12d5   : > { %5738 = vmatpush.msrb.mxu2 %v12911_v39  ;;  %14703 = vst [vmem:[#allocation77_spill] sm:$0xff] %v12970_v15 }
0x12d6   : > { %v5413_v50 = vmax.f32 %v5407_v31, 0.0 }
0x12d7   : > { %v5309_v35 = vpop.f32.mrf.mxu3  ;;  %5739 = vmatpush.msrb.mxu2 %v12917_v10 }
0x12d8   : > { %v5371_v9 = vadd.f32 %v5370_v28, %v5309_v35  ;;  %5445 = vmatmul.f32.gmra.mxu3 %v5413_v50  ;;  %5497 = vmatmul.f32.gmra.mxu2 %v5413_v50  ;;  %v5192_v50 = vpop.f32.mrf.mxu1 }
0x12d9   : > { %5740 = vmatpush.msrb.mxu2 %v12923_v24 }
0x12da   : > { %v5403_v13 = vadd.f32 %v5371_v9, %v5269_v38 }
0x12db   : > { %5741 = vmatpush.msrb.mxu2 %v12931_v45 }
0x12dc   : > { %v5409_v44 = vadd.f32 %v5403_v13, %v14254_v14 }
0x12dd   : > { %5742 = vmatpush.msrb.mxu2 %v12938_v0 }
0x12de   : > { %v5415_v61 = vmax.f32 %v5409_v44, 0.0 }
0x12df   : > { %5743 = vmatpush.msrb.mxu2 %v12944_v48 }
0x12e0   : > { %5448 = vmatmul.f32.gmra.mxu3 %v5415_v61  ;;  %5500 = vmatmul.f32.gmra.mxu2 %v5415_v61  ;;  %v5195_v28 = vpop.f32.mrf.mxu1 }
0x12e1   : > { %5744 = vmatpush.msrb.mxu2 %v12950_v46 }
0x12e3   : > { %5745 = vmatpush.msrb.mxu2 %v12958_v16 }
0x12e5   : > { %5746 = vmatpush.msrb.mxu2 %v12964_v30 }
0x12e7   : > { %5747 = vmatpush.msrb.mxu2 %v12970_v15 }
0x12e8   : > { %v5198_v44 = vpop.f32.mrf.mxu1 }
0x12ec   : > { %v12926_v2 = vpop.f32.mrf.mxu0 }
0x12ed   : > { %14695 = vst [vmem:[#allocation99_spill] sm:$0xff] %v12926_v2 }
0x12f0   : > { %v5329_v2 = vpop.f32.mrf.mxu1 }
0x12f4   : > { %v12953_v37 = vpop.f32.mrf.mxu0 }
0x12f5   : > { %14700 = vst [vmem:[#allocation61_spill] sm:$0xff] %v12953_v37 }
0x12f8   : > { %v5332_v0 = vpop.f32.mrf.mxu1 }
0x12fc   : > { %v5131_v31 = vpop.f32.mrf.mxu0 }
0x12fd   : > { %v5193_v37 = vadd.f32 %v5192_v50, %v5131_v31  ;;  %v12979_v31 = vld [vmem:[%s13777_s3 + $0x88] sm:$0xff] }
0x12fe   : > { %14704 = vst [vmem:[#allocation67_spill] sm:$0xff] %v12979_v31 }
0x1304   : > { %v5134_v38 = vpop.f32.mrf.mxu0 }
0x1305   : > { %v5196_v24 = vadd.f32 %v5195_v28, %v5134_v38  ;;  %v13012_v38 = vld [vmem:[%s13777_s3 + $0x60] sm:$0xff] }
0x1306   : > { %14709 = vst [vmem:[#allocation73_spill] sm:$0xff] %v13012_v38 }
0x130c   : > { %v5137_v35 = vpop.f32.mrf.mxu0 }
0x1314   : > { %v5256_v9 = vpop.f32.mrf.mxu0 }
0x1315   : > { %v5266_v30 = vadd.f32 %v5256_v9, %v5193_v37  ;;  %v13025_v9 = vld [vmem:[%s13777_s3 + $0x50] sm:$0xff] }
0x1316   : > { %14711 = vst [vmem:[#allocation85_spill] sm:$0xff] %v13025_v9 }
0x131c   : > { %v5259_v13 = vpop.f32.mrf.mxu0 }
0x131d   : > { %v5268_v39 = vadd.f32 %v5259_v13, %v5196_v24  ;;  %v5335_v24 = vpop.f32.mrf.mxu1  ;;  %v13033_v13 = vld [vmem:[%s13777_s3 + $0x48] sm:$0xff] }
0x131e   : > { %14712 = vst [vmem:[#allocation74_spill] sm:$0xff] %v13033_v13 }
0x1324   : > { %v5262_v61 = vpop.f32.mrf.mxu0 }
0x132c   : > { %v5390_v16 = vpop.f32.mrf.mxu0 }
0x132d   : > { %v5391_v46 = vadd.f32 %v5390_v16, %v5329_v2 }
0x132f   : > { %v5400_v48 = vadd.f32 %v5391_v46, %v5266_v30  ;;  %v13006_v30 = vld [vmem:[%s13777_s3 + $0x68] sm:$0xff] }
0x1330   : > { %14708 = vst [vmem:[#allocation72_spill] sm:$0xff] %v13006_v30 }
0x1331   : > { %v5406_v45 = vadd.f32 %v5400_v48, %v14255_v17  ;;  %v12985_v48 = vld [vmem:[%s13777_s3 + $0x80] sm:$0xff] }
0x1332   : > { %14705 = vst [vmem:[#allocation71_spill] sm:$0xff] %v12985_v48 }
0x1333   : > { %v5412_v15 = vmax.f32 %v5406_v45, 0.0  ;;  %v12992_v45 = vld [vmem:[%s13777_s3 + $0x78] sm:$0xff] }
0x1334   : > { %v5393_v10 = vpop.f32.mrf.mxu0  ;;  %14706 = vst [vmem:[#allocation70_spill] sm:$0xff] %v12992_v45 }
0x1335   : > { %v5394_v27 = vadd.f32 %v5393_v10, %v5332_v0  ;;  %7501 = vmatmul.msk.f32.vlgmr.msra.gmra.mxu1 %vm954_vm2, %v5412_v15  ;;  %7504 = vmatmul.msk.f32.vlgmr.msrb.gmra.mxu0 %vm954_vm2, %v5412_v15  ;;  %v5199_v0 = vadd.f32 %v5198_v44, %v5137_v35  ;;  %v13019_v35 = vld [vmem:[%s13777_s3 + $0x58] sm:$0xff] }
0x1336   : > { %5693 = vmatpush.msrb.mxu0 %v12979_v31  ;;  %14710 = vst [vmem:[#allocation78_spill] sm:$0xff] %v13019_v35  ;;  %v13039_v31 = vld [vmem:[%s13780_s6 + $0x10] sm:$0xff] }
0x1337   : > { %v5402_v2 = vadd.f32 %v5394_v27, %v5268_v39  ;;  %v12998_v39 = vld [vmem:[%s13777_s3 + $0x70] sm:$0xff]  ;;  %v5270_v37 = vadd.f32 %v5262_v61, %v5199_v0 }
0x1338   : > { %5694 = vmatpush.msrb.mxu0 %v12985_v48  ;;  %14707 = vst [vmem:[#allocation83_spill] sm:$0xff] %v12998_v39 }
0x1339   : > { %v5408_v10 = vadd.f32 %v5402_v2, %v14255_v17 }
0x133a   : > { %5695 = vmatpush.msrb.mxu0 %v12992_v45 }
0x133b   : > { %v5414_v46 = vmax.f32 %v5408_v10, 0.0 }
0x133c   : > { %v5396_v27 = vpop.f32.mrf.mxu0  ;;  %5696 = vmatpush.msrb.mxu0 %v12998_v39 }
0x133d   : > { %v5397_v16 = vadd.f32 %v5396_v27, %v5335_v24  ;;  %7502 = vmatmul.msk.f32.gmra.mxu1 %vm954_vm2, %v5414_v46  ;;  %7505 = vmatmul.msk.f32.gmra.mxu0 %vm954_vm2, %v5414_v46 }
0x133e   : > { %5697 = vmatpush.msrb.mxu0 %v13006_v30 }
0x133f   : > { %v5404_v15 = vadd.f32 %v5397_v16, %v5270_v37 }
0x1340   : > { %5698 = vmatpush.msrb.mxu0 %v13012_v38 }
0x1341   : > { %v5410_v50 = vadd.f32 %v5404_v15, %v14255_v17 }
0x1342   : > { %5699 = vmatpush.msrb.mxu0 %v13019_v35 }
0x1343   : > { %v5416_v28 = vmax.f32 %v5410_v50, 0.0 }
0x1344   : > { %5700 = vmatpush.msrb.mxu0 %v13025_v9 }
0x1345   : > { %7503 = vmatmul.msk.f32.gmra.mxu1 %vm954_vm2, %v5416_v28  ;;  %7506 = vmatmul.msk.f32.gmra.mxu0 %vm954_vm2, %v5416_v28 }
0x1346   : > { %5701 = vmatpush.msrb.mxu0 %v13033_v13 }
0x1353   : > { %v5443_v44 = vpop.f32.mrf.mxu3  ;;  %v5495_v61 = vpop.f32.mrf.mxu2 }
0x135b   : > { %v5446_v24 = vpop.f32.mrf.mxu3  ;;  %v5498_v0 = vpop.f32.mrf.mxu2 }
0x1363   : > { %v5449_v37 = vpop.f32.mrf.mxu3  ;;  %v5501_v16 = vpop.f32.mrf.mxu2 }
0x13b2   : > { %v5469_v2 = vpop.f32.mrf.mxu1  ;;  %v5521_v10 = vpop.f32.mrf.mxu0 }
0x13b3   : > { %v5470_v30 = vadd.f32 %v5469_v2, %v5443_v44  ;;  %v5522_v39 = vadd.f32 %v5521_v10, %v5495_v61  ;;  %v13095_v44 = vld [vmem:[%s13777_s3 + $0x100] sm:$0xff]  ;;  %v13101_v61 = vld [vmem:[%s13780_s6 + $0x18] sm:$0xf]  ;;  %v13108_v2 = vld [vmem:[%s13780_s6 + $0x8] sm:$0xf] }
0x13b4   : > { %14713 = vst [vmem:[#allocation80_spill] sm:$0xff] %v13101_v61  ;;  %v13115_v10 = vld [vmem:[%s13777_s3 + $0x20] sm:$0xff] }
0x13b5   : > { %v5530_v48 = vmax.f32 %v5470_v30, %v5522_v39  ;;  %v13065_v39 = vld [vmem:[%s13777_s3 + $0x38] sm:$0xff]  ;;  %v13071_v30 = vld [vmem:[%s13777_s3 + $0x110] sm:$0xff]  ;;  %14714 = vst [vmem:[#allocation90_spill] sm:$0xff] %v13108_v2 }
0x13b6   : > { %14715 = vst [vmem:[#allocation87_spill] sm:$0xff] %v13115_v10 }
0x13ba   : > { %v5472_v46 = vpop.f32.mrf.mxu1  ;;  %v5524_v27 = vpop.f32.mrf.mxu0 }
0x13bb   : > { %v5473_v28 = vadd.f32 %v5472_v46, %v5446_v24  ;;  %v5525_v9 = vadd.f32 %v5524_v27, %v5498_v0  ;;  %v13121_v24 = vld [vmem:[%s13777_s3 + $0xf8] sm:$0xff]  ;;  %v13133_v46 = vld [vmem:[%s13777_s3 + $0xf0] sm:$0xff] }
0x13bc   : > { %14716 = vst [vmem:[#allocation91_spill] sm:$0xff] %v13121_v24  ;;  %v13127_v0 = vld [vmem:[%s13777_s3 + $0x18] sm:$0xff]  ;;  %v13139_v27 = vld [vmem:[%s13777_s3 + $0x10] sm:$0xff] }
0x13bd   : > { %v5531_v13 = vmax.f32 %v5473_v28, %v5525_v9  ;;  %v13083_v9 = vld [vmem:[%s13777_s3 + $0x108] sm:$0xff]  ;;  %14717 = vst [vmem:[#allocation48_spill] sm:$0xff] %v13127_v0  ;;  %v13169_v28 = vld [vmem:[%s13777_s3 + $0xd8] sm:$0xff] }
0x13be   : > { %14718 = vst [vmem:[#allocation56_spill] sm:$0xff] %v13133_v46 }
0x13bf   : > { %14719 = vst [vmem:[#allocation49_spill] sm:$0xff] %v13139_v27 }
0x13c0   : > { %14724 = vst [vmem:[#allocation60_spill] sm:$0xff] %v13169_v28 }
0x13c2   : > { %v5475_v15 = vpop.f32.mrf.mxu1  ;;  %v5527_v50 = vpop.f32.mrf.mxu0 }
0x13c3   : > { %v5476_v35 = vadd.f32 %v5475_v15, %v5449_v37  ;;  %v5528_v38 = vadd.f32 %v5527_v50, %v5501_v16  ;;  %v13145_v37 = vld [vmem:[%s13777_s3 + $0xe8] sm:$0xff]  ;;  %v13157_v15 = vld [vmem:[%s13777_s3 + $0xe0] sm:$0xff] }
0x13c4   : > { %14720 = vst [vmem:[#allocation50_spill] sm:$0xff] %v13145_v37  ;;  %v13151_v16 = vld [vmem:[%s13777_s3 + $0x8] sm:$0xff]  ;;  %v13163_v50 = vld [vmem:[%s13777_s3] sm:$0xff] }
0x13c5   : > { %v5532_v45 = vmax.f32 %v5476_v35, %v5528_v38  ;;  %v13046_v38 = vld [vmem:[%s13780_s6] sm:$0xff]  ;;  %v13077_v35 = vld [vmem:[%s13777_s3 + $0x30] sm:$0xff]  ;;  %14721 = vst [vmem:[#allocation51_spill] sm:$0xff] %v13151_v16 }
0x13c6   : > { %14722 = vst [vmem:[#allocation58_spill] sm:$0xff] %v13157_v15 }
0x13c7   : > { %5546 = vmatpush.msrb.mxu1 %v5532_v45  ;;  %5569 = vmatpush.msrb.mxu3 %v5532_v45  ;;  %v13059_v45 = vld [vmem:[%s13777_s3 + $0x118] sm:$0xff]  ;;  %14723 = vst [vmem:[#allocation52_spill] sm:$0xff] %v13163_v50 }
0x13c9   : > { %5547 = vmatpush.msrb.mxu1 %v5531_v13  ;;  %5570 = vmatpush.msrb.mxu3 %v5531_v13  ;;  %v13089_v13 = vld [vmem:[%s13777_s3 + $0x28] sm:$0xff] }
0x13cb   : > { %5548 = vmatpush.msrb.mxu1 %v5530_v48  ;;  %5571 = vmatpush.msrb.mxu3 %v5530_v48  ;;  %v13053_v48 = vld [vmem:[%s13777_s3 + $0x40] sm:$0xff] }
0x13cc   : > { %7509 = vmatmul.msk.f32.vlgmr.msrb.gmra.mxu3 %vm1092_vm3, %v13039_v31  ;;  %7507 = vmatmul.msk.f32.vlgmr.msrb.gmra.mxu1 %vm1092_vm3, %v13046_v38 }
0x13cd   : > { %5617 = vmatpush.msra.mxu1 %v13053_v48  ;;  %5668 = vmatpush.msra.mxu3 %v13059_v45 }
0x13cf   : > { %5618 = vmatpush.msra.mxu1 %v13065_v39  ;;  %5669 = vmatpush.msra.mxu3 %v13071_v30 }
0x13d1   : > { %5619 = vmatpush.msra.mxu1 %v13077_v35  ;;  %5670 = vmatpush.msra.mxu3 %v13083_v9 }
0x13d3   : > { %5620 = vmatpush.msra.mxu1 %v13089_v13  ;;  %5671 = vmatpush.msra.mxu3 %v13095_v44 }
0x13d4   : > { %7510 = vmatmul.msk.f32.gmra.mxu3 %vm1092_vm3, %v13101_v61  ;;  %7508 = vmatmul.msk.f32.gmra.mxu1 %vm1092_vm3, %v13108_v2 }
0x13d5   : > { %5621 = vmatpush.msra.mxu1 %v13115_v10  ;;  %5672 = vmatpush.msra.mxu3 %v13121_v24 }
0x13d7   : > { %5622 = vmatpush.msra.mxu1 %v13127_v0  ;;  %5673 = vmatpush.msra.mxu3 %v13133_v46 }
0x13d9   : > { %5623 = vmatpush.msra.mxu1 %v13139_v27  ;;  %5674 = vmatpush.msra.mxu3 %v13145_v37 }
0x13db   : > { %5624 = vmatpush.msra.mxu1 %v13151_v16  ;;  %5675 = vmatpush.msra.mxu3 %v13157_v15  ;;  %v13175_v16 = vld [vmem:[%s13781_s7 + $0x58] sm:$0xff]  ;;  %v13181_v15 = vld [vmem:[%s13781_s7 + $0x50] sm:$0xff] }
0x13dc   : > { %14725 = vst [vmem:[#allocation53_spill] sm:$0xff] %v13175_v16 }
0x13dd   : > { %5625 = vmatpush.msra.mxu1 %v13163_v50  ;;  %5676 = vmatpush.msra.mxu3 %v13169_v28  ;;  %14726 = vst [vmem:[#allocation63_spill] sm:$0xff] %v13181_v15  ;;  %v13187_v50 = vld [vmem:[%s13781_s7 + $0x48] sm:$0xff]  ;;  %v13193_v28 = vld [vmem:[%s13781_s7 + $0x40] sm:$0xff] }
0x13de   : > { %14727 = vst [vmem:[#allocation55_spill] sm:$0xff] %v13187_v50 }
0x13df   : > { %5716 = vmatpush.msrb.mxu1 %v13175_v16  ;;  %14728 = vst [vmem:[#allocation66_spill] sm:$0xff] %v13193_v28  ;;  %v13199_v16 = vld [vmem:[%s13781_s7 + $0x38] sm:$0xff] }
0x13e0   : > { %14729 = vst [vmem:[#allocation100_spill] sm:$0xff] %v13199_v16 }
0x13e1   : > { %5717 = vmatpush.msrb.mxu1 %v13181_v15  ;;  %v13205_v15 = vld [vmem:[%s13781_s7 + $0x30] sm:$0xff] }
0x13e2   : > { %14730 = vst [vmem:[#allocation101_spill] sm:$0xff] %v13205_v15 }
0x13e3   : > { %5718 = vmatpush.msrb.mxu1 %v13187_v50  ;;  %v13211_v50 = vld [vmem:[%s13781_s7 + $0x28] sm:$0xff] }
0x13e4   : > { %14731 = vst [vmem:[#allocation102_spill] sm:$0xff] %v13211_v50 }
0x13e5   : > { %5719 = vmatpush.msrb.mxu1 %v13193_v28  ;;  %v13217_v28 = vld [vmem:[%s13781_s7 + $0x20] sm:$0xff] }
0x13e6   : > { %14732 = vst [vmem:[#allocation103_spill] sm:$0xff] %v13217_v28 }
0x13e7   : > { %5720 = vmatpush.msrb.mxu1 %v13199_v16  ;;  %v13223_v16 = vld [vmem:[%s13781_s7 + $0x18] sm:$0xff] }
0x13e8   : > { %14733 = vst [vmem:[#allocation104_spill] sm:$0xff] %v13223_v16 }
0x13e9   : > { %5721 = vmatpush.msrb.mxu1 %v13205_v15  ;;  %v13229_v15 = vld [vmem:[%s13781_s7 + $0x10] sm:$0xff] }
0x13ea   : > { %14734 = vst [vmem:[#allocation105_spill] sm:$0xff] %v13229_v15 }
0x13eb   : > { %5722 = vmatpush.msrb.mxu1 %v13211_v50  ;;  %v13235_v50 = vld [vmem:[%s13781_s7 + $0x8] sm:$0xff] }
0x13ec   : > { %14735 = vst [vmem:[#allocation106_spill] sm:$0xff] %v13235_v50 }
0x13ed   : > { %5723 = vmatpush.msrb.mxu1 %v13217_v28  ;;  %v13241_v28 = vld [vmem:[%s13781_s7] sm:$0xff] }
0x13ee   : > { %14736 = vst [vmem:[#allocation107_spill] sm:$0xff] %v13241_v28 }
0x13ef   : > { %5724 = vmatpush.msrb.mxu1 %v13223_v16 }
0x13f1   : > { %5725 = vmatpush.msrb.mxu1 %v13229_v15 }
0x13f3   : > { %5726 = vmatpush.msrb.mxu1 %v13235_v50 }
0x13f5   : > { %5727 = vmatpush.msrb.mxu1 %v13241_v28 }
0x1449   : > { %v5550_v16 = vpop.f32.mrf.mxu1 }
0x144f   : > { %v5573_v37 = vpop.f32.mrf.mxu3 }
0x1450   : > { %v5579_v27 = vmax.f32 %v5550_v16, %v5573_v37 }
0x1451   : > { %v5553_v15 = vpop.f32.mrf.mxu1 }
0x1452   : > { %7512 = vmatmul.msk.f32.vlgmr.msra.gmra.mxu1 %vm1181_vm4, %v5579_v27  ;;  %v5583_v0 = vrot.slane %v5579_v27, 2  ;;  %v5630_v24 = vrot.slane %v5579_v27, 4  ;;  %v5656_v37 = vrot.slane %v5579_v27, 3 }
0x1453   : > { %7534 = vmatpush.msk.msra.mxu1 %vm543_vm0, %v12301_v60 }
0x1455   : > { %5884 = vmatpush.msra.mxu1 %v12308_v40  ;;  %v8138_v40 = vld [vmem:[%s14139_s1 + $0xb0] sm:$0xf] }
0x1457   : > { %v5576_v46 = vpop.f32.mrf.mxu3  ;;  %5885 = vmatpush.msra.mxu1 %v12314_v6 }
0x1458   : > { %v5580_v50 = vmax.f32 %v5553_v15, %v5576_v46 }
0x1459   : > { %5886 = vmatpush.msra.mxu1 %v12320_v22  ;;  %v8139_v22 = vld [vmem:[%s14139_s1 + $0xa0] sm:$0xff] }
0x145a   : > { %v5584_v28 = vrot.slane %v5580_v50, 2  ;;  %v5631_v10 = vrot.slane %v5580_v50, 4  ;;  %v5657_v61 = vrot.slane %v5580_v50, 3  ;;  %v5682_v6 = vrot.slane %v5580_v50, 1 }
0x145c   : > { %v5585_v16 = vsel %vm1177_vm5, %v5583_v0, %v5584_v28  ;;  %v5632_v2 = vsel %vm543_vm0, %v5630_v24, %v5631_v10  ;;  %v5658_v60 = vsel %vm1282_vm6, %v5656_v37, %v5657_v61  ;;  %v5681_v61 = vrot.slane %v5579_v27, 1  ;;  %v14748_v27 = vld [vmem:[#allocation19_spill] sm:$0xff]  ;;  %v13370_v28 = vld [vmem:[%s8420_s17 + $0xe1] sm:$0xff] }
0x145d   : > { %7511 = vmatmul.msk.f32.vlgmr.msra.gmra.mxu0 %vm1181_vm4, %v5585_v16  ;;  %7513 = vmatmul.msk.f32.vlgmr.msra.gmra.mxu2 %vm1181_vm4, %v5632_v2  ;;  %v8140_v2 = vld [vmem:[%s14139_s1 + $0x90] sm:$0xff] }
0x145e   : > { %7514 = vmatmul.msk.f32.vlgmr.msra.gmra.mxu3 %vm1181_vm4, %v5658_v60  ;;  %7526 = vmatpush.msk.msra.mxu0 %vm543_vm0, %v8138_v40  ;;  %v5683_v10 = vsel %vm1308_vm7, %v5681_v61, %v5682_v6  ;;  %v14749_v16 = vld [vmem:[#allocation23_spill] sm:$0xff]  ;;  %v13379_v40 = vld [vmem:[%s13782_s8] sm:$0xf] }
0x145f   : > { %7538 = vmatpush.msk.msra.mxu2 %vm543_vm0, %v12334_v58  ;;  %v8141_v58 = vld [vmem:[%s14139_s1 + $0x80] sm:$0xff]  ;;  %v14750_v60 = vld [vmem:[#allocation15_spill] sm:$0xff] }
0x1460   : > { %5823 = vmatpush.msra.mxu0 %v8139_v22  ;;  %v7557_v6 = vld [vmem:[%s8420_s17 + $0xeb] sm:$0xff]  ;;  %v14752_v61 = vld [vmem:[#allocation37_spill] sm:$0xff] }
0x1461   : > { %5910 = vmatpush.msra.mxu2 %v12342_v5  ;;  %v13282_v5 = vld [vmem:[%s8420_s17 + $0xe2] sm:$0xff] }
0x1462   : > { %5824 = vmatpush.msra.mxu0 %v8140_v2  ;;  %v14751_v22 = vld [vmem:[#allocation14_spill] sm:$0xff]  ;;  %v8144_v2 = vld [vmem:[%s14139_s1 + $0xb8] sm:$0xf] }
0x1463   : > { %5911 = vmatpush.msra.mxu2 %v12349_v49 }
0x1464   : > { %5825 = vmatpush.msra.mxu0 %v8141_v58  ;;  %v8145_v58 = vld [vmem:[%s14139_s1 + $0xa8] sm:$0xff] }
0x1465   : > { %7515 = vmatmul.msk.f32.vlgmr.msrb.gmra.mxu0 %vm1181_vm4, %v5683_v10  ;;  %5912 = vmatpush.msra.mxu2 %v12358_v56  ;;  %v14753_v10 = vld [vmem:[#allocation25_spill] sm:$0xff] }
0x1466   : > { %7545 = vmatpush.msk.msrb.mxu0 %vm543_vm0, %v12364_v34 }
0x1468   : > { %5948 = vmatpush.msrb.mxu0 %v12371_v53 }
0x146a   : > { %5949 = vmatpush.msrb.mxu0 %v12377_v18 }
0x146c   : > { %5950 = vmatpush.msrb.mxu0 %v12383_v32 }
0x146d   : > { %7527 = vmatmul.msk.f32.vlgmr.msra.gmra.mxu0 %vm533_vm1, %v13282_v5 }
0x146e   : > { %7567 = vmatpush.msk.msra.mxu0 %vm543_vm0, %v12394_v33  ;;  %v13294_v33 = vld [vmem:[%s13778_s4] ss:$0 sm:$0xff] }
0x1470   : > { %6082 = vmatpush.msra.mxu0 %v12401_v3 }
0x1472   : > { %6083 = vmatpush.msra.mxu0 %v12410_v55 }
0x1474   : > { %6084 = vmatpush.msra.mxu0 %v12416_v21  ;;  %v13310_v21 = vld [vmem:[%s8420_s17 + $0xea] sm:$0xff] }
0x1475   : > { %7528 = vmatmul.msk.f32.gmra.mxu0 %vm533_vm1, %v13310_v21 }
0x14cf   : > { %v5627_v56 = vpop.f32.mrf.mxu1 }
0x14da   : > { %v5605_v49 = vpop.f32.mrf.mxu0 }
0x14db   : > { %v5628_v53 = vadd.f32 %v5627_v56, %v5605_v49  ;;  %v7554_v49 = vld [vmem:[%s8420_s17 + $0xe9] sm:$0xff] }
0x14dc   : > { %v14754_v56 = vld [vmem:[#allocation62_spill] sm:$0xff] }
0x14e0   : > { %v5652_v34 = vpop.f32.mrf.mxu2 }
0x14e1   : > { %v5678_v18 = vpop.f32.mrf.mxu3  ;;  %v5655_v24 = vadd.f32 %v5652_v34, %v5628_v53  ;;  %v14755_v34 = vld [vmem:[#allocation26_spill] sm:$0xff]  ;;  %v8146_v53 = vld [vmem:[%s14139_s1 + $0x98] sm:$0xff] }
0x14e2   : > { %v5703_v32 = vpop.f32.mrf.mxu0 }
0x14e3   : > { %v5704_v0 = vadd.f32 %v5703_v32, %v5678_v18  ;;  %v13406_v18 = vld [vmem:[%s13782_s8 + $0x4] sm:$0xf]  ;;  %v7558_v32 = vld [vmem:[%s8420_s17 + $0xf3] sm:$0xff] }
0x14e5   : > { %v5706_v46 = vadd.f32 %v5704_v0, %v5655_v24  ;;  %v14756_v24 = vld [vmem:[#allocation28_spill] sm:$0xff]  ;;  %v8148_v0 = vld [vmem:[%s14139_s1 + $0x88] sm:$0xff] }
0x14e7   : > { %v5707_v3 = vadd.f32 %v13294_v33, %v5706_v46  ;;  %v8149_v46 = vld [vmem:[%s14139_s1 + $0x138] sm:$0xf] }
0x14e9   : > { %v5708_v55 = vmax.f32 %v5707_v3, 0.0  ;;  %v14757_v3 = vld [vmem:[#allocation16_spill] sm:$0xff] }
0x14eb   : > { %7516 = vmatmul.msk.f32.vlgmr.msrb.gmra.mxu1 %vm1353_vm8, %v5708_v55  ;;  %7517 = vmatmul.msk.f32.vlgmr.msrb.gmra.mxu2 %vm1353_vm8, %v5708_v55  ;;  %v8150_v55 = vld [vmem:[%s14139_s1 + $0x128] sm:$0xff] }
0x14ec   : > { %7559 = vmatpush.msk.msrb.mxu1 %vm543_vm0, %v12455_v12  ;;  %7563 = vmatpush.msk.msrb.mxu2 %vm543_vm0, %v12462_v51  ;;  %v13315_v12 = vld [vmem:[%s8420_s17 + $0xf2] sm:$0xff]  ;;  %v7520_v51 = vld [vmem:[%s8420_s17 + $0xe0] sm:$0xff] }
0x14ed   : > { %7529 = vmatmul.msk.f32.gmra.mxu0 %vm533_vm1, %v13315_v12 }
0x14ee   : > { %6021 = vmatpush.msrb.mxu1 %v12475_v4  ;;  %6047 = vmatpush.msrb.mxu2 %v12481_v8  ;;  %v13325_v4 = vld [vmem:[%s8420_s17 + $0xe4] sm:$0xff] }
0x14ef   : > { %v7521_v8 = vld [vmem:[%s8420_s17 + $0xe8] sm:$0xff] }
0x14f0   : > { %6022 = vmatpush.msrb.mxu1 %v12494_v26  ;;  %6048 = vmatpush.msrb.mxu2 %v12500_v43  ;;  %v13340_v26 = vld [vmem:[%s8420_s17 + $0xec] sm:$0xff] }
0x14f1   : > { %v7522_v43 = vld [vmem:[%s8420_s17 + $0xf0] sm:$0xff] }
0x14f2   : > { %6023 = vmatpush.msrb.mxu1 %v12512_v23  ;;  %6049 = vmatpush.msrb.mxu2 %v12518_v29  ;;  %v14738_v23 = vld [vmem:[#allocation31_spill] sm:$0xff] }
0x14f3   : > { %7535 = vmatmul.msk.f32.vlgmr.msra.gmra.mxu1 %vm533_vm1, %v7520_v51  ;;  %7539 = vmatmul.msk.f32.vlgmr.msra.gmra.mxu2 %vm533_vm1, %v7520_v51  ;;  %v14739_v29 = vld [vmem:[#allocation27_spill] sm:$0xff] }
0x14f4   : > { %6148 = vmatpush.msra.mxu1 %v12526_v54  ;;  %6188 = vmatpush.msra.mxu2 %v12538_v47  ;;  %v13355_v54 = vld [vmem:[%s8420_s17 + $0xf4] sm:$0xff] }
0x14f5   : > { %7546 = vmatmul.msk.f32.vlgmr.msrb.gmra.mxu0 %vm533_vm1, %v13325_v4  ;;  %v14742_v47 = vld [vmem:[#allocation32_spill] sm:$0xff] }
0x14f6   : > { %6149 = vmatpush.msra.mxu1 %v12544_v57  ;;  %6189 = vmatpush.msra.mxu2 %v12556_v1  ;;  %v14743_v57 = vld [vmem:[#allocation35_spill] sm:$0xff]  ;;  %v14744_v1 = vld [vmem:[#allocation18_spill] sm:$0xff] }
0x14f7   : > { %6200 = vmatpush.msrb.mxu0 %v12434_v41  ;;  %v14737_v41 = vld [vmem:[#allocation24_spill] sm:$0xff] }
0x14f8   : > { %6150 = vmatpush.msra.mxu1 %v12562_v62  ;;  %v7556_v62 = vld [vmem:[%s8420_s17 + $0xe3] sm:$0xff]  ;;  %v7555_v51 = vld [vmem:[%s8420_s17 + $0xf1] sm:$0xff]  ;;  %s7617_s17 = sshll.u32 %s8357_s22, 3 }
0x14f9   : > { %6201 = vmatpush.msrb.mxu0 %v12441_v11  ;;  %v14740_v11 = vld [vmem:[#allocation12_spill] sm:$0xff]  ;;  %s6831_s27 = scalar_lea.hbm %s13789_s15, %s7617_s17 }
0x14fa   : > { %6151 = vmatpush.msra.mxu1 %v12574_v19  ;;  %v14745_v19 = vld [vmem:[#allocation22_spill] sm:$0xff]  ;;  %s6835_s13 = sshll.u32 %s6831_s27, 4  ;;  %s6836_s13 = int_to_ptr.hbm [resolvable:$true] %s6835_s13 }
0x14fb   : > { %7536 = vmatmul.msk.f32.gmra.mxu1 %vm533_vm1, %v7521_v8  ;;  %7540 = vmatmul.msk.f32.gmra.mxu2 %vm533_vm1, %v7521_v8  ;;  %v14758_v8 = vld [vmem:[#allocation29_spill] sm:$0xff]  ;;  %s8199_s2 = sshra.s32 %s6836_s13, 4  ;;  %s8200_s2 = int_to_ptr.hbm [resolvable:$true] %s8199_s2 }
0x14fc   : > { %6152 = vmatpush.msra.mxu1 %v12586_v52  ;;  %6202 = vmatpush.msrb.mxu0 %v12447_v20  ;;  %v14741_v20 = vld [vmem:[#allocation34_spill] sm:$0xff]  ;;  %v14746_v52 = vld [vmem:[#allocation13_spill] sm:$0xff]  ;;  %s8201_s22 = scalar_lea.hbm %s8200_s2, 8  ;;  %p8206_p3 = scmp.lt.s32.totalorder %s8200_s2, %s13789_s15 }
0x14fd   : > { %7547 = vmatmul.msk.f32.gmra.mxu0 %vm533_vm1, %v13340_v26  ;;  %p8202_p0 = scmp.ne.s32.totalorder %s8200_s2, %s8201_s22  ;;  %p8207_p4 = scmp.lt.s32.totalorder %s8205_s23, %s8201_s22 }
0x14fe   : > { %6153 = vmatpush.msra.mxu1 %v12598_v59  ;;  %6203 = vmatpush.msrb.mxu0 %v14738_v23  ;;  %v14747_v59 = vld [vmem:[#allocation33_spill] sm:$0xff]  ;;  %v8152_v23 = vld [vmem:[%s14139_s1 + $0x108] sm:$0xff] }
0x14ff   : > { %p8203_p1 = pnand %p8202_p0, %p8374_p5  ;;  %p8208_p7 = por %p8207_p4, %p8206_p3 }
0x1500   : > { %6154 = vmatpush.msra.mxu1 %v14737_v41  ;;  %6204 = vmatpush.msrb.mxu0 %v14740_v11  ;;  %v8151_v41 = vld [vmem:[%s14139_s1 + $0x118] sm:$0xff] }
0x1501   : > { %v8153_v11 = vld [vmem:[%s14139_s1 + $0x78] sm:$0xf]  ;;  %p8204_p2 = pneg %p8203_p1 }
0x1502   : > { %6155 = vmatpush.msra.mxu1 %v14739_v29  ;;  %6205 = vmatpush.msrb.mxu0 %v14742_v47  ;;  %v14760_v29 = vld [vmem:[#allocation65_spill] sm:$0xff]  ;;  %v14762_v47 = vld [vmem:[#allocation40_spill] sm:$0xff] }
0x1503   : > { %7537 = vmatmul.msk.f32.gmra.mxu1 %vm533_vm1, %v7522_v43  ;;  %7541 = vmatmul.msk.f32.gmra.mxu2 %vm533_vm1, %v7522_v43  ;;  %v14759_v43 = vld [vmem:[#allocation17_spill] sm:$0xff]  ;;  %p8209_p8 = pnand %p8208_p7, %p8204_p2 }
0x1504   : > { %6156 = vmatpush.msra.mxu1 %v14741_v20  ;;  %6206 = vmatpush.msrb.mxu0 %v14745_v19  ;;  %v14761_v20 = vld [vmem:[#allocation68_spill] sm:$0xff]  ;;  %v14766_v19 = vld [vmem:[#allocation89_spill] sm:$0xff] }
0x1505   : > { %7548 = vmatmul.msk.f32.gmra.mxu0 %vm533_vm1, %v13355_v54 }
0x1506   : > { %6157 = vmatpush.msra.mxu1 %v14743_v57  ;;  %6207 = vmatpush.msrb.mxu0 %v14747_v59  ;;  %v14763_v57 = vld [vmem:[#allocation39_spill] sm:$0xff]  ;;  %v14775_v59 = vld [vmem:[#allocation54_spill] sm:$0xff] }
0x1508   : > { %6158 = vmatpush.msra.mxu1 %v14744_v1  ;;  %6208 = vmatpush.msrb.mxu0 %v14749_v16  ;;  %v14764_v1 = vld [vmem:[#allocation75_spill] sm:$0xff] }
0x150a   : > { %6159 = vmatpush.msra.mxu1 %v14746_v52  ;;  %6209 = vmatpush.msrb.mxu0 %v14751_v22  ;;  %v5827_v52 = vpop.f32.mrf.mxu0 }
0x150b   : > { %7560 = vmatmul.msk.f32.vlgmr.msrb.gmra.mxu1 %vm533_vm1, %v7556_v62  ;;  %7564 = vmatmul.msk.f32.vlgmr.msrb.gmra.mxu2 %vm533_vm1, %v7556_v62  ;;  %v14765_v62 = vld [vmem:[#allocation82_spill] sm:$0xff] }
0x150c   : > { %6160 = vmatpush.msra.mxu1 %v14748_v27  ;;  %6210 = vmatpush.msrb.mxu0 %v14753_v10  ;;  %v14777_v27 = vld [vmem:[#allocation93_spill] sm:$0xff] }
0x150d   : > { %7568 = vmatmul.msk.f32.vlgmr.msra.gmra.mxu0 %vm533_vm1, %v13370_v28 }
0x150e   : > { %6161 = vmatpush.msra.mxu1 %v14750_v60  ;;  %6211 = vmatpush.msrb.mxu0 %v14755_v34 }
0x1510   : > { %6162 = vmatpush.msra.mxu1 %v14752_v61  ;;  %6212 = vmatpush.msrb.mxu0 %v14756_v24 }
0x1512   : > { %6163 = vmatpush.msra.mxu1 %v14754_v56  ;;  %6213 = vmatpush.msrb.mxu0 %v14757_v3 }
0x1513   : > { %7561 = vmatmul.msk.f32.gmra.mxu1 %vm533_vm1, %v7557_v6  ;;  %7565 = vmatmul.msk.f32.gmra.mxu2 %vm533_vm1, %v7557_v6 }
0x1514   : > { %6214 = vmatpush.msrb.mxu0 %v14758_v8 }
0x1515   : > { %7569 = vmatmul.msk.f32.gmra.mxu0 %vm533_vm1, %v7554_v49 }
0x1516   : > { %6215 = vmatpush.msrb.mxu0 %v14759_v43 }
0x1518   : > { %6364 = vmatpush.msra.mxu0 %v14760_v29 }
0x151a   : > { %6365 = vmatpush.msra.mxu0 %v14761_v20 }
0x151b   : > { %7562 = vmatmul.msk.f32.gmra.mxu1 %vm533_vm1, %v7558_v32  ;;  %7566 = vmatmul.msk.f32.gmra.mxu2 %vm533_vm1, %v7558_v32 }
0x151c   : > { %6366 = vmatpush.msra.mxu0 %v14762_v47 }
0x151d   : > { %7570 = vmatmul.msk.f32.gmra.mxu0 %vm533_vm1, %v7555_v51 }
0x151e   : > { %6367 = vmatpush.msra.mxu0 %v14763_v57 }
0x1520   : > { %6368 = vmatpush.msra.mxu0 %v14764_v1  ;;  %v14780_v1 = vld [vmem:[#allocation97_spill] sm:$0xff] }
0x1522   : > { %6369 = vmatpush.msra.mxu0 %v14765_v62 }
0x1524   : > { %6370 = vmatpush.msra.mxu0 %v14766_v19 }
0x1526   : > { %6371 = vmatpush.msra.mxu0 %v12770_v25  ;;  %v14769_v25 = vld [vmem:[#allocation43_spill] sm:$0xff] }
0x1528   : > { %6372 = vmatpush.msra.mxu0 %v12779_v63  ;;  %v14771_v63 = vld [vmem:[#allocation45_spill] sm:$0xff] }
0x1568   : > { %v5729_v15 = vpop.f32.mrf.mxu1 }
0x156e   : > { %v5749_v50 = vpop.f32.mrf.mxu2 }
0x156f   : > { %v5752_v37 = vmax.f32 %v5729_v15, %v5749_v50  ;;  %v5830_v15 = vpop.f32.mrf.mxu0 }
0x1571   : > { %5768 = vmatpush.msrb.mxu3 %v5752_v37 }
0x1572   : > { %7518 = vmatmul.msk.f32.vlgmr.msrb.gmra.mxu3 %vm1412_vm9, %v13379_v40 }
0x1573   : > { %5788 = vmatpush.msra.mxu3 %v5752_v37 }
0x1575   : > { %7530 = vmatpush.msk.msrb.mxu3 %vm543_vm0, %v8144_v2 }
0x1577   : > { %5849 = vmatpush.msrb.mxu3 %v8145_v58  ;;  %v5833_v50 = vpop.f32.mrf.mxu0 }
0x1579   : > { %5850 = vmatpush.msrb.mxu3 %v8146_v53 }
0x157a   : > { %7519 = vmatmul.msk.f32.vlgmr.msra.gmra.mxu3 %vm1412_vm9, %v13406_v18 }
0x157b   : > { %5851 = vmatpush.msrb.mxu3 %v8148_v0 }
0x157d   : > { %7549 = vmatpush.msk.msra.mxu3 %vm543_vm0, %v8149_v46 }
0x157f   : > { %5974 = vmatpush.msra.mxu3 %v8150_v55  ;;  %v5952_v37 = vpop.f32.mrf.mxu0 }
0x1581   : > { %5975 = vmatpush.msra.mxu3 %v8151_v41  ;;  %v14778_v41 = vld [vmem:[#allocation94_spill] sm:$0xff] }
0x1582   : > { %7531 = vmatmul.msk.f32.vlgmr.msrb.gmra.mxu3 %vm533_vm1, %v13282_v5  ;;  %v8154_v5 = vld [vmem:[%s14139_s1 + $0x68] sm:$0xff]  ;;  %s6833_s1 = sshll.u32 %s504_s0, 4  ;;  %s6834_s1 = int_to_ptr.vmem [resolvable:$true] %s6833_s1 }
0x1583   : > { %5976 = vmatpush.msra.mxu3 %v8152_v23  ;;  %v14779_v23 = vld [vmem:[#allocation95_spill] sm:$0xff] }
0x1585   : > { %7571 = vmatpush.msk.msrb.mxu3 %vm543_vm0, %v8153_v11 }
0x1587   : > { %6108 = vmatpush.msrb.mxu3 %v8154_v5  ;;  %v5955_v60 = vpop.f32.mrf.mxu0 }
0x1589   : > { %6109 = vmatpush.msrb.mxu3 %v12804_v36  ;;  %v14767_v36 = vld [vmem:[#allocation84_spill] sm:$0xff] }
0x158a   : > { %7532 = vmatmul.msk.f32.gmra.mxu3 %vm533_vm1, %v13310_v21  ;;  %v14768_v21 = vld [vmem:[#allocation86_spill] sm:$0xff] }
0x158b   : > { %6110 = vmatpush.msrb.mxu3 %v12812_v7  ;;  %v14770_v7 = vld [vmem:[#allocation44_spill] sm:$0xff] }
0x158f   : > { %v5958_v22 = vpop.f32.mrf.mxu0 }
0x1592   : > { %7533 = vmatmul.msk.f32.gmra.mxu3 %vm533_vm1, %v13315_v12  ;;  %v14772_v12 = vld [vmem:[#allocation41_spill] sm:$0xff] }
0x1597   : > { %v6086_v58 = vpop.f32.mrf.mxu0 }
0x159a   : > { %7550 = vmatmul.msk.f32.vlgmr.msra.gmra.mxu3 %vm533_vm1, %v13325_v4  ;;  %v14773_v4 = vld [vmem:[#allocation42_spill] sm:$0xff] }
0x159b   : > { %6240 = vmatpush.msra.mxu3 %v14767_v36  ;;  %v14782_v36 = vld [vmem:[#allocation69_spill] sm:$0xff] }
0x159d   : > { %6241 = vmatpush.msra.mxu3 %v14768_v21 }
0x159f   : > { %v6089_v3 = vpop.f32.mrf.mxu0 }
0x15a2   : > { %7551 = vmatmul.msk.f32.gmra.mxu3 %vm533_vm1, %v13340_v26  ;;  %v14774_v26 = vld [vmem:[#allocation47_spill] sm:$0xff] }
0x15a7   : > { %v6092_v57 = vpop.f32.mrf.mxu0 }
0x15aa   : > { %7552 = vmatmul.msk.f32.gmra.mxu3 %vm533_vm1, %v13355_v54  ;;  %v14776_v54 = vld [vmem:[#allocation92_spill] sm:$0xff] }
0x15b2   : > { %7572 = vmatmul.msk.f32.vlgmr.msrb.gmra.mxu3 %vm533_vm1, %v13370_v28  ;;  %v5888_v28 = vpop.f32.mrf.mxu1 }
0x15b3   : > { %6317 = vmatpush.msrb.mxu3 %v14769_v25  ;;  %v5889_v61 = vadd.f32 %v5888_v28, %v5827_v52  ;;  %v14783_v25 = vld [vmem:[#allocation79_spill] sm:$0xff]  ;;  %v14786_v52 = vld [vmem:[#allocation81_spill] sm:$0xff] }
0x15b5   : > { %6318 = vmatpush.msrb.mxu3 %v14770_v7  ;;  %v5987_v2 = vadd.f32 %v5952_v37, %v5889_v61 }
0x15b7   : > { %6319 = vmatpush.msrb.mxu3 %v14771_v63 }
0x15b9   : > { %6320 = vmatpush.msrb.mxu3 %v14772_v12  ;;  %v14784_v12 = vld [vmem:[#allocation59_spill] sm:$0xff] }
0x15ba   : > { %7573 = vmatmul.msk.f32.gmra.mxu3 %vm533_vm1, %v7554_v49  ;;  %v5891_v16 = vpop.f32.mrf.mxu1 }
0x15bb   : > { %6321 = vmatpush.msrb.mxu3 %v14773_v4  ;;  %v5892_v56 = vadd.f32 %v5891_v16, %v5830_v15  ;;  %v14785_v4 = vld [vmem:[#allocation76_spill] sm:$0xff] }
0x15bd   : > { %6322 = vmatpush.msrb.mxu3 %v14774_v26  ;;  %v5989_v24 = vadd.f32 %v5955_v60, %v5892_v56  ;;  %v14787_v26 = vld [vmem:[#allocation64_spill] sm:$0xff] }
0x15bf   : > { %6323 = vmatpush.msrb.mxu3 %v14775_v59 }
0x15c1   : > { %6324 = vmatpush.msrb.mxu3 %v14776_v54  ;;  %v14788_v54 = vld [vmem:[#allocation77_spill] sm:$0xff] }
0x15c2   : > { %7574 = vmatmul.msk.f32.gmra.mxu3 %vm533_vm1, %v7555_v51  ;;  %v5894_v6 = vpop.f32.mrf.mxu1 }
0x15c3   : > { %6325 = vmatpush.msrb.mxu3 %v14777_v27  ;;  %v5895_v51 = vadd.f32 %v5894_v6, %v5833_v50  ;;  %v5914_v27 = vpop.f32.mrf.mxu2 }
0x15c5   : > { %v5991_v11 = vadd.f32 %v5958_v22, %v5895_v51 }
0x15ca   : > { %v6025_v10 = vpop.f32.mrf.mxu1 }
0x15cb   : > { %v6087_v49 = vadd.f32 %v6086_v58, %v6025_v10 }
0x15cd   : > { %v6121_v34 = vadd.f32 %v6087_v49, %v5987_v2 }
0x15cf   : > { %v6127_v53 = vadd.f32 %v6121_v34, %v14254_v14 }
0x15d1   : > { %v6133_v0 = vmax.f32 %v6127_v53, 0.0 }
0x15d2   : > { %v6028_v46 = vpop.f32.mrf.mxu1 }
0x15d3   : > { %v6090_v55 = vadd.f32 %v6089_v3, %v6028_v46  ;;  %6164 = vmatmul.f32.vlgmr.msra.gmra.mxu1 %v6133_v0  ;;  %6216 = vmatmul.f32.vlgmr.msrb.gmra.mxu0 %v6133_v0  ;;  %v14789_v0 = vld [vmem:[#allocation67_spill] sm:$0xff] }
0x15d4   : > { %6458 = vmatpush.msrb.mxu0 %v12898_v42  ;;  %v14781_v42 = vld [vmem:[#allocation98_spill] sm:$0xff]  ;;  %v14790_v3 = vld [vmem:[#allocation71_spill] sm:$0xff] }
0x15d5   : > { %v6123_v8 = vadd.f32 %v6090_v55, %v5989_v24 }
0x15d6   : > { %6459 = vmatpush.msrb.mxu0 %v14778_v41 }
0x15d7   : > { %v6129_v43 = vadd.f32 %v6123_v8, %v14254_v14  ;;  %v14791_v8 = vld [vmem:[#allocation70_spill] sm:$0xff] }
0x15d8   : > { %6460 = vmatpush.msrb.mxu0 %v14779_v23 }
0x15d9   : > { %v6135_v20 = vmax.f32 %v6129_v43, 0.0 }
0x15da   : > { %v6031_v47 = vpop.f32.mrf.mxu1  ;;  %6461 = vmatpush.msrb.mxu0 %v14780_v1  ;;  %v14794_v1 = vld [vmem:[#allocation73_spill] sm:$0xff] }
0x15db   : > { %v6093_v62 = vadd.f32 %v6092_v57, %v6031_v47  ;;  %6167 = vmatmul.f32.gmra.mxu1 %v6135_v20  ;;  %6219 = vmatmul.f32.gmra.mxu0 %v6135_v20  ;;  %v14793_v47 = vld [vmem:[#allocation72_spill] sm:$0xff] }
0x15dc   : > { %6462 = vmatpush.msrb.mxu0 %v14781_v42  ;;  %v14795_v42 = vld [vmem:[#allocation78_spill] sm:$0xff] }
0x15dd   : > { %v6125_v19 = vadd.f32 %v6093_v62, %v5991_v11 }
0x15de   : > { %6463 = vmatpush.msrb.mxu0 %v14782_v36  ;;  %v14796_v36 = vld [vmem:[#allocation85_spill] sm:$0xff] }
0x15df   : > { %v6131_v21 = vadd.f32 %v6125_v19, %v14254_v14  ;;  %v5917_v14 = vpop.f32.mrf.mxu2 }
0x15e0   : > { %6464 = vmatpush.msrb.mxu0 %v14783_v25 }
0x15e1   : > { %v6137_v63 = vmax.f32 %v6131_v21, 0.0  ;;  %v14797_v21 = vld [vmem:[#allocation74_spill] sm:$0xff] }
0x15e2   : > { %6465 = vmatpush.msrb.mxu0 %v14784_v12 }
0x15e3   : > { %6170 = vmatmul.f32.gmra.mxu1 %v6137_v63  ;;  %6222 = vmatmul.f32.gmra.mxu0 %v6137_v63 }
0x15e4   : > { %6466 = vmatpush.msrb.mxu0 %v14785_v4 }
0x15e6   : > { %6467 = vmatpush.msrb.mxu0 %v14786_v52 }
0x15e7   : > { %v5920_v37 = vpop.f32.mrf.mxu2 }
0x15e8   : > { %6468 = vmatpush.msrb.mxu0 %v14787_v26 }
0x15ea   : > { %6469 = vmatpush.msrb.mxu0 %v14788_v54 }
0x15ef   : > { %v6051_v60 = vpop.f32.mrf.mxu2 }
0x15f5   : > { %v5770_v32 = vpop.f32.mrf.mxu3 }
0x15f7   : > { %v6054_v58 = vpop.f32.mrf.mxu2 }
0x15fd   : > { %v5790_v29 = vpop.f32.mrf.mxu3 }
0x15fe   : > { %v13485_v5 = vmax.f32 %v5770_v32, %v5790_v29  ;;  %v14792_v29 = vld [vmem:[#allocation83_spill] sm:$0xff] }
0x15ff   : > { %v6057_v51 = vpop.f32.mrf.mxu2 }
0x1605   : > { %v5853_v7 = vpop.f32.mrf.mxu3 }
0x1606   : > { %v5915_v6 = vadd.f32 %v5914_v27, %v5853_v7 }
0x160d   : > { %v5856_v59 = vpop.f32.mrf.mxu3 }
0x160e   : > { %v5918_v56 = vadd.f32 %v5917_v14, %v5856_v59 }
0x1615   : > { %v5859_v15 = vpop.f32.mrf.mxu3 }
0x1616   : > { %v5921_v41 = vadd.f32 %v5920_v37, %v5859_v15 }
0x161d   : > { %v5978_v50 = vpop.f32.mrf.mxu3 }
0x161e   : > { %v5988_v61 = vadd.f32 %v5978_v50, %v5915_v6 }
0x1625   : > { %v5981_v28 = vpop.f32.mrf.mxu3 }
0x1626   : > { %v5990_v32 = vadd.f32 %v5981_v28, %v5918_v56  ;;  %v14812_v56 = vld [vmem:[#allocation55_spill] sm:$0xff] }
0x162d   : > { %v5984_v16 = vpop.f32.mrf.mxu3 }
0x162e   : > { %v5992_v11 = vadd.f32 %v5984_v16, %v5921_v41 }
0x1635   : > { %v6112_v22 = vpop.f32.mrf.mxu3 }
0x1636   : > { %v6113_v2 = vadd.f32 %v6112_v22, %v6051_v60 }
0x1638   : > { %v6122_v10 = vadd.f32 %v6113_v2, %v5988_v61  ;;  %v14808_v2 = vld [vmem:[#allocation52_spill] sm:$0xff] }
0x163a   : > { %v6128_v49 = vadd.f32 %v6122_v10, %v14255_v17  ;;  %v14809_v10 = vld [vmem:[#allocation60_spill] sm:$0xff] }
0x163c   : > { %v6134_v34 = vmax.f32 %v6128_v49, 0.0  ;;  %v14811_v49 = vld [vmem:[#allocation63_spill] sm:$0xff] }
0x163d   : > { %v6115_v53 = vpop.f32.mrf.mxu3 }
0x163e   : > { %v6116_v24 = vadd.f32 %v6115_v53, %v6054_v58  ;;  %7575 = vmatmul.msk.f32.vlgmr.msra.gmra.mxu2 %vm954_vm2, %v6134_v34  ;;  %7578 = vmatmul.msk.f32.vlgmr.msra.gmra.mxu3 %vm954_vm2, %v6134_v34  ;;  %v14810_v58 = vld [vmem:[#allocation53_spill] sm:$0xff]  ;;  %v14813_v34 = vld [vmem:[#allocation66_spill] sm:$0xff]  ;;  %v14814_v53 = vld [vmem:[#allocation100_spill] sm:$0xff] }
0x163f   : > { %6415 = vmatpush.msra.mxu3 %v14789_v0  ;;  %v14817_v0 = vld [vmem:[#allocation103_spill] sm:$0xff] }
0x1640   : > { %v6124_v46 = vadd.f32 %v6116_v24, %v5990_v32  ;;  %v14815_v32 = vld [vmem:[#allocation101_spill] sm:$0xff]  ;;  %v14816_v24 = vld [vmem:[#allocation102_spill] sm:$0xff] }
0x1641   : > { %6416 = vmatpush.msra.mxu3 %v14790_v3  ;;  %v14819_v3 = vld [vmem:[#allocation105_spill] sm:$0xff] }
0x1642   : > { %v6130_v55 = vadd.f32 %v6124_v46, %v14255_v17  ;;  %v14818_v46 = vld [vmem:[#allocation104_spill] sm:$0xff] }
0x1643   : > { %6417 = vmatpush.msra.mxu3 %v14791_v8 }
0x1644   : > { %v6136_v43 = vmax.f32 %v6130_v55, 0.0  ;;  %v14820_v55 = vld [vmem:[#allocation106_spill] sm:$0xff] }
0x1645   : > { %v6118_v23 = vpop.f32.mrf.mxu3  ;;  %6418 = vmatpush.msra.mxu3 %v14792_v29 }
0x1646   : > { %v6119_v20 = vadd.f32 %v6118_v23, %v6057_v51  ;;  %7576 = vmatmul.msk.f32.gmra.mxu2 %vm954_vm2, %v6136_v43  ;;  %7579 = vmatmul.msk.f32.gmra.mxu3 %vm954_vm2, %v6136_v43  ;;  %v14821_v51 = vld [vmem:[#allocation107_spill] sm:$0xff] }
0x1647   : > { %6419 = vmatpush.msra.mxu3 %v14793_v47 }
0x1648   : > { %v6126_v57 = vadd.f32 %v6119_v20, %v5992_v11 }
0x1649   : > { %6420 = vmatpush.msra.mxu3 %v14794_v1 }
0x164a   : > { %v6132_v62 = vadd.f32 %v6126_v57, %v14255_v17 }
0x164b   : > { %6421 = vmatpush.msra.mxu3 %v14795_v42 }
0x164c   : > { %v6138_v19 = vmax.f32 %v6132_v62, 0.0 }
0x164d   : > { %6422 = vmatpush.msra.mxu3 %v14796_v36 }
0x164e   : > { %7577 = vmatmul.msk.f32.gmra.mxu2 %vm954_vm2, %v6138_v19  ;;  %7580 = vmatmul.msk.f32.gmra.mxu3 %vm954_vm2, %v6138_v19 }
0x164f   : > { %6423 = vmatpush.msra.mxu3 %v14797_v21 }
0x1650   : > { %v6165_v25 = vpop.f32.mrf.mxu1  ;;  %v6217_v7 = vpop.f32.mrf.mxu0 }
0x1658   : > { %v6168_v4 = vpop.f32.mrf.mxu1  ;;  %v6220_v52 = vpop.f32.mrf.mxu0 }
0x1660   : > { %v6171_v17 = vpop.f32.mrf.mxu1  ;;  %v6223_v54 = vpop.f32.mrf.mxu0 }
0x16c1   : > { %v6191_v63 = vpop.f32.mrf.mxu2  ;;  %v6243_v12 = vpop.f32.mrf.mxu3 }
0x16c2   : > { %v6192_v16 = vadd.f32 %v6191_v63, %v6165_v25  ;;  %v6244_v60 = vadd.f32 %v6243_v12, %v6217_v7 }
0x16c4   : > { %v6252_v61 = vmax.f32 %v6192_v16, %v6244_v60  ;;  %v6552_v60 = vld [vmem:[%s13783_s9 + $0x28] sm:$0xff] }
0x16c9   : > { %v6194_v26 = vpop.f32.mrf.mxu2  ;;  %v6246_v59 = vpop.f32.mrf.mxu3 }
0x16ca   : > { %v6195_v14 = vadd.f32 %v6194_v26, %v6168_v4  ;;  %v6247_v50 = vadd.f32 %v6246_v59, %v6220_v52 }
0x16cc   : > { %v6253_v22 = vmax.f32 %v6195_v14, %v6247_v50 }
0x16d1   : > { %v6197_v27 = vpop.f32.mrf.mxu2  ;;  %v6249_v15 = vpop.f32.mrf.mxu3 }
0x16d2   : > { %v6198_v28 = vadd.f32 %v6197_v27, %v6171_v17  ;;  %v6250_v37 = vadd.f32 %v6249_v15, %v6223_v54 }
0x16d4   : > { %v6254_v6 = vmax.f32 %v6198_v28, %v6250_v37 }
0x16d6   : > { %6268 = vmatpush.msrb.mxu2 %v6254_v6  ;;  %6291 = vmatpush.msrb.mxu1 %v6254_v6  ;;  %v7613_v6 = vld [vmem:[%s13783_s9 + $0xb8] sm:$0xff] }
0x16d8   : > { %6269 = vmatpush.msrb.mxu2 %v6253_v22  ;;  %6292 = vmatpush.msrb.mxu1 %v6253_v22  ;;  %v6551_v22 = vld [vmem:[%s13783_s9 + $0x20] sm:$0xff] }
0x16da   : > { %6270 = vmatpush.msrb.mxu2 %v6252_v61  ;;  %6293 = vmatpush.msrb.mxu1 %v6252_v61  ;;  %v7612_v61 = vld [vmem:[%s13783_s9 + $0xb0] sm:$0xff] }
0x16db   : > { %7581 = vmatmul.msk.f32.vlgmr.msrb.gmra.mxu2 %vm1092_vm3, %v13046_v38  ;;  %7583 = vmatmul.msk.f32.vlgmr.msrb.gmra.mxu1 %vm1092_vm3, %v13039_v31  ;;  %v14798_v38 = vld [vmem:[#allocation90_spill] sm:$0xff]  ;;  %v14799_v31 = vld [vmem:[#allocation80_spill] sm:$0xff] }
0x16dc   : > { %6339 = vmatpush.msra.mxu2 %v13053_v48  ;;  %6390 = vmatpush.msra.mxu1 %v13059_v45  ;;  %v14800_v48 = vld [vmem:[#allocation87_spill] sm:$0xff] }
0x16dd   : > { %v14801_v45 = vld [vmem:[#allocation91_spill] sm:$0xff] }
0x16de   : > { %6340 = vmatpush.msra.mxu2 %v13065_v39  ;;  %6391 = vmatpush.msra.mxu1 %v13071_v30  ;;  %v14802_v39 = vld [vmem:[#allocation48_spill] sm:$0xff] }
0x16df   : > { %v14803_v30 = vld [vmem:[#allocation56_spill] sm:$0xff] }
0x16e0   : > { %6341 = vmatpush.msra.mxu2 %v13077_v35  ;;  %6392 = vmatpush.msra.mxu1 %v13083_v9  ;;  %v14804_v35 = vld [vmem:[#allocation49_spill] sm:$0xff]  ;;  %v14805_v9 = vld [vmem:[#allocation50_spill] sm:$0xff] }
0x16e2   : > { %6342 = vmatpush.msra.mxu2 %v13089_v13  ;;  %6393 = vmatpush.msra.mxu1 %v13095_v44  ;;  %v14806_v13 = vld [vmem:[#allocation51_spill] sm:$0xff]  ;;  %v14807_v44 = vld [vmem:[#allocation58_spill] sm:$0xff] }
0x16e3   : > { %7582 = vmatmul.msk.f32.gmra.mxu2 %vm1092_vm3, %v14798_v38  ;;  %7584 = vmatmul.msk.f32.gmra.mxu1 %vm1092_vm3, %v14799_v31  ;;  %v7606_v38 = vld [vmem:[%s13783_s9 + $0x50] sm:$0xff]  ;;  %v7597_v31 = vld [vmem:[%s13783_s9 + $0x78] sm:$0xff] }
0x16e4   : > { %6343 = vmatpush.msra.mxu2 %v14800_v48  ;;  %6394 = vmatpush.msra.mxu1 %v14801_v45  ;;  %v6550_v48 = vld [vmem:[%s13783_s9 + $0x18] sm:$0xff]  ;;  %v7611_v45 = vld [vmem:[%s13783_s9 + $0xa8] sm:$0xff] }
0x16e6   : > { %6344 = vmatpush.msra.mxu2 %v14802_v39  ;;  %6395 = vmatpush.msra.mxu1 %v14803_v30  ;;  %v7605_v39 = vld [vmem:[%s13783_s9 + $0x48] sm:$0xff]  ;;  %v7596_v30 = vld [vmem:[%s13783_s9 + $0x70] sm:$0xff] }
0x16e8   : > { %6345 = vmatpush.msra.mxu2 %v14804_v35  ;;  %6396 = vmatpush.msra.mxu1 %v14805_v9  ;;  %v6549_v35 = vld [vmem:[%s13783_s9 + $0x10] sm:$0xff]  ;;  %v7610_v9 = vld [vmem:[%s13783_s9 + $0xa0] sm:$0xff] }
0x16ea   : > { %6346 = vmatpush.msra.mxu2 %v14806_v13  ;;  %6397 = vmatpush.msra.mxu1 %v14807_v44  ;;  %v7604_v13 = vld [vmem:[%s13783_s9 + $0x40] sm:$0xff]  ;;  %v7595_v44 = vld [vmem:[%s13783_s9 + $0x68] sm:$0xff] }
0x16ec   : > { %6347 = vmatpush.msra.mxu2 %v14808_v2  ;;  %6398 = vmatpush.msra.mxu1 %v14809_v10  ;;  %v6548_v2 = vld [vmem:[%s13783_s9 + $0x8] sm:$0xff]  ;;  %v7609_v10 = vld [vmem:[%s13783_s9 + $0x98] sm:$0xff] }
0x16ee   : > { %6438 = vmatpush.msrb.mxu2 %v14810_v58  ;;  %v7603_v58 = vld [vmem:[%s13783_s9 + $0x38] sm:$0xff] }
0x16f0   : > { %6439 = vmatpush.msrb.mxu2 %v14811_v49  ;;  %v7594_v49 = vld [vmem:[%s13783_s9 + $0x60] sm:$0xff] }
0x16f2   : > { %6440 = vmatpush.msrb.mxu2 %v14812_v56  ;;  %v6547_v56 = vld [vmem:[%s13783_s9] sm:$0xff] }
0x16f4   : > { %6441 = vmatpush.msrb.mxu2 %v14813_v34  ;;  %v7608_v34 = vld [vmem:[%s13783_s9 + $0x90] sm:$0xff] }
0x16f6   : > { %6442 = vmatpush.msrb.mxu2 %v14814_v53  ;;  %v7602_v53 = vld [vmem:[%s13783_s9 + $0x30] sm:$0xff] }
0x16f8   : > { %6443 = vmatpush.msrb.mxu2 %v14815_v32  ;;  %v6753_v32 = vld [vmem:[%s13785_s11 + $0x78] sm:$0xff] }
0x16fa   : > { %6444 = vmatpush.msrb.mxu2 %v14816_v24  ;;  %v6752_v24 = vld [vmem:[%s13785_s11 + $0x70] sm:$0xff] }
0x16fc   : > { %6445 = vmatpush.msrb.mxu2 %v14817_v0  ;;  %v6751_v0 = vld [vmem:[%s13785_s11 + $0x68] sm:$0xff] }
0x16fe   : > { %6446 = vmatpush.msrb.mxu2 %v14818_v46  ;;  %v6750_v46 = vld [vmem:[%s13785_s11 + $0x60] sm:$0xff] }
0x1700   : > { %6447 = vmatpush.msrb.mxu2 %v14819_v3  ;;  %v6749_v3 = vld [vmem:[%s13785_s11 + $0x58] sm:$0xff] }
0x1702   : > { %6448 = vmatpush.msrb.mxu2 %v14820_v55  ;;  %v6748_v55 = vld [vmem:[%s13785_s11 + $0x50] sm:$0xff] }
0x1704   : > { %6449 = vmatpush.msrb.mxu2 %v14821_v51  ;;  %v6747_v51 = vld [vmem:[%s13785_s11 + $0x48] sm:$0xff] }
0x1758   : > { %v6295_v8 = vpop.f32.mrf.mxu1 }
0x175e   : > { %v6272_v41 = vpop.f32.mrf.mxu2 }
0x175f   : > { %v6301_v43 = vmax.f32 %v6272_v41, %v6295_v8  ;;  %v14822_v8 = vld [vmem:[#allocation46_spill] sm:$0xff]  ;;  %v14823_v41 = vld [vmem:[#allocation88_spill] sm:$0xff] }
0x1760   : > { %v6298_v23 = vpop.f32.mrf.mxu1 }
0x1761   : > { %7586 = vmatmul.msk.f32.vlgmr.msra.gmra.mxu2 %vm1181_vm4, %v6301_v43  ;;  %v6305_v20 = vrot.slane %v6301_v43, 2  ;;  %v6352_v47 = vrot.slane %v6301_v43, 4  ;;  %v6378_v42 = vrot.slane %v6301_v43, 3  ;;  %v6403_v7 = vrot.slane %v6301_v43, 1 }
0x1762   : > { %6698 = vmatpush.msra.mxu2 %v7613_v6  ;;  %v2183_v43 = vmax.f32 %v14823_v41, %v14822_v8 }
0x1764   : > { %6699 = vmatpush.msra.mxu2 %v7612_v61 }
0x1766   : > { %v6275_v29 = vpop.f32.mrf.mxu2  ;;  %6700 = vmatpush.msra.mxu2 %v7611_v45 }
0x1767   : > { %v6302_v11 = vmax.f32 %v6275_v29, %v6298_v23  ;;  %v14824_v23 = vld [vmem:[#allocation11_spill] sm:$0xff]  ;;  %v14825_v29 = vld [vmem:[#allocation36_spill] sm:$0xff] }
0x1768   : > { %6701 = vmatpush.msra.mxu2 %v7610_v9 }
0x1769   : > { %v6306_v57 = vrot.slane %v6302_v11, 2  ;;  %v6353_v1 = vrot.slane %v6302_v11, 4  ;;  %v6379_v62 = vrot.slane %v6302_v11, 3  ;;  %v6404_v25 = vrot.slane %v6302_v11, 1 }
0x176a   : > { %6702 = vmatpush.msra.mxu2 %v7609_v10  ;;  %v1461_v11 = vmax.f32 %v14825_v29, %v14824_v23 }
0x176b   : > { %v6307_v19 = vsel %vm1177_vm5, %v6305_v20, %v6306_v57  ;;  %v6354_v36 = vsel %vm543_vm0, %v6352_v47, %v6353_v1  ;;  %v6380_v21 = vsel %vm1282_vm6, %v6378_v42, %v6379_v62  ;;  %v6405_v63 = vsel %vm1308_vm7, %v6403_v7, %v6404_v25  ;;  %v6746_v20 = vld [vmem:[%s13785_s11 + $0x40] sm:$0xff]  ;;  %v14826_v47 = vld [vmem:[#allocation38_spill] sm:$0xff]  ;;  %v14827_v57 = vld [vmem:[#allocation20_spill] sm:$0xff] }
0x176c   : > { %7585 = vmatmul.msk.f32.vlgmr.msrb.gmra.mxu3 %vm1181_vm4, %v6307_v19  ;;  %7587 = vmatmul.msk.f32.vlgmr.msra.gmra.mxu0 %vm1181_vm4, %v6354_v36  ;;  %v2905_v1 = vmax.f32 %v14827_v57, %v14826_v47  ;;  %v14828_v62 = vld [vmem:[#allocation57_spill] sm:$0xff]  ;;  %v14829_v42 = vld [vmem:[#allocation96_spill] sm:$0xff]  ;;  %v6517_v36 = vrot.slane %v2183_v43, 7  ;;  %v6659_v25 = vrot.slane %v2183_v43, 2  ;;  %v6554_v7 = vrot.slane %v1461_v11, 2 }
0x176d   : > { %7588 = vmatmul.msk.f32.vlgmr.msra.gmra.mxu1 %vm1181_vm4, %v6380_v21  ;;  %6703 = vmatpush.msra.mxu2 %v7608_v34  ;;  %v3627_v19 = vmax.f32 %v14829_v42, %v14828_v62  ;;  %v6556_v21 = vrot.slane %v2183_v43, 1  ;;  %v6532_v34 = vrot.slane %v13485_v5, 2 }
0x1774   : > { %7589 = vmatmul.msk.f32.vlgmr.msra.gmra.mxu3 %vm1181_vm4, %v6405_v63  ;;  %v6629_v63 = vrot.slane %v1461_v11, 1 }
0x17e4   : > { %v6349_v4 = vpop.f32.mrf.mxu2 }
0x17e9   : > { %v6374_v26 = vpop.f32.mrf.mxu0 }
0x17ea   : > { %v6400_v59 = vpop.f32.mrf.mxu1 }
0x17ef   : > { %v6327_v12 = vpop.f32.mrf.mxu3 }
0x17f0   : > { %v6350_v52 = vadd.f32 %v6349_v4, %v6327_v12  ;;  %v6657_v12 = vrot.slane %v1461_v11, 3  ;;  %v14830_v4 = vld [vmem:[#allocation21_spill] sm:$0xff] }
0x17f2   : > { %v6377_v54 = vadd.f32 %v6374_v26, %v6350_v52  ;;  %v14831_v52 = vld [vmem:[#allocation30_spill] sm:$0xff]  ;;  %v6671_v6 = vsel %vm6537_vm10, %v6657_v12, %v6659_v25  ;;  %v6744_v25 = vld [vmem:[%s13785_s11 + $0x30] sm:$0xff]  ;;  %v6741_v12 = vld [vmem:[%s13785_s11 + $0x18] sm:$0xff] }
0x17f3   : > { %v4349_v26 = vmax.f32 %v14831_v52, %v14830_v4  ;;  %v6740_v4 = vld [vmem:[%s13785_s11 + $0x10] sm:$0xff]  ;;  %v6739_v52 = vld [vmem:[%s13785_s11 + $0x8] sm:$0xff] }
0x17f5   : > { %v6560_v61 = vrot.slane %v4349_v26, 6 }
0x17f7   : > { %v6425_v17 = vpop.f32.mrf.mxu3 }
0x17f8   : > { %v6426_v27 = vadd.f32 %v6425_v17, %v6400_v59  ;;  %v6520_v59 = vrot.slane %v2905_v1, 6  ;;  %v6631_v17 = vrot.slane %v2905_v1, 7 }
0x17fa   : > { %v6428_v15 = vadd.f32 %v6426_v27, %v6377_v54  ;;  %v6661_v54 = vrot.slane %v2905_v1, 1 }
0x17fc   : > { %v6429_v14 = vadd.f32 %v13294_v33, %v6428_v15  ;;  %v7599_v33 = vld [vmem:[%s13783_s9 + $0x88] sm:$0xff]  ;;  %v6643_v15 = vsel %vm6537_vm10, %v6629_v63, %v2183_v43  ;;  %v6742_v63 = vld [vmem:[%s13785_s11 + $0x20] sm:$0xff] }
0x17fd   : > { %6596 = vmatpush.msrb.mxu3 %v7599_v33  ;;  %v6568_v33 = vsel %vm6537_vm10, %v6554_v7, %v6556_v21  ;;  %v6745_v21 = vld [vmem:[%s13785_s11 + $0x38] sm:$0xff]  ;;  %v6743_v7 = vld [vmem:[%s13785_s11 + $0x28] sm:$0xff] }
0x17fe   : > { %v6430_v50 = vmax.f32 %v6429_v14, 0.0  ;;  %v6523_v14 = vrot.slane %v3627_v19, 5 }
0x1800   : > { %7590 = vmatmul.msk.f32.vlgmr.msrb.gmra.mxu2 %vm1353_vm8, %v6430_v50  ;;  %7591 = vmatmul.msk.f32.vlgmr.msrb.gmra.mxu0 %vm1353_vm8, %v6430_v50  ;;  %v14832_v50 = vld [vmem:[#allocation61_spill] sm:$0xff] }
0x187d   : > { %v6471_v28 = vpop.f32.mrf.mxu0 }
0x1883   : > { %v6451_v37 = vpop.f32.mrf.mxu2 }
0x1884   : > { %v6474_v16 = vmax.f32 %v6451_v37, %v6471_v28  ;;  %v14833_v28 = vld [vmem:[#allocation99_spill] sm:$0xff] }
0x1885   : > { %v5071_v37 = vmax.f32 %v14833_v28, %v14832_v50  ;;  %v6788_v50 = vld [vmem:[#allocation2 + $0x48] sm:$0xff]  ;;  %v6787_v28 = vld [vmem:[#allocation2 + $0x40] sm:$0xff] }
0x1886   : > { %6490 = vmatpush.msrb.mxu1 %v6474_v16 }
0x1887   : > { %7592 = vmatmul.msk.f32.vlgmr.msrb.gmra.mxu1 %vm1412_vm9, %v13379_v40  ;;  %v7607_v40 = vld [vmem:[%s13783_s9 + $0x58] sm:$0xff] }
0x1888   : > { %6510 = vmatpush.msra.mxu1 %v6474_v16  ;;  %6721 = vmatpush.msra.mxu0 %v7607_v40  ;;  %v6538_v16 = vsel %vm6537_vm10, %v1461_v11, %v6517_v36  ;;  %v6569_v40 = vsel %vm6539_vm11, %v6568_v33, %v2905_v1  ;;  %v6784_v33 = vld [vmem:[#allocation2 + $0x28] sm:$0xff] }
0x188a   : > { %6619 = vmatpush.msrb.mxu1 %v6552_v60  ;;  %6722 = vmatpush.msra.mxu0 %v7606_v38  ;;  %v6558_v60 = vrot.slane %v3627_v19, 7  ;;  %v6540_v38 = vsel %vm6539_vm11, %v6538_v16, %v6520_v59  ;;  %v6794_v59 = vld [vmem:[#allocation2 + $0x78] sm:$0xff]  ;;  %v6785_v16 = vld [vmem:[#allocation2 + $0x30] sm:$0xff] }
0x188b   : > { %v6542_v45 = vsel %vm6541_vm12, %v6540_v38, %v6523_v14  ;;  %v6789_v14 = vld [vmem:[#allocation2 + $0x50] sm:$0xff] }
0x188c   : > { %6620 = vmatpush.msrb.mxu1 %v6551_v22  ;;  %6723 = vmatpush.msra.mxu0 %v7605_v39  ;;  %v6526_v22 = vrot.slane %v4349_v26, 4  ;;  %v6635_v39 = vrot.slane %v4349_v26, 5  ;;  %v6570_v9 = vsel %vm6541_vm12, %v6569_v40, %v6558_v60  ;;  %v6783_v60 = vld [vmem:[#allocation2 + $0x20] sm:$0xff] }
0x188e   : > { %6621 = vmatpush.msrb.mxu1 %v6550_v48  ;;  %6724 = vmatpush.msra.mxu0 %v7604_v13  ;;  %v6672_v48 = vsel %vm6539_vm11, %v6671_v6, %v6661_v54  ;;  %v6529_v13 = vrot.slane %v5071_v37, 3  ;;  %v6792_v54 = vld [vmem:[#allocation2 + $0x68] sm:$0xff] }
0x188f   : > { %7593 = vmatmul.msk.f32.vlgmr.msra.gmra.mxu1 %vm1412_vm9, %v13406_v18  ;;  %v7598_v18 = vld [vmem:[%s13783_s9 + $0x80] sm:$0xff] }
0x1890   : > { %6597 = vmatpush.msrb.mxu3 %v7598_v18  ;;  %6622 = vmatpush.msrb.mxu1 %v6549_v35  ;;  %v6633_v18 = vrot.slane %v3627_v19, 6  ;;  %v6562_v35 = vrot.slane %v5071_v37, 5 }
0x1891   : > { %6725 = vmatpush.msra.mxu0 %v7603_v58  ;;  %v6673_v58 = vsel %vm6541_vm12, %v6672_v48, %v3627_v19  ;;  %v7682_v48 = vld [vmem:[%s13784_s10] ss:$0 sm:$0xff] }
0x1892   : > { %6598 = vmatpush.msrb.mxu3 %v7597_v31  ;;  %6623 = vmatpush.msrb.mxu1 %v6548_v2  ;;  %v6644_v31 = vsel %vm6539_vm11, %v6643_v15, %v6631_v17  ;;  %v6665_v2 = vrot.slane %v5071_v37, 6  ;;  %v6793_v17 = vld [vmem:[#allocation2 + $0x70] sm:$0xff]  ;;  %v6790_v15 = vld [vmem:[#allocation2 + $0x58] sm:$0xff] }
0x1893   : > { %6726 = vmatpush.msra.mxu0 %v7602_v53  ;;  %v6645_v10 = vsel %vm6541_vm12, %v6644_v31, %v6633_v18  ;;  %v6564_v53 = vrot.slane %v13485_v5, 4  ;;  %v6782_v18 = vld [vmem:[#allocation2 + $0x18] sm:$0xff] }
0x1894   : > { %6599 = vmatpush.msrb.mxu3 %v7596_v30  ;;  %6624 = vmatpush.msrb.mxu1 %v6547_v56  ;;  %v6663_v30 = vrot.slane %v4349_v26, 7  ;;  %v6571_v56 = vsel %vm543_vm0, %v6570_v9, %v6560_v61  ;;  %v6738_v26 = vld [vmem:[%s13785_s11] sm:$0xff]  ;;  %v6780_v9 = vld [vmem:[#allocation2 + $0x8] sm:$0xff] }
0x1896   : > { %6600 = vmatpush.msrb.mxu3 %v7595_v44  ;;  %v6637_v44 = vrot.slane %v5071_v37, 4  ;;  %6799 = vmatpush.msra.mxu1 %v6794_v59  ;;  %v6786_v37 = vld [vmem:[#allocation2 + $0x38] sm:$0xff] }
0x1898   : > { %6601 = vmatpush.msrb.mxu3 %v7594_v49  ;;  %v6543_v49 = vsel %vm543_vm0, %v6542_v45, %v6526_v22  ;;  %6800 = vmatpush.msra.mxu1 %v6793_v17 }
0x1899   : > { %v6544_v8 = vsel %vm1282_vm6, %v6543_v49, %v6529_v13  ;;  %v6779_v13 = vld [vmem:[#allocation2] sm:$0xff] }
0x189a   : > { %6758 = vmatpush.msra.mxu3 %v6753_v32  ;;  %v6639_v32 = vrot.slane %v13485_v5, 3  ;;  %v6545_v47 = vsel %vm1177_vm5, %v6544_v8, %v6532_v34  ;;  %6801 = vmatpush.msra.mxu1 %v6792_v54  ;;  %v7684_v49 = vld [vmem:[%s13788_s14] ss:$0 sm:$0xff] }
0x189c   : > { %6759 = vmatpush.msra.mxu3 %v6752_v24  ;;  %v6667_v24 = vrot.slane %v13485_v5, 5 }
0x189e   : > { %6760 = vmatpush.msra.mxu3 %v6751_v0 }
0x18a0   : > { %6761 = vmatpush.msra.mxu3 %v6750_v46  ;;  %v6646_v46 = vsel %vm543_vm0, %v6645_v10, %v6635_v39 }
0x18a1   : > { %v6647_v43 = vsel %vm1282_vm6, %v6646_v46, %v6637_v44  ;;  %v7683_v44 = vld [vmem:[%s13786_s12] ss:$0 sm:$0xff] }
0x18a2   : > { %6762 = vmatpush.msra.mxu3 %v6749_v3  ;;  %v6674_v3 = vsel %vm543_vm0, %v6673_v58, %v6663_v30  ;;  %v6648_v1 = vsel %vm1177_vm5, %v6647_v43, %v6639_v32 }
0x18a3   : > { %v6675_v41 = vsel %vm1282_vm6, %v6674_v3, %v6665_v2 }
0x18a4   : > { %6763 = vmatpush.msra.mxu3 %v6748_v55  ;;  %v6676_v57 = vsel %vm1177_vm5, %v6675_v41, %v6667_v24 }
0x18a6   : > { %6764 = vmatpush.msra.mxu3 %v6747_v51  ;;  %v6572_v51 = vsel %vm1282_vm6, %v6571_v56, %v6562_v35  ;;  %v6781_v35 = vld [vmem:[#allocation2 + $0x10] sm:$0xff] }
0x18a7   : > { %v6573_v5 = vsel %vm1177_vm5, %v6572_v51, %v6564_v53 }
0x18a8   : > { %6765 = vmatpush.msra.mxu3 %v6746_v20 }
0x18aa   : > { %6766 = vmatpush.msra.mxu3 %v6745_v21 }
0x18ac   : > { %6767 = vmatpush.msra.mxu3 %v6744_v25 }
0x18ae   : > { %6768 = vmatpush.msra.mxu3 %v6743_v7 }
0x18b0   : > { %6769 = vmatpush.msra.mxu3 %v6742_v63 }
0x18b2   : > { %6770 = vmatpush.msra.mxu3 %v6741_v12 }
0x18b4   : > { %6771 = vmatpush.msra.mxu3 %v6740_v4 }
0x18b6   : > { %6772 = vmatpush.msra.mxu3 %v6739_v52 }
0x18b8   : > { %6773 = vmatpush.msra.mxu3 %v6738_v26 }
0x1904   : > { %v6492_v27 = vpop.f32.mrf.mxu1 }
0x190c   : > { %v6512_v0 = vpop.f32.mrf.mxu1 }
0x190d   : > { %v6515_v55 = vmax.f32 %v6492_v27, %v6512_v0  ;;  %v6791_v27 = vld [vmem:[#allocation2 + $0x60] sm:$0xff] }
0x190e   : > { %6802 = vmatpush.msra.mxu1 %v6791_v27 }
0x190f   : > { %v6535_v23 = vrot.slane %v6515_v55, 1  ;;  %v6566_v29 = vrot.slane %v6515_v55, 3  ;;  %v6641_v11 = vrot.slane %v6515_v55, 2  ;;  %v6669_v20 = vrot.slane %v6515_v55, 4 }
0x1910   : > { %6803 = vmatpush.msra.mxu1 %v6790_v15 }
0x1911   : > { %v6574_v62 = vsel %vm1308_vm7, %v6573_v5, %v6566_v29  ;;  %v6546_v42 = vsel %vm1308_vm7, %v6545_v47, %v6535_v23  ;;  %v6677_v19 = vsel %vm1308_vm7, %v6676_v57, %v6669_v20  ;;  %v6649_v36 = vsel %vm1308_vm7, %v6648_v1, %v6641_v11 }
0x1912   : > { %7600 = vmatmul.msk.f32.vlgmr.msrb.gmra.mxu3 %vm6582_vm13, %v6574_v62  ;;  %7601 = vmatmul.msk.f32.vlgmr.msrb.gmra.mxu1 %vm6582_vm13, %v6546_v42 }
0x1913   : > { %7614 = vmatmul.msk.f32.vlgmr.msra.gmra.mxu2 %vm6582_vm13, %v6677_v19  ;;  %7615 = vmatmul.msk.f32.vlgmr.msra.gmra.mxu0 %vm6582_vm13, %v6649_v36 }
0x1914   : > { %6804 = vmatpush.msra.mxu1 %v6789_v14 }
0x1916   : > { %6805 = vmatpush.msra.mxu1 %v6788_v50 }
0x1918   : > { %6806 = vmatpush.msra.mxu1 %v6787_v28 }
0x191a   : > { %6807 = vmatpush.msra.mxu1 %v6786_v37 }
0x191c   : > { %6808 = vmatpush.msra.mxu1 %v6785_v16 }
0x191e   : > { %6809 = vmatpush.msra.mxu1 %v6784_v33 }
0x1920   : > { %6810 = vmatpush.msra.mxu1 %v6783_v60 }
0x1922   : > { %6811 = vmatpush.msra.mxu1 %v6782_v18 }
0x1924   : > { %6812 = vmatpush.msra.mxu1 %v6781_v35 }
0x1926   : > { %6813 = vmatpush.msra.mxu1 %v6780_v9 }
0x1928   : > { %6814 = vmatpush.msra.mxu1 %v6779_v13 }
0x198f   : > { %v6626_v6 = vpop.f32.mrf.mxu1 }
0x1990   : > { %v6728_v22 = vpop.f32.mrf.mxu0 }
0x1995   : > { %v6603_v40 = vpop.f32.mrf.mxu3 }
0x1996   : > { %v6627_v61 = vadd.f32 %v6626_v6, %v6603_v40  ;;  %v6705_v38 = vpop.f32.mrf.mxu2 }
0x1997   : > { %v6729_v31 = vadd.f32 %v6728_v22, %v6705_v38 }
0x1999   : > { %v6731_v45 = vadd.f32 %v6729_v31, %v6627_v61 }
0x199b   : > { %v6736_v39 = vadd.f32 %v7682_v48, %v6731_v45 }
0x199d   : > { %v6737_v30 = vmax.f32 %v6736_v39, 0.0 }
0x199f   : > { %6774 = vmatmul.f32.vlgmr.msra.gmra.mxu3 %v6737_v30 }
0x1a22   : > { %v6775_v2 = vpop.f32.mrf.mxu3 }
0x1a23   : > { %v6776_v10 = vadd.f32 %v7683_v44, %v6775_v2 }
0x1a25   : > { %v6778_v58 = vmax.f32 %v6776_v10, 0.0 }
0x1a27   : > { %6815 = vmatmul.f32.vlgmr.msra.gmra.mxu1 %v6778_v58 }
0x1aa4   : > { %v6816_v56 = vpop.f32.mrf.mxu1 }
0x1aa5   : > { %v6817_v34 = vadd.f32 %v7684_v49, %v6816_v56 }
0x1aa7   : > { %6819 = vst [vmem:[%s504_s0] sm:$0xff] %v6817_v34 }
0x1aa8   : > { %8212 = shalt.err (!%p8209_p8)
}
0x1aa9   : > { %7633 = dma.vmem_to_hbm [thread:$0]  (%p8374_p5), %s6834_s1, 128, %s6836_s13, %s6821_s30  }
0x1aaa PF: > { %p7645_p9 = scmp.ge.s32.totalorder %s8251_s21, 2  ;;  %s6847_s0 = sand.u32 1, %s8239_s18  }
0x1aab   : > { %s6848_s20 = scalar_lea.sflag [#allocation4], %s6847_s0 }
0x1aac   : > { %p7640_p10 = pnand %p7645_p9, %p8378_p6 }
0x1aae   : > { %p7641_p11 = pneg %p7640_p10 }
0x1ab0   : > { %8234 = dma.done.wait (%p7641_p11), %s6848_s20, 128  }
0x1ab1   : > { %8236 = vsyncadd (%p7641_p11), %s6848_s20, 4294967168  ;;  %s14834_s21 = sld [smem:[#allocation9_spill]]  ;;  %s14837_s18 = smov %s8243_s19 }
0x1ab2   : > { %s14835_s2 = sld [smem:[#allocation8_spill]] }
0x1ab3   : > { %s14836_s20 = sld [smem:[#allocation10_spill]] }
0x1ab7   : > { %p26_p12 = scmp.ge.s32.totalorder %s14834_s21, 4  }
0x1ab8   : > { %s14838_s19 = smov %s14835_s2 }
0x1ab9   :  { %28 = sbr.rel (!%p26_p12) target bundleno = 9 (0x9), region = 142 }
0x1abe   :  { %6854 = vsyncpa [#allocation3], 1 }
0x1abf   :  { %6856 = vsyncpa [#allocation3 + $0x1], 1 }
0x1ac0   :  { %6857 = vsyncpa [#allocation4], 1 }
0x1ac1   :  { %6859 = vsyncpa [#allocation4 + $0x1], 1 }

</bundles_post_ra>
